<compile_context>
chip_gen: v7x
topology: tpu7x:2x2x1
jax: 0.10.0
libtpu: 0.0.40
codegen_flags: <defaults>
</compile_context>

<pallas_src>
import functools

import jax
import jax.numpy as jnp
from jax import lax
from jax.experimental import pallas as pl
from jax.experimental.pallas import tpu as pltpu


# ---------------------------------------------------------------------------
# Fused kernel: one grid step == Bt images packed along lanes.
# Work-buffer layout (lanes):  [gap G][img0 HW][gap G][img1 HW]...[gap G]
# with G a multiple of 128 and >= 2W+2 (the 5x5 halo), so per-image interiors
# start at 128-aligned lane offsets and vertical taps fall into the zero gaps.
# ---------------------------------------------------------------------------
def _curve_ca_kernel(x_ref, w1_ref, b1_ref, w2_ref, b2_ref, w3_ref, b3_ref,
                     o_ref, xw_s, *, C, H, W, Bt, G, n_curve):
    f32 = jnp.float32
    HW = H * W
    S = HW + G                  # lane stride of one image inside the work buffer
    NN = Bt * S - G             # conv domain (all images + the gaps between them)

    # ---- hoisted per-step constants (masks / iota built once, reused) ----
    j = lax.broadcasted_iota(jnp.int32, (1, NN), 1)
    col = (j % S) % W           # pixel column; gap lanes are don't-cares
    cmask = {}
    for dw in (-2, -1, 1, 2):
        lo, hi = max(0, -dw), min(W, W - dw)
        cmask[dw] = jnp.logical_and(col >= lo, col < hi)
    gap_zero = jnp.zeros((C, G), f32)

    # ---- zero only the inter-image / boundary gaps, once per grid step ----
    # (interiors are fully overwritten below; gaps stay zero for both convs)
    for k in range(Bt + 1):
        xw_s[:, k * S:k * S + G] = gap_zero

    def conv(w_taps_ref, b_ref, ksize):
        """'SAME' ksize x ksize conv over the packed batch.

        One accumulating (C,C)x(C,NN) f32 MXU dot per tap, reading lane-shifted
        static slices of xw_s directly (no im2col matrix is materialized).
        Vertical out-of-range taps land in the zero gaps; horizontal wrap
        columns are killed with the hoisted column masks.
        """
        p = (ksize - 1) // 2
        acc = jnp.zeros((C, NN), f32)
        for kh in range(ksize):
            for kw in range(ksize):
                dh, dw = kh - p, kw - p
                s = dh * W + dw
                patch = xw_s[:, G + s:G + s + NN]            # (C, NN) f32
                if dw != 0:
                    patch = jnp.where(cmask[dw], patch, 0.0)
                acc = acc + jnp.dot(w_taps_ref[kh * ksize + kw], patch,
                                    preferred_element_type=f32)
        return jnp.maximum(acc + b_ref[...], 0.0)            # bias + ReLU

    # ---- conv1: 5x5  (pack the Bt images into the work buffer, lane-aligned) ----
    for bi in range(Bt):
        xw_s[:, G + bi * S:G + bi * S + HW] = x_ref[bi]
    h1 = conv(w1_ref, b1_ref, 5)

    # ---- conv2: 3x3  (h1 never leaves VMEM / vregs) ----
    for bi in range(Bt):
        xw_s[:, G + bi * S:G + bi * S + HW] = h1[:, bi * S:bi * S + HW]
    h2 = conv(w2_ref, b2_ref, 3)

    # ---- per-image tail: 1x1 conv -> sigmoid curve maps (VPU MACs with SMEM
    #      scalars), clamp, n_curve iterations, then a lane-dense store ----
    for bi in range(Bt):
        h2b = h2[:, bi * S:bi * S + HW]                      # (C, HW) aligned slice
        rows = [h2b[c:c + 1, :] for c in range(C)]           # hoisted extracts
        xb = x_ref[bi]
        xb = jnp.maximum(xb, 0.0) - jnp.maximum(xb - 1.0, 0.0)   # relu(x)-relu(x-1)
        for i in range(n_curve):
            ai = rows[0] * w3_ref[0, i]
            for c in range(1, C):
                ai = ai + rows[c] * w3_ref[c, i]
            ai = jax.nn.sigmoid(ai + b3_ref[i])              # (1, HW)
            xb = xb * (1.0 + ai * (1.0 - xb))                # == xb + ai*xb*(1-xb)
        o_ref[bi] = xb


# ---------------------------------------------------------------------------
# Batch-tile heuristic and parameter packing.
# ---------------------------------------------------------------------------
def _pick_batch_tile(B, HW, target_lanes=2048):
    """Images per grid step: enough for ~2K-lane matmuls, but keep >=2 grid
    steps when possible so both v7x TensorCores get work."""
    bt = min(B, max(1, target_lanes // max(HW, 1)))
    while B % bt:
        bt -= 1
    if B // bt == 1 and bt % 2 == 0:
        bt //= 2
    return bt


def _pack_params(params, C):
    # Per-tap (Cout, Cin) matrices: lhs of each accumulating MXU dot.
    w1t = jnp.transpose(params["w1"], (0, 1, 3, 2)).reshape(25, C, C).astype(jnp.float32)
    w2t = jnp.transpose(params["w2"], (0, 1, 3, 2)).reshape(9, C, C).astype(jnp.float32)
    b1 = params["b1"].reshape(C, 1).astype(jnp.float32)
    b2 = params["b2"].reshape(C, 1).astype(jnp.float32)
    w3 = params["w3"].astype(jnp.float32)        # (C, 3)  -> SMEM scalars
    b3 = params["b3"].astype(jnp.float32)        # (3,)    -> SMEM scalars
    return w1t, b1, w2t, b2, w3, b3


# ---------------------------------------------------------------------------
# Public forward (PyTorch NCHW interface; only free reshapes at the boundary).
# ---------------------------------------------------------------------------
def curve_ca_forward(x_nchw, params, *, batch_tile=None):
    x = x_nchw.astype(jnp.float32)
    B, C, H, W = x.shape
    HW = H * W
    Bt = batch_tile if batch_tile is not None else _pick_batch_tile(B, HW)
    assert B % Bt == 0, (B, Bt)
    G = ((2 * W + 2 + 127) // 128) * 128          # zero gap: >= 5x5 halo, lane-aligned
    S = HW + G

    w1t, b1, w2t, b2, w3, b3 = _pack_params(params, C)
    xf = x.reshape(B, C, HW)                      # free reshape (NCHW contiguous)

    # VMEM budget derived from the actual working set (double-buffered blocks
    # + gapped work buffer + tile-padded weights), clamped for v7x's 64 MiB.
    blk = Bt * C * HW * 4
    scratch = C * (G + Bt * S) * 4
    weights = (25 + 9 + 2) * 8 * 128 * 4
    vmem_limit = int(min(64 << 20,
                         max(8 << 20, 4 * blk + 2 * scratch + weights + (4 << 20))))

    kern = functools.partial(_curve_ca_kernel, C=C, H=H, W=W, Bt=Bt, G=G, n_curve=3)
    smem = pl.BlockSpec(memory_space=pltpu.MemorySpace.SMEM)
    out = pl.pallas_call(
        kern,
        out_shape=jax.ShapeDtypeStruct((B, C, HW), jnp.float32),
        grid=(B // Bt,),
        in_specs=[
            pl.BlockSpec((Bt, C, HW), lambda b: (b, 0, 0)),     # x (batch tile)
            pl.BlockSpec((25, C, C), lambda b: (0, 0, 0)),      # 5x5 per-tap weights
            pl.BlockSpec((C, 1), lambda b: (0, 0)),             # b1
            pl.BlockSpec((9, C, C), lambda b: (0, 0, 0)),       # 3x3 per-tap weights
            pl.BlockSpec((C, 1), lambda b: (0, 0)),             # b2
            smem,                                               # w3 scalars (SMEM)
            smem,                                               # b3 scalars (SMEM)
        ],
        out_specs=pl.BlockSpec((Bt, C, HW), lambda b: (b, 0, 0)),  # lane-dense
        scratch_shapes=[pltpu.VMEM((C, G + Bt * S), jnp.float32)],  # gapped work buf
        compiler_params=pltpu.CompilerParams(
            dimension_semantics=("parallel",),
            vmem_limit_bytes=vmem_limit,
        ),
    )(xf, w1t, b1, w2t, b2, w3, b3)
    return out.reshape(B, C, H, W)


def init_params(channel, key):
    k1, k2, k3 = jax.random.split(key, 3)
    return {
        "w1": 0.1 * jax.random.normal(k1, (5, 5, channel, channel), jnp.float32),
        "b1": jnp.linspace(-0.1, 0.1, channel, dtype=jnp.float32),
        "w2": 0.1 * jax.random.normal(k2, (3, 3, channel, channel), jnp.float32),
        "b2": jnp.linspace(0.1, -0.1, channel, dtype=jnp.float32),
        "w3": 0.1 * jax.random.normal(k3, (channel, 3), jnp.float32),
        "b3": jnp.array([0.05, -0.05, 0.0], jnp.float32),
    }


# Pure-JAX (f32) reference for the correctness check.
def _reference(x_nchw, params):
    x = jnp.transpose(x_nchw, (0, 2, 3, 1)).astype(jnp.float32)
    dn = ("NHWC", "HWIO", "NHWC")
    h = jax.lax.conv_general_dilated(x, params["w1"], (1, 1), "SAME",
                                     dimension_numbers=dn) + params["b1"]
    h = jnp.maximum(h, 0.0)
    h = jax.lax.conv_general_dilated(h, params["w2"], (1, 1), "SAME",
                                     dimension_numbers=dn) + params["b2"]
    h = jnp.maximum(h, 0.0)
    a = jax.nn.sigmoid(jnp.einsum("bhwc,cn->bhwn", h, params["w3"]) + params["b3"])
    y = jnp.maximum(x, 0.0) - jnp.maximum(x - 1.0, 0.0)
    for i in range(3):
        y = y + a[..., i:i + 1] * y * (1.0 - y)
    return jnp.transpose(y, (0, 3, 1, 2))


if __name__ == "__main__":
    key = jax.random.PRNGKey(0)
    kx, kp = jax.random.split(key)

    # batch=8 exercises the lane-packed batch tile (Bt=4) and a 2-step parallel grid.
    B, C, H, W = 8, 4, 16, 16
    x = jax.random.normal(kx, (B, C, H, W), jnp.float32)
    params = init_params(C, kp)

    fwd = jax.jit(curve_ca_forward)
    out = jax.block_until_ready(fwd(x, params))

    ref = _reference(x, params)
    assert out.shape == (B, C, H, W)
    max_err = float(jnp.max(jnp.abs(out - ref)))
    assert jnp.allclose(out, ref, atol=1e-2, rtol=1e-2), f"mismatch: {max_err}"

    print("KERNEL_OK")
</pallas_src>

<mosaic_0001>
module attributes {stable_mosaic.version = 11 : i64} {
  func.func @_curve_ca_kernel(%arg0: i32, %arg1: memref<4x4x256xf32, #tpu.memory_space<vmem>>, %arg2: memref<25x4x4xf32, #tpu.memory_space<vmem>>, %arg3: memref<4x1xf32, #tpu.memory_space<vmem>>, %arg4: memref<9x4x4xf32, #tpu.memory_space<vmem>>, %arg5: memref<4x1xf32, #tpu.memory_space<vmem>>, %arg6: memref<4x3xf32, #tpu.memory_space<smem>>, %arg7: memref<3xf32, #tpu.memory_space<smem>>, %arg8: memref<4x4x256xf32, #tpu.memory_space<vmem>>, %arg9: memref<4x1664xf32, #tpu.memory_space<vmem>>) attributes {dimension_semantics = [#tpu.dimension_semantics<parallel>], iteration_bounds = array<i64: 2>, scalar_prefetch = 0 : i64, scratch_operands = 1 : i64, tpu.core_type = #tpu.core_type<tc>, window_params = [{transform_indices = @transform_0, window_bounds = array<i64: 4, 4, 256>}, {pipeline_mode = #tpu.pipeline_mode<synchronous>, transform_indices = @transform_1, window_bounds = array<i64: 25, 4, 4>}, {pipeline_mode = #tpu.pipeline_mode<synchronous>, transform_indices = @transform_2, window_bounds = array<i64: 4, 1>}, {pipeline_mode = #tpu.pipeline_mode<synchronous>, transform_indices = @transform_3, window_bounds = array<i64: 9, 4, 4>}, {pipeline_mode = #tpu.pipeline_mode<synchronous>, transform_indices = @transform_4, window_bounds = array<i64: 4, 1>}, {transform_indices = @transform_5, window_bounds = array<i64: 4, 3>}, {transform_indices = @transform_6, window_bounds = array<i64: 3>}, {transform_indices = @transform_7, window_bounds = array<i64: 4, 4, 256>}]} {
    %0 = tpu.iota {dimensions = array<i32: 1>} : vector<1x1408xi32>
    %c384_i32 = arith.constant 384 : i32
    %c0_i32 = arith.constant 0 : i32
    %1 = arith.cmpi eq, %c384_i32, %c0_i32 : i32
    %c1_i32 = arith.constant 1 : i32
    %2 = arith.select %1, %c1_i32, %c384_i32 : i32
    %3 = vector.broadcast %2 : i32 to vector<1x1408xi32>
    %4 = arith.remsi %0, %3 : vector<1x1408xi32>
    %c0_i32_0 = arith.constant 0 : i32
    %5 = vector.broadcast %c0_i32_0 : i32 to vector<1x1408xi32>
    %6 = arith.cmpi ne, %4, %5 : vector<1x1408xi32>
    %c0_i32_1 = arith.constant 0 : i32
    %7 = vector.broadcast %c0_i32_1 : i32 to vector<1x1408xi32>
    %8 = arith.cmpi slt, %4, %7 : vector<1x1408xi32>
    %c0_i32_2 = arith.constant 0 : i32
    %9 = arith.cmpi slt, %2, %c0_i32_2 : i32
    %10 = vector.broadcast %9 : i1 to vector<1x1408xi1>
    %11 = vector.broadcast %10 : vector<1x1408xi1> to vector<1x1408xi1>
    %12 = arith.xori %8, %11 : vector<1x1408xi1>
    %13 = arith.andi %12, %6 : vector<1x1408xi1>
    %14 = vector.broadcast %2 : i32 to vector<1x1408xi32>
    %15 = arith.addi %4, %14 : vector<1x1408xi32>
    %16 = arith.select %13, %15, %4 : vector<1x1408xi1>, vector<1x1408xi32>
    %c16_i32 = arith.constant 16 : i32
    %c0_i32_3 = arith.constant 0 : i32
    %17 = arith.cmpi eq, %c16_i32, %c0_i32_3 : i32
    %c1_i32_4 = arith.constant 1 : i32
    %18 = arith.select %17, %c1_i32_4, %c16_i32 : i32
    %19 = vector.broadcast %18 : i32 to vector<1x1408xi32>
    %20 = arith.remsi %16, %19 : vector<1x1408xi32>
    %c0_i32_5 = arith.constant 0 : i32
    %21 = vector.broadcast %c0_i32_5 : i32 to vector<1x1408xi32>
    %22 = arith.cmpi ne, %20, %21 : vector<1x1408xi32>
    %c0_i32_6 = arith.constant 0 : i32
    %23 = vector.broadcast %c0_i32_6 : i32 to vector<1x1408xi32>
    %24 = arith.cmpi slt, %20, %23 : vector<1x1408xi32>
    %c0_i32_7 = arith.constant 0 : i32
    %25 = arith.cmpi slt, %18, %c0_i32_7 : i32
    %26 = vector.broadcast %25 : i1 to vector<1x1408xi1>
    %27 = vector.broadcast %26 : vector<1x1408xi1> to vector<1x1408xi1>
    %28 = arith.xori %24, %27 : vector<1x1408xi1>
    %29 = arith.andi %28, %22 : vector<1x1408xi1>
    %30 = vector.broadcast %18 : i32 to vector<1x1408xi32>
    %31 = arith.addi %20, %30 : vector<1x1408xi32>
    %32 = arith.select %29, %31, %20 : vector<1x1408xi1>, vector<1x1408xi32>
    %c2_i32 = arith.constant 2 : i32
    %33 = vector.broadcast %c2_i32 : i32 to vector<1x1408xi32>
    %34 = arith.cmpi sge, %32, %33 : vector<1x1408xi32>
    %c16_i32_8 = arith.constant 16 : i32
    %35 = vector.broadcast %c16_i32_8 : i32 to vector<1x1408xi32>
    %36 = arith.cmpi slt, %32, %35 : vector<1x1408xi32>
    %37 = arith.andi %34, %36 : vector<1x1408xi1>
    %c1_i32_9 = arith.constant 1 : i32
    %38 = vector.broadcast %c1_i32_9 : i32 to vector<1x1408xi32>
    %39 = arith.cmpi sge, %32, %38 : vector<1x1408xi32>
    %c16_i32_10 = arith.constant 16 : i32
    %40 = vector.broadcast %c16_i32_10 : i32 to vector<1x1408xi32>
    %41 = arith.cmpi slt, %32, %40 : vector<1x1408xi32>
    %42 = arith.andi %39, %41 : vector<1x1408xi1>
    %c0_i32_11 = arith.constant 0 : i32
    %43 = vector.broadcast %c0_i32_11 : i32 to vector<1x1408xi32>
    %44 = arith.cmpi sge, %32, %43 : vector<1x1408xi32>
    %c15_i32 = arith.constant 15 : i32
    %45 = vector.broadcast %c15_i32 : i32 to vector<1x1408xi32>
    %46 = arith.cmpi slt, %32, %45 : vector<1x1408xi32>
    %47 = arith.andi %44, %46 : vector<1x1408xi1>
    %c0_i32_12 = arith.constant 0 : i32
    %48 = vector.broadcast %c0_i32_12 : i32 to vector<1x1408xi32>
    %49 = arith.cmpi sge, %32, %48 : vector<1x1408xi32>
    %c14_i32 = arith.constant 14 : i32
    %50 = vector.broadcast %c14_i32 : i32 to vector<1x1408xi32>
    %51 = arith.cmpi slt, %32, %50 : vector<1x1408xi32>
    %52 = arith.andi %49, %51 : vector<1x1408xi1>
    %cst = arith.constant 0.000000e+00 : f32
    %53 = vector.broadcast %cst : f32 to vector<4x128xf32>
    %c0 = arith.constant 0 : index
    %c0_13 = arith.constant 0 : index
    %54 = vector.load %arg9[%c0, %c0_13] : memref<4x1664xf32, #tpu.memory_space<vmem>>, vector<4x128xf32>
    tpu.vector_store %arg9[%c0, %c0_13], %53 {strides = array<i32>} : memref<4x1664xf32, #tpu.memory_space<vmem>>, vector<4x128xf32>,
    %c0_14 = arith.constant 0 : index
    %c384 = arith.constant 384 : index
    %55 = vector.load %arg9[%c0_14, %c384] : memref<4x1664xf32, #tpu.memory_space<vmem>>, vector<4x128xf32>
    tpu.vector_store %arg9[%c0_14, %c384], %53 {strides = array<i32>} : memref<4x1664xf32, #tpu.memory_space<vmem>>, vector<4x128xf32>,
    %c0_15 = arith.constant 0 : index
    %c768 = arith.constant 768 : index
    %56 = vector.load %arg9[%c0_15, %c768] : memref<4x1664xf32, #tpu.memory_space<vmem>>, vector<4x128xf32>
    tpu.vector_store %arg9[%c0_15, %c768], %53 {strides = array<i32>} : memref<4x1664xf32, #tpu.memory_space<vmem>>, vector<4x128xf32>,
    %c0_16 = arith.constant 0 : index
    %c1152 = arith.constant 1152 : index
    %57 = vector.load %arg9[%c0_16, %c1152] : memref<4x1664xf32, #tpu.memory_space<vmem>>, vector<4x128xf32>
    tpu.vector_store %arg9[%c0_16, %c1152], %53 {strides = array<i32>} : memref<4x1664xf32, #tpu.memory_space<vmem>>, vector<4x128xf32>,
    %c0_17 = arith.constant 0 : index
    %c1536 = arith.constant 1536 : index
    %58 = vector.load %arg9[%c0_17, %c1536] : memref<4x1664xf32, #tpu.memory_space<vmem>>, vector<4x128xf32>
    tpu.vector_store %arg9[%c0_17, %c1536], %53 {strides = array<i32>} : memref<4x1664xf32, #tpu.memory_space<vmem>>, vector<4x128xf32>,
    %c0_18 = arith.constant 0 : index
    %c0_19 = arith.constant 0 : index
    %c0_20 = arith.constant 0 : index
    %59 = vector.load %arg1[%c0_18, %c0_19, %c0_20] : memref<4x4x256xf32, #tpu.memory_space<vmem>>, vector<1x4x256xf32>
    %60 = vector.shape_cast %59 : vector<1x4x256xf32> to vector<4x256xf32>
    %c0_21 = arith.constant 0 : index
    %c128 = arith.constant 128 : index
    %61 = vector.load %arg9[%c0_21, %c128] : memref<4x1664xf32, #tpu.memory_space<vmem>>, vector<4x256xf32>
    tpu.vector_store %arg9[%c0_21, %c128], %60 {strides = array<i32>} : memref<4x1664xf32, #tpu.memory_space<vmem>>, vector<4x256xf32>,
    %c1 = arith.constant 1 : index
    %c0_22 = arith.constant 0 : index
    %c0_23 = arith.constant 0 : index
    %62 = vector.load %arg1[%c1, %c0_22, %c0_23] : memref<4x4x256xf32, #tpu.memory_space<vmem>>, vector<1x4x256xf32>
    %63 = vector.shape_cast %62 : vector<1x4x256xf32> to vector<4x256xf32>
    %c0_24 = arith.constant 0 : index
    %c512 = arith.constant 512 : index
    %64 = vector.load %arg9[%c0_24, %c512] : memref<4x1664xf32, #tpu.memory_space<vmem>>, vector<4x256xf32>
    tpu.vector_store %arg9[%c0_24, %c512], %63 {strides = array<i32>} : memref<4x1664xf32, #tpu.memory_space<vmem>>, vector<4x256xf32>,
    %c2 = arith.constant 2 : index
    %c0_25 = arith.constant 0 : index
    %c0_26 = arith.constant 0 : index
    %65 = vector.load %arg1[%c2, %c0_25, %c0_26] : memref<4x4x256xf32, #tpu.memory_space<vmem>>, vector<1x4x256xf32>
    %66 = vector.shape_cast %65 : vector<1x4x256xf32> to vector<4x256xf32>
    %c0_27 = arith.constant 0 : index
    %c896 = arith.constant 896 : index
    %67 = vector.load %arg9[%c0_27, %c896] : memref<4x1664xf32, #tpu.memory_space<vmem>>, vector<4x256xf32>
    tpu.vector_store %arg9[%c0_27, %c896], %66 {strides = array<i32>} : memref<4x1664xf32, #tpu.memory_space<vmem>>, vector<4x256xf32>,
    %c3 = arith.constant 3 : index
    %c0_28 = arith.constant 0 : index
    %c0_29 = arith.constant 0 : index
    %68 = vector.load %arg1[%c3, %c0_28, %c0_29] : memref<4x4x256xf32, #tpu.memory_space<vmem>>, vector<1x4x256xf32>
    %69 = vector.shape_cast %68 : vector<1x4x256xf32> to vector<4x256xf32>
    %c0_30 = arith.constant 0 : index
    %c1280 = arith.constant 1280 : index
    %70 = vector.load %arg9[%c0_30, %c1280] : memref<4x1664xf32, #tpu.memory_space<vmem>>, vector<4x256xf32>
    tpu.vector_store %arg9[%c0_30, %c1280], %69 {strides = array<i32>} : memref<4x1664xf32, #tpu.memory_space<vmem>>, vector<4x256xf32>,
    %cst_31 = arith.constant 0.000000e+00 : f32
    %71 = vector.broadcast %cst_31 : f32 to vector<4x1408xf32>
    %c0_32 = arith.constant 0 : index
    %c94 = arith.constant 94 : index
    %72 = vector.load %arg9[%c0_32, %c94] : memref<4x1664xf32, #tpu.memory_space<vmem>>, vector<4x1408xf32>
    %cst_33 = arith.constant 0.000000e+00 : f32
    %73 = vector.shape_cast %37 : vector<1x1408xi1> to vector<1x1408xi1>
    %74 = vector.broadcast %73 : vector<1x1408xi1> to vector<4x1408xi1>
    %75 = vector.broadcast %cst_33 : f32 to vector<4x1408xf32>
    %76 = arith.select %74, %72, %75 : vector<4x1408xi1>, vector<4x1408xf32>
    %c0_34 = arith.constant 0 : index
    %c0_35 = arith.constant 0 : index
    %c0_36 = arith.constant 0 : index
    %77 = vector.load %arg2[%c0_34, %c0_35, %c0_36] : memref<25x4x4xf32, #tpu.memory_space<vmem>>, vector<1x4x4xf32>
    %78 = vector.shape_cast %77 : vector<1x4x4xf32> to vector<4x4xf32>
    %cst_37 = arith.constant dense<0.000000e+00> : vector<4x1408xf32>
    %79 = tpu.matmul %78, %76, %cst_37 {dimension_numbers = #tpu.dot_dimension_numbers<[1], [0], [0], [1], [0, 0, 1, 1], [], []>} : vector<4x4xf32>, vector<4x1408xf32>, vector<4x1408xf32> -> vector<4x1408xf32>
    %80 = arith.addf %71, %79 : vector<4x1408xf32>
    %c0_38 = arith.constant 0 : index
    %c95 = arith.constant 95 : index
    %81 = vector.load %arg9[%c0_38, %c95] : memref<4x1664xf32, #tpu.memory_space<vmem>>, vector<4x1408xf32>
    %cst_39 = arith.constant 0.000000e+00 : f32
    %82 = vector.shape_cast %42 : vector<1x1408xi1> to vector<1x1408xi1>
    %83 = vector.broadcast %82 : vector<1x1408xi1> to vector<4x1408xi1>
    %84 = vector.broadcast %cst_39 : f32 to vector<4x1408xf32>
    %85 = arith.select %83, %81, %84 : vector<4x1408xi1>, vector<4x1408xf32>
    %c1_40 = arith.constant 1 : index
    %c0_41 = arith.constant 0 : index
    %c0_42 = arith.constant 0 : index
    %86 = vector.load %arg2[%c1_40, %c0_41, %c0_42] : memref<25x4x4xf32, #tpu.memory_space<vmem>>, vector<1x4x4xf32>
    %87 = vector.shape_cast %86 : vector<1x4x4xf32> to vector<4x4xf32>
    %cst_43 = arith.constant dense<0.000000e+00> : vector<4x1408xf32>
    %88 = tpu.matmul %87, %85, %cst_43 {dimension_numbers = #tpu.dot_dimension_numbers<[1], [0], [0], [1], [0, 0, 1, 1], [], []>} : vector<4x4xf32>, vector<4x1408xf32>, vector<4x1408xf32> -> vector<4x1408xf32>
    %89 = arith.addf %80, %88 : vector<4x1408xf32>
    %c0_44 = arith.constant 0 : index
    %c96 = arith.constant 96 : index
    %90 = vector.load %arg9[%c0_44, %c96] : memref<4x1664xf32, #tpu.memory_space<vmem>>, vector<4x1408xf32>
    %c2_45 = arith.constant 2 : index
    %c0_46 = arith.constant 0 : index
    %c0_47 = arith.constant 0 : index
    %91 = vector.load %arg2[%c2_45, %c0_46, %c0_47] : memref<25x4x4xf32, #tpu.memory_space<vmem>>, vector<1x4x4xf32>
    %92 = vector.shape_cast %91 : vector<1x4x4xf32> to vector<4x4xf32>
    %cst_48 = arith.constant dense<0.000000e+00> : vector<4x1408xf32>
    %93 = tpu.matmul %92, %90, %cst_48 {dimension_numbers = #tpu.dot_dimension_numbers<[1], [0], [0], [1], [0, 0, 1, 1], [], []>} : vector<4x4xf32>, vector<4x1408xf32>, vector<4x1408xf32> -> vector<4x1408xf32>
    %94 = arith.addf %89, %93 : vector<4x1408xf32>
    %c0_49 = arith.constant 0 : index
    %c97 = arith.constant 97 : index
    %95 = vector.load %arg9[%c0_49, %c97] : memref<4x1664xf32, #tpu.memory_space<vmem>>, vector<4x1408xf32>
    %cst_50 = arith.constant 0.000000e+00 : f32
    %96 = vector.shape_cast %47 : vector<1x1408xi1> to vector<1x1408xi1>
    %97 = vector.broadcast %96 : vector<1x1408xi1> to vector<4x1408xi1>
    %98 = vector.broadcast %cst_50 : f32 to vector<4x1408xf32>
    %99 = arith.select %97, %95, %98 : vector<4x1408xi1>, vector<4x1408xf32>
    %c3_51 = arith.constant 3 : index
    %c0_52 = arith.constant 0 : index
    %c0_53 = arith.constant 0 : index
    %100 = vector.load %arg2[%c3_51, %c0_52, %c0_53] : memref<25x4x4xf32, #tpu.memory_space<vmem>>, vector<1x4x4xf32>
    %101 = vector.shape_cast %100 : vector<1x4x4xf32> to vector<4x4xf32>
    %cst_54 = arith.constant dense<0.000000e+00> : vector<4x1408xf32>
    %102 = tpu.matmul %101, %99, %cst_54 {dimension_numbers = #tpu.dot_dimension_numbers<[1], [0], [0], [1], [0, 0, 1, 1], [], []>} : vector<4x4xf32>, vector<4x1408xf32>, vector<4x1408xf32> -> vector<4x1408xf32>
    %103 = arith.addf %94, %102 : vector<4x1408xf32>
    %c0_55 = arith.constant 0 : index
    %c98 = arith.constant 98 : index
    %104 = vector.load %arg9[%c0_55, %c98] : memref<4x1664xf32, #tpu.memory_space<vmem>>, vector<4x1408xf32>
    %cst_56 = arith.constant 0.000000e+00 : f32
    %105 = vector.shape_cast %52 : vector<1x1408xi1> to vector<1x1408xi1>
    %106 = vector.broadcast %105 : vector<1x1408xi1> to vector<4x1408xi1>
    %107 = vector.broadcast %cst_56 : f32 to vector<4x1408xf32>
    %108 = arith.select %106, %104, %107 : vector<4x1408xi1>, vector<4x1408xf32>
    %c4 = arith.constant 4 : index
    %c0_57 = arith.constant 0 : index
    %c0_58 = arith.constant 0 : index
    %109 = vector.load %arg2[%c4, %c0_57, %c0_58] : memref<25x4x4xf32, #tpu.memory_space<vmem>>, vector<1x4x4xf32>
    %110 = vector.shape_cast %109 : vector<1x4x4xf32> to vector<4x4xf32>
    %cst_59 = arith.constant dense<0.000000e+00> : vector<4x1408xf32>
    %111 = tpu.matmul %110, %108, %cst_59 {dimension_numbers = #tpu.dot_dimension_numbers<[1], [0], [0], [1], [0, 0, 1, 1], [], []>} : vector<4x4xf32>, vector<4x1408xf32>, vector<4x1408xf32> -> vector<4x1408xf32>
    %112 = arith.addf %103, %111 : vector<4x1408xf32>
    %c0_60 = arith.constant 0 : index
    %c110 = arith.constant 110 : index
    %113 = vector.load %arg9[%c0_60, %c110] : memref<4x1664xf32, #tpu.memory_space<vmem>>, vector<4x1408xf32>
    %cst_61 = arith.constant 0.000000e+00 : f32
    %114 = vector.shape_cast %37 : vector<1x1408xi1> to vector<1x1408xi1>
    %115 = vector.broadcast %114 : vector<1x1408xi1> to vector<4x1408xi1>
    %116 = vector.broadcast %cst_61 : f32 to vector<4x1408xf32>
    %117 = arith.select %115, %113, %116 : vector<4x1408xi1>, vector<4x1408xf32>
    %c5 = arith.constant 5 : index
    %c0_62 = arith.constant 0 : index
    %c0_63 = arith.constant 0 : index
    %118 = vector.load %arg2[%c5, %c0_62, %c0_63] : memref<25x4x4xf32, #tpu.memory_space<vmem>>, vector<1x4x4xf32>
    %119 = vector.shape_cast %118 : vector<1x4x4xf32> to vector<4x4xf32>
    %cst_64 = arith.constant dense<0.000000e+00> : vector<4x1408xf32>
    %120 = tpu.matmul %119, %117, %cst_64 {dimension_numbers = #tpu.dot_dimension_numbers<[1], [0], [0], [1], [0, 0, 1, 1], [], []>} : vector<4x4xf32>, vector<4x1408xf32>, vector<4x1408xf32> -> vector<4x1408xf32>
    %121 = arith.addf %112, %120 : vector<4x1408xf32>
    %c0_65 = arith.constant 0 : index
    %c111 = arith.constant 111 : index
    %122 = vector.load %arg9[%c0_65, %c111] : memref<4x1664xf32, #tpu.memory_space<vmem>>, vector<4x1408xf32>
    %cst_66 = arith.constant 0.000000e+00 : f32
    %123 = vector.shape_cast %42 : vector<1x1408xi1> to vector<1x1408xi1>
    %124 = vector.broadcast %123 : vector<1x1408xi1> to vector<4x1408xi1>
    %125 = vector.broadcast %cst_66 : f32 to vector<4x1408xf32>
    %126 = arith.select %124, %122, %125 : vector<4x1408xi1>, vector<4x1408xf32>
    %c6 = arith.constant 6 : index
    %c0_67 = arith.constant 0 : index
    %c0_68 = arith.constant 0 : index
    %127 = vector.load %arg2[%c6, %c0_67, %c0_68] : memref<25x4x4xf32, #tpu.memory_space<vmem>>, vector<1x4x4xf32>
    %128 = vector.shape_cast %127 : vector<1x4x4xf32> to vector<4x4xf32>
    %cst_69 = arith.constant dense<0.000000e+00> : vector<4x1408xf32>
    %129 = tpu.matmul %128, %126, %cst_69 {dimension_numbers = #tpu.dot_dimension_numbers<[1], [0], [0], [1], [0, 0, 1, 1], [], []>} : vector<4x4xf32>, vector<4x1408xf32>, vector<4x1408xf32> -> vector<4x1408xf32>
    %130 = arith.addf %121, %129 : vector<4x1408xf32>
    %c0_70 = arith.constant 0 : index
    %c112 = arith.constant 112 : index
    %131 = vector.load %arg9[%c0_70, %c112] : memref<4x1664xf32, #tpu.memory_space<vmem>>, vector<4x1408xf32>
    %c7 = arith.constant 7 : index
    %c0_71 = arith.constant 0 : index
    %c0_72 = arith.constant 0 : index
    %132 = vector.load %arg2[%c7, %c0_71, %c0_72] : memref<25x4x4xf32, #tpu.memory_space<vmem>>, vector<1x4x4xf32>
    %133 = vector.shape_cast %132 : vector<1x4x4xf32> to vector<4x4xf32>
    %cst_73 = arith.constant dense<0.000000e+00> : vector<4x1408xf32>
    %134 = tpu.matmul %133, %131, %cst_73 {dimension_numbers = #tpu.dot_dimension_numbers<[1], [0], [0], [1], [0, 0, 1, 1], [], []>} : vector<4x4xf32>, vector<4x1408xf32>, vector<4x1408xf32> -> vector<4x1408xf32>
    %135 = arith.addf %130, %134 : vector<4x1408xf32>
    %c0_74 = arith.constant 0 : index
    %c113 = arith.constant 113 : index
    %136 = vector.load %arg9[%c0_74, %c113] : memref<4x1664xf32, #tpu.memory_space<vmem>>, vector<4x1408xf32>
    %cst_75 = arith.constant 0.000000e+00 : f32
    %137 = vector.shape_cast %47 : vector<1x1408xi1> to vector<1x1408xi1>
    %138 = vector.broadcast %137 : vector<1x1408xi1> to vector<4x1408xi1>
    %139 = vector.broadcast %cst_75 : f32 to vector<4x1408xf32>
    %140 = arith.select %138, %136, %139 : vector<4x1408xi1>, vector<4x1408xf32>
    %c8 = arith.constant 8 : index
    %c0_76 = arith.constant 0 : index
    %c0_77 = arith.constant 0 : index
    %141 = vector.load %arg2[%c8, %c0_76, %c0_77] : memref<25x4x4xf32, #tpu.memory_space<vmem>>, vector<1x4x4xf32>
    %142 = vector.shape_cast %141 : vector<1x4x4xf32> to vector<4x4xf32>
    %cst_78 = arith.constant dense<0.000000e+00> : vector<4x1408xf32>
    %143 = tpu.matmul %142, %140, %cst_78 {dimension_numbers = #tpu.dot_dimension_numbers<[1], [0], [0], [1], [0, 0, 1, 1], [], []>} : vector<4x4xf32>, vector<4x1408xf32>, vector<4x1408xf32> -> vector<4x1408xf32>
    %144 = arith.addf %135, %143 : vector<4x1408xf32>
    %c0_79 = arith.constant 0 : index
    %c114 = arith.constant 114 : index
    %145 = vector.load %arg9[%c0_79, %c114] : memref<4x1664xf32, #tpu.memory_space<vmem>>, vector<4x1408xf32>
    %cst_80 = arith.constant 0.000000e+00 : f32
    %146 = vector.shape_cast %52 : vector<1x1408xi1> to vector<1x1408xi1>
    %147 = vector.broadcast %146 : vector<1x1408xi1> to vector<4x1408xi1>
    %148 = vector.broadcast %cst_80 : f32 to vector<4x1408xf32>
    %149 = arith.select %147, %145, %148 : vector<4x1408xi1>, vector<4x1408xf32>
    %c9 = arith.constant 9 : index
    %c0_81 = arith.constant 0 : index
    %c0_82 = arith.constant 0 : index
    %150 = vector.load %arg2[%c9, %c0_81, %c0_82] : memref<25x4x4xf32, #tpu.memory_space<vmem>>, vector<1x4x4xf32>
    %151 = vector.shape_cast %150 : vector<1x4x4xf32> to vector<4x4xf32>
    %cst_83 = arith.constant dense<0.000000e+00> : vector<4x1408xf32>
    %152 = tpu.matmul %151, %149, %cst_83 {dimension_numbers = #tpu.dot_dimension_numbers<[1], [0], [0], [1], [0, 0, 1, 1], [], []>} : vector<4x4xf32>, vector<4x1408xf32>, vector<4x1408xf32> -> vector<4x1408xf32>
    %153 = arith.addf %144, %152 : vector<4x1408xf32>
    %c0_84 = arith.constant 0 : index
    %c126 = arith.constant 126 : index
    %154 = vector.load %arg9[%c0_84, %c126] : memref<4x1664xf32, #tpu.memory_space<vmem>>, vector<4x1408xf32>
    %cst_85 = arith.constant 0.000000e+00 : f32
    %155 = vector.shape_cast %37 : vector<1x1408xi1> to vector<1x1408xi1>
    %156 = vector.broadcast %155 : vector<1x1408xi1> to vector<4x1408xi1>
    %157 = vector.broadcast %cst_85 : f32 to vector<4x1408xf32>
    %158 = arith.select %156, %154, %157 : vector<4x1408xi1>, vector<4x1408xf32>
    %c10 = arith.constant 10 : index
    %c0_86 = arith.constant 0 : index
    %c0_87 = arith.constant 0 : index
    %159 = vector.load %arg2[%c10, %c0_86, %c0_87] : memref<25x4x4xf32, #tpu.memory_space<vmem>>, vector<1x4x4xf32>
    %160 = vector.shape_cast %159 : vector<1x4x4xf32> to vector<4x4xf32>
    %cst_88 = arith.constant dense<0.000000e+00> : vector<4x1408xf32>
    %161 = tpu.matmul %160, %158, %cst_88 {dimension_numbers = #tpu.dot_dimension_numbers<[1], [0], [0], [1], [0, 0, 1, 1], [], []>} : vector<4x4xf32>, vector<4x1408xf32>, vector<4x1408xf32> -> vector<4x1408xf32>
    %162 = arith.addf %153, %161 : vector<4x1408xf32>
    %c0_89 = arith.constant 0 : index
    %c127 = arith.constant 127 : index
    %163 = vector.load %arg9[%c0_89, %c127] : memref<4x1664xf32, #tpu.memory_space<vmem>>, vector<4x1408xf32>
    %cst_90 = arith.constant 0.000000e+00 : f32
    %164 = vector.shape_cast %42 : vector<1x1408xi1> to vector<1x1408xi1>
    %165 = vector.broadcast %164 : vector<1x1408xi1> to vector<4x1408xi1>
    %166 = vector.broadcast %cst_90 : f32 to vector<4x1408xf32>
    %167 = arith.select %165, %163, %166 : vector<4x1408xi1>, vector<4x1408xf32>
    %c11 = arith.constant 11 : index
    %c0_91 = arith.constant 0 : index
    %c0_92 = arith.constant 0 : index
    %168 = vector.load %arg2[%c11, %c0_91, %c0_92] : memref<25x4x4xf32, #tpu.memory_space<vmem>>, vector<1x4x4xf32>
    %169 = vector.shape_cast %168 : vector<1x4x4xf32> to vector<4x4xf32>
    %cst_93 = arith.constant dense<0.000000e+00> : vector<4x1408xf32>
    %170 = tpu.matmul %169, %167, %cst_93 {dimension_numbers = #tpu.dot_dimension_numbers<[1], [0], [0], [1], [0, 0, 1, 1], [], []>} : vector<4x4xf32>, vector<4x1408xf32>, vector<4x1408xf32> -> vector<4x1408xf32>
    %171 = arith.addf %162, %170 : vector<4x1408xf32>
    %c0_94 = arith.constant 0 : index
    %c128_95 = arith.constant 128 : index
    %172 = vector.load %arg9[%c0_94, %c128_95] : memref<4x1664xf32, #tpu.memory_space<vmem>>, vector<4x1408xf32>
    %c12 = arith.constant 12 : index
    %c0_96 = arith.constant 0 : index
    %c0_97 = arith.constant 0 : index
    %173 = vector.load %arg2[%c12, %c0_96, %c0_97] : memref<25x4x4xf32, #tpu.memory_space<vmem>>, vector<1x4x4xf32>
    %174 = vector.shape_cast %173 : vector<1x4x4xf32> to vector<4x4xf32>
    %cst_98 = arith.constant dense<0.000000e+00> : vector<4x1408xf32>
    %175 = tpu.matmul %174, %172, %cst_98 {dimension_numbers = #tpu.dot_dimension_numbers<[1], [0], [0], [1], [0, 0, 1, 1], [], []>} : vector<4x4xf32>, vector<4x1408xf32>, vector<4x1408xf32> -> vector<4x1408xf32>
    %176 = arith.addf %171, %175 : vector<4x1408xf32>
    %c0_99 = arith.constant 0 : index
    %c129 = arith.constant 129 : index
    %177 = vector.load %arg9[%c0_99, %c129] : memref<4x1664xf32, #tpu.memory_space<vmem>>, vector<4x1408xf32>
    %cst_100 = arith.constant 0.000000e+00 : f32
    %178 = vector.shape_cast %47 : vector<1x1408xi1> to vector<1x1408xi1>
    %179 = vector.broadcast %178 : vector<1x1408xi1> to vector<4x1408xi1>
    %180 = vector.broadcast %cst_100 : f32 to vector<4x1408xf32>
    %181 = arith.select %179, %177, %180 : vector<4x1408xi1>, vector<4x1408xf32>
    %c13 = arith.constant 13 : index
    %c0_101 = arith.constant 0 : index
    %c0_102 = arith.constant 0 : index
    %182 = vector.load %arg2[%c13, %c0_101, %c0_102] : memref<25x4x4xf32, #tpu.memory_space<vmem>>, vector<1x4x4xf32>
    %183 = vector.shape_cast %182 : vector<1x4x4xf32> to vector<4x4xf32>
    %cst_103 = arith.constant dense<0.000000e+00> : vector<4x1408xf32>
    %184 = tpu.matmul %183, %181, %cst_103 {dimension_numbers = #tpu.dot_dimension_numbers<[1], [0], [0], [1], [0, 0, 1, 1], [], []>} : vector<4x4xf32>, vector<4x1408xf32>, vector<4x1408xf32> -> vector<4x1408xf32>
    %185 = arith.addf %176, %184 : vector<4x1408xf32>
    %c0_104 = arith.constant 0 : index
    %c130 = arith.constant 130 : index
    %186 = vector.load %arg9[%c0_104, %c130] : memref<4x1664xf32, #tpu.memory_space<vmem>>, vector<4x1408xf32>
    %cst_105 = arith.constant 0.000000e+00 : f32
    %187 = vector.shape_cast %52 : vector<1x1408xi1> to vector<1x1408xi1>
    %188 = vector.broadcast %187 : vector<1x1408xi1> to vector<4x1408xi1>
    %189 = vector.broadcast %cst_105 : f32 to vector<4x1408xf32>
    %190 = arith.select %188, %186, %189 : vector<4x1408xi1>, vector<4x1408xf32>
    %c14 = arith.constant 14 : index
    %c0_106 = arith.constant 0 : index
    %c0_107 = arith.constant 0 : index
    %191 = vector.load %arg2[%c14, %c0_106, %c0_107] : memref<25x4x4xf32, #tpu.memory_space<vmem>>, vector<1x4x4xf32>
    %192 = vector.shape_cast %191 : vector<1x4x4xf32> to vector<4x4xf32>
    %cst_108 = arith.constant dense<0.000000e+00> : vector<4x1408xf32>
    %193 = tpu.matmul %192, %190, %cst_108 {dimension_numbers = #tpu.dot_dimension_numbers<[1], [0], [0], [1], [0, 0, 1, 1], [], []>} : vector<4x4xf32>, vector<4x1408xf32>, vector<4x1408xf32> -> vector<4x1408xf32>
    %194 = arith.addf %185, %193 : vector<4x1408xf32>
    %c0_109 = arith.constant 0 : index
    %c142 = arith.constant 142 : index
    %195 = vector.load %arg9[%c0_109, %c142] : memref<4x1664xf32, #tpu.memory_space<vmem>>, vector<4x1408xf32>
    %cst_110 = arith.constant 0.000000e+00 : f32
    %196 = vector.shape_cast %37 : vector<1x1408xi1> to vector<1x1408xi1>
    %197 = vector.broadcast %196 : vector<1x1408xi1> to vector<4x1408xi1>
    %198 = vector.broadcast %cst_110 : f32 to vector<4x1408xf32>
    %199 = arith.select %197, %195, %198 : vector<4x1408xi1>, vector<4x1408xf32>
    %c15 = arith.constant 15 : index
    %c0_111 = arith.constant 0 : index
    %c0_112 = arith.constant 0 : index
    %200 = vector.load %arg2[%c15, %c0_111, %c0_112] : memref<25x4x4xf32, #tpu.memory_space<vmem>>, vector<1x4x4xf32>
    %201 = vector.shape_cast %200 : vector<1x4x4xf32> to vector<4x4xf32>
    %cst_113 = arith.constant dense<0.000000e+00> : vector<4x1408xf32>
    %202 = tpu.matmul %201, %199, %cst_113 {dimension_numbers = #tpu.dot_dimension_numbers<[1], [0], [0], [1], [0, 0, 1, 1], [], []>} : vector<4x4xf32>, vector<4x1408xf32>, vector<4x1408xf32> -> vector<4x1408xf32>
    %203 = arith.addf %194, %202 : vector<4x1408xf32>
    %c0_114 = arith.constant 0 : index
    %c143 = arith.constant 143 : index
    %204 = vector.load %arg9[%c0_114, %c143] : memref<4x1664xf32, #tpu.memory_space<vmem>>, vector<4x1408xf32>
    %cst_115 = arith.constant 0.000000e+00 : f32
    %205 = vector.shape_cast %42 : vector<1x1408xi1> to vector<1x1408xi1>
    %206 = vector.broadcast %205 : vector<1x1408xi1> to vector<4x1408xi1>
    %207 = vector.broadcast %cst_115 : f32 to vector<4x1408xf32>
    %208 = arith.select %206, %204, %207 : vector<4x1408xi1>, vector<4x1408xf32>
    %c16 = arith.constant 16 : index
    %c0_116 = arith.constant 0 : index
    %c0_117 = arith.constant 0 : index
    %209 = vector.load %arg2[%c16, %c0_116, %c0_117] : memref<25x4x4xf32, #tpu.memory_space<vmem>>, vector<1x4x4xf32>
    %210 = vector.shape_cast %209 : vector<1x4x4xf32> to vector<4x4xf32>
    %cst_118 = arith.constant dense<0.000000e+00> : vector<4x1408xf32>
    %211 = tpu.matmul %210, %208, %cst_118 {dimension_numbers = #tpu.dot_dimension_numbers<[1], [0], [0], [1], [0, 0, 1, 1], [], []>} : vector<4x4xf32>, vector<4x1408xf32>, vector<4x1408xf32> -> vector<4x1408xf32>
    %212 = arith.addf %203, %211 : vector<4x1408xf32>
    %c0_119 = arith.constant 0 : index
    %c144 = arith.constant 144 : index
    %213 = vector.load %arg9[%c0_119, %c144] : memref<4x1664xf32, #tpu.memory_space<vmem>>, vector<4x1408xf32>
    %c17 = arith.constant 17 : index
    %c0_120 = arith.constant 0 : index
    %c0_121 = arith.constant 0 : index
    %214 = vector.load %arg2[%c17, %c0_120, %c0_121] : memref<25x4x4xf32, #tpu.memory_space<vmem>>, vector<1x4x4xf32>
    %215 = vector.shape_cast %214 : vector<1x4x4xf32> to vector<4x4xf32>
    %cst_122 = arith.constant dense<0.000000e+00> : vector<4x1408xf32>
    %216 = tpu.matmul %215, %213, %cst_122 {dimension_numbers = #tpu.dot_dimension_numbers<[1], [0], [0], [1], [0, 0, 1, 1], [], []>} : vector<4x4xf32>, vector<4x1408xf32>, vector<4x1408xf32> -> vector<4x1408xf32>
    %217 = arith.addf %212, %216 : vector<4x1408xf32>
    %c0_123 = arith.constant 0 : index
    %c145 = arith.constant 145 : index
    %218 = vector.load %arg9[%c0_123, %c145] : memref<4x1664xf32, #tpu.memory_space<vmem>>, vector<4x1408xf32>
    %cst_124 = arith.constant 0.000000e+00 : f32
    %219 = vector.shape_cast %47 : vector<1x1408xi1> to vector<1x1408xi1>
    %220 = vector.broadcast %219 : vector<1x1408xi1> to vector<4x1408xi1>
    %221 = vector.broadcast %cst_124 : f32 to vector<4x1408xf32>
    %222 = arith.select %220, %218, %221 : vector<4x1408xi1>, vector<4x1408xf32>
    %c18 = arith.constant 18 : index
    %c0_125 = arith.constant 0 : index
    %c0_126 = arith.constant 0 : index
    %223 = vector.load %arg2[%c18, %c0_125, %c0_126] : memref<25x4x4xf32, #tpu.memory_space<vmem>>, vector<1x4x4xf32>
    %224 = vector.shape_cast %223 : vector<1x4x4xf32> to vector<4x4xf32>
    %cst_127 = arith.constant dense<0.000000e+00> : vector<4x1408xf32>
    %225 = tpu.matmul %224, %222, %cst_127 {dimension_numbers = #tpu.dot_dimension_numbers<[1], [0], [0], [1], [0, 0, 1, 1], [], []>} : vector<4x4xf32>, vector<4x1408xf32>, vector<4x1408xf32> -> vector<4x1408xf32>
    %226 = arith.addf %217, %225 : vector<4x1408xf32>
    %c0_128 = arith.constant 0 : index
    %c146 = arith.constant 146 : index
    %227 = vector.load %arg9[%c0_128, %c146] : memref<4x1664xf32, #tpu.memory_space<vmem>>, vector<4x1408xf32>
    %cst_129 = arith.constant 0.000000e+00 : f32
    %228 = vector.shape_cast %52 : vector<1x1408xi1> to vector<1x1408xi1>
    %229 = vector.broadcast %228 : vector<1x1408xi1> to vector<4x1408xi1>
    %230 = vector.broadcast %cst_129 : f32 to vector<4x1408xf32>
    %231 = arith.select %229, %227, %230 : vector<4x1408xi1>, vector<4x1408xf32>
    %c19 = arith.constant 19 : index
    %c0_130 = arith.constant 0 : index
    %c0_131 = arith.constant 0 : index
    %232 = vector.load %arg2[%c19, %c0_130, %c0_131] : memref<25x4x4xf32, #tpu.memory_space<vmem>>, vector<1x4x4xf32>
    %233 = vector.shape_cast %232 : vector<1x4x4xf32> to vector<4x4xf32>
    %cst_132 = arith.constant dense<0.000000e+00> : vector<4x1408xf32>
    %234 = tpu.matmul %233, %231, %cst_132 {dimension_numbers = #tpu.dot_dimension_numbers<[1], [0], [0], [1], [0, 0, 1, 1], [], []>} : vector<4x4xf32>, vector<4x1408xf32>, vector<4x1408xf32> -> vector<4x1408xf32>
    %235 = arith.addf %226, %234 : vector<4x1408xf32>
    %c0_133 = arith.constant 0 : index
    %c158 = arith.constant 158 : index
    %236 = vector.load %arg9[%c0_133, %c158] : memref<4x1664xf32, #tpu.memory_space<vmem>>, vector<4x1408xf32>
    %cst_134 = arith.constant 0.000000e+00 : f32
    %237 = vector.shape_cast %37 : vector<1x1408xi1> to vector<1x1408xi1>
    %238 = vector.broadcast %237 : vector<1x1408xi1> to vector<4x1408xi1>
    %239 = vector.broadcast %cst_134 : f32 to vector<4x1408xf32>
    %240 = arith.select %238, %236, %239 : vector<4x1408xi1>, vector<4x1408xf32>
    %c20 = arith.constant 20 : index
    %c0_135 = arith.constant 0 : index
    %c0_136 = arith.constant 0 : index
    %241 = vector.load %arg2[%c20, %c0_135, %c0_136] : memref<25x4x4xf32, #tpu.memory_space<vmem>>, vector<1x4x4xf32>
    %242 = vector.shape_cast %241 : vector<1x4x4xf32> to vector<4x4xf32>
    %cst_137 = arith.constant dense<0.000000e+00> : vector<4x1408xf32>
    %243 = tpu.matmul %242, %240, %cst_137 {dimension_numbers = #tpu.dot_dimension_numbers<[1], [0], [0], [1], [0, 0, 1, 1], [], []>} : vector<4x4xf32>, vector<4x1408xf32>, vector<4x1408xf32> -> vector<4x1408xf32>
    %244 = arith.addf %235, %243 : vector<4x1408xf32>
    %c0_138 = arith.constant 0 : index
    %c159 = arith.constant 159 : index
    %245 = vector.load %arg9[%c0_138, %c159] : memref<4x1664xf32, #tpu.memory_space<vmem>>, vector<4x1408xf32>
    %cst_139 = arith.constant 0.000000e+00 : f32
    %246 = vector.shape_cast %42 : vector<1x1408xi1> to vector<1x1408xi1>
    %247 = vector.broadcast %246 : vector<1x1408xi1> to vector<4x1408xi1>
    %248 = vector.broadcast %cst_139 : f32 to vector<4x1408xf32>
    %249 = arith.select %247, %245, %248 : vector<4x1408xi1>, vector<4x1408xf32>
    %c21 = arith.constant 21 : index
    %c0_140 = arith.constant 0 : index
    %c0_141 = arith.constant 0 : index
    %250 = vector.load %arg2[%c21, %c0_140, %c0_141] : memref<25x4x4xf32, #tpu.memory_space<vmem>>, vector<1x4x4xf32>
    %251 = vector.shape_cast %250 : vector<1x4x4xf32> to vector<4x4xf32>
    %cst_142 = arith.constant dense<0.000000e+00> : vector<4x1408xf32>
    %252 = tpu.matmul %251, %249, %cst_142 {dimension_numbers = #tpu.dot_dimension_numbers<[1], [0], [0], [1], [0, 0, 1, 1], [], []>} : vector<4x4xf32>, vector<4x1408xf32>, vector<4x1408xf32> -> vector<4x1408xf32>
    %253 = arith.addf %244, %252 : vector<4x1408xf32>
    %c0_143 = arith.constant 0 : index
    %c160 = arith.constant 160 : index
    %254 = vector.load %arg9[%c0_143, %c160] : memref<4x1664xf32, #tpu.memory_space<vmem>>, vector<4x1408xf32>
    %c22 = arith.constant 22 : index
    %c0_144 = arith.constant 0 : index
    %c0_145 = arith.constant 0 : index
    %255 = vector.load %arg2[%c22, %c0_144, %c0_145] : memref<25x4x4xf32, #tpu.memory_space<vmem>>, vector<1x4x4xf32>
    %256 = vector.shape_cast %255 : vector<1x4x4xf32> to vector<4x4xf32>
    %cst_146 = arith.constant dense<0.000000e+00> : vector<4x1408xf32>
    %257 = tpu.matmul %256, %254, %cst_146 {dimension_numbers = #tpu.dot_dimension_numbers<[1], [0], [0], [1], [0, 0, 1, 1], [], []>} : vector<4x4xf32>, vector<4x1408xf32>, vector<4x1408xf32> -> vector<4x1408xf32>
    %258 = arith.addf %253, %257 : vector<4x1408xf32>
    %c0_147 = arith.constant 0 : index
    %c161 = arith.constant 161 : index
    %259 = vector.load %arg9[%c0_147, %c161] : memref<4x1664xf32, #tpu.memory_space<vmem>>, vector<4x1408xf32>
    %cst_148 = arith.constant 0.000000e+00 : f32
    %260 = vector.shape_cast %47 : vector<1x1408xi1> to vector<1x1408xi1>
    %261 = vector.broadcast %260 : vector<1x1408xi1> to vector<4x1408xi1>
    %262 = vector.broadcast %cst_148 : f32 to vector<4x1408xf32>
    %263 = arith.select %261, %259, %262 : vector<4x1408xi1>, vector<4x1408xf32>
    %c23 = arith.constant 23 : index
    %c0_149 = arith.constant 0 : index
    %c0_150 = arith.constant 0 : index
    %264 = vector.load %arg2[%c23, %c0_149, %c0_150] : memref<25x4x4xf32, #tpu.memory_space<vmem>>, vector<1x4x4xf32>
    %265 = vector.shape_cast %264 : vector<1x4x4xf32> to vector<4x4xf32>
    %cst_151 = arith.constant dense<0.000000e+00> : vector<4x1408xf32>
    %266 = tpu.matmul %265, %263, %cst_151 {dimension_numbers = #tpu.dot_dimension_numbers<[1], [0], [0], [1], [0, 0, 1, 1], [], []>} : vector<4x4xf32>, vector<4x1408xf32>, vector<4x1408xf32> -> vector<4x1408xf32>
    %267 = arith.addf %258, %266 : vector<4x1408xf32>
    %c0_152 = arith.constant 0 : index
    %c162 = arith.constant 162 : index
    %268 = vector.load %arg9[%c0_152, %c162] : memref<4x1664xf32, #tpu.memory_space<vmem>>, vector<4x1408xf32>
    %cst_153 = arith.constant 0.000000e+00 : f32
    %269 = vector.shape_cast %52 : vector<1x1408xi1> to vector<1x1408xi1>
    %270 = vector.broadcast %269 : vector<1x1408xi1> to vector<4x1408xi1>
    %271 = vector.broadcast %cst_153 : f32 to vector<4x1408xf32>
    %272 = arith.select %270, %268, %271 : vector<4x1408xi1>, vector<4x1408xf32>
    %c24 = arith.constant 24 : index
    %c0_154 = arith.constant 0 : index
    %c0_155 = arith.constant 0 : index
    %273 = vector.load %arg2[%c24, %c0_154, %c0_155] : memref<25x4x4xf32, #tpu.memory_space<vmem>>, vector<1x4x4xf32>
    %274 = vector.shape_cast %273 : vector<1x4x4xf32> to vector<4x4xf32>
    %cst_156 = arith.constant dense<0.000000e+00> : vector<4x1408xf32>
    %275 = tpu.matmul %274, %272, %cst_156 {dimension_numbers = #tpu.dot_dimension_numbers<[1], [0], [0], [1], [0, 0, 1, 1], [], []>} : vector<4x4xf32>, vector<4x1408xf32>, vector<4x1408xf32> -> vector<4x1408xf32>
    %276 = arith.addf %267, %275 : vector<4x1408xf32>
    %c0_157 = arith.constant 0 : index
    %c0_158 = arith.constant 0 : index
    %277 = vector.load %arg3[%c0_157, %c0_158] : memref<4x1xf32, #tpu.memory_space<vmem>>, vector<4x1xf32>
    %278 = vector.broadcast %277 : vector<4x1xf32> to vector<4x1408xf32>
    %279 = arith.addf %276, %278 : vector<4x1408xf32>
    %cst_159 = arith.constant 0.000000e+00 : f32
    %280 = vector.broadcast %cst_159 : f32 to vector<4x1408xf32>
    %281 = arith.maximumf %279, %280 : vector<4x1408xf32>
    %282 = vector.extract_strided_slice %281 {offsets = [0, 0], sizes = [4, 256], strides = [1, 1]} : vector<4x1408xf32> to vector<4x256xf32>
    %c0_160 = arith.constant 0 : index
    %c128_161 = arith.constant 128 : index
    %283 = vector.load %arg9[%c0_160, %c128_161] : memref<4x1664xf32, #tpu.memory_space<vmem>>, vector<4x256xf32>
    tpu.vector_store %arg9[%c0_160, %c128_161], %282 {strides = array<i32>} : memref<4x1664xf32, #tpu.memory_space<vmem>>, vector<4x256xf32>,
    %284 = vector.extract_strided_slice %281 {offsets = [0, 384], sizes = [4, 256], strides = [1, 1]} : vector<4x1408xf32> to vector<4x256xf32>
    %c0_162 = arith.constant 0 : index
    %c512_163 = arith.constant 512 : index
    %285 = vector.load %arg9[%c0_162, %c512_163] : memref<4x1664xf32, #tpu.memory_space<vmem>>, vector<4x256xf32>
    tpu.vector_store %arg9[%c0_162, %c512_163], %284 {strides = array<i32>} : memref<4x1664xf32, #tpu.memory_space<vmem>>, vector<4x256xf32>,
    %286 = vector.extract_strided_slice %281 {offsets = [0, 768], sizes = [4, 256], strides = [1, 1]} : vector<4x1408xf32> to vector<4x256xf32>
    %c0_164 = arith.constant 0 : index
    %c896_165 = arith.constant 896 : index
    %287 = vector.load %arg9[%c0_164, %c896_165] : memref<4x1664xf32, #tpu.memory_space<vmem>>, vector<4x256xf32>
    tpu.vector_store %arg9[%c0_164, %c896_165], %286 {strides = array<i32>} : memref<4x1664xf32, #tpu.memory_space<vmem>>, vector<4x256xf32>,
    %288 = vector.extract_strided_slice %281 {offsets = [0, 1152], sizes = [4, 256], strides = [1, 1]} : vector<4x1408xf32> to vector<4x256xf32>
    %c0_166 = arith.constant 0 : index
    %c1280_167 = arith.constant 1280 : index
    %289 = vector.load %arg9[%c0_166, %c1280_167] : memref<4x1664xf32, #tpu.memory_space<vmem>>, vector<4x256xf32>
    tpu.vector_store %arg9[%c0_166, %c1280_167], %288 {strides = array<i32>} : memref<4x1664xf32, #tpu.memory_space<vmem>>, vector<4x256xf32>,
    %cst_168 = arith.constant 0.000000e+00 : f32
    %290 = vector.broadcast %cst_168 : f32 to vector<4x1408xf32>
    %c0_169 = arith.constant 0 : index
    %c111_170 = arith.constant 111 : index
    %291 = vector.load %arg9[%c0_169, %c111_170] : memref<4x1664xf32, #tpu.memory_space<vmem>>, vector<4x1408xf32>
    %cst_171 = arith.constant 0.000000e+00 : f32
    %292 = vector.shape_cast %42 : vector<1x1408xi1> to vector<1x1408xi1>
    %293 = vector.broadcast %292 : vector<1x1408xi1> to vector<4x1408xi1>
    %294 = vector.broadcast %cst_171 : f32 to vector<4x1408xf32>
    %295 = arith.select %293, %291, %294 : vector<4x1408xi1>, vector<4x1408xf32>
    %c0_172 = arith.constant 0 : index
    %c0_173 = arith.constant 0 : index
    %c0_174 = arith.constant 0 : index
    %296 = vector.load %arg4[%c0_172, %c0_173, %c0_174] : memref<9x4x4xf32, #tpu.memory_space<vmem>>, vector<1x4x4xf32>
    %297 = vector.shape_cast %296 : vector<1x4x4xf32> to vector<4x4xf32>
    %cst_175 = arith.constant dense<0.000000e+00> : vector<4x1408xf32>
    %298 = tpu.matmul %297, %295, %cst_175 {dimension_numbers = #tpu.dot_dimension_numbers<[1], [0], [0], [1], [0, 0, 1, 1], [], []>} : vector<4x4xf32>, vector<4x1408xf32>, vector<4x1408xf32> -> vector<4x1408xf32>
    %299 = arith.addf %290, %298 : vector<4x1408xf32>
    %c0_176 = arith.constant 0 : index
    %c112_177 = arith.constant 112 : index
    %300 = vector.load %arg9[%c0_176, %c112_177] : memref<4x1664xf32, #tpu.memory_space<vmem>>, vector<4x1408xf32>
    %c1_178 = arith.constant 1 : index
    %c0_179 = arith.constant 0 : index
    %c0_180 = arith.constant 0 : index
    %301 = vector.load %arg4[%c1_178, %c0_179, %c0_180] : memref<9x4x4xf32, #tpu.memory_space<vmem>>, vector<1x4x4xf32>
    %302 = vector.shape_cast %301 : vector<1x4x4xf32> to vector<4x4xf32>
    %cst_181 = arith.constant dense<0.000000e+00> : vector<4x1408xf32>
    %303 = tpu.matmul %302, %300, %cst_181 {dimension_numbers = #tpu.dot_dimension_numbers<[1], [0], [0], [1], [0, 0, 1, 1], [], []>} : vector<4x4xf32>, vector<4x1408xf32>, vector<4x1408xf32> -> vector<4x1408xf32>
    %304 = arith.addf %299, %303 : vector<4x1408xf32>
    %c0_182 = arith.constant 0 : index
    %c113_183 = arith.constant 113 : index
    %305 = vector.load %arg9[%c0_182, %c113_183] : memref<4x1664xf32, #tpu.memory_space<vmem>>, vector<4x1408xf32>
    %cst_184 = arith.constant 0.000000e+00 : f32
    %306 = vector.shape_cast %47 : vector<1x1408xi1> to vector<1x1408xi1>
    %307 = vector.broadcast %306 : vector<1x1408xi1> to vector<4x1408xi1>
    %308 = vector.broadcast %cst_184 : f32 to vector<4x1408xf32>
    %309 = arith.select %307, %305, %308 : vector<4x1408xi1>, vector<4x1408xf32>
    %c2_185 = arith.constant 2 : index
    %c0_186 = arith.constant 0 : index
    %c0_187 = arith.constant 0 : index
    %310 = vector.load %arg4[%c2_185, %c0_186, %c0_187] : memref<9x4x4xf32, #tpu.memory_space<vmem>>, vector<1x4x4xf32>
    %311 = vector.shape_cast %310 : vector<1x4x4xf32> to vector<4x4xf32>
    %cst_188 = arith.constant dense<0.000000e+00> : vector<4x1408xf32>
    %312 = tpu.matmul %311, %309, %cst_188 {dimension_numbers = #tpu.dot_dimension_numbers<[1], [0], [0], [1], [0, 0, 1, 1], [], []>} : vector<4x4xf32>, vector<4x1408xf32>, vector<4x1408xf32> -> vector<4x1408xf32>
    %313 = arith.addf %304, %312 : vector<4x1408xf32>
    %c0_189 = arith.constant 0 : index
    %c127_190 = arith.constant 127 : index
    %314 = vector.load %arg9[%c0_189, %c127_190] : memref<4x1664xf32, #tpu.memory_space<vmem>>, vector<4x1408xf32>
    %cst_191 = arith.constant 0.000000e+00 : f32
    %315 = vector.shape_cast %42 : vector<1x1408xi1> to vector<1x1408xi1>
    %316 = vector.broadcast %315 : vector<1x1408xi1> to vector<4x1408xi1>
    %317 = vector.broadcast %cst_191 : f32 to vector<4x1408xf32>
    %318 = arith.select %316, %314, %317 : vector<4x1408xi1>, vector<4x1408xf32>
    %c3_192 = arith.constant 3 : index
    %c0_193 = arith.constant 0 : index
    %c0_194 = arith.constant 0 : index
    %319 = vector.load %arg4[%c3_192, %c0_193, %c0_194] : memref<9x4x4xf32, #tpu.memory_space<vmem>>, vector<1x4x4xf32>
    %320 = vector.shape_cast %319 : vector<1x4x4xf32> to vector<4x4xf32>
    %cst_195 = arith.constant dense<0.000000e+00> : vector<4x1408xf32>
    %321 = tpu.matmul %320, %318, %cst_195 {dimension_numbers = #tpu.dot_dimension_numbers<[1], [0], [0], [1], [0, 0, 1, 1], [], []>} : vector<4x4xf32>, vector<4x1408xf32>, vector<4x1408xf32> -> vector<4x1408xf32>
    %322 = arith.addf %313, %321 : vector<4x1408xf32>
    %c0_196 = arith.constant 0 : index
    %c128_197 = arith.constant 128 : index
    %323 = vector.load %arg9[%c0_196, %c128_197] : memref<4x1664xf32, #tpu.memory_space<vmem>>, vector<4x1408xf32>
    %c4_198 = arith.constant 4 : index
    %c0_199 = arith.constant 0 : index
    %c0_200 = arith.constant 0 : index
    %324 = vector.load %arg4[%c4_198, %c0_199, %c0_200] : memref<9x4x4xf32, #tpu.memory_space<vmem>>, vector<1x4x4xf32>
    %325 = vector.shape_cast %324 : vector<1x4x4xf32> to vector<4x4xf32>
    %cst_201 = arith.constant dense<0.000000e+00> : vector<4x1408xf32>
    %326 = tpu.matmul %325, %323, %cst_201 {dimension_numbers = #tpu.dot_dimension_numbers<[1], [0], [0], [1], [0, 0, 1, 1], [], []>} : vector<4x4xf32>, vector<4x1408xf32>, vector<4x1408xf32> -> vector<4x1408xf32>
    %327 = arith.addf %322, %326 : vector<4x1408xf32>
    %c0_202 = arith.constant 0 : index
    %c129_203 = arith.constant 129 : index
    %328 = vector.load %arg9[%c0_202, %c129_203] : memref<4x1664xf32, #tpu.memory_space<vmem>>, vector<4x1408xf32>
    %cst_204 = arith.constant 0.000000e+00 : f32
    %329 = vector.shape_cast %47 : vector<1x1408xi1> to vector<1x1408xi1>
    %330 = vector.broadcast %329 : vector<1x1408xi1> to vector<4x1408xi1>
    %331 = vector.broadcast %cst_204 : f32 to vector<4x1408xf32>
    %332 = arith.select %330, %328, %331 : vector<4x1408xi1>, vector<4x1408xf32>
    %c5_205 = arith.constant 5 : index
    %c0_206 = arith.constant 0 : index
    %c0_207 = arith.constant 0 : index
    %333 = vector.load %arg4[%c5_205, %c0_206, %c0_207] : memref<9x4x4xf32, #tpu.memory_space<vmem>>, vector<1x4x4xf32>
    %334 = vector.shape_cast %333 : vector<1x4x4xf32> to vector<4x4xf32>
    %cst_208 = arith.constant dense<0.000000e+00> : vector<4x1408xf32>
    %335 = tpu.matmul %334, %332, %cst_208 {dimension_numbers = #tpu.dot_dimension_numbers<[1], [0], [0], [1], [0, 0, 1, 1], [], []>} : vector<4x4xf32>, vector<4x1408xf32>, vector<4x1408xf32> -> vector<4x1408xf32>
    %336 = arith.addf %327, %335 : vector<4x1408xf32>
    %c0_209 = arith.constant 0 : index
    %c143_210 = arith.constant 143 : index
    %337 = vector.load %arg9[%c0_209, %c143_210] : memref<4x1664xf32, #tpu.memory_space<vmem>>, vector<4x1408xf32>
    %cst_211 = arith.constant 0.000000e+00 : f32
    %338 = vector.shape_cast %42 : vector<1x1408xi1> to vector<1x1408xi1>
    %339 = vector.broadcast %338 : vector<1x1408xi1> to vector<4x1408xi1>
    %340 = vector.broadcast %cst_211 : f32 to vector<4x1408xf32>
    %341 = arith.select %339, %337, %340 : vector<4x1408xi1>, vector<4x1408xf32>
    %c6_212 = arith.constant 6 : index
    %c0_213 = arith.constant 0 : index
    %c0_214 = arith.constant 0 : index
    %342 = vector.load %arg4[%c6_212, %c0_213, %c0_214] : memref<9x4x4xf32, #tpu.memory_space<vmem>>, vector<1x4x4xf32>
    %343 = vector.shape_cast %342 : vector<1x4x4xf32> to vector<4x4xf32>
    %cst_215 = arith.constant dense<0.000000e+00> : vector<4x1408xf32>
    %344 = tpu.matmul %343, %341, %cst_215 {dimension_numbers = #tpu.dot_dimension_numbers<[1], [0], [0], [1], [0, 0, 1, 1], [], []>} : vector<4x4xf32>, vector<4x1408xf32>, vector<4x1408xf32> -> vector<4x1408xf32>
    %345 = arith.addf %336, %344 : vector<4x1408xf32>
    %c0_216 = arith.constant 0 : index
    %c144_217 = arith.constant 144 : index
    %346 = vector.load %arg9[%c0_216, %c144_217] : memref<4x1664xf32, #tpu.memory_space<vmem>>, vector<4x1408xf32>
    %c7_218 = arith.constant 7 : index
    %c0_219 = arith.constant 0 : index
    %c0_220 = arith.constant 0 : index
    %347 = vector.load %arg4[%c7_218, %c0_219, %c0_220] : memref<9x4x4xf32, #tpu.memory_space<vmem>>, vector<1x4x4xf32>
    %348 = vector.shape_cast %347 : vector<1x4x4xf32> to vector<4x4xf32>
    %cst_221 = arith.constant dense<0.000000e+00> : vector<4x1408xf32>
    %349 = tpu.matmul %348, %346, %cst_221 {dimension_numbers = #tpu.dot_dimension_numbers<[1], [0], [0], [1], [0, 0, 1, 1], [], []>} : vector<4x4xf32>, vector<4x1408xf32>, vector<4x1408xf32> -> vector<4x1408xf32>
    %350 = arith.addf %345, %349 : vector<4x1408xf32>
    %c0_222 = arith.constant 0 : index
    %c145_223 = arith.constant 145 : index
    %351 = vector.load %arg9[%c0_222, %c145_223] : memref<4x1664xf32, #tpu.memory_space<vmem>>, vector<4x1408xf32>
    %cst_224 = arith.constant 0.000000e+00 : f32
    %352 = vector.shape_cast %47 : vector<1x1408xi1> to vector<1x1408xi1>
    %353 = vector.broadcast %352 : vector<1x1408xi1> to vector<4x1408xi1>
    %354 = vector.broadcast %cst_224 : f32 to vector<4x1408xf32>
    %355 = arith.select %353, %351, %354 : vector<4x1408xi1>, vector<4x1408xf32>
    %c8_225 = arith.constant 8 : index
    %c0_226 = arith.constant 0 : index
    %c0_227 = arith.constant 0 : index
    %356 = vector.load %arg4[%c8_225, %c0_226, %c0_227] : memref<9x4x4xf32, #tpu.memory_space<vmem>>, vector<1x4x4xf32>
    %357 = vector.shape_cast %356 : vector<1x4x4xf32> to vector<4x4xf32>
    %cst_228 = arith.constant dense<0.000000e+00> : vector<4x1408xf32>
    %358 = tpu.matmul %357, %355, %cst_228 {dimension_numbers = #tpu.dot_dimension_numbers<[1], [0], [0], [1], [0, 0, 1, 1], [], []>} : vector<4x4xf32>, vector<4x1408xf32>, vector<4x1408xf32> -> vector<4x1408xf32>
    %359 = arith.addf %350, %358 : vector<4x1408xf32>
    %c0_229 = arith.constant 0 : index
    %c0_230 = arith.constant 0 : index
    %360 = vector.load %arg5[%c0_229, %c0_230] : memref<4x1xf32, #tpu.memory_space<vmem>>, vector<4x1xf32>
    %361 = vector.broadcast %360 : vector<4x1xf32> to vector<4x1408xf32>
    %362 = arith.addf %359, %361 : vector<4x1408xf32>
    %cst_231 = arith.constant 0.000000e+00 : f32
    %363 = vector.broadcast %cst_231 : f32 to vector<4x1408xf32>
    %364 = arith.maximumf %362, %363 : vector<4x1408xf32>
    %365 = vector.extract_strided_slice %364 {offsets = [0, 0], sizes = [4, 256], strides = [1, 1]} : vector<4x1408xf32> to vector<4x256xf32>
    %366 = vector.extract_strided_slice %365 {offsets = [0, 0], sizes = [1, 256], strides = [1, 1]} : vector<4x256xf32> to vector<1x256xf32>
    %367 = vector.extract_strided_slice %365 {offsets = [1, 0], sizes = [1, 256], strides = [1, 1]} : vector<4x256xf32> to vector<1x256xf32>
    %368 = vector.extract_strided_slice %365 {offsets = [2, 0], sizes = [1, 256], strides = [1, 1]} : vector<4x256xf32> to vector<1x256xf32>
    %369 = vector.extract_strided_slice %365 {offsets = [3, 0], sizes = [1, 256], strides = [1, 1]} : vector<4x256xf32> to vector<1x256xf32>
    %c0_232 = arith.constant 0 : index
    %c0_233 = arith.constant 0 : index
    %c0_234 = arith.constant 0 : index
    %370 = vector.load %arg1[%c0_232, %c0_233, %c0_234] : memref<4x4x256xf32, #tpu.memory_space<vmem>>, vector<1x4x256xf32>
    %371 = vector.shape_cast %370 : vector<1x4x256xf32> to vector<4x256xf32>
    %cst_235 = arith.constant 0.000000e+00 : f32
    %372 = vector.broadcast %cst_235 : f32 to vector<4x256xf32>
    %373 = arith.maximumf %371, %372 : vector<4x256xf32>
    %cst_236 = arith.constant 1.000000e+00 : f32
    %374 = vector.broadcast %cst_236 : f32 to vector<4x256xf32>
    %375 = arith.subf %371, %374 : vector<4x256xf32>
    %cst_237 = arith.constant 0.000000e+00 : f32
    %376 = vector.broadcast %cst_237 : f32 to vector<4x256xf32>
    %377 = arith.maximumf %375, %376 : vector<4x256xf32>
    %378 = arith.subf %373, %377 : vector<4x256xf32>
    %c0_238 = arith.constant 0 : index
    %c0_239 = arith.constant 0 : index
    %379 = memref.load %arg6[%c0_238, %c0_239] : memref<4x3xf32, #tpu.memory_space<smem>>
    %380 = vector.broadcast %379 : f32 to vector<1x256xf32>
    %381 = arith.mulf %366, %380 : vector<1x256xf32>
    %c1_240 = arith.constant 1 : index
    %c0_241 = arith.constant 0 : index
    %382 = memref.load %arg6[%c1_240, %c0_241] : memref<4x3xf32, #tpu.memory_space<smem>>
    %383 = vector.broadcast %382 : f32 to vector<1x256xf32>
    %384 = arith.mulf %367, %383 : vector<1x256xf32>
    %385 = arith.addf %381, %384 : vector<1x256xf32>
    %c2_242 = arith.constant 2 : index
    %c0_243 = arith.constant 0 : index
    %386 = memref.load %arg6[%c2_242, %c0_243] : memref<4x3xf32, #tpu.memory_space<smem>>
    %387 = vector.broadcast %386 : f32 to vector<1x256xf32>
    %388 = arith.mulf %368, %387 : vector<1x256xf32>
    %389 = arith.addf %385, %388 : vector<1x256xf32>
    %c3_244 = arith.constant 3 : index
    %c0_245 = arith.constant 0 : index
    %390 = memref.load %arg6[%c3_244, %c0_245] : memref<4x3xf32, #tpu.memory_space<smem>>
    %391 = vector.broadcast %390 : f32 to vector<1x256xf32>
    %392 = arith.mulf %369, %391 : vector<1x256xf32>
    %393 = arith.addf %389, %392 : vector<1x256xf32>
    %c0_246 = arith.constant 0 : index
    %394 = memref.load %arg7[%c0_246] : memref<3xf32, #tpu.memory_space<smem>>
    %395 = vector.broadcast %394 : f32 to vector<1x256xf32>
    %396 = arith.addf %393, %395 : vector<1x256xf32>
    %397 = arith.negf %396 : vector<1x256xf32>
    %398 = math.exp %397 : vector<1x256xf32>
    %cst_247 = arith.constant 1.000000e+00 : f32
    %399 = vector.broadcast %cst_247 : f32 to vector<1x256xf32>
    %400 = arith.addf %399, %398 : vector<1x256xf32>
    %401 = arith.divf %399, %400 : vector<1x256xf32>
    %cst_248 = arith.constant 1.000000e+00 : f32
    %402 = vector.broadcast %cst_248 : f32 to vector<4x256xf32>
    %403 = arith.subf %402, %378 : vector<4x256xf32>
    %404 = vector.broadcast %401 : vector<1x256xf32> to vector<4x256xf32>
    %405 = arith.mulf %404, %403 : vector<4x256xf32>
    %cst_249 = arith.constant 1.000000e+00 : f32
    %406 = vector.broadcast %cst_249 : f32 to vector<4x256xf32>
    %407 = arith.addf %406, %405 : vector<4x256xf32>
    %408 = arith.mulf %378, %407 : vector<4x256xf32>
    %c0_250 = arith.constant 0 : index
    %c1_251 = arith.constant 1 : index
    %409 = memref.load %arg6[%c0_250, %c1_251] : memref<4x3xf32, #tpu.memory_space<smem>>
    %410 = vector.broadcast %409 : f32 to vector<1x256xf32>
    %411 = arith.mulf %366, %410 : vector<1x256xf32>
    %c1_252 = arith.constant 1 : index
    %c1_253 = arith.constant 1 : index
    %412 = memref.load %arg6[%c1_252, %c1_253] : memref<4x3xf32, #tpu.memory_space<smem>>
    %413 = vector.broadcast %412 : f32 to vector<1x256xf32>
    %414 = arith.mulf %367, %413 : vector<1x256xf32>
    %415 = arith.addf %411, %414 : vector<1x256xf32>
    %c2_254 = arith.constant 2 : index
    %c1_255 = arith.constant 1 : index
    %416 = memref.load %arg6[%c2_254, %c1_255] : memref<4x3xf32, #tpu.memory_space<smem>>
    %417 = vector.broadcast %416 : f32 to vector<1x256xf32>
    %418 = arith.mulf %368, %417 : vector<1x256xf32>
    %419 = arith.addf %415, %418 : vector<1x256xf32>
    %c3_256 = arith.constant 3 : index
    %c1_257 = arith.constant 1 : index
    %420 = memref.load %arg6[%c3_256, %c1_257] : memref<4x3xf32, #tpu.memory_space<smem>>
    %421 = vector.broadcast %420 : f32 to vector<1x256xf32>
    %422 = arith.mulf %369, %421 : vector<1x256xf32>
    %423 = arith.addf %419, %422 : vector<1x256xf32>
    %c1_258 = arith.constant 1 : index
    %424 = memref.load %arg7[%c1_258] : memref<3xf32, #tpu.memory_space<smem>>
    %425 = vector.broadcast %424 : f32 to vector<1x256xf32>
    %426 = arith.addf %423, %425 : vector<1x256xf32>
    %427 = arith.negf %426 : vector<1x256xf32>
    %428 = math.exp %427 : vector<1x256xf32>
    %cst_259 = arith.constant 1.000000e+00 : f32
    %429 = vector.broadcast %cst_259 : f32 to vector<1x256xf32>
    %430 = arith.addf %429, %428 : vector<1x256xf32>
    %431 = arith.divf %429, %430 : vector<1x256xf32>
    %cst_260 = arith.constant 1.000000e+00 : f32
    %432 = vector.broadcast %cst_260 : f32 to vector<4x256xf32>
    %433 = arith.subf %432, %408 : vector<4x256xf32>
    %434 = vector.broadcast %431 : vector<1x256xf32> to vector<4x256xf32>
    %435 = arith.mulf %434, %433 : vector<4x256xf32>
    %cst_261 = arith.constant 1.000000e+00 : f32
    %436 = vector.broadcast %cst_261 : f32 to vector<4x256xf32>
    %437 = arith.addf %436, %435 : vector<4x256xf32>
    %438 = arith.mulf %408, %437 : vector<4x256xf32>
    %c0_262 = arith.constant 0 : index
    %c2_263 = arith.constant 2 : index
    %439 = memref.load %arg6[%c0_262, %c2_263] : memref<4x3xf32, #tpu.memory_space<smem>>
    %440 = vector.broadcast %439 : f32 to vector<1x256xf32>
    %441 = arith.mulf %366, %440 : vector<1x256xf32>
    %c1_264 = arith.constant 1 : index
    %c2_265 = arith.constant 2 : index
    %442 = memref.load %arg6[%c1_264, %c2_265] : memref<4x3xf32, #tpu.memory_space<smem>>
    %443 = vector.broadcast %442 : f32 to vector<1x256xf32>
    %444 = arith.mulf %367, %443 : vector<1x256xf32>
    %445 = arith.addf %441, %444 : vector<1x256xf32>
    %c2_266 = arith.constant 2 : index
    %c2_267 = arith.constant 2 : index
    %446 = memref.load %arg6[%c2_266, %c2_267] : memref<4x3xf32, #tpu.memory_space<smem>>
    %447 = vector.broadcast %446 : f32 to vector<1x256xf32>
    %448 = arith.mulf %368, %447 : vector<1x256xf32>
    %449 = arith.addf %445, %448 : vector<1x256xf32>
    %c3_268 = arith.constant 3 : index
    %c2_269 = arith.constant 2 : index
    %450 = memref.load %arg6[%c3_268, %c2_269] : memref<4x3xf32, #tpu.memory_space<smem>>
    %451 = vector.broadcast %450 : f32 to vector<1x256xf32>
    %452 = arith.mulf %369, %451 : vector<1x256xf32>
    %453 = arith.addf %449, %452 : vector<1x256xf32>
    %c2_270 = arith.constant 2 : index
    %454 = memref.load %arg7[%c2_270] : memref<3xf32, #tpu.memory_space<smem>>
    %455 = vector.broadcast %454 : f32 to vector<1x256xf32>
    %456 = arith.addf %453, %455 : vector<1x256xf32>
    %457 = arith.negf %456 : vector<1x256xf32>
    %458 = math.exp %457 : vector<1x256xf32>
    %cst_271 = arith.constant 1.000000e+00 : f32
    %459 = vector.broadcast %cst_271 : f32 to vector<1x256xf32>
    %460 = arith.addf %459, %458 : vector<1x256xf32>
    %461 = arith.divf %459, %460 : vector<1x256xf32>
    %cst_272 = arith.constant 1.000000e+00 : f32
    %462 = vector.broadcast %cst_272 : f32 to vector<4x256xf32>
    %463 = arith.subf %462, %438 : vector<4x256xf32>
    %464 = vector.broadcast %461 : vector<1x256xf32> to vector<4x256xf32>
    %465 = arith.mulf %464, %463 : vector<4x256xf32>
    %cst_273 = arith.constant 1.000000e+00 : f32
    %466 = vector.broadcast %cst_273 : f32 to vector<4x256xf32>
    %467 = arith.addf %466, %465 : vector<4x256xf32>
    %468 = arith.mulf %438, %467 : vector<4x256xf32>
    %c0_274 = arith.constant 0 : index
    %c0_275 = arith.constant 0 : index
    %c0_276 = arith.constant 0 : index
    %469 = vector.load %arg8[%c0_274, %c0_275, %c0_276] : memref<4x4x256xf32, #tpu.memory_space<vmem>>, vector<1x4x256xf32>
    %470 = vector.shape_cast %469 : vector<1x4x256xf32> to vector<4x256xf32>
    %471 = vector.shape_cast %468 : vector<4x256xf32> to vector<1x4x256xf32>
    tpu.vector_store %arg8[%c0_274, %c0_275, %c0_276], %471 {strides = array<i32>} : memref<4x4x256xf32, #tpu.memory_space<vmem>>, vector<1x4x256xf32>,
    %472 = vector.extract_strided_slice %364 {offsets = [0, 384], sizes = [4, 256], strides = [1, 1]} : vector<4x1408xf32> to vector<4x256xf32>
    %473 = vector.extract_strided_slice %472 {offsets = [0, 0], sizes = [1, 256], strides = [1, 1]} : vector<4x256xf32> to vector<1x256xf32>
    %474 = vector.extract_strided_slice %472 {offsets = [1, 0], sizes = [1, 256], strides = [1, 1]} : vector<4x256xf32> to vector<1x256xf32>
    %475 = vector.extract_strided_slice %472 {offsets = [2, 0], sizes = [1, 256], strides = [1, 1]} : vector<4x256xf32> to vector<1x256xf32>
    %476 = vector.extract_strided_slice %472 {offsets = [3, 0], sizes = [1, 256], strides = [1, 1]} : vector<4x256xf32> to vector<1x256xf32>
    %c1_277 = arith.constant 1 : index
    %c0_278 = arith.constant 0 : index
    %c0_279 = arith.constant 0 : index
    %477 = vector.load %arg1[%c1_277, %c0_278, %c0_279] : memref<4x4x256xf32, #tpu.memory_space<vmem>>, vector<1x4x256xf32>
    %478 = vector.shape_cast %477 : vector<1x4x256xf32> to vector<4x256xf32>
    %cst_280 = arith.constant 0.000000e+00 : f32
    %479 = vector.broadcast %cst_280 : f32 to vector<4x256xf32>
    %480 = arith.maximumf %478, %479 : vector<4x256xf32>
    %cst_281 = arith.constant 1.000000e+00 : f32
    %481 = vector.broadcast %cst_281 : f32 to vector<4x256xf32>
    %482 = arith.subf %478, %481 : vector<4x256xf32>
    %cst_282 = arith.constant 0.000000e+00 : f32
    %483 = vector.broadcast %cst_282 : f32 to vector<4x256xf32>
    %484 = arith.maximumf %482, %483 : vector<4x256xf32>
    %485 = arith.subf %480, %484 : vector<4x256xf32>
    %c0_283 = arith.constant 0 : index
    %c0_284 = arith.constant 0 : index
    %486 = memref.load %arg6[%c0_283, %c0_284] : memref<4x3xf32, #tpu.memory_space<smem>>
    %487 = vector.broadcast %486 : f32 to vector<1x256xf32>
    %488 = arith.mulf %473, %487 : vector<1x256xf32>
    %c1_285 = arith.constant 1 : index
    %c0_286 = arith.constant 0 : index
    %489 = memref.load %arg6[%c1_285, %c0_286] : memref<4x3xf32, #tpu.memory_space<smem>>
    %490 = vector.broadcast %489 : f32 to vector<1x256xf32>
    %491 = arith.mulf %474, %490 : vector<1x256xf32>
    %492 = arith.addf %488, %491 : vector<1x256xf32>
    %c2_287 = arith.constant 2 : index
    %c0_288 = arith.constant 0 : index
    %493 = memref.load %arg6[%c2_287, %c0_288] : memref<4x3xf32, #tpu.memory_space<smem>>
    %494 = vector.broadcast %493 : f32 to vector<1x256xf32>
    %495 = arith.mulf %475, %494 : vector<1x256xf32>
    %496 = arith.addf %492, %495 : vector<1x256xf32>
    %c3_289 = arith.constant 3 : index
    %c0_290 = arith.constant 0 : index
    %497 = memref.load %arg6[%c3_289, %c0_290] : memref<4x3xf32, #tpu.memory_space<smem>>
    %498 = vector.broadcast %497 : f32 to vector<1x256xf32>
    %499 = arith.mulf %476, %498 : vector<1x256xf32>
    %500 = arith.addf %496, %499 : vector<1x256xf32>
    %c0_291 = arith.constant 0 : index
    %501 = memref.load %arg7[%c0_291] : memref<3xf32, #tpu.memory_space<smem>>
    %502 = vector.broadcast %501 : f32 to vector<1x256xf32>
    %503 = arith.addf %500, %502 : vector<1x256xf32>
    %504 = arith.negf %503 : vector<1x256xf32>
    %505 = math.exp %504 : vector<1x256xf32>
    %cst_292 = arith.constant 1.000000e+00 : f32
    %506 = vector.broadcast %cst_292 : f32 to vector<1x256xf32>
    %507 = arith.addf %506, %505 : vector<1x256xf32>
    %508 = arith.divf %506, %507 : vector<1x256xf32>
    %cst_293 = arith.constant 1.000000e+00 : f32
    %509 = vector.broadcast %cst_293 : f32 to vector<4x256xf32>
    %510 = arith.subf %509, %485 : vector<4x256xf32>
    %511 = vector.broadcast %508 : vector<1x256xf32> to vector<4x256xf32>
    %512 = arith.mulf %511, %510 : vector<4x256xf32>
    %cst_294 = arith.constant 1.000000e+00 : f32
    %513 = vector.broadcast %cst_294 : f32 to vector<4x256xf32>
    %514 = arith.addf %513, %512 : vector<4x256xf32>
    %515 = arith.mulf %485, %514 : vector<4x256xf32>
    %c0_295 = arith.constant 0 : index
    %c1_296 = arith.constant 1 : index
    %516 = memref.load %arg6[%c0_295, %c1_296] : memref<4x3xf32, #tpu.memory_space<smem>>
    %517 = vector.broadcast %516 : f32 to vector<1x256xf32>
    %518 = arith.mulf %473, %517 : vector<1x256xf32>
    %c1_297 = arith.constant 1 : index
    %c1_298 = arith.constant 1 : index
    %519 = memref.load %arg6[%c1_297, %c1_298] : memref<4x3xf32, #tpu.memory_space<smem>>
    %520 = vector.broadcast %519 : f32 to vector<1x256xf32>
    %521 = arith.mulf %474, %520 : vector<1x256xf32>
    %522 = arith.addf %518, %521 : vector<1x256xf32>
    %c2_299 = arith.constant 2 : index
    %c1_300 = arith.constant 1 : index
    %523 = memref.load %arg6[%c2_299, %c1_300] : memref<4x3xf32, #tpu.memory_space<smem>>
    %524 = vector.broadcast %523 : f32 to vector<1x256xf32>
    %525 = arith.mulf %475, %524 : vector<1x256xf32>
    %526 = arith.addf %522, %525 : vector<1x256xf32>
    %c3_301 = arith.constant 3 : index
    %c1_302 = arith.constant 1 : index
    %527 = memref.load %arg6[%c3_301, %c1_302] : memref<4x3xf32, #tpu.memory_space<smem>>
    %528 = vector.broadcast %527 : f32 to vector<1x256xf32>
    %529 = arith.mulf %476, %528 : vector<1x256xf32>
    %530 = arith.addf %526, %529 : vector<1x256xf32>
    %c1_303 = arith.constant 1 : index
    %531 = memref.load %arg7[%c1_303] : memref<3xf32, #tpu.memory_space<smem>>
    %532 = vector.broadcast %531 : f32 to vector<1x256xf32>
    %533 = arith.addf %530, %532 : vector<1x256xf32>
    %534 = arith.negf %533 : vector<1x256xf32>
    %535 = math.exp %534 : vector<1x256xf32>
    %cst_304 = arith.constant 1.000000e+00 : f32
    %536 = vector.broadcast %cst_304 : f32 to vector<1x256xf32>
    %537 = arith.addf %536, %535 : vector<1x256xf32>
    %538 = arith.divf %536, %537 : vector<1x256xf32>
    %cst_305 = arith.constant 1.000000e+00 : f32
    %539 = vector.broadcast %cst_305 : f32 to vector<4x256xf32>
    %540 = arith.subf %539, %515 : vector<4x256xf32>
    %541 = vector.broadcast %538 : vector<1x256xf32> to vector<4x256xf32>
    %542 = arith.mulf %541, %540 : vector<4x256xf32>
    %cst_306 = arith.constant 1.000000e+00 : f32
    %543 = vector.broadcast %cst_306 : f32 to vector<4x256xf32>
    %544 = arith.addf %543, %542 : vector<4x256xf32>
    %545 = arith.mulf %515, %544 : vector<4x256xf32>
    %c0_307 = arith.constant 0 : index
    %c2_308 = arith.constant 2 : index
    %546 = memref.load %arg6[%c0_307, %c2_308] : memref<4x3xf32, #tpu.memory_space<smem>>
    %547 = vector.broadcast %546 : f32 to vector<1x256xf32>
    %548 = arith.mulf %473, %547 : vector<1x256xf32>
    %c1_309 = arith.constant 1 : index
    %c2_310 = arith.constant 2 : index
    %549 = memref.load %arg6[%c1_309, %c2_310] : memref<4x3xf32, #tpu.memory_space<smem>>
    %550 = vector.broadcast %549 : f32 to vector<1x256xf32>
    %551 = arith.mulf %474, %550 : vector<1x256xf32>
    %552 = arith.addf %548, %551 : vector<1x256xf32>
    %c2_311 = arith.constant 2 : index
    %c2_312 = arith.constant 2 : index
    %553 = memref.load %arg6[%c2_311, %c2_312] : memref<4x3xf32, #tpu.memory_space<smem>>
    %554 = vector.broadcast %553 : f32 to vector<1x256xf32>
    %555 = arith.mulf %475, %554 : vector<1x256xf32>
    %556 = arith.addf %552, %555 : vector<1x256xf32>
    %c3_313 = arith.constant 3 : index
    %c2_314 = arith.constant 2 : index
    %557 = memref.load %arg6[%c3_313, %c2_314] : memref<4x3xf32, #tpu.memory_space<smem>>
    %558 = vector.broadcast %557 : f32 to vector<1x256xf32>
    %559 = arith.mulf %476, %558 : vector<1x256xf32>
    %560 = arith.addf %556, %559 : vector<1x256xf32>
    %c2_315 = arith.constant 2 : index
    %561 = memref.load %arg7[%c2_315] : memref<3xf32, #tpu.memory_space<smem>>
    %562 = vector.broadcast %561 : f32 to vector<1x256xf32>
    %563 = arith.addf %560, %562 : vector<1x256xf32>
    %564 = arith.negf %563 : vector<1x256xf32>
    %565 = math.exp %564 : vector<1x256xf32>
    %cst_316 = arith.constant 1.000000e+00 : f32
    %566 = vector.broadcast %cst_316 : f32 to vector<1x256xf32>
    %567 = arith.addf %566, %565 : vector<1x256xf32>
    %568 = arith.divf %566, %567 : vector<1x256xf32>
    %cst_317 = arith.constant 1.000000e+00 : f32
    %569 = vector.broadcast %cst_317 : f32 to vector<4x256xf32>
    %570 = arith.subf %569, %545 : vector<4x256xf32>
    %571 = vector.broadcast %568 : vector<1x256xf32> to vector<4x256xf32>
    %572 = arith.mulf %571, %570 : vector<4x256xf32>
    %cst_318 = arith.constant 1.000000e+00 : f32
    %573 = vector.broadcast %cst_318 : f32 to vector<4x256xf32>
    %574 = arith.addf %573, %572 : vector<4x256xf32>
    %575 = arith.mulf %545, %574 : vector<4x256xf32>
    %c1_319 = arith.constant 1 : index
    %c0_320 = arith.constant 0 : index
    %c0_321 = arith.constant 0 : index
    %576 = vector.load %arg8[%c1_319, %c0_320, %c0_321] : memref<4x4x256xf32, #tpu.memory_space<vmem>>, vector<1x4x256xf32>
    %577 = vector.shape_cast %576 : vector<1x4x256xf32> to vector<4x256xf32>
    %578 = vector.shape_cast %575 : vector<4x256xf32> to vector<1x4x256xf32>
    tpu.vector_store %arg8[%c1_319, %c0_320, %c0_321], %578 {strides = array<i32>} : memref<4x4x256xf32, #tpu.memory_space<vmem>>, vector<1x4x256xf32>,
    %579 = vector.extract_strided_slice %364 {offsets = [0, 768], sizes = [4, 256], strides = [1, 1]} : vector<4x1408xf32> to vector<4x256xf32>
    %580 = vector.extract_strided_slice %579 {offsets = [0, 0], sizes = [1, 256], strides = [1, 1]} : vector<4x256xf32> to vector<1x256xf32>
    %581 = vector.extract_strided_slice %579 {offsets = [1, 0], sizes = [1, 256], strides = [1, 1]} : vector<4x256xf32> to vector<1x256xf32>
    %582 = vector.extract_strided_slice %579 {offsets = [2, 0], sizes = [1, 256], strides = [1, 1]} : vector<4x256xf32> to vector<1x256xf32>
    %583 = vector.extract_strided_slice %579 {offsets = [3, 0], sizes = [1, 256], strides = [1, 1]} : vector<4x256xf32> to vector<1x256xf32>
    %c2_322 = arith.constant 2 : index
    %c0_323 = arith.constant 0 : index
    %c0_324 = arith.constant 0 : index
    %584 = vector.load %arg1[%c2_322, %c0_323, %c0_324] : memref<4x4x256xf32, #tpu.memory_space<vmem>>, vector<1x4x256xf32>
    %585 = vector.shape_cast %584 : vector<1x4x256xf32> to vector<4x256xf32>
    %cst_325 = arith.constant 0.000000e+00 : f32
    %586 = vector.broadcast %cst_325 : f32 to vector<4x256xf32>
    %587 = arith.maximumf %585, %586 : vector<4x256xf32>
    %cst_326 = arith.constant 1.000000e+00 : f32
    %588 = vector.broadcast %cst_326 : f32 to vector<4x256xf32>
    %589 = arith.subf %585, %588 : vector<4x256xf32>
    %cst_327 = arith.constant 0.000000e+00 : f32
    %590 = vector.broadcast %cst_327 : f32 to vector<4x256xf32>
    %591 = arith.maximumf %589, %590 : vector<4x256xf32>
    %592 = arith.subf %587, %591 : vector<4x256xf32>
    %c0_328 = arith.constant 0 : index
    %c0_329 = arith.constant 0 : index
    %593 = memref.load %arg6[%c0_328, %c0_329] : memref<4x3xf32, #tpu.memory_space<smem>>
    %594 = vector.broadcast %593 : f32 to vector<1x256xf32>
    %595 = arith.mulf %580, %594 : vector<1x256xf32>
    %c1_330 = arith.constant 1 : index
    %c0_331 = arith.constant 0 : index
    %596 = memref.load %arg6[%c1_330, %c0_331] : memref<4x3xf32, #tpu.memory_space<smem>>
    %597 = vector.broadcast %596 : f32 to vector<1x256xf32>
    %598 = arith.mulf %581, %597 : vector<1x256xf32>
    %599 = arith.addf %595, %598 : vector<1x256xf32>
    %c2_332 = arith.constant 2 : index
    %c0_333 = arith.constant 0 : index
    %600 = memref.load %arg6[%c2_332, %c0_333] : memref<4x3xf32, #tpu.memory_space<smem>>
    %601 = vector.broadcast %600 : f32 to vector<1x256xf32>
    %602 = arith.mulf %582, %601 : vector<1x256xf32>
    %603 = arith.addf %599, %602 : vector<1x256xf32>
    %c3_334 = arith.constant 3 : index
    %c0_335 = arith.constant 0 : index
    %604 = memref.load %arg6[%c3_334, %c0_335] : memref<4x3xf32, #tpu.memory_space<smem>>
    %605 = vector.broadcast %604 : f32 to vector<1x256xf32>
    %606 = arith.mulf %583, %605 : vector<1x256xf32>
    %607 = arith.addf %603, %606 : vector<1x256xf32>
    %c0_336 = arith.constant 0 : index
    %608 = memref.load %arg7[%c0_336] : memref<3xf32, #tpu.memory_space<smem>>
    %609 = vector.broadcast %608 : f32 to vector<1x256xf32>
    %610 = arith.addf %607, %609 : vector<1x256xf32>
    %611 = arith.negf %610 : vector<1x256xf32>
    %612 = math.exp %611 : vector<1x256xf32>
    %cst_337 = arith.constant 1.000000e+00 : f32
    %613 = vector.broadcast %cst_337 : f32 to vector<1x256xf32>
    %614 = arith.addf %613, %612 : vector<1x256xf32>
    %615 = arith.divf %613, %614 : vector<1x256xf32>
    %cst_338 = arith.constant 1.000000e+00 : f32
    %616 = vector.broadcast %cst_338 : f32 to vector<4x256xf32>
    %617 = arith.subf %616, %592 : vector<4x256xf32>
    %618 = vector.broadcast %615 : vector<1x256xf32> to vector<4x256xf32>
    %619 = arith.mulf %618, %617 : vector<4x256xf32>
    %cst_339 = arith.constant 1.000000e+00 : f32
    %620 = vector.broadcast %cst_339 : f32 to vector<4x256xf32>
    %621 = arith.addf %620, %619 : vector<4x256xf32>
    %622 = arith.mulf %592, %621 : vector<4x256xf32>
    %c0_340 = arith.constant 0 : index
    %c1_341 = arith.constant 1 : index
    %623 = memref.load %arg6[%c0_340, %c1_341] : memref<4x3xf32, #tpu.memory_space<smem>>
    %624 = vector.broadcast %623 : f32 to vector<1x256xf32>
    %625 = arith.mulf %580, %624 : vector<1x256xf32>
    %c1_342 = arith.constant 1 : index
    %c1_343 = arith.constant 1 : index
    %626 = memref.load %arg6[%c1_342, %c1_343] : memref<4x3xf32, #tpu.memory_space<smem>>
    %627 = vector.broadcast %626 : f32 to vector<1x256xf32>
    %628 = arith.mulf %581, %627 : vector<1x256xf32>
    %629 = arith.addf %625, %628 : vector<1x256xf32>
    %c2_344 = arith.constant 2 : index
    %c1_345 = arith.constant 1 : index
    %630 = memref.load %arg6[%c2_344, %c1_345] : memref<4x3xf32, #tpu.memory_space<smem>>
    %631 = vector.broadcast %630 : f32 to vector<1x256xf32>
    %632 = arith.mulf %582, %631 : vector<1x256xf32>
    %633 = arith.addf %629, %632 : vector<1x256xf32>
    %c3_346 = arith.constant 3 : index
    %c1_347 = arith.constant 1 : index
    %634 = memref.load %arg6[%c3_346, %c1_347] : memref<4x3xf32, #tpu.memory_space<smem>>
    %635 = vector.broadcast %634 : f32 to vector<1x256xf32>
    %636 = arith.mulf %583, %635 : vector<1x256xf32>
    %637 = arith.addf %633, %636 : vector<1x256xf32>
    %c1_348 = arith.constant 1 : index
    %638 = memref.load %arg7[%c1_348] : memref<3xf32, #tpu.memory_space<smem>>
    %639 = vector.broadcast %638 : f32 to vector<1x256xf32>
    %640 = arith.addf %637, %639 : vector<1x256xf32>
    %641 = arith.negf %640 : vector<1x256xf32>
    %642 = math.exp %641 : vector<1x256xf32>
    %cst_349 = arith.constant 1.000000e+00 : f32
    %643 = vector.broadcast %cst_349 : f32 to vector<1x256xf32>
    %644 = arith.addf %643, %642 : vector<1x256xf32>
    %645 = arith.divf %643, %644 : vector<1x256xf32>
    %cst_350 = arith.constant 1.000000e+00 : f32
    %646 = vector.broadcast %cst_350 : f32 to vector<4x256xf32>
    %647 = arith.subf %646, %622 : vector<4x256xf32>
    %648 = vector.broadcast %645 : vector<1x256xf32> to vector<4x256xf32>
    %649 = arith.mulf %648, %647 : vector<4x256xf32>
    %cst_351 = arith.constant 1.000000e+00 : f32
    %650 = vector.broadcast %cst_351 : f32 to vector<4x256xf32>
    %651 = arith.addf %650, %649 : vector<4x256xf32>
    %652 = arith.mulf %622, %651 : vector<4x256xf32>
    %c0_352 = arith.constant 0 : index
    %c2_353 = arith.constant 2 : index
    %653 = memref.load %arg6[%c0_352, %c2_353] : memref<4x3xf32, #tpu.memory_space<smem>>
    %654 = vector.broadcast %653 : f32 to vector<1x256xf32>
    %655 = arith.mulf %580, %654 : vector<1x256xf32>
    %c1_354 = arith.constant 1 : index
    %c2_355 = arith.constant 2 : index
    %656 = memref.load %arg6[%c1_354, %c2_355] : memref<4x3xf32, #tpu.memory_space<smem>>
    %657 = vector.broadcast %656 : f32 to vector<1x256xf32>
    %658 = arith.mulf %581, %657 : vector<1x256xf32>
    %659 = arith.addf %655, %658 : vector<1x256xf32>
    %c2_356 = arith.constant 2 : index
    %c2_357 = arith.constant 2 : index
    %660 = memref.load %arg6[%c2_356, %c2_357] : memref<4x3xf32, #tpu.memory_space<smem>>
    %661 = vector.broadcast %660 : f32 to vector<1x256xf32>
    %662 = arith.mulf %582, %661 : vector<1x256xf32>
    %663 = arith.addf %659, %662 : vector<1x256xf32>
    %c3_358 = arith.constant 3 : index
    %c2_359 = arith.constant 2 : index
    %664 = memref.load %arg6[%c3_358, %c2_359] : memref<4x3xf32, #tpu.memory_space<smem>>
    %665 = vector.broadcast %664 : f32 to vector<1x256xf32>
    %666 = arith.mulf %583, %665 : vector<1x256xf32>
    %667 = arith.addf %663, %666 : vector<1x256xf32>
    %c2_360 = arith.constant 2 : index
    %668 = memref.load %arg7[%c2_360] : memref<3xf32, #tpu.memory_space<smem>>
    %669 = vector.broadcast %668 : f32 to vector<1x256xf32>
    %670 = arith.addf %667, %669 : vector<1x256xf32>
    %671 = arith.negf %670 : vector<1x256xf32>
    %672 = math.exp %671 : vector<1x256xf32>
    %cst_361 = arith.constant 1.000000e+00 : f32
    %673 = vector.broadcast %cst_361 : f32 to vector<1x256xf32>
    %674 = arith.addf %673, %672 : vector<1x256xf32>
    %675 = arith.divf %673, %674 : vector<1x256xf32>
    %cst_362 = arith.constant 1.000000e+00 : f32
    %676 = vector.broadcast %cst_362 : f32 to vector<4x256xf32>
    %677 = arith.subf %676, %652 : vector<4x256xf32>
    %678 = vector.broadcast %675 : vector<1x256xf32> to vector<4x256xf32>
    %679 = arith.mulf %678, %677 : vector<4x256xf32>
    %cst_363 = arith.constant 1.000000e+00 : f32
    %680 = vector.broadcast %cst_363 : f32 to vector<4x256xf32>
    %681 = arith.addf %680, %679 : vector<4x256xf32>
    %682 = arith.mulf %652, %681 : vector<4x256xf32>
    %c2_364 = arith.constant 2 : index
    %c0_365 = arith.constant 0 : index
    %c0_366 = arith.constant 0 : index
    %683 = vector.load %arg8[%c2_364, %c0_365, %c0_366] : memref<4x4x256xf32, #tpu.memory_space<vmem>>, vector<1x4x256xf32>
    %684 = vector.shape_cast %683 : vector<1x4x256xf32> to vector<4x256xf32>
    %685 = vector.shape_cast %682 : vector<4x256xf32> to vector<1x4x256xf32>
    tpu.vector_store %arg8[%c2_364, %c0_365, %c0_366], %685 {strides = array<i32>} : memref<4x4x256xf32, #tpu.memory_space<vmem>>, vector<1x4x256xf32>,
    %686 = vector.extract_strided_slice %364 {offsets = [0, 1152], sizes = [4, 256], strides = [1, 1]} : vector<4x1408xf32> to vector<4x256xf32>
    %687 = vector.extract_strided_slice %686 {offsets = [0, 0], sizes = [1, 256], strides = [1, 1]} : vector<4x256xf32> to vector<1x256xf32>
    %688 = vector.extract_strided_slice %686 {offsets = [1, 0], sizes = [1, 256], strides = [1, 1]} : vector<4x256xf32> to vector<1x256xf32>
    %689 = vector.extract_strided_slice %686 {offsets = [2, 0], sizes = [1, 256], strides = [1, 1]} : vector<4x256xf32> to vector<1x256xf32>
    %690 = vector.extract_strided_slice %686 {offsets = [3, 0], sizes = [1, 256], strides = [1, 1]} : vector<4x256xf32> to vector<1x256xf32>
    %c3_367 = arith.constant 3 : index
    %c0_368 = arith.constant 0 : index
    %c0_369 = arith.constant 0 : index
    %691 = vector.load %arg1[%c3_367, %c0_368, %c0_369] : memref<4x4x256xf32, #tpu.memory_space<vmem>>, vector<1x4x256xf32>
    %692 = vector.shape_cast %691 : vector<1x4x256xf32> to vector<4x256xf32>
    %cst_370 = arith.constant 0.000000e+00 : f32
    %693 = vector.broadcast %cst_370 : f32 to vector<4x256xf32>
    %694 = arith.maximumf %692, %693 : vector<4x256xf32>
    %cst_371 = arith.constant 1.000000e+00 : f32
    %695 = vector.broadcast %cst_371 : f32 to vector<4x256xf32>
    %696 = arith.subf %692, %695 : vector<4x256xf32>
    %cst_372 = arith.constant 0.000000e+00 : f32
    %697 = vector.broadcast %cst_372 : f32 to vector<4x256xf32>
    %698 = arith.maximumf %696, %697 : vector<4x256xf32>
    %699 = arith.subf %694, %698 : vector<4x256xf32>
    %c0_373 = arith.constant 0 : index
    %c0_374 = arith.constant 0 : index
    %700 = memref.load %arg6[%c0_373, %c0_374] : memref<4x3xf32, #tpu.memory_space<smem>>
    %701 = vector.broadcast %700 : f32 to vector<1x256xf32>
    %702 = arith.mulf %687, %701 : vector<1x256xf32>
    %c1_375 = arith.constant 1 : index
    %c0_376 = arith.constant 0 : index
    %703 = memref.load %arg6[%c1_375, %c0_376] : memref<4x3xf32, #tpu.memory_space<smem>>
    %704 = vector.broadcast %703 : f32 to vector<1x256xf32>
    %705 = arith.mulf %688, %704 : vector<1x256xf32>
    %706 = arith.addf %702, %705 : vector<1x256xf32>
    %c2_377 = arith.constant 2 : index
    %c0_378 = arith.constant 0 : index
    %707 = memref.load %arg6[%c2_377, %c0_378] : memref<4x3xf32, #tpu.memory_space<smem>>
    %708 = vector.broadcast %707 : f32 to vector<1x256xf32>
    %709 = arith.mulf %689, %708 : vector<1x256xf32>
    %710 = arith.addf %706, %709 : vector<1x256xf32>
    %c3_379 = arith.constant 3 : index
    %c0_380 = arith.constant 0 : index
    %711 = memref.load %arg6[%c3_379, %c0_380] : memref<4x3xf32, #tpu.memory_space<smem>>
    %712 = vector.broadcast %711 : f32 to vector<1x256xf32>
    %713 = arith.mulf %690, %712 : vector<1x256xf32>
    %714 = arith.addf %710, %713 : vector<1x256xf32>
    %c0_381 = arith.constant 0 : index
    %715 = memref.load %arg7[%c0_381] : memref<3xf32, #tpu.memory_space<smem>>
    %716 = vector.broadcast %715 : f32 to vector<1x256xf32>
    %717 = arith.addf %714, %716 : vector<1x256xf32>
    %718 = arith.negf %717 : vector<1x256xf32>
    %719 = math.exp %718 : vector<1x256xf32>
    %cst_382 = arith.constant 1.000000e+00 : f32
    %720 = vector.broadcast %cst_382 : f32 to vector<1x256xf32>
    %721 = arith.addf %720, %719 : vector<1x256xf32>
    %722 = arith.divf %720, %721 : vector<1x256xf32>
    %cst_383 = arith.constant 1.000000e+00 : f32
    %723 = vector.broadcast %cst_383 : f32 to vector<4x256xf32>
    %724 = arith.subf %723, %699 : vector<4x256xf32>
    %725 = vector.broadcast %722 : vector<1x256xf32> to vector<4x256xf32>
    %726 = arith.mulf %725, %724 : vector<4x256xf32>
    %cst_384 = arith.constant 1.000000e+00 : f32
    %727 = vector.broadcast %cst_384 : f32 to vector<4x256xf32>
    %728 = arith.addf %727, %726 : vector<4x256xf32>
    %729 = arith.mulf %699, %728 : vector<4x256xf32>
    %c0_385 = arith.constant 0 : index
    %c1_386 = arith.constant 1 : index
    %730 = memref.load %arg6[%c0_385, %c1_386] : memref<4x3xf32, #tpu.memory_space<smem>>
    %731 = vector.broadcast %730 : f32 to vector<1x256xf32>
    %732 = arith.mulf %687, %731 : vector<1x256xf32>
    %c1_387 = arith.constant 1 : index
    %c1_388 = arith.constant 1 : index
    %733 = memref.load %arg6[%c1_387, %c1_388] : memref<4x3xf32, #tpu.memory_space<smem>>
    %734 = vector.broadcast %733 : f32 to vector<1x256xf32>
    %735 = arith.mulf %688, %734 : vector<1x256xf32>
    %736 = arith.addf %732, %735 : vector<1x256xf32>
    %c2_389 = arith.constant 2 : index
    %c1_390 = arith.constant 1 : index
    %737 = memref.load %arg6[%c2_389, %c1_390] : memref<4x3xf32, #tpu.memory_space<smem>>
    %738 = vector.broadcast %737 : f32 to vector<1x256xf32>
    %739 = arith.mulf %689, %738 : vector<1x256xf32>
    %740 = arith.addf %736, %739 : vector<1x256xf32>
    %c3_391 = arith.constant 3 : index
    %c1_392 = arith.constant 1 : index
    %741 = memref.load %arg6[%c3_391, %c1_392] : memref<4x3xf32, #tpu.memory_space<smem>>
    %742 = vector.broadcast %741 : f32 to vector<1x256xf32>
    %743 = arith.mulf %690, %742 : vector<1x256xf32>
    %744 = arith.addf %740, %743 : vector<1x256xf32>
    %c1_393 = arith.constant 1 : index
    %745 = memref.load %arg7[%c1_393] : memref<3xf32, #tpu.memory_space<smem>>
    %746 = vector.broadcast %745 : f32 to vector<1x256xf32>
    %747 = arith.addf %744, %746 : vector<1x256xf32>
    %748 = arith.negf %747 : vector<1x256xf32>
    %749 = math.exp %748 : vector<1x256xf32>
    %cst_394 = arith.constant 1.000000e+00 : f32
    %750 = vector.broadcast %cst_394 : f32 to vector<1x256xf32>
    %751 = arith.addf %750, %749 : vector<1x256xf32>
    %752 = arith.divf %750, %751 : vector<1x256xf32>
    %cst_395 = arith.constant 1.000000e+00 : f32
    %753 = vector.broadcast %cst_395 : f32 to vector<4x256xf32>
    %754 = arith.subf %753, %729 : vector<4x256xf32>
    %755 = vector.broadcast %752 : vector<1x256xf32> to vector<4x256xf32>
    %756 = arith.mulf %755, %754 : vector<4x256xf32>
    %cst_396 = arith.constant 1.000000e+00 : f32
    %757 = vector.broadcast %cst_396 : f32 to vector<4x256xf32>
    %758 = arith.addf %757, %756 : vector<4x256xf32>
    %759 = arith.mulf %729, %758 : vector<4x256xf32>
    %c0_397 = arith.constant 0 : index
    %c2_398 = arith.constant 2 : index
    %760 = memref.load %arg6[%c0_397, %c2_398] : memref<4x3xf32, #tpu.memory_space<smem>>
    %761 = vector.broadcast %760 : f32 to vector<1x256xf32>
    %762 = arith.mulf %687, %761 : vector<1x256xf32>
    %c1_399 = arith.constant 1 : index
    %c2_400 = arith.constant 2 : index
    %763 = memref.load %arg6[%c1_399, %c2_400] : memref<4x3xf32, #tpu.memory_space<smem>>
    %764 = vector.broadcast %763 : f32 to vector<1x256xf32>
    %765 = arith.mulf %688, %764 : vector<1x256xf32>
    %766 = arith.addf %762, %765 : vector<1x256xf32>
    %c2_401 = arith.constant 2 : index
    %c2_402 = arith.constant 2 : index
    %767 = memref.load %arg6[%c2_401, %c2_402] : memref<4x3xf32, #tpu.memory_space<smem>>
    %768 = vector.broadcast %767 : f32 to vector<1x256xf32>
    %769 = arith.mulf %689, %768 : vector<1x256xf32>
    %770 = arith.addf %766, %769 : vector<1x256xf32>
    %c3_403 = arith.constant 3 : index
    %c2_404 = arith.constant 2 : index
    %771 = memref.load %arg6[%c3_403, %c2_404] : memref<4x3xf32, #tpu.memory_space<smem>>
    %772 = vector.broadcast %771 : f32 to vector<1x256xf32>
    %773 = arith.mulf %690, %772 : vector<1x256xf32>
    %774 = arith.addf %770, %773 : vector<1x256xf32>
    %c2_405 = arith.constant 2 : index
    %775 = memref.load %arg7[%c2_405] : memref<3xf32, #tpu.memory_space<smem>>
    %776 = vector.broadcast %775 : f32 to vector<1x256xf32>
    %777 = arith.addf %774, %776 : vector<1x256xf32>
    %778 = arith.negf %777 : vector<1x256xf32>
    %779 = math.exp %778 : vector<1x256xf32>
    %cst_406 = arith.constant 1.000000e+00 : f32
    %780 = vector.broadcast %cst_406 : f32 to vector<1x256xf32>
    %781 = arith.addf %780, %779 : vector<1x256xf32>
    %782 = arith.divf %780, %781 : vector<1x256xf32>
    %cst_407 = arith.constant 1.000000e+00 : f32
    %783 = vector.broadcast %cst_407 : f32 to vector<4x256xf32>
    %784 = arith.subf %783, %759 : vector<4x256xf32>
    %785 = vector.broadcast %782 : vector<1x256xf32> to vector<4x256xf32>
    %786 = arith.mulf %785, %784 : vector<4x256xf32>
    %cst_408 = arith.constant 1.000000e+00 : f32
    %787 = vector.broadcast %cst_408 : f32 to vector<4x256xf32>
    %788 = arith.addf %787, %786 : vector<4x256xf32>
    %789 = arith.mulf %759, %788 : vector<4x256xf32>
    %c3_409 = arith.constant 3 : index
    %c0_410 = arith.constant 0 : index
    %c0_411 = arith.constant 0 : index
    %790 = vector.load %arg8[%c3_409, %c0_410, %c0_411] : memref<4x4x256xf32, #tpu.memory_space<vmem>>, vector<1x4x256xf32>
    %791 = vector.shape_cast %790 : vector<1x4x256xf32> to vector<4x256xf32>
    %792 = vector.shape_cast %789 : vector<4x256xf32> to vector<1x4x256xf32>
    tpu.vector_store %arg8[%c3_409, %c0_410, %c0_411], %792 {strides = array<i32>} : memref<4x4x256xf32, #tpu.memory_space<vmem>>, vector<1x4x256xf32>,
    return
  }
  func.func @transform_0(%arg0: i32) -> (i32, i32, i32) {
    %c0_i32 = arith.constant 0 : i32
    %c0_i32_0 = arith.constant 0 : i32
    %c0_i32_1 = arith.constant 0 : i32
    return %arg0, %c0_i32, %c0_i32_0 : i32, i32, i32
  }
  func.func @transform_1(%arg0: i32) -> (i32, i32, i32) {
    %c0_i32 = arith.constant 0 : i32
    %c0_i32_0 = arith.constant 0 : i32
    %c0_i32_1 = arith.constant 0 : i32
    %c0_i32_2 = arith.constant 0 : i32
    return %c0_i32, %c0_i32_0, %c0_i32_1 : i32, i32, i32
  }
  func.func @transform_2(%arg0: i32) -> (i32, i32) {
    %c0_i32 = arith.constant 0 : i32
    %c0_i32_0 = arith.constant 0 : i32
    %c0_i32_1 = arith.constant 0 : i32
    return %c0_i32, %c0_i32_0 : i32, i32
  }
  func.func @transform_3(%arg0: i32) -> (i32, i32, i32) {
    %c0_i32 = arith.constant 0 : i32
    %c0_i32_0 = arith.constant 0 : i32
    %c0_i32_1 = arith.constant 0 : i32
    %c0_i32_2 = arith.constant 0 : i32
    return %c0_i32, %c0_i32_0, %c0_i32_1 : i32, i32, i32
  }
  func.func @transform_4(%arg0: i32) -> (i32, i32) {
    %c0_i32 = arith.constant 0 : i32
    %c0_i32_0 = arith.constant 0 : i32
    %c0_i32_1 = arith.constant 0 : i32
    return %c0_i32, %c0_i32_0 : i32, i32
  }
  func.func @transform_5(%arg0: i32) -> (i32, i32) {
    %c0_i32 = arith.constant 0 : i32
    %c0_i32_0 = arith.constant 0 : i32
    %c0_i32_1 = arith.constant 0 : i32
    return %c0_i32, %c0_i32_0 : i32, i32
  }
  func.func @transform_6(%arg0: i32) -> i32 {
    %c0_i32 = arith.constant 0 : i32
    %c0_i32_0 = arith.constant 0 : i32
    return %c0_i32 : i32
  }
  func.func @transform_7(%arg0: i32) -> (i32, i32, i32) {
    %c0_i32 = arith.constant 0 : i32
    %c0_i32_0 = arith.constant 0 : i32
    %c0_i32_1 = arith.constant 0 : i32
    return %arg0, %c0_i32, %c0_i32_0 : i32, i32, i32
  }
}

</mosaic_0001>

<bundles_post_ra>
// kernel: curve_ca_forward.1
= control target key start
LH: loop header
LB: loop body
LE: loop exit
PB: predicated region body
PF: predicated region fallthrough
CT: control target
= control target key end

     0   :  { %12 = vsyncpa [#allocation4], 0  ;;  %s25785_s0 = inlined_call_operand.vmem [shape: f32[8,4,256], index: 0, kind: input, shape index: {}]   ;;  %s25786_s1 = inlined_call_operand.vmem [shape: f32[25,4,4], index: 1, kind: input, shape index: {}]   ;;  %s25787_s2 = inlined_call_operand.vmem [shape: f32[4,1], index: 2, kind: input, shape index: {}]   ;;  %s25788_s3 = inlined_call_operand.vmem [shape: f32[9,4,4], index: 3, kind: input, shape index: {}]   ;;  %s25789_s4 = inlined_call_operand.vmem [shape: f32[4,1], index: 4, kind: input, shape index: {}]   ;;  %s25790_s5 = inlined_call_operand.vmem [shape: f32[4,3], index: 5, kind: input, shape index: {}]   ;;  %s25791_s6 = inlined_call_operand.vmem [shape: f32[3], index: 6, kind: input, shape index: {}]   ;;  %s25792_s7 = inlined_call_operand.vmem [shape: f32[8,4,256], index: 7, kind: output, shape index: {}]  }
   0x1   :  { %13 = vsyncpa [#allocation6], 0  ;;  %s21446_s24 = smov 0  }
   0x2 LB: > { %s20025_s25 = sadd.s32 4294967295, %s21375_s24   ;;  %p20027_p0 = scmp.ge.s32.totalorder %s21375_s24, 1  ;;  %s21375_s24 = sphi %s21446_s24, %s19_s24  }
   0x3   : > { %p202_p1 = scmp.lt.s32.totalorder %s21375_s24, 3  ;;  %s227_s28 = sshll.u32 %s25790_s5, 4  ;;  %s228_s28 = int_to_ptr.vmem [resolvable:$true] %s227_s28 }
   0x4   : > { %p21463_p3 = scmp.eq.s32.totalorder %s20025_s25, 0  ;;  %s238_s10 = sshll.u32 %s25791_s6, 4  ;;  %s239_s10 = int_to_ptr.vmem [resolvable:$true] %s238_s10 }
   0x5   : > { %p21457_p2 = pnand %p20027_p0, %p202_p1  ;;  %s21331_s12 = scalar_lea.vmem %s228_s28, 64 }
   0x6   : > { %s25987_s30 = scalar_select %p21463_p3, 1, 0 }
   0x7   : > { %s25986_s29 = scalar_select %p21457_p2, 1, 0 }
   0x8   : > { %p21150_p4 = pneg %p21457_p2  ;;  %p21332_p6 = scmp.ne.s32.totalorder %s228_s28, %s21331_s12 }
   0x9   : > { %p21339_p10 = scmp.lt.s32.totalorder %s228_s28, %s228_s28  ;;  %p21340_p11 = scmp.lt.s32.totalorder %s21331_s12, %s21331_s12 }
   0xa   : > { %p21474_p5 = pnand %p21463_p3, %p21150_p4 }
   0xb   : > { %p21341_p12 = por %p21340_p11, %p21339_p10 }
   0xc   : > { %p21333_p7 = pneg %p21474_p5 }
   0xe   : > { %p21334_p8 = pnand %p21333_p7, %p21332_p6 }
  0x10   : > { %p21335_p9 = pneg %p21334_p8 }
  0x12   : > { %p21342_p13 = pnand %p21341_p12, %p21335_p9 }
  0x14   : > { %21345 = shalt.err (!%p21342_p13)
}
  0x15   : > { %s21377_s13 = smov [#allocation3]   ;;  %s21346_s14 = scalar_lea.vmem %s239_s10, 16 }
  0x16   : > { %21153 = dma.vmem_to_smem (!%p21474_p5), %s228_s28, 64, %s21377_s13, [#allocation4]  }
  0x17   : > { %p21347_p0 = scmp.ne.s32.totalorder %s239_s10, %s21346_s14  ;;  %p21354_p3 = scmp.lt.s32.totalorder %s239_s10, %s239_s10 }
  0x18   : > { %p21355_p2 = scmp.lt.s32.totalorder %s21346_s14, %s21346_s14 }
  0x19   : > { %p21349_p1 = pnand %p21347_p0, %p21333_p7 }
  0x1a   : > { %p21356_p6 = por %p21355_p2, %p21354_p3 }
  0x1b   : > { %p21350_p4 = pneg %p21349_p1 }
  0x1d   : > { %p21357_p8 = pnand %p21356_p6, %p21350_p4 }
  0x1f   : > { %21360 = shalt.err (!%p21357_p8)
}
  0x20   : > { %s21378_s15 = smov [#allocation5]   ;;  %p25989_p9 = scmp.ne.s32.totalorder %s25986_s29, 0 }
  0x21   : > { %21156 = dma.vmem_to_smem (!%p21474_p5), %s239_s10, 16, %s21378_s15, [#allocation6]  }
  0x22   : > { %261 = sbr.rel (%p25989_p9) target bundleno = 1676 (0x68c), region = 48 }
  0x29   : > { %p25990_p10 = scmp.ne.s32.totalorder %s25987_s30, 0 }
  0x2b   : > { %21366 = dma.done.wait (%p25990_p10), [#allocation4], 64  }
  0x2c   : > { %21368 = vsyncadd (%p25990_p10), [#allocation4], 4294967232 }
  0x2d   : > { %21370 = dma.done.wait (%p25990_p10), [#allocation6], 16  }
  0x2e   : > { %21372 = vsyncadd (%p25990_p10), [#allocation6], 4294967280 }
  0x2f   : > { %271 = sfence }
  0x30   : > { %s20034_s16 = sshll.u32 %s20025_s25, 2  ;;  %v25861_v0 = vmov 0.0   ;;  %s21380_s21 = smov 33   ;;  %v25852_v15 = vlaneseq }
  0x31   : > { %p301_p2 = scmp.lt.s32.totalorder %s20034_s16, 7  ;;  %745 = vst [vmem:[#allocation2 + $0xc] sm:$0xf] %v25861_v0  ;;  %744 = vst [vmem:[#allocation2] sm:$0xf] %v25861_v0  ;;  %1114 = vmatprep.mubr.f32.mxu1 %v25861_v0  ;;  %1043 = vmatprep.mubr.f32.mxu0 %v25861_v0  ;;  %s21381_s22 = smov 34  }
  0x32   : > { %746 = vst [vmem:[#allocation2 + $0x18] sm:$0xf] %v25861_v0  ;;  %747 = vst [vmem:[#allocation2 + $0x24] sm:$0xf] %v25861_v0  ;;  %v21576_v16 = vand.u32 127, %v25852_v15  ;;  %s21382_s23 = smov 32  }
  0x33   : > { %748 = vst [vmem:[#allocation2 + $0x30] sm:$0xf] %v25861_v0  ;;  %s27010_s16 = smov (!%p301_p2, %s20034_s16), 7  ;;  %s21383_s25 = smov 31  }
  0x34   : > { %s20752_s17 = sshll.u32 %s27010_s16, 3  ;;  %v318_v17 = vadd.s32 384, %v21576_v16  ;;  %v317_v20 = vadd.s32 256, %v21576_v16  ;;  %v321_v24 = vadd.s32 768, %v21576_v16  ;;  %v319_v28 = vadd.s32 512, %v21576_v16  ;;  %s21384_s26 = smov 30  }
  0x35   : > { %s305_s20 = scalar_lea.vmem %s25785_s0, %s20752_s17  ;;  %v322_v29 = vadd.s32 896, %v21576_v16  ;;  %v21625_v36 = vadd.s32 128, %v21576_v16  ;;  %v21629_v40 = vadd.s32 640, %v21576_v16  ;;  %v21644_v46 = vadd.s32 1152, %v21576_v16  ;;  %s21385_s27 = smov 18  }
  0x36   : > { %v21511_v1 = vld [vmem:[%s305_s20] sm:$0xff]  ;;  %v21513_v2 = vld [vmem:[%s305_s20 + $0x8] sm:$0xff]  ;;  %v21515_v3 = vld [vmem:[%s305_s20 + $0x10] sm:$0xff]  ;;  %v21583_v18 = vmul.u32.u64.low 2863311531, %v318_v17  ;;  %v21584_v19 = vmul.u32.u64.high 2863311531, %v318_v17, %v21583_v18  ;;  %v21649_v49 = vadd.s32 1024, %v21576_v16 }
  0x37   : > { %25991 = vst [vmem:[#allocation9_spill] sm:$0xff] %v21511_v1  ;;  %25992 = vst [vmem:[#allocation10_spill] sm:$0xff] %v21513_v2  ;;  %v21518_v4 = vld [vmem:[%s305_s20 + $0x18] sm:$0xff]  ;;  %v21537_v8 = vcombine.high %v21513_v2, %v21513_v2  ;;  %v21596_v22 = vmul.u32.u64.low 2863311531, %v317_v20  ;;  %v21597_v23 = vmul.u32.u64.high 2863311531, %v317_v20, %v21596_v22  ;;  %v21662_v54 = vadd.s32 1280, %v21576_v16 }
  0x38   : > { %25993 = vst [vmem:[#allocation11_spill] sm:$0xff] %v21515_v3  ;;  %750 = vst [vmem:[#allocation2 + $0x4] sm:$0xff] %v21511_v1  ;;  %v21565_v14 = vcombine.high %v21518_v4, %v21518_v4  ;;  %v365_v21 = vshrl.u32 %v21584_v19, 8  ;;  %v21604_v26 = vmul.u32.u64.low 2863311531, %v321_v24  ;;  %v21605_v27 = vmul.u32.u64.high 2863311531, %v321_v24, %v21604_v26  ;;  %s21387_s30 = smov 17  }
  0x39   : > { %25994 = vst [vmem:[#allocation12_spill] sm:$0xff] %v21518_v4  ;;  %753 = vst [vmem:[#allocation2 + $0x10] sm:$0xff] %v21513_v2  ;;  %v354_v31 = vshrl.u32 %v21597_v23, 8  ;;  %v21614_v32 = vmul.u32.u64.low 2863311531, %v319_v28  ;;  %v21615_v33 = vmul.u32.u64.high 2863311531, %v319_v28, %v21614_v32  ;;  %s21388_s12 = smov 16  }
  0x3a   : > { %756 = vst [vmem:[#allocation2 + $0x1c] sm:$0xff] %v21515_v3  ;;  %759 = vst [vmem:[#allocation2 + $0x28] sm:$0xff] %v21518_v4  ;;  %v366_v25 = vmul.u32 384, %v365_v21  ;;  %v21617_v34 = vmul.u32.u64.low 2863311531, %v322_v29  ;;  %v21618_v35 = vmul.u32.u64.high 2863311531, %v322_v29, %v21617_v34  ;;  %v398_v39 = vshrl.u32 %v21605_v27, 8 }
  0x3b   : > { %v355_v37 = vmul.u32 384, %v354_v31  ;;  %v21636_v41 = vmul.u32.u64.low 2863311531, %v21625_v36  ;;  %v21637_v42 = vmul.u32.u64.high 2863311531, %v21625_v36, %v21636_v41  ;;  %v376_v50 = vshrl.u32 %v21615_v33, 8  ;;  %s21389_s13 = smov 15   ;;  %s21390_s20 = smov 14  }
  0x3c   : > { %v367_v30 = vsub.s32 %v318_v17, %v366_v25  ;;  %v21640_v44 = vmul.u32.u64.low 2863311531, %v21576_v16  ;;  %v21641_v45 = vmul.u32.u64.high 2863311531, %v21576_v16, %v21640_v44  ;;  %v399_v48 = vmul.u32 384, %v398_v39  ;;  %s21393_s8 = smov 127   ;;  %s21394_s9 = smov 126  }
  0x3d   : > { %v356_v43 = vsub.s32 %v317_v20, %v355_v37  ;;  %v409_v51 = vshrl.u32 %v21618_v35, 8  ;;  %v21654_v52 = vmul.u32.u64.low 2863311531, %v21629_v40  ;;  %v21655_v53 = vmul.u32.u64.high 2863311531, %v21629_v40, %v21654_v52  ;;  %s21395_s14 = smov 114   ;;  %s21396_s19 = smov 113  }
  0x3e   : > { %vm450_vm0 = vcmp.ne.s32.totalorder %v367_v30, 0  ;;  %vm461_vm1 = vcmp.lt.s32.totalorder %v367_v30, 0  ;;  %v483_v38 = vadd.s32 384, %v367_v30  ;;  %v400_v58 = vsub.s32 %v321_v24, %v399_v48  ;;  %s21399_s15 = smov 110   ;;  %s21401_s28 = smov 97  }
  0x3f   : > { %v21523_v5 = vld [vmem:[#allocation2 + $0x8] sm:$0xff]  ;;  %v21525_v6 = vld [vmem:[#allocation2] sm:$0xff]  ;;  %vm472_vm2 = vmand %vm461_vm1, %vm450_vm0  ;;  %vm449_vm3 = vcmp.ne.s32.totalorder %v356_v43, 0  ;;  %vm460_vm4 = vcmp.lt.s32.totalorder %v356_v43, 0  ;;  %v21665_v55 = vmul.u32.u64.low 2863311531, %v21644_v46  ;;  %v21666_v56 = vmul.u32.u64.high 2863311531, %v21644_v46, %v21665_v55 }
  0x40   : > { %885 = vrot.lane.b32.xlu0 %v21523_v5, %s21380_s21  ;;  %881 = vrot.lane.b32.xlu1 %v21525_v6, %s21380_s21  ;;  %v21531_v7 = vcombine.high %v21523_v5, %v21523_v5  ;;  %v21557_v13 = vcombine.high %v21525_v6, %v21525_v6  ;;  %v21646_v47 = vsel %vm472_vm2, %v483_v38, %v367_v30  ;;  %v482_v61 = vadd.s32 384, %v356_v43  ;;  %vm471_vm5 = vmand %vm460_vm4, %vm449_vm3  ;;  %s21402_s10 = smov 96   ;;  %s21403_s11 = smov 95  }
  0x41   : > { %v21539_v9 = vld [vmem:[#allocation2 + $0x18] sm:$0xff]  ;;  %v21547_v11 = vld [vmem:[#allocation2 + $0x20] sm:$0xff]  ;;  %v524_v57 = vsub.s32 0, %v21646_v47  ;;  %v21670_v59 = vmul.u32.u64.low 2863311531, %v21649_v49  ;;  %v21671_v60 = vmul.u32.u64.high 2863311531, %v21649_v49, %v21670_v59  ;;  %v377_v62 = vmul.u32 384, %v376_v50 }
  0x42   : > { %v21545_v10 = vcombine.high %v21539_v9, %v21539_v9  ;;  %v21553_v12 = vcombine.high %v21547_v11, %v21547_v11  ;;  %v410_v63 = vmul.u32 384, %v409_v51  ;;  %v343_v17 = vshrl.u32 %v21637_v42, 8  ;;  %s21404_s18 = smov 94   ;;  %s19039_s29 = sld [smem:[#allocation5]] }
  0x43   : > { %v21679_v18 = vmul.u32.u64.low 2863311531, %v21662_v54  ;;  %v21680_v19 = vmul.u32.u64.high 2863311531, %v21662_v54, %v21679_v18  ;;  %v332_v20 = vshrl.u32 %v21641_v45, 8  ;;  %v21684_v21 = vmin.u32 %v524_v57, %v21646_v47 }
  0x44   : > { %889 = vrot.lane.b32.xlu0 %v21513_v2, %s21380_s21  ;;  %887 = vrot.lane.b32.xlu1 %v21531_v7, %s21380_s21  ;;  %vm453_vm6 = vcmp.ne.s32.totalorder %v400_v58, 0  ;;  %vm464_vm7 = vcmp.lt.s32.totalorder %v400_v58, 0  ;;  %v21686_v22 = vsel %vm471_vm5, %v482_v61, %v356_v43  ;;  %v378_v23 = vsub.s32 %v319_v28, %v377_v62 }
  0x45   : > { %v411_v24 = vsub.s32 %v322_v29, %v410_v63  ;;  %v387_v25 = vshrl.u32 %v21655_v53, 8  ;;  %v486_v26 = vadd.s32 384, %v400_v58  ;;  %v344_v27 = vmul.u32 384, %v343_v17  ;;  %vm475_vm8 = vmand %vm464_vm7, %vm453_vm6 }
  0x46   : > { %v333_v30 = vmul.u32 384, %v332_v20  ;;  %v431_v31 = vshrl.u32 %v21666_v56, 8  ;;  %v527_v32 = vand.u32 15, %v21684_v21  ;;  %v517_v33 = vsub.s32 0, %v21686_v22 }
  0x47   : > { %v420_v28 = vshrl.u32 %v21671_v60, 8  ;;  %vm451_vm9 = vcmp.ne.s32.totalorder %v378_v23, 0  ;;  %vm454_vm10 = vcmp.ne.s32.totalorder %v411_v24, 0  ;;  %vm465_vm11 = vcmp.lt.s32.totalorder %v411_v24, 0 }
  0x48   : > { %893 = vrot.lane.b32.xlu0 %v21539_v9, %s21380_s21  ;;  %891 = vrot.lane.b32.xlu1 %v21537_v8, %s21380_s21  ;;  %v388_v29 = vmul.u32 384, %v387_v25  ;;  %vm462_vm12 = vcmp.lt.s32.totalorder %v378_v23, 0  ;;  %v21701_v34 = vsel %vm475_vm8, %v486_v26, %v400_v58  ;;  %v345_v35 = vsub.s32 %v21625_v36, %v344_v27  ;;  %vm476_vm13 = vmand %vm465_vm11, %vm454_vm10 }
  0x49   : > { %v442_v37 = vshrl.u32 %v21680_v19, 8  ;;  %v487_v38 = vadd.s32 384, %v411_v24  ;;  %v334_v39 = vsub.s32 %v21576_v16, %v333_v30  ;;  %v432_v41 = vmul.u32 384, %v431_v31  ;;  %vm473_vm15 = vmand %vm462_vm12, %vm451_vm9 }
  0x4a   : > { %v20042_v42 = vmin.u32 %v517_v33, %v21686_v22  ;;  %v484_v43 = vadd.s32 384, %v378_v23  ;;  %v421_v44 = vmul.u32 384, %v420_v28  ;;  %vm523_vm14 = vcmp.lt.s32.totalorder %v21646_v47, 0 }
  0x4b   : > { %v545_v45 = vsub.s32 0, %v21701_v34  ;;  %v389_v48 = vsub.s32 %v21629_v40, %v388_v29  ;;  %v528_v16 = vsub.s32 0, %v527_v32  ;;  %vm448_vm0 = vcmp.ne.s32.totalorder %v345_v35, 0 }
  0x4c   : > { %897 = vrot.lane.b32.xlu0 %v21547_v11, %s21380_s21  ;;  %895 = vrot.lane.b32.xlu1 %v21545_v10, %s21380_s21  ;;  %vm459_vm1 = vcmp.lt.s32.totalorder %v345_v35, 0  ;;  %v443_v36 = vmul.u32 384, %v442_v37  ;;  %v21715_v50 = vsel %vm476_vm13, %v487_v38, %v411_v24  ;;  %vm447_vm2 = vcmp.ne.s32.totalorder %v334_v39, 0 }
  0x4d   : > { %vm458_vm3 = vcmp.lt.s32.totalorder %v334_v39, 0  ;;  %v433_v51 = vsub.s32 %v21644_v46, %v432_v41  ;;  %v520_v52 = vand.u32 15, %v20042_v42  ;;  %v21718_v53 = vsel %vm473_vm15, %v484_v43, %v378_v23  ;;  %vm21722_vm4 = vmand %vm459_vm1, %vm448_vm0 }
  0x4e   : > { %v422_v40 = vsub.s32 %v21649_v49, %v421_v44  ;;  %v481_v55 = vadd.s32 384, %v345_v35  ;;  %v20046_v56 = vmin.u32 %v545_v45, %v21701_v34  ;;  %v480_v58 = vadd.s32 384, %v334_v39  ;;  %vm469_vm8 = vmand %vm458_vm3, %vm447_vm2 }
  0x4f   : > { %vm452_vm5 = vcmp.ne.s32.totalorder %v389_v48, 0  ;;  %vm463_vm6 = vcmp.lt.s32.totalorder %v389_v48, 0  ;;  %vm516_vm7 = vcmp.lt.s32.totalorder %v21686_v22, 0  ;;  %v552_v46 = vsub.s32 0, %v21715_v50 }
  0x50   : > { %899 = vrot.lane.b32.xlu1 %v21553_v12, %s21380_s21  ;;  %883 = vrot.lane.b32.xlu0 %v21557_v13, %s21380_s21  ;;  %v444_v49 = vsub.s32 %v21662_v54, %v443_v36  ;;  %v529_v59 = vsel %vm523_vm14, %v528_v16, %v527_v32  ;;  %v485_v60 = vadd.s32 384, %v389_v48  ;;  %vm456_vm9 = vcmp.ne.s32.totalorder %v433_v51, 0  ;;  %vm474_vm12 = vmand %vm463_vm6, %vm452_vm5 }
  0x51   : > { %vm467_vm10 = vcmp.lt.s32.totalorder %v433_v51, 0  ;;  %v521_v61 = vsub.s32 0, %v520_v52  ;;  %v531_v62 = vsub.s32 0, %v21718_v53  ;;  %vm455_vm11 = vcmp.ne.s32.totalorder %v422_v40, 0 }
  0x52   : > { %v21740_v63 = vsel %vm21722_vm4, %v481_v55, %v345_v35  ;;  %v548_v17 = vand.u32 15, %v20046_v56  ;;  %vm466_vm13 = vcmp.lt.s32.totalorder %v422_v40, 0  ;;  %v21744_v54 = vsel %vm469_vm8, %v480_v58, %v334_v39  ;;  %vm478_vm14 = vmand %vm467_vm10, %vm456_vm9 }
  0x53   : > { %v489_v47 = vadd.s32 384, %v433_v51  ;;  %v20047_v18 = vmin.u32 %v552_v46, %v21715_v50  ;;  %vm457_vm15 = vcmp.ne.s32.totalorder %v444_v49, 0  ;;  %vm468_vm0 = vcmp.lt.s32.totalorder %v444_v49, 0  ;;  %vm21759_vm2 = vmand %vm466_vm13, %vm455_vm11 }
  0x54   : > { %802 = vrot.lane.b32.xlu1 %v21557_v13, %s21381_s22  ;;  %901 = vrot.lane.b32.xlu0 %v21518_v4, %s21380_s21  ;;  %v488_v19 = vadd.s32 384, %v422_v40  ;;  %v510_v20 = vsub.s32 0, %v21740_v63  ;;  %v21753_v21 = vsel %vm474_vm12, %v485_v60, %v389_v48  ;;  %vm582_vm1 = vcmp.ne.s32.totalorder %v529_v59, 0  ;;  %vm479_vm4 = vmand %vm468_vm0, %vm457_vm15 }
  0x55   : > { %v522_v23 = vsel %vm516_vm7, %v521_v61, %v520_v52  ;;  %v503_v25 = vsub.s32 0, %v21744_v54  ;;  %v490_v26 = vadd.s32 384, %v444_v49  ;;  %vm593_vm3 = vcmp.lt.s32.totalorder %v529_v59, 0 }
  0x56   : > { %v20044_v27 = vmin.u32 %v531_v62, %v21718_v53  ;;  %v549_v30 = vsub.s32 0, %v548_v17  ;;  %v21765_v31 = vsel %vm478_vm14, %v489_v47, %v433_v51  ;;  %v615_v22 = vadd.s32 16, %v529_v59  ;;  %vm604_vm8 = vmand %vm593_vm3, %vm582_vm1 }
  0x57   : > { %vm544_vm5 = vcmp.lt.s32.totalorder %v21701_v34, 0  ;;  %v555_v32 = vand.u32 15, %v20047_v18  ;;  %v538_v33 = vsub.s32 0, %v21753_v21  ;;  %vm581_vm6 = vcmp.ne.s32.totalorder %v522_v23, 0 }
  0x58   : > { %903 = vrot.lane.b32.xlu1 %v21565_v14, %s21380_s21  ;;  %804 = vrot.lane.b32.xlu0 %v21523_v5, %s21381_s22  ;;  %vm592_vm7 = vcmp.lt.s32.totalorder %v522_v23, 0  ;;  %v21775_v28 = vsel %vm21759_vm2, %v488_v19, %v422_v40  ;;  %v20041_v29 = vmin.u32 %v510_v20, %v21740_v63  ;;  %v20040_v35 = vmin.u32 %v503_v25, %v21744_v54  ;;  %v22177_v20 = vld [vmem:[%s25786_s1] sm:$0xf]  ;;  %s21400_s21 = smov 98  }
  0x59   : > { %v566_v37 = vsub.s32 0, %v21765_v31  ;;  %v21782_v38 = vsel %vm479_vm4, %v490_v26, %v444_v49  ;;  %v614_v34 = vadd.s32 16, %v522_v23  ;;  %v534_v39 = vand.u32 15, %v20044_v27  ;;  %vm603_vm9 = vmand %vm592_vm7, %vm581_vm6 }
  0x5a   : > { %v550_v41 = vsel %vm544_vm5, %v549_v30, %v548_v17  ;;  %v556_v42 = vsub.s32 0, %v555_v32  ;;  %v559_v43 = vsub.s32 0, %v21775_v28  ;;  %v20045_v44 = vmin.u32 %v538_v33, %v21753_v21 }
  0x5b   : > { %v21790_v45 = vsel %vm604_vm8, %v615_v22, %v529_v59  ;;  %vm551_vm10 = vcmp.lt.s32.totalorder %v21715_v50, 0  ;;  %v513_v48 = vand.u32 15, %v20041_v29  ;;  %v573_v16 = vsub.s32 0, %v21782_v38 }
  0x5c   : > { %806 = vrot.lane.b32.xlu1 %v21531_v7, %s21381_s22  ;;  %800 = vrot.lane.b32.xlu0 %v21525_v6, %s21381_s22  ;;  %vm585_vm11 = vcmp.ne.s32.totalorder %v550_v41, 0  ;;  %vm596_vm12 = vcmp.lt.s32.totalorder %v550_v41, 0  ;;  %v506_v36 = vand.u32 15, %v20040_v35  ;;  %v21795_v51 = vmin.u32 %v566_v37, %v21765_v31 }
  0x5d   : > { %v21797_v52 = vsel %vm603_vm9, %v614_v34, %v522_v23  ;;  %v535_v40 = vsub.s32 0, %v534_v39  ;;  %vm25798_vm13 = vcmask 269312   ;;  %v618_v50 = vadd.s32 16, %v550_v41  ;;  %vm607_vm0 = vmand %vm596_vm12, %vm585_vm11 }
  0x5e   : > { %v557_v55 = vsel %vm551_vm10, %v556_v42, %v555_v32  ;;  %v21804_v56 = vmin.u32 %v559_v43, %v21775_v28  ;;  %v541_v57 = vand.u32 15, %v20045_v44  ;;  %vm25796_vm14 = vcmp.lt.s32.totalorder %v21790_v45, 16  ;;  %v21899_v42 = vld [vmem:[%s25786_s1 + $0x4] sm:$0xf] }
  0x5f   : > { %vm530_vm15 = vcmp.lt.s32.totalorder %v21718_v53, 0  ;;  %v514_v58 = vsub.s32 0, %v513_v48  ;;  %v21810_v46 = vmin.u32 %v573_v16, %v21782_v38  ;;  %vm670_vm1 = vcmp.ge.s32.totalorder %v21790_v45, 1 }
  0x60   : > { %810 = vrot.lane.b32.xlu1 %v21537_v8, %s21381_s22  ;;  %808 = vrot.lane.b32.xlu0 %v21513_v2, %s21381_s22  ;;  %vm25799_vm2 = vcmask 1043456   ;;  %vm509_vm3 = vcmp.lt.s32.totalorder %v21740_v63, 0  ;;  %v507_v49 = vsub.s32 0, %v506_v36  ;;  %v569_v59 = vand.u32 15, %v21795_v51 }
  0x61   : > { %vm25797_vm4 = vcmp.lt.s32.totalorder %v21797_v52, 16  ;;  %vm586_vm5 = vcmp.ne.s32.totalorder %v557_v55, 0  ;;  %vm597_vm6 = vcmp.lt.s32.totalorder %v557_v55, 0  ;;  %vm502_vm7 = vcmp.lt.s32.totalorder %v21744_v54, 0 }
  0x62   : > { %v21821_v53 = vsel %vm530_vm15, %v535_v40, %v534_v39  ;;  %v21823_v60 = vsel %vm607_vm0, %v618_v50, %v550_v41  ;;  %v562_v61 = vand.u32 15, %v21804_v56  ;;  %v542_v62 = vsub.s32 0, %v541_v57  ;;  %vm21835_vm11 = vmand %vm597_vm6, %vm586_vm5 }
  0x63   : > { %v619_v63 = vadd.s32 16, %v557_v55  ;;  %v515_v17 = vsel %vm509_vm3, %v514_v58, %v513_v48  ;;  %vm537_vm9 = vcmp.lt.s32.totalorder %v21753_v21, 0  ;;  %v576_v47 = vand.u32 15, %v21810_v46  ;;  %vm21854_vm5 = vmand %vm670_vm1, %vm25796_vm14 }
  0x64   : > { %814 = vrot.lane.b32.xlu1 %v21545_v10, %s21381_s22  ;;  %812 = vrot.lane.b32.xlu0 %v21539_v9, %s21381_s22  ;;  %vm669_vm10 = vcmp.ge.s32.totalorder %v21797_v52, 1  ;;  %vm558_vm12 = vcmp.lt.s32.totalorder %v21775_v28, 0  ;;  %v508_v23 = vsel %vm502_vm7, %v507_v49, %v506_v36  ;;  %v570_v24 = vsub.s32 0, %v569_v59 }
  0x65   : > { %vm583_vm15 = vcmp.ne.s32.totalorder %v21821_v53, 0  ;;  %vm594_vm0 = vcmp.lt.s32.totalorder %v21821_v53, 0  ;;  %vm565_vm8 = vcmp.lt.s32.totalorder %v21765_v31, 0  ;;  %v26001_v54 = vmov 0  ;;  %vm21864_vm3 = vmand %vm669_vm10, %vm25797_vm4 }
  0x66   : > { %v26002_v54 = vsel %vm21854_vm5, 4294967295, %v26001_v54  ;;  %v563_v25 = vsub.s32 0, %v562_v61  ;;  %vm580_vm6 = vcmp.ne.s32.totalorder %v515_v17, 0  ;;  %vm591_vm7 = vcmp.lt.s32.totalorder %v515_v17, 0 }
  0x67   : > { %26003 = vst [vmem:[#allocation13_spill] sm:$0xff] %v26002_v54  ;;  %v543_v26 = vsel %vm537_vm9, %v542_v62, %v541_v57  ;;  %v26004_v27 = vmov 0  ;;  %v21870_v30 = vsel %vm21835_vm11, %v619_v63, %v557_v55  ;;  %vm579_vm1 = vcmp.ne.s32.totalorder %v508_v23, 0  ;;  %vm21883_vm10 = vmand %vm591_vm7, %vm580_vm6 }
  0x68   : > { %818 = vrot.lane.b32.xlu1 %v21553_v12, %s21381_s22  ;;  %816 = vrot.lane.b32.xlu0 %v21547_v11, %s21381_s22  ;;  %v26005_v27 = vsel %vm21864_vm3, 4294967295, %v26004_v27  ;;  %vm590_vm14 = vcmp.lt.s32.totalorder %v508_v23, 0  ;;  %v577_v22 = vsub.s32 0, %v576_v47  ;;  %v613_v21 = vadd.s32 16, %v515_v17  ;;  %vm21914_vm7 = vmand %vm594_vm0, %vm583_vm15 }
  0x69   : > { %26006 = vst [vmem:[#allocation14_spill] sm:$0xff] %v26005_v27  ;;  %v612_v29 = vadd.s32 16, %v508_v23  ;;  %v571_v35 = vsel %vm565_vm8, %v570_v24, %v569_v59  ;;  %vm572_vm9 = vcmp.lt.s32.totalorder %v21782_v38, 0  ;;  %vm584_vm11 = vcmp.ne.s32.totalorder %v543_v26, 0  ;;  %vm21905_vm6 = vmand %vm590_vm14, %vm579_vm1 }
  0x6a   : > { %vm595_vm4 = vcmp.lt.s32.totalorder %v543_v26, 0  ;;  %v564_v43 = vsel %vm558_vm12, %v563_v25, %v562_v61  ;;  %v617_v48 = vadd.s32 16, %v543_v26  ;;  %vm599_vm8 = vcmp.lt.s32.totalorder %v571_v35, 0 }
  0x6b   : > { %v578_v28 = vsel %vm572_vm9, %v577_v22, %v576_v47  ;;  %v616_v36 = vadd.s32 16, %v21821_v53  ;;  %vm674_vm12 = vcmp.ge.s32.totalorder %v21870_v30, 1  ;;  %v21928_v40 = vsel %vm21883_vm10, %v613_v21, %v515_v17  ;;  %vm21932_vm15 = vmand %vm595_vm4, %vm584_vm11 }
  0x6c   : > { %822 = vrot.lane.b32.xlu1 %v21565_v14, %s21381_s22  ;;  %820 = vrot.lane.b32.xlu0 %v21518_v4, %s21381_s22  ;;  %vm26015_vm0 = vcmp.lt.s32.totalorder %v21823_v60, 16  ;;  %vm26016_vm1 = vcmp.ge.s32.totalorder %v21823_v60, 1  ;;  %v26017_v50 = vmov 0  ;;  %vm587_vm14 = vcmp.ne.s32.totalorder %v564_v43, 0  ;;  %s21397_s22 = smov 112  }
  0x6d   : > { %vm21940_vm9 = vmand %vm26016_vm1, %vm26015_vm0  ;;  %v21948_v55 = vsel %vm21905_vm6, %v612_v29, %v508_v23  ;;  %v621_v56 = vadd.s32 16, %v571_v35  ;;  %vm600_vm11 = vcmp.lt.s32.totalorder %v578_v28, 0  ;;  %vm26022_vm0 = vcmp.lt.s32.totalorder %v21870_v30, 16 }
  0x6e   : > { %v26018_v50 = vsel %vm21940_vm9, 4294967295, %v26017_v50  ;;  %vm21962_vm1 = vmand %vm674_vm12, %vm26022_vm0  ;;  %v26023_v58 = vmov 0  ;;  %v620_v46 = vadd.s32 16, %v564_v43  ;;  %vm25800_vm6 = vcmp.lt.s32.totalorder %v21928_v40, 16 }
  0x6f   : > { %v26024_v58 = vsel %vm21962_vm1, 4294967295, %v26023_v58  ;;  %v21976_v49 = vsel %vm21914_vm7, %v616_v36, %v21821_v53  ;;  %vm25801_vm12 = vcmp.lt.s32.totalorder %v21948_v55, 16  ;;  %v622_v63 = vadd.s32 16, %v578_v28 }
  0x70   : > { %1883 = vrot.lane.b32.xlu1 %v21523_v5, %s21382_s23  ;;  %1881 = vrot.lane.b32.xlu0 %v21557_v13, %s21382_s23  ;;  %vm26028_vm0 = vcmask 269312   ;;  %v26033_v25 = vmov 0  ;;  %v26195_v3 = vmov 0.0  }
  0x71   : > { %vm26029_vm10 = vmmov %vm26028_vm0 }
  0x74   : > { %1885 = vrot.lane.b32.xlu1 %v21531_v7, %s21382_s23  ;;  %1879 = vrot.lane.b32.xlu0 %v21525_v6, %s21382_s23 }
  0x78   : > { %1889 = vrot.lane.b32.xlu1 %v21537_v8, %s21382_s23  ;;  %1887 = vrot.lane.b32.xlu0 %v21513_v2, %s21382_s23 }
  0x7c   : > { %1893 = vrot.lane.b32.xlu1 %v21545_v10, %s21382_s23  ;;  %1891 = vrot.lane.b32.xlu0 %v21539_v9, %s21382_s23 }
  0x80   : > { %1897 = vrot.lane.b32.xlu1 %v21553_v12, %s21382_s23  ;;  %1895 = vrot.lane.b32.xlu0 %v21547_v11, %s21382_s23 }
  0x84   : > { %2412 = vrot.lane.b32.xlu1 %v21557_v13, %s21383_s25  ;;  %1899 = vrot.lane.b32.xlu0 %v21518_v4, %s21382_s23 }
  0x88   : > { %1901 = vrot.lane.b32.xlu1 %v21565_v14, %s21382_s23  ;;  %2414 = vrot.lane.b32.xlu0 %v21523_v5, %s21383_s25  ;;  %s21391_s23 = smov 2  }
  0x8c   : > { %2416 = vrot.lane.b32.xlu1 %v21531_v7, %s21383_s25  ;;  %2410 = vrot.lane.b32.xlu0 %v21525_v6, %s21383_s25 }
  0x90   : > { %2420 = vrot.lane.b32.xlu1 %v21537_v8, %s21383_s25  ;;  %2418 = vrot.lane.b32.xlu0 %v21513_v2, %s21383_s25 }
  0x94   : > { %2424 = vrot.lane.b32.xlu1 %v21545_v10, %s21383_s25  ;;  %2422 = vrot.lane.b32.xlu0 %v21539_v9, %s21383_s25 }
  0x98   : > { %2428 = vrot.lane.b32.xlu1 %v21553_v12, %s21383_s25  ;;  %2426 = vrot.lane.b32.xlu0 %v21547_v11, %s21383_s25 }
  0x9c   : > { %2432 = vrot.lane.b32.xlu1 %v21565_v14, %s21383_s25  ;;  %2430 = vrot.lane.b32.xlu0 %v21518_v4, %s21383_s25  ;;  %s21392_s25 = smov 1  }
  0xa0   : > { %2980 = vrot.lane.b32.xlu1 %v21523_v5, %s21384_s26  ;;  %2978 = vrot.lane.b32.xlu0 %v21557_v13, %s21384_s26 }
  0xa4   : > { %2982 = vrot.lane.b32.xlu1 %v21531_v7, %s21384_s26  ;;  %2976 = vrot.lane.b32.xlu0 %v21525_v6, %s21384_s26 }
  0xa8   : > { %2986 = vrot.lane.b32.xlu1 %v21537_v8, %s21384_s26  ;;  %2984 = vrot.lane.b32.xlu0 %v21513_v2, %s21384_s26 }
  0xac   : > { %2990 = vrot.lane.b32.xlu1 %v21545_v10, %s21384_s26  ;;  %2988 = vrot.lane.b32.xlu0 %v21539_v9, %s21384_s26 }
  0xb0   : > { %2994 = vrot.lane.b32.xlu1 %v21553_v12, %s21384_s26  ;;  %2992 = vrot.lane.b32.xlu0 %v21547_v11, %s21384_s26 }
  0xb2   : > { %v21828_v18 = vpop.permute.xlu0 %885  ;;  %v21830_v19 = vpop.permute.xlu1 %881 }
  0xb4   : > { %2998 = vrot.lane.b32.xlu1 %v21565_v14, %s21384_s26  ;;  %2996 = vrot.lane.b32.xlu0 %v21518_v4, %s21384_s26  ;;  %s20678_s26 = sld [smem:[#allocation3 + $0x82]] }
  0xb6   : > { %v21872_v32 = vpop.permute.xlu0 %889  ;;  %v888_v33 = vpop.permute.xlu1 %887 }
  0xb7   : > { %v909_v37 = vsel %vm25798_vm13, %v888_v33, %v21872_v32  ;;  %v908_v34 = vsel %vm25798_vm13, %v21828_v18, %v888_v33  ;;  %vm588_vm13 = vcmp.ne.s32.totalorder %v571_v35, 0 }
  0xb8   : > { %3524 = vrot.lane.b32.xlu1 %v21523_v5, %s21385_s27  ;;  %3522 = vrot.lane.b32.xlu0 %v21557_v13, %s21385_s27  ;;  %v931_v31 = vsel %vm21854_vm5, %v909_v37, 0.0  ;;  %v930_v41 = vsel %vm21864_vm3, %v908_v34, 0.0  ;;  %vm21956_vm4 = vmand %vm599_vm8, %vm588_vm13  ;;  %vm26025_vm13 = vcmp.lt.s32.totalorder %v564_v43, 0  ;;  %v26042_v34 = vmov 0 }
  0xb9   : > { %20058 = vmatprep.subr.msk.mxu1 %vm25799_vm2, %v931_v31  ;;  %vm21980_vm8 = vmand %vm26025_vm13, %vm587_vm14  ;;  %v21990_v53 = vsel %vm21956_vm4, %v621_v56, %v571_v35  ;;  %vm26032_vm14 = vcmp.ge.s32.totalorder %v21928_v40, 1  ;;  %vm26107_vm5 = vcmask 31744  }
  0xba   : > { %v894_v16 = vpop.permute.xlu0 %893  ;;  %20059 = vmatpush1.msk.msra.mxu1 %vm25799_vm2, %v930_v41  ;;  %v21922_v51 = vpop.permute.xlu1 %891  ;;  %vm26019_vm2 = vcmask 31744   ;;  %vm25804_vm13 = vcmp.lt.s32.totalorder %v21990_v53, 16 }
  0xbb   : > { %20060 = vmatmul.mubr.msk.f32.vlgmr.msra.gmra.mrb[0].mxu1 %vm26019_vm2, %v21899_v42  ;;  %vm589_vm2 = vcmp.ne.s32.totalorder %v578_v28, 0 }
  0xbc   : > { %3526 = vrot.lane.b32.xlu1 %v21531_v7, %s21385_s27  ;;  %3520 = vrot.lane.b32.xlu0 %v21525_v6, %s21385_s27  ;;  %v21970_v7 = vsel %vm21932_vm15, %v617_v48, %v543_v26  ;;  %vm667_vm15 = vcmp.ge.s32.totalorder %v21948_v55, 1  ;;  %vm21994_vm7 = vmand %vm600_vm11, %vm589_vm2  ;;  %vm25802_vm11 = vcmp.lt.s32.totalorder %v21976_v49, 16  ;;  %v26036_v26 = vmov 0 }
  0xbd   : > { %1254 = vmatprep.mubr.f32.mxu1 %v25861_v0  ;;  %vm25803_vm4 = vcmp.lt.s32.totalorder %v21970_v7, 16  ;;  %vm672_vm2 = vcmp.ge.s32.totalorder %v21970_v7, 1  ;;  %v22036_v21 = vsel %vm21994_vm7, %v622_v63, %v578_v28  ;;  %vm26044_vm7 = vcmask 31744  }
  0xbe   : > { %v898_v59 = vpop.permute.xlu0 %897  ;;  %v896_v61 = vpop.permute.xlu1 %895 }
  0xbf   : > { %v912_v17 = vsel %vm26028_vm0, %v894_v16, %v896_v61  ;;  %v913_v47 = vsel %vm26029_vm10, %v896_v61, %v898_v59  ;;  %vm22010_vm10 = vmand %vm26032_vm14, %vm25800_vm6  ;;  %vm26035_vm0 = vcmask 1043456   ;;  %v22154_v61 = vld [vmem:[#allocation2 + $0x8] sm:$0xff] }
  0xc0   : > { %v934_v23 = vsel %vm21940_vm9, %v912_v17, 0.0  ;;  %3530 = vrot.lane.b32.xlu1 %v21537_v8, %s21385_s27  ;;  %3528 = vrot.lane.b32.xlu0 %v21513_v2, %s21385_s27  ;;  %v935_v24 = vsel %vm21962_vm1, %v913_v47, 0.0  ;;  %v26034_v25 = vsel %vm22010_vm10, 4294967295, %v26033_v25  ;;  %v22021_v8 = vsel %vm21980_vm8, %v620_v46, %v564_v43  ;;  %vm22027_vm14 = vmand %vm667_vm15, %vm25801_vm12 }
  0xc1   : > { %20064 = vmatprep.subr.msk.mxu1 %vm26035_vm0, %v935_v24  ;;  %v26037_v26 = vsel %vm22027_vm14, 4294967295, %v26036_v26  ;;  %vm26038_vm6 = vmmov %vm26035_vm0  ;;  %vm676_vm0 = vcmp.ge.s32.totalorder %v21990_v53, 1  ;;  %vm26039_vm8 = vcmask 269312   ;;  %v26056_v43 = vmov 0 }
  0xc2   : > { %20065 = vmatpush1.msk.msra.mxu1 %vm26038_vm6, %v934_v23  ;;  %v900_v22 = vpop.permute.xlu1 %899  ;;  %v884_v33 = vpop.permute.xlu0 %883  ;;  %v911_v29 = vsel %vm26039_vm8, %v21922_v51, %v894_v16  ;;  %vm26040_vm15 = vmmov %vm26039_vm8  ;;  %vm26061_vm9 = vcmask 1043456   ;;  %v26065_v16 = vmov 0  ;;  %v22171_v47 = vcombine.high %v22154_v61, %v22154_v61  ;;  %v22188_v23 = vld [vmem:[#allocation2 + $0x10] sm:$0xff] }
  0xc3   : > { %v907_v35 = vsel %vm26040_vm15, %v884_v33, %v21828_v18  ;;  %vm26041_vm12 = vmmov %vm26039_vm8  ;;  %20822 = vmatprep.subr.mxu1 %v25861_v0  ;;  %20066 = vmatmul.mubr.msk.f32.vlgmr.msra.gmra.mrb[2].mxu1 %vm26044_vm7, %v21899_v42  ;;  %vm26045_vm8 = vcmp.ge.s32.totalorder %v21976_v49, 1  ;;  %v26046_v18 = vmov 0  ;;  %v26090_v24 = vmov 0 }
  0xc4   : > { %v906_v37 = vsel %vm26041_vm12, %v21830_v19, %v884_v33  ;;  %vm22048_vm6 = vmand %vm672_vm2, %vm25803_vm4  ;;  %3534 = vrot.lane.b32.xlu1 %v21545_v10, %s21385_s27  ;;  %3532 = vrot.lane.b32.xlu0 %v21539_v9, %s21385_s27  ;;  %v929_v19 = vsel %vm22010_vm10, %v907_v35, 0.0  ;;  %v26050_v10 = vmov 0  ;;  %vm25805_vm2 = vmmov 0  }
  0xc5   : > { %v26043_v34 = vsel %vm22048_vm6, 4294967295, %v26042_v34  ;;  %vm22059_vm15 = vmand %vm26045_vm8, %vm25802_vm11  ;;  %v928_v39 = vsel %vm22027_vm14, %v906_v37, 0.0  ;;  %vm26049_vm8 = vcmask 1043456   ;;  %20824 = vmatprep.mubr.msk.f32.mxu1 %vm25805_vm2, %v25861_v0  ;;  %v933_v41 = vsel %vm22048_vm6, %v911_v29, 0.0 }
  0xc6   : > { %v26047_v18 = vsel %vm22059_vm15, 4294967295, %v26046_v18  ;;  %vm26048_vm7 = vmmov %vm26041_vm12  ;;  %20055 = vmatprep.subr.msk.mxu0 %vm26049_vm8, %v929_v19  ;;  %v803_v9 = vpop.permute.xlu1 %802  ;;  %v22209_v37 = vcombine.high %v22188_v23, %v22188_v23  ;;  %vm26104_vm6 = vcmask 277504   ;;  %vm26114_vm14 = vcmask 277504  }
  0xc7   : > { %v910_v31 = vsel %vm26048_vm7, %v21872_v32, %v21922_v51  ;;  %vm22081_vm11 = vmand %vm676_vm0, %vm25804_vm13  ;;  %v902_v32 = vpop.permute.xlu0 %901  ;;  %vm677_vm0 = vcmp.ge.s32.totalorder %v22036_v21, 1  ;;  %vm26055_vm13 = vcmp.ge.s32.totalorder %v22021_v8, 1  ;;  %v26199_v2 = vmov 0 }
  0xc8   : > { %v26051_v10 = vsel %vm22081_vm11, 4294967295, %v26050_v10  ;;  %vm26053_vm12 = vmmov %vm26049_vm8  ;;  %vm26054_vm8 = vcmp.lt.s32.totalorder %v22021_v8, 16  ;;  %v932_v44 = vsel %vm22059_vm15, %v910_v31, 0.0  ;;  %3538 = vrot.lane.b32.xlu1 %v21553_v12, %s21385_s27  ;;  %3536 = vrot.lane.b32.xlu0 %v21547_v11, %s21385_s27  ;;  %v26070_v12 = vmov 0  ;;  %v22223_v31 = vld [vmem:[#allocation2 + $0x18] sm:$0xff] }
  0xc9   : > { %26052 = vst [vmem:[#allocation15_spill] sm:$0xff] %v26051_v10  ;;  %20056 = vmatpush1.msk.msra.mxu0 %vm26053_vm12, %v928_v39  ;;  %vm22097_vm4 = vmand %vm26055_vm13, %vm26054_vm8  ;;  %vm26060_vm12 = vcmask 31744   ;;  %vm26064_vm8 = vcmp.ge.s32.totalorder %v21928_v40, 2  ;;  %vm634_vm13 = vcmp.ge.s32.totalorder %v21948_v55, 2  ;;  %vm26095_vm15 = vcmask 31744  }
  0xca   : > { %v26057_v43 = vsel %vm22097_vm4, 4294967295, %v26056_v43  ;;  %vm26059_vm2 = vmmov %vm26048_vm7  ;;  %20057 = vmatmul.mubr.msk.f32.vlgmr.msra.gmra.mrb[0].mxu0 %vm26060_vm12, %v21899_v42  ;;  %20061 = vmatprep.subr.msk.mxu0 %vm26061_vm9, %v933_v41  ;;  %vm26068_vm12 = vcmask 1043456   ;;  %v904_v11 = vpop.permute.xlu1 %903  ;;  %v26098_v39 = vmov 0 }
  0xcb   : > { %26058 = vst [vmem:[#allocation16_spill] sm:$0xff] %v26057_v43  ;;  %v915_v5 = vsel %vm26059_vm2, %v900_v22, %v902_v32  ;;  %vm26062_vm7 = vmmov %vm26059_vm2  ;;  %vm26063_vm2 = vcmp.lt.s32.totalorder %v21928_v40, 16  ;;  %20062 = vmatpush1.msk.msra.mxu0 %vm26068_vm12, %v932_v44  ;;  %1184 = vmatprep.mubr.f32.mxu0 %v25861_v0  ;;  %v805_v36 = vpop.permute.xlu0 %804 }
  0xcc   : > { %v914_v48 = vsel %vm26062_vm7, %v898_v59, %v900_v22  ;;  %v937_v28 = vsel %vm22081_vm11, %v915_v5, 0.0  ;;  %vm22118_vm9 = vmand %vm26064_vm8, %vm26063_vm2  ;;  %vm26069_vm7 = vcmp.lt.s32.totalorder %v22036_v21, 16  ;;  %vm26073_vm2 = vcmask 269312   ;;  %3542 = vrot.lane.b32.xlu1 %v21565_v14, %s21385_s27  ;;  %3540 = vrot.lane.b32.xlu0 %v21518_v4, %s21385_s27  ;;  %s21398_s27 = smov 111  }
  0xcd   : > { %v26066_v16 = vsel %vm22118_vm9, 4294967295, %v26065_v16  ;;  %vm22125_vm1 = vmand %vm677_vm0, %vm26069_vm7  ;;  %v936_v51 = vsel %vm22097_vm4, %v914_v48, 0.0  ;;  %v916_v38 = vsel %vm26073_vm2, %v902_v32, %v904_v11  ;;  %vm26074_vm8 = vcmask 277504  }
  0xce   : > { %26067 = vst [vmem:[#allocation17_spill] sm:$0xff] %v26066_v16  ;;  %v26071_v12 = vsel %vm22125_vm1, 4294967295, %v26070_v12  ;;  %vm26072_vm11 = vmmov %vm26068_vm12  ;;  %v826_v56 = vsel %vm26074_vm8, %v803_v9, %v805_v36  ;;  %vm26075_vm0 = vcmask 31744   ;;  %v938_v57 = vsel %vm22125_vm1, %v916_v38, 0.0  ;;  %v807_v62 = vpop.permute.xlu1 %806 }
  0xcf   : > { %20067 = vmatprep.subr.msk.mxu0 %vm26072_vm11, %v937_v28  ;;  %20063 = vmatmul.mubr.msk.f32.vlgmr.msra.gmra.mrb[2].mxu0 %vm26075_vm0, %v21899_v42  ;;  %vm26076_vm12 = vmmov %vm26072_vm11  ;;  %v848_v46 = vsel %vm22118_vm9, %v826_v56, 0.0  ;;  %vm26077_vm7 = vcmp.lt.s32.totalorder %v21948_v55, 16  ;;  %v26078_v59 = vmov 0  ;;  %v801_v14 = vpop.permute.xlu0 %800  ;;  %vm637_vm0 = vcmp.ge.s32.totalorder %v21790_v45, 2 }
  0xd0   : > { %20068 = vmatpush1.msk.msra.mxu0 %vm26076_vm12, %v936_v51  ;;  %20823 = vmatpush3.msk.msra.mxu1 %vm26072_vm11, %v938_v57  ;;  %vm22150_vm2 = vmand %vm634_vm13, %vm26077_vm7  ;;  %vm636_vm12 = vcmp.ge.s32.totalorder %v21797_v52, 2  ;;  %vm26082_vm4 = vcmask 277504   ;;  %vm26086_vm7 = vcmp.lt.s32.totalorder %v21790_v45, 16  ;;  %vm26093_vm1 = vcmask 277504  }
  0xd1   : > { %v26079_v59 = vsel %vm22150_vm2, 4294967295, %v26078_v59  ;;  %vm26081_vm8 = vmmov %vm26072_vm11  ;;  %1325 = vmatprep.mubr.f32.mxu0 %v25861_v0  ;;  %v825_v63 = vsel %vm26082_vm4, %v801_v14, %v803_v9  ;;  %vm26083_vm11 = vcmask 31744   ;;  %4068 = vrot.lane.b32.xlu1 %v22154_v61, %s21387_s30  ;;  %v827_v22 = vsel %vm26093_vm1, %v805_v36, %v807_v62  ;;  %v22259_v36 = vld [vmem:[#allocation2 + $0x20] sm:$0xff] }
  0xd2   : > { %26080 = vst [vmem:[#allocation18_spill] sm:$0xff] %v26079_v59  ;;  %20072 = vmatprep.subr.msk.mxu0 %vm26081_vm8, %v848_v46  ;;  %vm26084_vm13 = vmmov %vm26083_vm11  ;;  %v847_v17 = vsel %vm22150_vm2, %v825_v63, 0.0  ;;  %4066 = vrot.lane.b32.xlu0 %v21557_v13, %s21387_s30  ;;  %v811_v33 = vpop.permute.xlu1 %810  ;;  %v26101_v9 = vmov 0  ;;  %v22244_v48 = vcombine.high %v22223_v31, %v22223_v31  ;;  %v26109_v11 = vmov 0 }
  0xd3   : > { %20069 = vmatmul.mubr.msk.f32.vlgmr.msra.gmra.mrb[4].mxu0 %vm26083_vm11, %v21899_v42  ;;  %20825 = vmatmul.mubr.msk.f32.vlgmr.msra.gmra.mrb[4].mxu1 %vm26084_vm13, %v21899_v42  ;;  %vm26085_vm4 = vmmov %vm26081_vm8  ;;  %v26087_v42 = vmov 0  ;;  %vm26089_vm11 = vcmp.lt.s32.totalorder %v21797_v52, 16  ;;  %v809_v13 = vpop.permute.xlu0 %808  ;;  %v26112_v51 = vmov 0  ;;  %v26118_v14 = vmov 0 }
  0xd4   : > { %1501 = vmatprep.mubr.f32.mxu0 %v25861_v0  ;;  %20073 = vmatpush1.msk.msra.mxu0 %vm26085_vm4, %v847_v17  ;;  %vm22184_vm8 = vmand %vm637_vm0, %vm26086_vm7  ;;  %vm639_vm4 = vcmp.ge.s32.totalorder %v21970_v7, 2  ;;  %vm638_vm0 = vcmp.ge.s32.totalorder %v21976_v49, 2  ;;  %v829_v32 = vsel %vm26104_vm6, %v809_v13, %v811_v33  ;;  %v22286_v63 = vcombine.high %v22259_v36, %v22259_v36 }
  0xd5   : > { %v26088_v42 = vsel %vm22184_vm8, 4294967295, %v26087_v42  ;;  %vm22192_vm13 = vmand %vm636_vm12, %vm26089_vm11  ;;  %1572 = vmatprep.mubr.f32.mxu1 %v25861_v0  ;;  %4070 = vrot.lane.b32.xlu1 %v22171_v47, %s21387_s30  ;;  %vm26100_vm11 = vcmp.lt.s32.totalorder %v21976_v49, 16 }
  0xd6   : > { %v26091_v24 = vsel %vm22192_vm13, 4294967295, %v26090_v24  ;;  %vm26094_vm7 = vmmov %vm26093_vm1  ;;  %v849_v19 = vsel %vm22192_vm13, %v827_v22, 0.0  ;;  %4064 = vrot.lane.b32.xlu0 %v21525_v6, %s21387_s30  ;;  %vm26096_vm1 = vcmask 1043456   ;;  %v815_v41 = vpop.permute.xlu1 %814  ;;  %v26122_v22 = vmov 0 }
  0xd7   : > { %26092 = vst [vmem:[#allocation19_spill] sm:$0xff] %v26091_v24  ;;  %v828_v29 = vsel %vm26094_vm7, %v807_v62, %v809_v13  ;;  %20074 = vmatmul.mubr.msk.f32.vlgmr.msra.gmra.mrb[0].mxu0 %vm26095_vm15, %v22177_v20  ;;  %vm26097_vm15 = vcmp.lt.s32.totalorder %v21970_v7, 16  ;;  %vm22227_vm7 = vmand %vm638_vm0, %vm26100_vm11  ;;  %v813_v6 = vpop.permute.xlu0 %812  ;;  %vm644_vm0 = vcmp.ge.s32.totalorder %v22036_v21, 2  ;;  %vm26111_vm11 = vcmp.lt.s32.totalorder %v21823_v60, 16 }
  0xd8   : > { %v850_v35 = vsel %vm22184_vm8, %v828_v29, 0.0  ;;  %1642 = vmatprep.mubr.f32.mxu0 %v25861_v0  ;;  %vm22219_vm12 = vmand %vm639_vm4, %vm26097_vm15  ;;  %v26102_v9 = vsel %vm22227_vm7, 4294967295, %v26101_v9  ;;  %vm640_vm4 = vcmp.ge.s32.totalorder %v21823_v60, 2  ;;  %v851_v28 = vsel %vm22227_vm7, %v829_v32, 0.0 }
  0xd9   : > { %20075 = vmatprep.subr.msk.mxu1 %vm26096_vm1, %v850_v35  ;;  %v26099_v39 = vsel %vm22219_vm12, 4294967295, %v26098_v39  ;;  %26103 = vst [vmem:[#allocation20_spill] sm:$0xff] %v26102_v9  ;;  %vm26105_vm3 = vmmov %vm26096_vm1  ;;  %vm641_vm1 = vcmp.ge.s32.totalorder %v21870_v30, 2  ;;  %4074 = vrot.lane.b32.xlu1 %v22209_v37, %s21387_s30  ;;  %v831_v38 = vsel %vm26114_vm14, %v813_v6, %v815_v41  ;;  %vm26116_vm7 = vcmask 31744  }
  0xda   : > { %20076 = vmatpush1.msk.msra.mxu1 %vm26105_vm3, %v849_v19  ;;  %vm26106_vm15 = vmmov %vm26104_vm6  ;;  %4072 = vrot.lane.b32.xlu0 %v22188_v23, %s21387_s30  ;;  %v819_v56 = vpop.permute.xlu1 %818  ;;  %v26125_v13 = vmov 0 }
  0xdb   : > { %v830_v5 = vsel %vm26106_vm15, %v811_v33, %v813_v6  ;;  %20077 = vmatmul.mubr.msk.f32.vlgmr.msra.gmra.mrb[6].mxu1 %vm26107_vm5, %v22177_v20  ;;  %vm26108_vm5 = vcmp.lt.s32.totalorder %v21870_v30, 16  ;;  %vm22263_vm15 = vmand %vm640_vm4, %vm26111_vm11  ;;  %v817_v57 = vpop.permute.xlu0 %816  ;;  %v22300_v33 = vld [vmem:[#allocation2 + $0x28] sm:$0xff]  ;;  %vm26124_vm11 = vcmp.lt.s32.totalorder %v22021_v8, 16 }
  0xdc   : > { %v852_v44 = vsel %vm22219_vm12, %v830_v5, 0.0  ;;  %1712 = vmatprep.mubr.f32.mxu1 %v25861_v0  ;;  %vm22254_vm6 = vmand %vm641_vm1, %vm26108_vm5  ;;  %v26113_v51 = vsel %vm22263_vm15, 4294967295, %v26112_v51  ;;  %vm643_vm1 = vcmp.ge.s32.totalorder %v21990_v53, 2  ;;  %vm642_vm5 = vcmp.ge.s32.totalorder %v22021_v8, 2 }
  0xdd   : > { %20078 = vmatprep.subr.msk.mxu0 %vm26105_vm3, %v852_v44  ;;  %v26110_v11 = vsel %vm22254_vm6, 4294967295, %v26109_v11  ;;  %vm26115_vm10 = vmmov %vm26114_vm14  ;;  %4078 = vrot.lane.b32.xlu1 %v22244_v48, %s21387_s30  ;;  %vm26117_vm14 = vcmp.lt.s32.totalorder %v22036_v21, 16  ;;  %v853_v17 = vsel %vm22263_vm15, %v831_v38, 0.0  ;;  %v22323_v44 = vcombine.high %v22300_v33, %v22300_v33 }
  0xde   : > { %20079 = vmatpush1.msk.msra.mxu0 %vm26105_vm3, %v851_v28  ;;  %v832_v46 = vsel %vm26115_vm10, %v815_v41, %v817_v57  ;;  %vm22280_vm4 = vmand %vm644_vm0, %vm26117_vm14  ;;  %4076 = vrot.lane.b32.xlu0 %v22223_v31, %s21387_s30  ;;  %vm26127_vm14 = vcmask 277504   ;;  %v823_v35 = vpop.permute.xlu1 %822 }
  0xdf   : > { %20080 = vmatmul.mubr.msk.f32.vlgmr.msra.gmra.mrb[6].mxu0 %vm26116_vm7, %v22177_v20  ;;  %v854_v62 = vsel %vm22254_vm6, %v832_v46, 0.0  ;;  %v26119_v14 = vsel %vm22280_vm4, 4294967295, %v26118_v14  ;;  %vm26120_vm10 = vmmov %vm26105_vm3  ;;  %vm26121_vm7 = vcmp.lt.s32.totalorder %v21990_v53, 16  ;;  %v833_v29 = vsel %vm26127_vm14, %v817_v57, %v819_v56  ;;  %v821_v19 = vpop.permute.xlu0 %820  ;;  %v22334_v57 = vld [vmem:[#allocation2] sm:$0xff] }
  0xe0   : > { %1783 = vmatprep.mubr.f32.mxu0 %v25861_v0  ;;  %20081 = vmatprep.subr.msk.mxu1 %vm26120_vm10, %v854_v62  ;;  %vm22296_vm0 = vmand %vm643_vm1, %vm26121_vm7  ;;  %vm26131_vm7 = vcmask 31744   ;;  %v22348_v62 = vcombine.high %v22334_v57, %v22334_v57  ;;  %vm26170_vm6 = vcmask 31744  }
  0xe1   : > { %v26123_v22 = vsel %vm22296_vm0, 4294967295, %v26122_v22  ;;  %vm22304_vm3 = vmand %vm642_vm5, %vm26124_vm11  ;;  %4082 = vrot.lane.b32.xlu1 %v22286_v63, %s21387_s30  ;;  %vm26132_vm5 = vmmov 0   ;;  %vm26133_vm11 = vcmask 1043456  }
  0xe2   : > { %v26126_v13 = vsel %vm22304_vm3, 4294967295, %v26125_v13  ;;  %vm26128_vm15 = vmmov %vm26120_vm10  ;;  %v855_v28 = vsel %vm22304_vm3, %v833_v29, 0.0  ;;  %4080 = vrot.lane.b32.xlu0 %v22259_v36, %s21387_s30  ;;  %v1884_v38 = vpop.permute.xlu1 %1883 }
  0xe3   : > { %20082 = vmatpush1.msk.msra.mxu1 %vm26128_vm15, %v853_v17  ;;  %vm26129_vm10 = vmmov %vm26127_vm14  ;;  %vm25835_vm15 = vcmask 261120  }
  0xe4   : > { %v834_v32 = vsel %vm26129_vm10, %v819_v56, %v821_v19  ;;  %vm26130_vm1 = vmmov %vm26129_vm10  ;;  %20827 = vmatprep.subr.mxu1 %v25861_v0  ;;  %20083 = vmatmul.mubr.msk.f32.vlgmr.msra.gmra.mrb[2].mxu1 %vm26131_vm7, %v22177_v20  ;;  %v1882_v56 = vpop.permute.xlu0 %1881 }
  0xe5   : > { %v835_v41 = vsel %vm26130_vm1, %v821_v19, %v823_v35  ;;  %v856_v5 = vsel %vm22296_vm0, %v834_v32, 0.0  ;;  %20829 = vmatprep.mubr.msk.f32.mxu1 %vm26132_vm5, %v25861_v0  ;;  %vm26134_vm14 = vmmov %vm26133_vm11  ;;  %v1905_v46 = vsel %vm25835_vm15, %v1882_v56, %v1884_v38  ;;  %4086 = vrot.lane.b32.xlu1 %v22323_v44, %s21387_s30  ;;  %vm700_vm0 = vcmp.lt.s32.totalorder %v21948_v55, 15 }
  0xe6   : > { %v857_v6 = vsel %vm22280_vm4, %v835_v41, 0.0  ;;  %20084 = vmatprep.subr.msk.mxu0 %vm26133_vm11, %v856_v5  ;;  %vm26135_vm10 = vmmov %vm26133_vm11  ;;  %4084 = vrot.lane.b32.xlu0 %v22300_v33, %s21387_s30  ;;  %v1886_v17 = vpop.permute.xlu1 %1885  ;;  %vm26154_vm4 = vcmask 252928  }
  0xe7   : > { %20828 = vmatpush3.msk.msra.mxu1 %vm26134_vm14, %v857_v6  ;;  %20085 = vmatpush1.msk.msra.mxu0 %vm26135_vm10, %v855_v28  ;;  %vm26136_vm1 = vmmov %vm26131_vm7  ;;  %v1906_v6 = vsel %vm25835_vm15, %v1884_v38, %v1886_v17 }
  0xe8   : > { %20086 = vmatmul.mubr.msk.f32.vlgmr.msra.gmra.mrb[8].mxu0 %vm26136_vm1, %v22177_v20  ;;  %vm26137_vm7 = vmmov %vm26136_vm1  ;;  %v1880_v29 = vpop.permute.xlu0 %1879 }
  0xe9   : > { %20830 = vmatmul.mubr.msk.f32.vlgmr.msra.gmra.mrb[8].mxu1 %vm26137_vm7, %v22177_v20  ;;  %vm26138_vm11 = vmmov %vm26135_vm10  ;;  %2004 = vmatprep.mubr.f32.mxu0 %v25861_v0  ;;  %v22354_v20 = vld [vmem:[%s25786_s1 + $0x8] sm:$0xf]  ;;  %v1904_v35 = vsel %vm25835_vm15, %v1880_v29, %v1882_v56 }
  0xea   : > { %20090 = vmatprep.subr.msk.mxu0 %vm26138_vm11, %v1905_v46  ;;  %2075 = vmatprep.mubr.f32.mxu1 %v25861_v0  ;;  %vm26139_vm14 = vmmov %vm26135_vm10  ;;  %v1890_v19 = vpop.permute.xlu1 %1889 }
  0xeb   : > { %4614 = vrot.lane.b32.xlu1 %v22154_v61, %s21388_s12  ;;  %20091 = vmatpush1.msk.msra.mxu0 %vm26139_vm14, %v1904_v35  ;;  %vm26140_vm10 = vmmov %vm26136_vm1 }
  0xec   : > { %4612 = vrot.lane.b32.xlu0 %v22348_v62, %s21388_s12  ;;  %20092 = vmatmul.mubr.msk.f32.vlgmr.msra.gmra.mrb[0].mxu0 %vm26140_vm10, %v22354_v20  ;;  %v1888_v32 = vpop.permute.xlu0 %1887  ;;  %vm26141_vm1 = vmmov %vm26138_vm11 }
  0xed   : > { %2145 = vmatprep.mubr.f32.mxu0 %v25861_v0  ;;  %v1907_v41 = vsel %vm25835_vm15, %v1886_v17, %v1888_v32  ;;  %vm26142_vm7 = vmmov %vm26141_vm1  ;;  %v1908_v38 = vsel %vm25835_vm15, %v1888_v32, %v1890_v19 }
  0xee   : > { %20093 = vmatprep.subr.msk.mxu1 %vm26141_vm1, %v1907_v41  ;;  %v1894_v5 = vpop.permute.xlu1 %1893  ;;  %vm26143_vm11 = vmmov %vm26140_vm10 }
  0xef   : > { %4616 = vrot.lane.b32.xlu1 %v22171_v47, %s21388_s12  ;;  %20094 = vmatpush1.msk.msra.mxu1 %vm26142_vm7, %v1906_v6  ;;  %vm26144_vm14 = vmmov %vm26141_vm1 }
  0xf0   : > { %4610 = vrot.lane.b32.xlu0 %v22334_v57, %s21388_s12  ;;  %v1892_v28 = vpop.permute.xlu0 %1891  ;;  %20095 = vmatmul.mubr.msk.f32.vlgmr.msra.gmra.mrb[10].mxu1 %vm26143_vm11, %v22354_v20  ;;  %vm26145_vm10 = vmmov %vm26141_vm1 }
  0xf1   : > { %v1909_v56 = vsel %vm25835_vm15, %v1890_v19, %v1892_v28  ;;  %2215 = vmatprep.mubr.f32.mxu1 %v25861_v0  ;;  %vm26146_vm1 = vmmov %vm26143_vm11  ;;  %v1910_v35 = vsel %vm25835_vm15, %v1892_v28, %v1894_v5 }
  0xf2   : > { %20096 = vmatprep.subr.msk.mxu0 %vm26144_vm14, %v1909_v56  ;;  %v1898_v46 = vpop.permute.xlu1 %1897  ;;  %vm26147_vm11 = vmmov %vm26142_vm7 }
  0xf3   : > { %4620 = vrot.lane.b32.xlu1 %v22209_v37, %s21388_s12  ;;  %20097 = vmatpush1.msk.msra.mxu0 %vm26145_vm10, %v1908_v38  ;;  %vm26148_vm14 = vmmov %vm26146_vm1  ;;  %vm25840_vm10 = vcmp.ge.s32.totalorder %v21928_v40, 0 }
  0xf4   : > { %4618 = vrot.lane.b32.xlu0 %v22188_v23, %s21388_s12  ;;  %v1896_v17 = vpop.permute.xlu0 %1895  ;;  %20098 = vmatmul.mubr.msk.f32.vlgmr.msra.gmra.mrb[10].mxu0 %vm26146_vm1, %v22354_v20  ;;  %vm701_vm1 = vcmp.lt.s32.totalorder %v21928_v40, 15 }
  0xf5   : > { %v1911_v29 = vsel %vm25835_vm15, %v1894_v5, %v1896_v17  ;;  %2286 = vmatprep.mubr.f32.mxu0 %v25861_v0  ;;  %v1912_v6 = vsel %vm25835_vm15, %v1896_v17, %v1898_v46  ;;  %vm22413_vm3 = vmand %vm25840_vm10, %vm701_vm1  ;;  %v26150_v5 = vmov 0  ;;  %vm25851_vm10 = vcmp.ge.s32.totalorder %v21797_v52, 0 }
  0xf6   : > { %20099 = vmatprep.subr.msk.mxu1 %vm26142_vm7, %v1911_v29  ;;  %v2413_v19 = vpop.permute.xlu1 %2412  ;;  %v26151_v5 = vsel %vm22413_vm3, 4294967295, %v26150_v5  ;;  %v26157_v29 = vmov 0 }
  0xf7   : > { %4624 = vrot.lane.b32.xlu1 %v22244_v48, %s21388_s12  ;;  %20100 = vmatpush1.msk.msra.mxu1 %vm26147_vm11, %v1910_v35  ;;  %vm26153_vm11 = vcmask 261120  }
  0xf8   : > { %4622 = vrot.lane.b32.xlu0 %v22223_v31, %s21388_s12  ;;  %v1900_v32 = vpop.permute.xlu0 %1899  ;;  %20832 = vmatprep.subr.mxu1 %v25861_v0 }
  0xf9   : > { %20101 = vmatmul.mubr.msk.f32.vlgmr.msra.gmra.mrb[2].mxu1 %vm26148_vm14, %v22354_v20  ;;  %v1913_v41 = vsel %vm25835_vm15, %v1898_v46, %v1900_v32  ;;  %vm26149_vm14 = vmmov %vm26142_vm7  ;;  %vm25843_vm15 = vcmp.ge.s32.totalorder %v21948_v55, 0 }
  0xfa   : > { %20834 = vmatprep.mubr.msk.f32.mxu1 %vm26132_vm5, %v25861_v0  ;;  %20102 = vmatprep.subr.msk.mxu0 %vm26142_vm7, %v1913_v41  ;;  %v1902_v28 = vpop.permute.xlu1 %1901  ;;  %vm26152_vm7 = vcmask 31744   ;;  %vm26155_vm1 = vmmov %vm26149_vm14 }
  0xfb   : > { %4628 = vrot.lane.b32.xlu1 %v22286_v63, %s21388_s12  ;;  %20103 = vmatpush1.msk.msra.mxu0 %vm26149_vm14, %v1912_v6  ;;  %v1914_v38 = vsel %vm26153_vm11, %v1900_v32, %v1902_v28  ;;  %vm26156_vm14 = vmmov %vm26155_vm1  ;;  %v22448_v6 = vld [vmem:[%s25786_s1 + $0xc] sm:$0xf] }
  0xfc   : > { %4626 = vrot.lane.b32.xlu0 %v22259_v36, %s21388_s12  ;;  %v2415_v56 = vpop.permute.xlu0 %2414  ;;  %20104 = vmatmul.mubr.msk.f32.vlgmr.msra.gmra.mrb[12].mxu0 %vm26152_vm7, %v22354_v20  ;;  %vm22434_vm11 = vmand %vm25843_vm15, %vm700_vm0  ;;  %vm703_vm7 = vcmp.lt.s32.totalorder %v21790_v45, 15  ;;  %vm26162_vm0 = vcmask 1043456   ;;  %vm26169_vm15 = vcmask 252928  }
  0xfd   : > { %v2436_v46 = vsel %vm26154_vm4, %v2413_v19, %v2415_v56  ;;  %2570 = vmatprep.mubr.f32.mxu0 %v25861_v0  ;;  %20833 = vmatpush3.msk.msra.mxu1 %vm26155_vm1, %v1914_v38  ;;  %v26158_v29 = vsel %vm22434_vm11, 4294967295, %v26157_v29  ;;  %vm25848_vm4 = vcmp.ge.s32.totalorder %v21790_v45, 0  ;;  %vm26160_vm1 = vcmask 31744   ;;  %vm26171_vm12 = vmmov %vm26169_vm15 }
  0xfe   : > { %v2458_v17 = vsel %vm22413_vm3, %v2436_v46, 0.0  ;;  %26159 = vst [vmem:[#allocation21_spill] sm:$0xff] %v26158_v29  ;;  %v2417_v35 = vpop.permute.xlu1 %2416  ;;  %20835 = vmatmul.mubr.msk.f32.vlgmr.msra.gmra.mrb[12].mxu1 %vm26160_vm1, %v22354_v20  ;;  %vm702_vm3 = vcmp.lt.s32.totalorder %v21797_v52, 15  ;;  %vm22460_vm1 = vmand %vm25848_vm4, %vm703_vm7  ;;  %v26163_v20 = vmov 0  ;;  %vm25858_vm7 = vcmp.ge.s32.totalorder %v21976_v49, 0 }
  0xff   : > { %5121 = vrot.lane.b32.xlu1 %v22348_v62, %s21389_s13  ;;  %20108 = vmatprep.subr.msk.mxu0 %vm26156_vm14, %v2458_v17  ;;  %vm26161_vm14 = vcmask 252928   ;;  %v26164_v20 = vsel %vm22460_vm1, 4294967295, %v26163_v20  ;;  %v2437_v38 = vsel %vm26169_vm15, %v2415_v56, %v2417_v35  ;;  %vm704_vm4 = vcmp.lt.s32.totalorder %v21976_v49, 15 }
 0x100   : > { %4630 = vrot.lane.b32.xlu0 %v22300_v33, %s21388_s12  ;;  %v2411_v32 = vpop.permute.xlu0 %2410  ;;  %2641 = vmatprep.mubr.f32.mxu1 %v25861_v0  ;;  %26165 = vst [vmem:[#allocation22_spill] sm:$0xff] %v26164_v20 }
 0x101   : > { %v2435_v41 = vsel %vm26161_vm14, %v2411_v32, %v2413_v19  ;;  %vm22466_vm14 = vmand %vm25851_vm10, %vm702_vm3  ;;  %v26166_v19 = vmov 0 }
 0x102   : > { %v2457_v28 = vsel %vm22434_vm11, %v2435_v41, 0.0  ;;  %v26167_v19 = vsel %vm22466_vm14, 4294967295, %v26166_v19  ;;  %v2421_v46 = vpop.permute.xlu1 %2420  ;;  %vm25855_vm11 = vcmp.ge.s32.totalorder %v21970_v7, 0  ;;  %v2459_v41 = vsel %vm22466_vm14, %v2437_v38, 0.0 }
 0x103   : > { %4632 = vrot.lane.b32.xlu1 %v22323_v44, %s21388_s12  ;;  %20109 = vmatpush1.msk.msra.mxu0 %vm26162_vm0, %v2457_v28  ;;  %26168 = vst [vmem:[#allocation23_spill] sm:$0xff] %v26167_v19  ;;  %vm705_vm0 = vcmp.lt.s32.totalorder %v21970_v7, 15  ;;  %v26176_v28 = vmov 0  ;;  %vm707_vm14 = vcmp.lt.s32.totalorder %v21870_v30, 15 }
 0x104   : > { %5123 = vrot.lane.b32.xlu0 %v22154_v61, %s21389_s13  ;;  %v2419_v17 = vpop.permute.xlu0 %2418  ;;  %20110 = vmatmul.mubr.msk.f32.vlgmr.msra.gmra.mrb[0].mxu0 %vm26170_vm6, %v22448_v6  ;;  %vm26172_vm6 = vcmask 1043456   ;;  %vm22490_vm3 = vmand %vm25855_vm11, %vm705_vm0  ;;  %vm25876_vm0 = vcmp.ge.s32.totalorder %v21823_v60, 0  ;;  %vm706_vm11 = vcmp.lt.s32.totalorder %v21823_v60, 15 }
 0x105   : > { %v2438_v32 = vsel %vm26171_vm12, %v2417_v35, %v2419_v17  ;;  %2711 = vmatprep.mubr.f32.mxu0 %v25861_v0  ;;  %v26173_v35 = vmov 0  ;;  %vm22496_vm12 = vmand %vm25858_vm7, %vm704_vm4  ;;  %vm26181_vm4 = vcmask 31744  }
 0x106   : > { %v2460_v56 = vsel %vm22460_vm1, %v2438_v32, 0.0  ;;  %v26174_v35 = vsel %vm22490_vm3, 4294967295, %v26173_v35  ;;  %v26177_v28 = vsel %vm22496_vm12, 4294967295, %v26176_v28  ;;  %v2439_v32 = vsel %vm26169_vm15, %v2419_v17, %v2421_v46  ;;  %v2425_v38 = vpop.permute.xlu1 %2424  ;;  %vm26179_vm10 = vmmov %vm26172_vm6 }
 0x107   : > { %5125 = vrot.lane.b32.xlu1 %v22171_v47, %s21389_s13  ;;  %20111 = vmatprep.subr.msk.mxu1 %vm26172_vm6, %v2460_v56  ;;  %26175 = vst [vmem:[#allocation24_spill] sm:$0xff] %v26174_v35  ;;  %26178 = vst [vmem:[#allocation25_spill] sm:$0xff] %v26177_v28  ;;  %vm25863_vm6 = vcmp.ge.s32.totalorder %v21870_v30, 0 }
 0x108   : > { %5119 = vrot.lane.b32.xlu0 %v22334_v57, %s21389_s13  ;;  %20112 = vmatpush1.msk.msra.mxu1 %vm26179_vm10, %v2459_v41  ;;  %v2423_v15 = vpop.permute.xlu0 %2422  ;;  %vm26180_vm1 = vmmov %vm26169_vm15  ;;  %v2461_v41 = vsel %vm22496_vm12, %v2439_v32, 0.0 }
 0x109   : > { %v2440_v56 = vsel %vm26180_vm1, %v2421_v46, %v2423_v15  ;;  %20113 = vmatmul.mubr.msk.f32.vlgmr.msra.gmra.mrb[14].mxu1 %vm26181_vm4, %v22448_v6  ;;  %vm22521_vm1 = vmand %vm25863_vm6, %vm707_vm14  ;;  %v26182_v46 = vmov 0  ;;  %vm710_vm4 = vcmp.lt.s32.totalorder %v22036_v21, 15  ;;  %vm25883_vm14 = vcmp.ge.s32.totalorder %v21990_v53, 0 }
 0x10a   : > { %v2462_v17 = vsel %vm22490_vm3, %v2440_v56, 0.0  ;;  %2781 = vmatprep.mubr.f32.mxu1 %v25861_v0  ;;  %v26183_v46 = vsel %vm22521_vm1, 4294967295, %v26182_v46  ;;  %vm22529_vm7 = vmand %vm25876_vm0, %vm706_vm11  ;;  %v26185_v56 = vmov 0  ;;  %v2429_v0 = vpop.permute.xlu1 %2428  ;;  %vm709_vm6 = vcmp.lt.s32.totalorder %v21990_v53, 15 }
 0x10b   : > { %5129 = vrot.lane.b32.xlu1 %v22209_v37, %s21389_s13  ;;  %20114 = vmatprep.subr.msk.mxu0 %vm26179_vm10, %v2462_v17  ;;  %26184 = vst [vmem:[#allocation26_spill] sm:$0xff] %v26183_v46  ;;  %v26186_v56 = vsel %vm22529_vm7, 4294967295, %v26185_v56  ;;  %vm26188_vm12 = vmmov %vm26169_vm15  ;;  %vm25886_vm15 = vcmp.ge.s32.totalorder %v22021_v8, 0  ;;  %vm708_vm3 = vcmp.lt.s32.totalorder %v22021_v8, 15  ;;  %vm26190_vm11 = vcmask 31744  }
 0x10c   : > { %5127 = vrot.lane.b32.xlu0 %v22188_v23, %s21389_s13  ;;  %26187 = vst [vmem:[#allocation27_spill] sm:$0xff] %v26186_v56  ;;  %v2441_v32 = vsel %vm26188_vm12, %v2423_v15, %v2425_v38  ;;  %20115 = vmatpush1.msk.msra.mxu0 %vm26179_vm10, %v2461_v41  ;;  %v2427_v17 = vpop.permute.xlu0 %2426  ;;  %vm26189_vm13 = vmmov %vm26188_vm12  ;;  %vm26191_vm12 = vcmp.ge.s32.totalorder %v22036_v21, 0  ;;  %v26192_v41 = vmov 0 }
 0x10d   : > { %v2442_v4 = vsel %vm26189_vm13, %v2425_v38, %v2427_v17  ;;  %20116 = vmatmul.mubr.msk.f32.vlgmr.msra.gmra.mrb[14].mxu0 %vm26190_vm11, %v22448_v6  ;;  %vm22548_vm10 = vmand %vm26191_vm12, %vm710_vm4  ;;  %v2463_v38 = vsel %vm22529_vm7, %v2441_v32, 0.0  ;;  %vm26196_vm13 = vcmask 1043456   ;;  %vm26201_vm12 = vcmask 252928  }
 0x10e   : > { %v2464_v15 = vsel %vm22521_vm1, %v2442_v4, 0.0  ;;  %v26193_v41 = vsel %vm22548_vm10, 4294967295, %v26192_v41  ;;  %2852 = vmatprep.mubr.f32.mxu0 %v26195_v3  ;;  %vm22560_vm11 = vmand %vm25883_vm14, %vm709_vm6  ;;  %v26197_v4 = vmov 0  ;;  %v2443_v1 = vsel %vm26201_vm12, %v2427_v17, %v2429_v0  ;;  %v2433_v32 = vpop.permute.xlu1 %2432 }
 0x10f   : > { %5133 = vrot.lane.b32.xlu1 %v22244_v48, %s21389_s13  ;;  %26194 = vst [vmem:[#allocation28_spill] sm:$0xff] %v26193_v41  ;;  %20117 = vmatprep.subr.msk.mxu1 %vm26196_vm13, %v2464_v15  ;;  %v26198_v4 = vsel %vm22560_vm11, 4294967295, %v26197_v4  ;;  %vm22566_vm4 = vmand %vm25886_vm15, %vm708_vm3  ;;  %vm26205_vm14 = vcmask 31744   ;;  %vm25889_vm3 = vcmask 244736   ;;  %vm722_vm15 = vcmp.lt.s32.totalorder %v21948_v55, 14 }
 0x110   : > { %5131 = vrot.lane.b32.xlu0 %v22223_v31, %s21389_s13  ;;  %v26200_v2 = vsel %vm22566_vm4, 4294967295, %v26199_v2  ;;  %vm26202_vm0 = vmmov %vm26196_vm13  ;;  %v2431_v56 = vpop.permute.xlu0 %2430  ;;  %vm723_vm13 = vcmp.lt.s32.totalorder %v21928_v40, 14 }
 0x111   : > { %20118 = vmatpush1.msk.msra.mxu1 %vm26202_vm0, %v2463_v38  ;;  %vm26203_vm7 = vmmov %vm26201_vm12 }
 0x112   : > { %v2444_v15 = vsel %vm26203_vm7, %v2429_v0, %v2431_v56  ;;  %vm26204_vm6 = vmmov %vm26203_vm7  ;;  %20837 = vmatprep.subr.mxu1 %v26195_v3  ;;  %20119 = vmatmul.mubr.msk.f32.vlgmr.msra.gmra.mrb[2].mxu1 %vm26205_vm14, %v22448_v6  ;;  %v2465_v0 = vsel %vm22566_vm4, %v2443_v1, 0.0  ;;  %vm26212_vm4 = vcmask 31744  }
 0x113   : > { %v2445_v46 = vsel %vm26204_vm6, %v2431_v56, %v2433_v32  ;;  %5137 = vrot.lane.b32.xlu1 %v22286_v63, %s21389_s13  ;;  %v2466_v17 = vsel %vm22560_vm11, %v2444_v15, 0.0  ;;  %20839 = vmatprep.mubr.msk.f32.mxu1 %vm26132_vm5, %v26195_v3  ;;  %vm26206_vm7 = vmmov %vm26202_vm0  ;;  %vm26207_vm0 = vcmp.ge.s32.totalorder %v21928_v40, 0  ;;  %v2981_v56 = vpop.permute.xlu1 %2980  ;;  %vm728_vm11 = vcmp.lt.s32.totalorder %v21823_v60, 14 }
 0x114   : > { %v2467_v28 = vsel %vm22548_vm10, %v2445_v46, 0.0  ;;  %5135 = vrot.lane.b32.xlu0 %v22259_v36, %s21389_s13  ;;  %20120 = vmatprep.subr.msk.mxu0 %vm26206_vm7, %v2466_v17  ;;  %vm22593_vm14 = vmand %vm26207_vm0, %vm723_vm13  ;;  %v26208_v46 = vmov 0  ;;  %v2979_v38 = vpop.permute.xlu0 %2978  ;;  %vm26215_vm0 = vcmp.ge.s32.totalorder %v21948_v55, 0  ;;  %v22626_v17 = vld [vmem:[%s25786_s1 + $0x10] sm:$0xf]  ;;  %vm26248_vm10 = vcmask 31744  }
 0x115   : > { %v26209_v46 = vsel %vm22593_vm14, 4294967295, %v26208_v46  ;;  %vm26210_vm12 = vmmov %vm26206_vm7  ;;  %v3002_v1 = vsel %vm25889_vm3, %v2979_v38, %v2981_v56 }
 0x116   : > { %20838 = vmatpush3.msk.msra.mxu1 %vm26210_vm12, %v2467_v28  ;;  %vm26211_vm6 = vmmov %vm26206_vm7  ;;  %v3024_v40 = vsel %vm22593_vm14, %v3002_v1, 0.0  ;;  %v26216_v28 = vmov 0  ;;  %vm727_vm14 = vcmp.lt.s32.totalorder %v21970_v7, 14 }
 0x117   : > { %20121 = vmatpush1.msk.msra.mxu0 %vm26211_vm6, %v2465_v0  ;;  %vm26213_vm7 = vmmov %vm26212_vm4  ;;  %5141 = vrot.lane.b32.xlu1 %v22323_v44, %s21389_s13  ;;  %v26220_v0 = vmov 0 }
 0x118   : > { %20122 = vmatmul.mubr.msk.f32.vlgmr.msra.gmra.mrb[16].mxu0 %vm26212_vm4, %v22448_v6  ;;  %20840 = vmatmul.mubr.msk.f32.vlgmr.msra.gmra.mrb[16].mxu1 %vm26213_vm7, %v22448_v6  ;;  %vm26214_vm13 = vmmov %vm26211_vm6  ;;  %v2983_v6 = vpop.permute.xlu1 %2982  ;;  %v2977_v32 = vpop.permute.xlu0 %2976  ;;  %vm725_vm4 = vcmp.lt.s32.totalorder %v21790_v45, 14  ;;  %vm724_vm6 = vcmp.lt.s32.totalorder %v21797_v52, 14  ;;  %vm26219_vm7 = vcmp.ge.s32.totalorder %v21790_v45, 0 }
 0x119   : > { %3136 = vmatprep.mubr.f32.mxu0 %v26195_v3  ;;  %5139 = vrot.lane.b32.xlu0 %v22300_v33, %s21389_s13  ;;  %vm22615_vm12 = vmand %vm26215_vm0, %vm722_vm15  ;;  %v3001_v15 = vsel %vm25889_vm3, %v2977_v32, %v2979_v38  ;;  %vm26222_vm0 = vcmp.ge.s32.totalorder %v21797_v52, 0  ;;  %v26223_v38 = vmov 0 }
 0x11a   : > { %20126 = vmatprep.subr.msk.mxu0 %vm26214_vm13, %v3024_v40  ;;  %v26217_v28 = vsel %vm22615_vm12, 4294967295, %v26216_v28  ;;  %3207 = vmatprep.mubr.f32.mxu1 %v26195_v3  ;;  %v3023_v55 = vsel %vm22615_vm12, %v3001_v15, 0.0  ;;  %vm26218_vm15 = vmmov %vm26214_vm13  ;;  %vm26225_vm12 = vcmask 244736   ;;  %v26233_v15 = vmov 0 }
 0x11b   : > { %5667 = vrot.lane.b32.xlu1 %v22154_v61, %s21390_s20  ;;  %20127 = vmatpush1.msk.msra.mxu0 %vm26218_vm15, %v3023_v55  ;;  %vm22637_vm13 = vmand %vm26219_vm7, %vm725_vm4  ;;  %v3003_v1 = vsel %vm26225_vm12, %v2981_v56, %v2983_v6  ;;  %vm26226_vm15 = vcmask 31744   ;;  %vm726_vm4 = vcmp.lt.s32.totalorder %v21976_v49, 14 }
 0x11c   : > { %v26221_v0 = vsel %vm22637_vm13, 4294967295, %v26220_v0  ;;  %vm22643_vm3 = vmand %vm26222_vm0, %vm724_vm6  ;;  %v2987_v40 = vpop.permute.xlu1 %2986  ;;  %v2985_v32 = vpop.permute.xlu0 %2984  ;;  %20128 = vmatmul.mubr.msk.f32.vlgmr.msra.gmra.mrb[0].mxu0 %vm26226_vm15, %v22626_v17  ;;  %vm26229_vm6 = vcmp.ge.s32.totalorder %v21970_v7, 0  ;;  %vm26232_vm15 = vcmp.ge.s32.totalorder %v21976_v49, 0 }
 0x11d   : > { %5665 = vrot.lane.b32.xlu0 %v22348_v62, %s21390_s20  ;;  %v26224_v38 = vsel %vm22643_vm3, 4294967295, %v26223_v38  ;;  %vm26227_vm7 = vmmov %vm26225_vm12  ;;  %3277 = vmatprep.mubr.f32.mxu0 %v26195_v3  ;;  %v3025_v56 = vsel %vm22643_vm3, %v3003_v1, 0.0  ;;  %vm26228_vm12 = vcmask 1043456  }
 0x11e   : > { %v3004_v45 = vsel %vm26227_vm7, %v2983_v6, %v2985_v32  ;;  %vm22665_vm0 = vmand %vm26229_vm6, %vm727_vm14  ;;  %v26230_v6 = vmov 0  ;;  %vm26238_vm6 = vcmask 31744  }
 0x11f   : > { %5669 = vrot.lane.b32.xlu1 %v22171_v47, %s21390_s20  ;;  %v3026_v52 = vsel %vm22637_vm13, %v3004_v45, 0.0  ;;  %v26231_v6 = vsel %vm22665_vm0, 4294967295, %v26230_v6  ;;  %vm22671_vm7 = vmand %vm26232_vm15, %vm726_vm4  ;;  %vm26235_vm13 = vcmask 244736   ;;  %vm732_vm15 = vcmp.lt.s32.totalorder %v22036_v21, 14 }
 0x120   : > { %20129 = vmatprep.subr.msk.mxu1 %vm26228_vm12, %v3026_v52  ;;  %v26234_v15 = vsel %vm22671_vm7, 4294967295, %v26233_v15  ;;  %v3005_v55 = vsel %vm26235_vm13, %v2985_v32, %v2987_v40  ;;  %v2991_v1 = vpop.permute.xlu1 %2990  ;;  %vm26236_vm3 = vmmov %vm26228_vm12  ;;  %v2989_v45 = vpop.permute.xlu0 %2988  ;;  %vm729_vm12 = vcmp.lt.s32.totalorder %v21870_v30, 14  ;;  %v26243_v52 = vmov 0 }
 0x121   : > { %5663 = vrot.lane.b32.xlu0 %v22334_v57, %s21390_s20  ;;  %20130 = vmatpush1.msk.msra.mxu1 %vm26236_vm3, %v3025_v56  ;;  %vm26237_vm14 = vmmov %vm26235_vm13  ;;  %v3027_v32 = vsel %vm22671_vm7, %v3005_v55, 0.0  ;;  %vm26239_vm13 = vcmp.ge.s32.totalorder %v21870_v30, 0  ;;  %vm26245_vm7 = vcmask 244736  }
 0x122   : > { %v3006_v7 = vsel %vm26237_vm14, %v2987_v40, %v2989_v45  ;;  %20131 = vmatmul.mubr.msk.f32.vlgmr.msra.gmra.mrb[18].mxu1 %vm26238_vm6, %v22626_v17  ;;  %vm22694_vm4 = vmand %vm26239_vm13, %vm729_vm12  ;;  %v26240_v40 = vmov 0  ;;  %vm26242_vm14 = vcmp.ge.s32.totalorder %v21823_v60, 0  ;;  %v3007_v56 = vsel %vm26245_vm7, %v2989_v45, %v2991_v1 }
 0x123   : > { %5673 = vrot.lane.b32.xlu1 %v22209_v37, %s21390_s20  ;;  %v3028_v49 = vsel %vm22665_vm0, %v3006_v7, 0.0  ;;  %3347 = vmatprep.mubr.f32.mxu1 %v26195_v3  ;;  %v26241_v40 = vsel %vm22694_vm4, 4294967295, %v26240_v40  ;;  %vm22701_vm6 = vmand %vm26242_vm14, %vm728_vm11  ;;  %vm730_vm12 = vcmp.lt.s32.totalorder %v22021_v8, 14  ;;  %vm26249_vm11 = vcmp.ge.s32.totalorder %v22036_v21, 0 }
 0x124   : > { %20132 = vmatprep.subr.msk.mxu0 %vm26236_vm3, %v3028_v49  ;;  %v26244_v52 = vsel %vm22701_vm6, 4294967295, %v26243_v52  ;;  %v2995_v55 = vpop.permute.xlu1 %2994  ;;  %vm26246_vm0 = vmmov %vm26236_vm3  ;;  %v2993_v7 = vpop.permute.xlu0 %2992  ;;  %vm731_vm3 = vcmp.lt.s32.totalorder %v21990_v53, 14  ;;  %v26250_v45 = vmov 0  ;;  %v26255_v49 = vmov 0 }
 0x125   : > { %5671 = vrot.lane.b32.xlu0 %v22188_v23, %s21390_s20  ;;  %20133 = vmatpush1.msk.msra.mxu0 %vm26246_vm0, %v3027_v32  ;;  %vm26247_vm13 = vmmov %vm26245_vm7  ;;  %v26259_v21 = vmov 0 }
 0x126   : > { %v3008_v30 = vsel %vm26247_vm13, %v2991_v1, %v2993_v7  ;;  %20134 = vmatmul.mubr.msk.f32.vlgmr.msra.gmra.mrb[18].mxu0 %vm26248_vm10, %v22626_v17  ;;  %vm22718_vm7 = vmand %vm26249_vm11, %vm732_vm15  ;;  %v3029_v1 = vsel %vm22701_vm6, %v3007_v56, 0.0  ;;  %vm26258_vm15 = vcmp.ge.s32.totalorder %v22021_v8, 0  ;;  %vm26262_vm11 = vcmask 244736  }
 0x127   : > { %5677 = vrot.lane.b32.xlu1 %v22244_v48, %s21390_s20  ;;  %v3030_v60 = vsel %vm22694_vm4, %v3008_v30, 0.0  ;;  %v26251_v45 = vsel %vm22718_vm7, 4294967295, %v26250_v45  ;;  %3418 = vmatprep.mubr.f32.mxu0 %v26195_v3  ;;  %vm26253_vm10 = vmmov %vm26246_vm0  ;;  %vm26254_vm0 = vcmp.ge.s32.totalorder %v21990_v53, 0  ;;  %v3009_v32 = vsel %vm26262_vm11, %v2993_v7, %v2995_v55 }
 0x128   : > { %26252 = vst [vmem:[#allocation29_spill] sm:$0xff] %v26251_v45  ;;  %20135 = vmatprep.subr.msk.mxu1 %vm26253_vm10, %v3030_v60  ;;  %vm22730_vm14 = vmand %vm26254_vm0, %vm731_vm3  ;;  %v2999_v56 = vpop.permute.xlu1 %2998  ;;  %v2997_v30 = vpop.permute.xlu0 %2996  ;;  %vm26266_vm3 = vcmask 31744  }
 0x129   : > { %5675 = vrot.lane.b32.xlu0 %v22223_v31, %s21390_s20  ;;  %v26256_v49 = vsel %vm22730_vm14, 4294967295, %v26255_v49  ;;  %vm22736_vm13 = vmand %vm26258_vm15, %vm730_vm12 }
 0x12a   : > { %26257 = vst [vmem:[#allocation30_spill] sm:$0xff] %v26256_v49  ;;  %v26260_v21 = vsel %vm22736_vm13, 4294967295, %v26259_v21  ;;  %vm26263_vm6 = vmmov %vm26253_vm10 }
 0x12b   : > { %26261 = vst [vmem:[#allocation31_spill] sm:$0xff] %v26260_v21  ;;  %20136 = vmatpush1.msk.msra.mxu1 %vm26263_vm6, %v3029_v1  ;;  %vm26264_vm4 = vmmov %vm26262_vm11  ;;  %5681 = vrot.lane.b32.xlu1 %v22286_v63, %s21390_s20  ;;  %vm25912_vm6 = vcmask 146432  }
 0x12c   : > { %v3010_v60 = vsel %vm26264_vm4, %v2995_v55, %v2997_v30  ;;  %vm26265_vm10 = vmmov %vm26264_vm4  ;;  %20842 = vmatprep.subr.mxu1 %v26195_v3  ;;  %20137 = vmatmul.mubr.msk.f32.vlgmr.msra.gmra.mrb[2].mxu1 %vm26266_vm3, %v22626_v17  ;;  %v3031_v55 = vsel %vm22736_vm13, %v3009_v32, 0.0  ;;  %vm26267_vm4 = vcmask 1043456   ;;  %v3525_v1 = vpop.permute.xlu1 %3524 }
 0x12d   : > { %v3011_v53 = vsel %vm26265_vm10, %v2997_v30, %v2999_v56  ;;  %v3032_v7 = vsel %vm22730_vm14, %v3010_v60, 0.0  ;;  %20844 = vmatprep.mubr.msk.f32.mxu1 %vm26132_vm5, %v26195_v3  ;;  %5679 = vrot.lane.b32.xlu0 %v22259_v36, %s21390_s20  ;;  %vm26268_vm12 = vmmov %vm26267_vm4  ;;  %v3523_v56 = vpop.permute.xlu0 %3522 }
 0x12e   : > { %v3033_v8 = vsel %vm22718_vm7, %v3011_v53, 0.0  ;;  %20138 = vmatprep.subr.msk.mxu0 %vm26267_vm4, %v3032_v7  ;;  %vm26269_vm0 = vmmov %vm26267_vm4  ;;  %v3546_v30 = vsel %vm25912_vm6, %v3523_v56, %v3525_v1 }
 0x12f   : > { %20843 = vmatpush3.msk.msra.mxu1 %vm26268_vm12, %v3033_v8  ;;  %20139 = vmatpush1.msk.msra.mxu0 %vm26269_vm0, %v3031_v55  ;;  %vm26270_vm15 = vmmov %vm26266_vm3  ;;  %v3568_v32 = vsel %vm22118_vm9, %v3546_v30, 0.0  ;;  %vm26275_vm12 = vnez %v26091_v24 }
 0x130   : > { %20140 = vmatmul.mubr.msk.f32.vlgmr.msra.gmra.mrb[20].mxu0 %vm26270_vm15, %v22626_v17  ;;  %vm26271_vm11 = vmmov %vm26266_vm3  ;;  %5685 = vrot.lane.b32.xlu1 %v22323_v44, %s21390_s20  ;;  %v3527_v60 = vpop.permute.xlu1 %3526 }
 0x131   : > { %20845 = vmatmul.mubr.msk.f32.vlgmr.msra.gmra.mrb[20].mxu1 %vm26271_vm11, %v22626_v17  ;;  %3680 = vmatprep.mubr.f32.mxu0 %v26195_v3  ;;  %vm26272_vm10 = vmmov %vm26269_vm0  ;;  %v3521_v53 = vpop.permute.xlu0 %3520  ;;  %v22780_v17 = vld [vmem:[%s25786_s1 + $0x14] sm:$0xf]  ;;  %v3547_v55 = vsel %vm25912_vm6, %v3525_v1, %v3527_v60 }
 0x132   : > { %5683 = vrot.lane.b32.xlu0 %v22300_v33, %s21390_s20  ;;  %20144 = vmatprep.subr.msk.mxu0 %vm26272_vm10, %v3568_v32  ;;  %v3545_v8 = vsel %vm25912_vm6, %v3521_v53, %v3523_v56  ;;  %vm26273_vm3 = vmmov %vm26269_vm0  ;;  %vm26278_vm10 = vnez %v26099_v39 }
 0x133   : > { %3751 = vmatprep.mubr.f32.mxu1 %v26195_v3  ;;  %v3567_v7 = vsel %vm22150_vm2, %v3545_v8, 0.0  ;;  %vm26274_vm4 = vmmov %vm26271_vm11  ;;  %v3569_v8 = vsel %vm26275_vm12, %v3547_v55, 0.0 }
 0x134   : > { %6211 = vrot.lane.b32.xlu1 %v22154_v61, %s21391_s23  ;;  %20145 = vmatpush1.msk.msra.mxu0 %vm26273_vm3, %v3567_v7  ;;  %v3531_v56 = vpop.permute.xlu1 %3530  ;;  %vm26276_vm15 = vmmov %vm26269_vm0  ;;  %vm26279_vm3 = vnez %v26102_v9 }
 0x135   : > { %v3529_v30 = vpop.permute.xlu0 %3528  ;;  %20146 = vmatmul.mubr.msk.f32.vlgmr.msra.gmra.mrb[0].mxu0 %vm26274_vm4, %v22780_v17  ;;  %vm26277_vm11 = vmmov %vm26274_vm4 }
 0x136   : > { %6209 = vrot.lane.b32.xlu0 %v22348_v62, %s21391_s23  ;;  %v3548_v32 = vsel %vm25912_vm6, %v3527_v60, %v3529_v30  ;;  %3821 = vmatprep.mubr.f32.mxu0 %v26195_v3  ;;  %v3549_v1 = vsel %vm25912_vm6, %v3529_v30, %v3531_v56  ;;  %vm26280_vm4 = vmmov %vm26269_vm0 }
 0x137   : > { %v3570_v53 = vsel %vm22184_vm8, %v3548_v32, 0.0  ;;  %v3571_v30 = vsel %vm26279_vm3, %v3549_v1, 0.0 }
 0x138   : > { %6213 = vrot.lane.b32.xlu1 %v22171_v47, %s21391_s23  ;;  %20147 = vmatprep.subr.msk.mxu1 %vm26269_vm0, %v3570_v53  ;;  %v3535_v7 = vpop.permute.xlu1 %3534 }
 0x139   : > { %20148 = vmatpush1.msk.msra.mxu1 %vm26276_vm15, %v3569_v8  ;;  %v3533_v60 = vpop.permute.xlu0 %3532  ;;  %vm26281_vm15 = vmmov %vm26277_vm11 }
 0x13a   : > { %6207 = vrot.lane.b32.xlu0 %v22334_v57, %s21391_s23  ;;  %v3550_v59 = vsel %vm25912_vm6, %v3531_v56, %v3533_v60  ;;  %20149 = vmatmul.mubr.msk.f32.vlgmr.msra.gmra.mrb[22].mxu1 %vm26277_vm11, %v22780_v17  ;;  %v3551_v56 = vsel %vm25912_vm6, %v3533_v60, %v3535_v7  ;;  %vm26282_vm11 = vnez %v26110_v11 }
 0x13b   : > { %v3572_v55 = vsel %vm26278_vm10, %v3550_v59, 0.0  ;;  %3891 = vmatprep.mubr.f32.mxu1 %v26195_v3 }
 0x13c   : > { %6217 = vrot.lane.b32.xlu1 %v22209_v37, %s21391_s23  ;;  %20150 = vmatprep.subr.msk.mxu0 %vm26280_vm4, %v3572_v55  ;;  %v3539_v32 = vpop.permute.xlu1 %3538  ;;  %vm26283_vm4 = vnez %v26113_v51 }
 0x13d   : > { %20151 = vmatpush1.msk.msra.mxu0 %vm26269_vm0, %v3571_v30  ;;  %v3537_v53 = vpop.permute.xlu0 %3536  ;;  %v3573_v1 = vsel %vm26283_vm4, %v3551_v56, 0.0 }
 0x13e   : > { %6215 = vrot.lane.b32.xlu0 %v22188_v23, %s21391_s23  ;;  %v3552_v8 = vsel %vm25912_vm6, %v3535_v7, %v3537_v53  ;;  %20152 = vmatmul.mubr.msk.f32.vlgmr.msra.gmra.mrb[22].mxu0 %vm26281_vm15, %v22780_v17  ;;  %vm26284_vm6 = vmmov %vm26269_vm0  ;;  %vm26285_vm15 = vcmask 146432  }
 0x13f   : > { %v3574_v59 = vsel %vm26282_vm11, %v3552_v8, 0.0  ;;  %3962 = vmatprep.mubr.f32.mxu0 %v26195_v3  ;;  %v3553_v60 = vsel %vm26285_vm15, %v3537_v53, %v3539_v32  ;;  %vm26286_vm11 = vcmask 31744   ;;  %vm26287_vm3 = vmmov %vm26285_vm15 }
 0x140   : > { %6221 = vrot.lane.b32.xlu1 %v22244_v48, %s21391_s23  ;;  %20153 = vmatprep.subr.msk.mxu1 %vm26269_vm0, %v3574_v59  ;;  %v3543_v7 = vpop.permute.xlu1 %3542  ;;  %vm26288_vm10 = vmmov %vm26287_vm3  ;;  %vm26290_vm0 = vnez %v26123_v22 }
 0x141   : > { %20154 = vmatpush1.msk.msra.mxu1 %vm26284_vm6, %v3573_v1  ;;  %v3541_v55 = vpop.permute.xlu0 %3540  ;;  %vm26289_vm6 = vnez %v26119_v14 }
 0x142   : > { %6219 = vrot.lane.b32.xlu0 %v22223_v31, %s21391_s23  ;;  %20847 = vmatprep.subr.mxu1 %v26195_v3  ;;  %v3554_v30 = vsel %vm26287_vm3, %v3539_v32, %v3541_v55  ;;  %v3555_v56 = vsel %vm26288_vm10, %v3541_v55, %v3543_v7  ;;  %vm26291_vm3 = vnez %v26126_v13  ;;  %vm26292_vm10 = vcmask 1043456  }
 0x143   : > { %20155 = vmatmul.mubr.msk.f32.vlgmr.msra.gmra.mrb[2].mxu1 %vm26286_vm11, %v22780_v17  ;;  %v3577_v8 = vsel %vm26289_vm6, %v3555_v56, 0.0  ;;  %v3576_v53 = vsel %vm26290_vm0, %v3554_v30, 0.0  ;;  %vm25913_vm11 = vcmask 138240   ;;  %v3575_v32 = vsel %vm26291_vm3, %v3553_v60, 0.0  ;;  %vm26293_vm15 = vmmov %vm26292_vm10 }
 0x144   : > { %6225 = vrot.lane.b32.xlu1 %v22286_v63, %s21391_s23  ;;  %20849 = vmatprep.mubr.msk.f32.mxu1 %vm26132_vm5, %v26195_v3  ;;  %v4069_v59 = vpop.permute.xlu1 %4068  ;;  %vm26294_vm4 = vmmov %vm26292_vm10  ;;  %vm26295_vm6 = vcmask 31744  }
 0x145   : > { %20156 = vmatprep.subr.msk.mxu0 %vm26292_vm10, %v3576_v53  ;;  %20848 = vmatpush3.msk.msra.mxu1 %vm26293_vm15, %v3577_v8  ;;  %v4067_v1 = vpop.permute.xlu0 %4066  ;;  %vm26296_vm0 = vmmov %vm26295_vm6  ;;  %vm26297_vm10 = vnez %v26034_v25  ;;  %vm26300_vm15 = vcmask 31744  }
 0x146   : > { %6223 = vrot.lane.b32.xlu0 %v22259_v36, %s21391_s23  ;;  %20157 = vmatpush1.msk.msra.mxu0 %vm26294_vm4, %v3575_v32  ;;  %v4090_v7 = vsel %vm25913_vm11, %v4067_v1, %v4069_v59 }
 0x147   : > { %20850 = vmatmul.mubr.msk.f32.vlgmr.msra.gmra.mrb[24].mxu1 %vm26295_vm6, %v22780_v17  ;;  %20158 = vmatmul.mubr.msk.f32.vlgmr.msra.gmra.mrb[24].mxu0 %vm26296_vm0, %v22780_v17  ;;  %v4112_v60 = vsel %vm26297_vm10, %v4090_v7, 0.0  ;;  %v22875_v17 = vld [vmem:[%s25786_s1 + $0x18] sm:$0xf]  ;;  %vm26298_vm6 = vnez %v26037_v26  ;;  %vm26299_vm0 = vmmov %vm26294_vm4  ;;  %vm26305_vm10 = vcmask 31744  }
 0x148   : > { %6229 = vrot.lane.b32.xlu1 %v22323_v44, %s21391_s23  ;;  %4224 = vmatprep.mubr.f32.mxu0 %v26195_v3  ;;  %v4071_v55 = vpop.permute.xlu1 %4070 }
 0x149   : > { %20162 = vmatprep.subr.msk.mxu0 %vm26294_vm4, %v4112_v60  ;;  %4295 = vmatprep.mubr.f32.mxu1 %v26195_v3  ;;  %v4065_v30 = vpop.permute.xlu0 %4064  ;;  %v4091_v32 = vsel %vm25913_vm11, %v4069_v59, %v4071_v55  ;;  %vm26301_vm4 = vnez %v26002_v54 }
 0x14a   : > { %6227 = vrot.lane.b32.xlu0 %v22300_v33, %s21391_s23  ;;  %v4089_v56 = vsel %vm25913_vm11, %v4065_v30, %v4067_v1  ;;  %s25413_s23 = sld [smem:[#allocation3 + $0x2]] }
 0x14b   : > { %v4111_v8 = vsel %vm26298_vm6, %v4089_v56, 0.0  ;;  %vm26303_vm6 = vcmask 1043456  }
 0x14c   : > { %6755 = vrot.lane.b32.xlu1 %v22154_v61, %s21392_s25  ;;  %20163 = vmatpush1.msk.msra.mxu0 %vm26299_vm0, %v4111_v8  ;;  %v4075_v53 = vpop.permute.xlu1 %4074  ;;  %vm26302_vm0 = vnez %v26005_v27 }
 0x14d   : > { %v4073_v1 = vpop.permute.xlu0 %4072  ;;  %20164 = vmatmul.mubr.msk.f32.vlgmr.msra.gmra.mrb[0].mxu0 %vm26300_vm15, %v22875_v17  ;;  %v4113_v59 = vsel %vm26302_vm0, %v4091_v32, 0.0  ;;  %vm26304_vm15 = vmmov %vm26303_vm6  ;;  %vm26306_vm0 = vnez %v26043_v34 }
 0x14e   : > { %6753 = vrot.lane.b32.xlu0 %v22348_v62, %s21392_s25  ;;  %v4092_v61 = vsel %vm25913_vm11, %v4071_v55, %v4073_v1  ;;  %4365 = vmatprep.mubr.f32.mxu0 %v26195_v3  ;;  %v4093_v60 = vsel %vm25913_vm11, %v4073_v1, %v4075_v53 }
 0x14f   : > { %v4114_v62 = vsel %vm26301_vm4, %v4092_v61, 0.0  ;;  %vm26308_vm4 = vmmov %vm26304_vm15 }
 0x150   : > { %6757 = vrot.lane.b32.xlu1 %v22171_v47, %s21392_s25  ;;  %20165 = vmatprep.subr.msk.mxu1 %vm26303_vm6, %v4114_v62  ;;  %v4079_v7 = vpop.permute.xlu1 %4078  ;;  %vm26307_vm6 = vnez %v26047_v18 }
 0x151   : > { %20166 = vmatpush1.msk.msra.mxu1 %vm26304_vm15, %v4113_v59  ;;  %v4077_v55 = vpop.permute.xlu0 %4076  ;;  %v4115_v30 = vsel %vm26307_vm6, %v4093_v60, 0.0  ;;  %vm26309_vm6 = vnez %v26024_v58 }
 0x152   : > { %6751 = vrot.lane.b32.xlu0 %v22334_v57, %s21392_s25  ;;  %v4094_v47 = vsel %vm25913_vm11, %v4075_v53, %v4077_v55  ;;  %20167 = vmatmul.mubr.msk.f32.vlgmr.msra.gmra.mrb[26].mxu1 %vm26305_vm10, %v22875_v17  ;;  %v4095_v8 = vsel %vm25913_vm11, %v4077_v55, %v4079_v7  ;;  %v22945_v55 = vld [vmem:[#allocation2 + $0x4] sm:$0xff] }
 0x153   : > { %v4116_v57 = vsel %vm26306_vm0, %v4094_v47, 0.0  ;;  %4435 = vmatprep.mubr.f32.mxu1 %v26195_v3  ;;  %vm26311_vm0 = vmmov %vm26308_vm4 }
 0x154   : > { %6761 = vrot.lane.b32.xlu1 %v22209_v37, %s21392_s25  ;;  %20168 = vmatprep.subr.msk.mxu0 %vm26304_vm15, %v4116_v57  ;;  %v4083_v56 = vpop.permute.xlu1 %4082  ;;  %vm26310_vm15 = vnez %v26018_v50  ;;  %v22958_v57 = vld [vmem:[#allocation2 + $0xc] sm:$0xff] }
 0x155   : > { %20169 = vmatpush1.msk.msra.mxu0 %vm26308_vm4, %v4115_v30  ;;  %v4081_v37 = vpop.permute.xlu0 %4080  ;;  %v4117_v32 = vsel %vm26310_vm15, %v4095_v8, 0.0  ;;  %vm25914_vm15 = vcmask 130048   ;;  %v22962_v30 = vcombine.high %v22945_v55, %v22945_v55  ;;  %v22970_v8 = vld [vmem:[%s25786_s1 + $0x1c] sm:$0xf] }
 0x156   : > { %6759 = vrot.lane.b32.xlu0 %v22188_v23, %s21392_s25  ;;  %v4096_v53 = vsel %vm25913_vm11, %v4079_v7, %v4081_v37  ;;  %20170 = vmatmul.mubr.msk.f32.vlgmr.msra.gmra.mrb[26].mxu0 %vm26305_vm10, %v22875_v17  ;;  %v4097_v61 = vsel %vm25913_vm11, %v4081_v37, %v4083_v56  ;;  %vm26312_vm10 = vnez %v26071_v12  ;;  %v22976_v37 = vcombine.high %v22958_v57, %v22958_v57 }
 0x157   : > { %v4118_v23 = vsel %vm26309_vm6, %v4096_v53, 0.0  ;;  %4506 = vmatprep.mubr.f32.mxu0 %v26195_v3  ;;  %vm26316_vm6 = vcmask 1043456  }
 0x158   : > { %6765 = vrot.lane.b32.xlu1 %v22244_v48, %s21392_s25  ;;  %20171 = vmatprep.subr.msk.mxu1 %vm26308_vm4, %v4118_v23  ;;  %v4087_v1 = vpop.permute.xlu1 %4086  ;;  %vm26313_vm4 = vcmask 31744   ;;  %vm26317_vm3 = vmmov %vm26316_vm6 }
 0x159   : > { %20172 = vmatpush1.msk.msra.mxu1 %vm26311_vm0, %v4117_v32  ;;  %v4085_v48 = vpop.permute.xlu0 %4084  ;;  %vm26314_vm0 = vnez %v26051_v10 }
 0x15a   : > { %6763 = vrot.lane.b32.xlu0 %v22223_v31, %s21392_s25  ;;  %v4098_v62 = vsel %vm25913_vm11, %v4083_v56, %v4085_v48  ;;  %v4099_v31 = vsel %vm25913_vm11, %v4085_v48, %v4087_v1  ;;  %20852 = vmatprep.subr.mxu1 %v26195_v3  ;;  %vm26315_vm11 = vnez %v26057_v43  ;;  %v22999_v48 = vld [vmem:[#allocation2 + $0x1c] sm:$0xff] }
 0x15b   : > { %v4121_v59 = vsel %vm26312_vm10, %v4099_v31, 0.0  ;;  %20173 = vmatmul.mubr.msk.f32.vlgmr.msra.gmra.mrb[2].mxu1 %vm26313_vm4, %v22875_v17  ;;  %v4120_v7 = vsel %vm26314_vm0, %v4098_v62, 0.0  ;;  %v4119_v60 = vsel %vm26315_vm11, %v4097_v61, 0.0  ;;  %vm26318_vm10 = vmmov %vm26317_vm3 }
 0x15c   : > { %6769 = vrot.lane.b32.xlu1 %v22286_v63, %s21392_s25  ;;  %20174 = vmatprep.subr.msk.mxu0 %vm26316_vm6, %v4120_v7  ;;  %vm26319_vm6 = vmmov %vm26313_vm4  ;;  %v23009_v7 = vcombine.high %v22999_v48, %v22999_v48 }
 0x15d   : > { %20853 = vmatpush3.msk.msra.mxu1 %vm26317_vm3, %v4121_v59  ;;  %v4615_v63 = vpop.permute.xlu1 %4614  ;;  %20175 = vmatpush1.msk.msra.mxu0 %vm26318_vm10, %v4119_v60  ;;  %vm26320_vm10 = vmmov %vm26317_vm3 }
 0x15e   : > { %6767 = vrot.lane.b32.xlu0 %v22259_v36, %s21392_s25  ;;  %v4613_v36 = vpop.permute.xlu0 %4612  ;;  %20854 = vmatprep.mubr.msk.f32.mxu1 %vm26132_vm5, %v26195_v3 }
 0x15f   : > { %v4636_v47 = vsel %vm25914_vm15, %v4613_v36, %v4615_v63  ;;  %20176 = vmatmul.mubr.msk.f32.vlgmr.msra.gmra.mrb[28].mxu0 %vm26313_vm4, %v22875_v17  ;;  %20855 = vmatmul.mubr.msk.f32.vlgmr.msra.gmra.mrb[28].mxu1 %vm26319_vm6, %v22875_v17  ;;  %v22983_v17 = vld [vmem:[#allocation2 + $0x14] sm:$0xff]  ;;  %vm26321_vm6 = vmmov %vm26317_vm3 }
 0x160   : > { %6773 = vrot.lane.b32.xlu1 %v22323_v44, %s21392_s25  ;;  %20180 = vmatprep.subr.msk.mxu0 %vm26317_vm3, %v4636_v47  ;;  %v22993_v1 = vcombine.high %v22983_v17, %v22983_v17 }
 0x161   : > { %v4617_v56 = vpop.permute.xlu1 %4616  ;;  %4735 = vmatprep.mubr.f32.mxu0 %v26195_v3  ;;  %4806 = vmatprep.mubr.f32.mxu1 %v26195_v3 }
 0x162   : > { %6771 = vrot.lane.b32.xlu0 %v22300_v33, %s21392_s25  ;;  %v4611_v44 = vpop.permute.xlu0 %4610  ;;  %v4637_v61 = vsel %vm25914_vm15, %v4615_v63, %v4617_v56  ;;  %v23016_v63 = vld [vmem:[#allocation2 + $0x24] sm:$0xff] }
 0x163   : > { %v4635_v33 = vsel %vm25914_vm15, %v4611_v44, %v4613_v36  ;;  %v23026_v44 = vcombine.high %v23016_v63, %v23016_v63 }
 0x164   : > { %7773 = vrot.lane.b32.xlu1 %v22958_v57, %s21393_s8  ;;  %20181 = vmatpush1.msk.msra.mxu0 %vm26320_vm10, %v4635_v33  ;;  %vm26322_vm10 = vmmov %vm26313_vm4 }
 0x165   : > { %v4621_v53 = vpop.permute.xlu1 %4620  ;;  %20182 = vmatmul.mubr.msk.f32.vlgmr.msra.gmra.mrb[0].mxu0 %vm26313_vm4, %v22970_v8  ;;  %vm26323_vm4 = vmmov %vm26317_vm3 }
 0x166   : > { %7771 = vrot.lane.b32.xlu0 %v22962_v30, %s21393_s8  ;;  %v4619_v23 = vpop.permute.xlu0 %4618  ;;  %4876 = vmatprep.mubr.f32.mxu0 %v26195_v3 }
 0x167   : > { %v4638_v32 = vsel %vm25914_vm15, %v4617_v56, %v4619_v23  ;;  %v4639_v60 = vsel %vm25914_vm15, %v4619_v23, %v4621_v53 }
 0x168   : > { %7775 = vrot.lane.b32.xlu1 %v22976_v37, %s21393_s8  ;;  %20183 = vmatprep.subr.msk.mxu1 %vm26317_vm3, %v4638_v32 }
 0x169   : > { %20184 = vmatpush1.msk.msra.mxu1 %vm26321_vm6, %v4637_v61  ;;  %v4625_v62 = vpop.permute.xlu1 %4624  ;;  %vm26324_vm6 = vmmov %vm26322_vm10 }
 0x16a   : > { %7769 = vrot.lane.b32.xlu0 %v22945_v55, %s21393_s8  ;;  %v4623_v31 = vpop.permute.xlu0 %4622  ;;  %20185 = vmatmul.mubr.msk.f32.vlgmr.msra.gmra.mrb[30].mxu1 %vm26322_vm10, %v22970_v8  ;;  %vm26325_vm10 = vmmov %vm26317_vm3 }
 0x16b   : > { %v4640_v59 = vsel %vm25914_vm15, %v4621_v53, %v4623_v31  ;;  %4946 = vmatprep.mubr.f32.mxu1 %v26195_v3  ;;  %v4641_v33 = vsel %vm25914_vm15, %v4623_v31, %v4625_v62  ;;  %v23033_v53 = vld [vmem:[#allocation2 + $0x2c] sm:$0xff] }
 0x16c   : > { %7779 = vrot.lane.b32.xlu1 %v22993_v1, %s21393_s8  ;;  %20186 = vmatprep.subr.msk.mxu0 %vm26323_vm4, %v4640_v59  ;;  %vm26326_vm4 = vmmov %vm26317_vm3 }
 0x16d   : > { %20187 = vmatpush1.msk.msra.mxu0 %vm26317_vm3, %v4639_v60  ;;  %v4629_v36 = vpop.permute.xlu1 %4628  ;;  %vm26327_vm3 = vmmov %vm26324_vm6 }
 0x16e   : > { %7777 = vrot.lane.b32.xlu0 %v22983_v17, %s21393_s8  ;;  %v4627_v47 = vpop.permute.xlu0 %4626  ;;  %20188 = vmatmul.mubr.msk.f32.vlgmr.msra.gmra.mrb[30].mxu0 %vm26324_vm6, %v22970_v8  ;;  %vm26328_vm6 = vmmov %vm26326_vm4 }
 0x16f   : > { %v4642_v56 = vsel %vm25914_vm15, %v4625_v62, %v4627_v47  ;;  %5017 = vmatprep.mubr.f32.mxu0 %v26195_v3  ;;  %v23044_v62 = vcombine.high %v23033_v53, %v23033_v53  ;;  %v4643_v31 = vsel %vm25914_vm15, %v4627_v47, %v4629_v36  ;;  %vm26329_vm11 = vmmov %vm26326_vm4 }
 0x170   : > { %7783 = vrot.lane.b32.xlu1 %v23009_v7, %s21393_s8  ;;  %20189 = vmatprep.subr.msk.mxu1 %vm26325_vm10, %v4642_v56  ;;  %vm25921_vm10 = vcmask 121856  }
 0x171   : > { %20190 = vmatpush1.msk.msra.mxu1 %vm26326_vm4, %v4641_v33  ;;  %v5122_v23 = vpop.permute.xlu1 %5121 }
 0x172   : > { %7781 = vrot.lane.b32.xlu0 %v22999_v48, %s21393_s8  ;;  %v4631_v32 = vpop.permute.xlu0 %4630  ;;  %20857 = vmatprep.subr.mxu1 %v26195_v3 }
 0x173   : > { %20191 = vmatmul.mubr.msk.f32.vlgmr.msra.gmra.mrb[2].mxu1 %vm26327_vm3, %v22970_v8  ;;  %v4644_v61 = vsel %vm25914_vm15, %v4629_v36, %v4631_v32 }
 0x174   : > { %7787 = vrot.lane.b32.xlu1 %v23026_v44, %s21393_s8  ;;  %20859 = vmatprep.mubr.msk.f32.mxu1 %vm26132_vm5, %v26195_v3 }
 0x175   : > { %20192 = vmatprep.subr.msk.mxu0 %vm26328_vm6, %v4644_v61  ;;  %v4633_v59 = vpop.permute.xlu1 %4632  ;;  %vm26330_vm6 = vnez %v26151_v5 }
 0x176   : > { %7785 = vrot.lane.b32.xlu0 %v23016_v63, %s21393_s8  ;;  %20193 = vmatpush1.msk.msra.mxu0 %vm26326_vm4, %v4643_v31  ;;  %v4645_v60 = vsel %vm25914_vm15, %v4631_v32, %v4633_v59  ;;  %v5124_v56 = vpop.permute.xlu0 %5123  ;;  %vm26331_vm4 = vmmov %vm26327_vm3  ;;  %v23075_v31 = vld [vmem:[%s25786_s1 + $0x20] sm:$0xf] }
 0x177   : > { %20194 = vmatmul.mubr.msk.f32.vlgmr.msra.gmra.mrb[32].mxu0 %vm26327_vm3, %v22970_v8  ;;  %v5145_v33 = vsel %vm25921_vm10, %v5122_v23, %v5124_v56  ;;  %20858 = vmatpush3.msk.msra.mxu1 %vm26329_vm11, %v4645_v60  ;;  %vm26332_vm15 = vmmov %vm26329_vm11  ;;  %vm26333_vm11 = vnez %v26158_v29 }
 0x178   : > { %7791 = vrot.lane.b32.xlu1 %v23044_v62, %s21393_s8  ;;  %v5167_v36 = vsel %vm26330_vm6, %v5145_v33, 0.0  ;;  %20860 = vmatmul.mubr.msk.f32.vlgmr.msra.gmra.mrb[32].mxu1 %vm26331_vm4, %v22970_v8  ;;  %vm26334_vm4 = vnez %v26164_v20  ;;  %vm26338_vm6 = vcmask 31744  }
 0x179   : > { %20198 = vmatprep.subr.msk.mxu0 %vm26332_vm15, %v5167_v36  ;;  %v5126_v47 = vpop.permute.xlu1 %5125  ;;  %5279 = vmatprep.mubr.f32.mxu0 %v26195_v3 }
 0x17a   : > { %7789 = vrot.lane.b32.xlu0 %v23033_v53, %s21393_s8  ;;  %v5120_v32 = vpop.permute.xlu0 %5119  ;;  %5350 = vmatprep.mubr.f32.mxu1 %v26195_v3 }
 0x17b   : > { %v5144_v61 = vsel %vm25921_vm10, %v5120_v32, %v5122_v23  ;;  %v5146_v23 = vsel %vm25921_vm10, %v5124_v56, %v5126_v47 }
 0x17c   : > { %8317 = vrot.lane.b32.xlu1 %v22958_v57, %s21394_s9  ;;  %v5166_v8 = vsel %vm26333_vm11, %v5144_v61, 0.0  ;;  %vm26336_vm11 = vcmask 1043456  }
 0x17d   : > { %20199 = vmatpush1.msk.msra.mxu0 %vm26332_vm15, %v5166_v8  ;;  %v5130_v59 = vpop.permute.xlu1 %5129  ;;  %vm26335_vm15 = vnez %v26167_v19 }
 0x17e   : > { %8315 = vrot.lane.b32.xlu0 %v22962_v30, %s21394_s9  ;;  %v5128_v60 = vpop.permute.xlu0 %5127  ;;  %20200 = vmatmul.mubr.msk.f32.vlgmr.msra.gmra.mrb[0].mxu0 %vm26327_vm3, %v23075_v31  ;;  %v5168_v56 = vsel %vm26335_vm15, %v5146_v23, 0.0  ;;  %vm26337_vm3 = vmmov %vm26336_vm11  ;;  %vm26339_vm15 = vnez %v26174_v35 }
 0x17f   : > { %v5147_v33 = vsel %vm25921_vm10, %v5126_v47, %v5128_v60  ;;  %5420 = vmatprep.mubr.f32.mxu0 %v26195_v3  ;;  %v5148_v61 = vsel %vm25921_vm10, %v5128_v60, %v5130_v59  ;;  %v26340_v60 = vld [vmem:[#allocation25_spill] sm:$0xff] }
 0x180   : > { %8319 = vrot.lane.b32.xlu1 %v22976_v37, %s21394_s9  ;;  %v5169_v36 = vsel %vm26334_vm4, %v5147_v33, 0.0  ;;  %vm26342_vm4 = vmmov %vm26337_vm3 }
 0x181   : > { %20201 = vmatprep.subr.msk.mxu1 %vm26336_vm11, %v5169_v36  ;;  %v5134_v32 = vpop.permute.xlu1 %5133  ;;  %vm26341_vm11 = vnez %v26340_v60 }
 0x182   : > { %8313 = vrot.lane.b32.xlu0 %v22945_v55, %s21394_s9  ;;  %20202 = vmatpush1.msk.msra.mxu1 %vm26337_vm3, %v5168_v56  ;;  %v5132_v47 = vpop.permute.xlu0 %5131  ;;  %v5170_v33 = vsel %vm26341_vm11, %v5148_v61, 0.0  ;;  %v26343_v61 = vld [vmem:[#allocation26_spill] sm:$0xff]  ;;  %vm26346_vm11 = vmmov %vm26342_vm4 }
 0x183   : > { %v5149_v8 = vsel %vm25921_vm10, %v5130_v59, %v5132_v47  ;;  %20203 = vmatmul.mubr.msk.f32.vlgmr.msra.gmra.mrb[34].mxu1 %vm26338_vm6, %v23075_v31  ;;  %v5150_v36 = vsel %vm25921_vm10, %v5132_v47, %v5134_v32  ;;  %v26344_v47 = vld [vmem:[#allocation27_spill] sm:$0xff] }
 0x184   : > { %8323 = vrot.lane.b32.xlu1 %v22993_v1, %s21394_s9  ;;  %v5171_v23 = vsel %vm26339_vm15, %v5149_v8, 0.0  ;;  %5490 = vmatprep.mubr.f32.mxu1 %v26195_v3 }
 0x185   : > { %20204 = vmatprep.subr.msk.mxu0 %vm26337_vm3, %v5171_v23  ;;  %v5138_v59 = vpop.permute.xlu1 %5137  ;;  %vm26345_vm3 = vnez %v26344_v47 }
 0x186   : > { %8321 = vrot.lane.b32.xlu0 %v22983_v17, %s21394_s9  ;;  %20205 = vmatpush1.msk.msra.mxu0 %vm26342_vm4, %v5170_v33  ;;  %v5136_v56 = vpop.permute.xlu0 %5135  ;;  %v5172_v23 = vsel %vm26345_vm3, %v5150_v36, 0.0  ;;  %vm5687_vm3 = vcmask 113664  }
 0x187   : > { %v5151_v29 = vsel %vm25921_vm10, %v5134_v32, %v5136_v56  ;;  %20206 = vmatmul.mubr.msk.f32.vlgmr.msra.gmra.mrb[34].mxu0 %vm26338_vm6, %v23075_v31  ;;  %v5152_v33 = vsel %vm25921_vm10, %v5136_v56, %v5138_v59  ;;  %vm26347_vm6 = vnez %v26193_v41 }
 0x188   : > { %8327 = vrot.lane.b32.xlu1 %v23009_v7, %s21394_s9  ;;  %v5173_v8 = vsel %vm22521_vm1, %v5151_v29, 0.0  ;;  %5561 = vmatprep.mubr.f32.mxu0 %v26195_v3  ;;  %vm26351_vm1 = vcmask 1043456  }
 0x189   : > { %20207 = vmatprep.subr.msk.mxu1 %vm26342_vm4, %v5173_v8  ;;  %v5142_v32 = vpop.permute.xlu1 %5141  ;;  %vm26348_vm4 = vcmask 31744   ;;  %vm26352_vm15 = vmmov %vm26351_vm1 }
 0x18a   : > { %8325 = vrot.lane.b32.xlu0 %v22999_v48, %s21394_s9  ;;  %20208 = vmatpush1.msk.msra.mxu1 %vm26346_vm11, %v5172_v23  ;;  %vm26349_vm11 = vnez %v26198_v4  ;;  %vm26353_vm0 = vmmov %vm26351_vm1 }
 0x18b   : > { %v5140_v60 = vpop.permute.xlu0 %5139  ;;  %20862 = vmatprep.subr.mxu1 %v26195_v3  ;;  %20209 = vmatmul.mubr.msk.f32.vlgmr.msra.gmra.mrb[2].mxu1 %vm26348_vm4, %v23075_v31 }
 0x18c   : > { %v5153_v35 = vsel %vm25921_vm10, %v5138_v59, %v5140_v60  ;;  %v5154_v19 = vsel %vm25921_vm10, %v5140_v60, %v5142_v32  ;;  %8331 = vrot.lane.b32.xlu1 %v23026_v44, %s21394_s9  ;;  %vm26350_vm10 = vnez %v26200_v2  ;;  %20864 = vmatprep.mubr.msk.f32.mxu1 %vm26132_vm5, %v26195_v3 }
 0x18d   : > { %v5176_v29 = vsel %vm26347_vm6, %v5154_v19, 0.0  ;;  %v5175_v36 = vsel %vm26349_vm11, %v5153_v35, 0.0  ;;  %v5174_v60 = vsel %vm26350_vm10, %v5152_v33, 0.0  ;;  %v5668_v59 = vpop.permute.xlu1 %5667  ;;  %vm26361_vm10 = vcmask 1043456  }
 0x18e   : > { %8329 = vrot.lane.b32.xlu0 %v23016_v63, %s21394_s9  ;;  %20210 = vmatprep.subr.msk.mxu0 %vm26351_vm1, %v5175_v36  ;;  %vm26354_vm1 = vnez %v26209_v46  ;;  %v1116_v23 = vpop.f32.mrb[0].mxu1 }
 0x18f   : > { %20863 = vmatpush3.msk.msra.mxu1 %vm26352_vm15, %v5176_v29  ;;  %20211 = vmatpush1.msk.msra.mxu0 %vm26353_vm0, %v5174_v60  ;;  %v5666_v19 = vpop.permute.xlu0 %5665  ;;  %vm26355_vm0 = vmmov %vm26348_vm4  ;;  %v23168_v29 = vld [vmem:[%s25786_s1 + $0x24] sm:$0xf] }
 0x190   : > { %v5689_v56 = vsel %vm5687_vm3, %v5666_v19, %v5668_v59  ;;  %8335 = vrot.lane.b32.xlu1 %v23044_v62, %s21394_s9  ;;  %20212 = vmatmul.mubr.msk.f32.vlgmr.msra.gmra.mrb[36].mxu0 %vm26348_vm4, %v23075_v31  ;;  %vm26356_vm4 = vnez %v26217_v28 }
 0x191   : > { %v5711_v35 = vsel %vm26354_vm1, %v5689_v56, 0.0  ;;  %20865 = vmatmul.mubr.msk.f32.vlgmr.msra.gmra.mrb[36].mxu1 %vm26355_vm0, %v23075_v31  ;;  %v5670_v8 = vpop.permute.xlu1 %5669  ;;  %5823 = vmatprep.mubr.f32.mxu0 %v26195_v3  ;;  %vm26357_vm0 = vmmov %vm26352_vm15  ;;  %vm26363_vm1 = vcmask 31744  }
 0x192   : > { %8333 = vrot.lane.b32.xlu0 %v23033_v53, %s21394_s9  ;;  %20216 = vmatprep.subr.msk.mxu0 %vm26352_vm15, %v5711_v35  ;;  %v5690_v60 = vsel %vm5687_vm3, %v5668_v59, %v5670_v8  ;;  %vm26358_vm15 = vcmask 31744   ;;  %s20680_s9 = sld [smem:[#allocation3 + $0x182]] }
 0x193   : > { %v5664_v32 = vpop.permute.xlu0 %5663  ;;  %5894 = vmatprep.mubr.f32.mxu1 %v26195_v3 }
 0x194   : > { %v5688_v33 = vsel %vm5687_vm3, %v5664_v32, %v5666_v19  ;;  %8861 = vrot.lane.b32.xlu1 %v22958_v57, %s21395_s14 }
 0x195   : > { %v5710_v31 = vsel %vm26356_vm4, %v5688_v33, 0.0  ;;  %v5674_v36 = vpop.permute.xlu1 %5673  ;;  %vm26359_vm4 = vnez %v26221_v0 }
 0x196   : > { %8859 = vrot.lane.b32.xlu0 %v22962_v30, %s21395_s14  ;;  %20217 = vmatpush1.msk.msra.mxu0 %vm26357_vm0, %v5710_v31  ;;  %vm26360_vm0 = vnez %v26224_v38 }
 0x197   : > { %v5672_v19 = vpop.permute.xlu0 %5671  ;;  %20218 = vmatmul.mubr.msk.f32.vlgmr.msra.gmra.mrb[0].mxu0 %vm26358_vm15, %v23168_v29  ;;  %v5712_v59 = vsel %vm26360_vm0, %v5690_v60, 0.0  ;;  %vm26362_vm15 = vmmov %vm26361_vm10  ;;  %vm26364_vm0 = vnez %v26231_v6 }
 0x198   : > { %v5691_v56 = vsel %vm5687_vm3, %v5670_v8, %v5672_v19  ;;  %8863 = vrot.lane.b32.xlu1 %v22976_v37, %s21395_s14  ;;  %5964 = vmatprep.mubr.f32.mxu0 %v26195_v3  ;;  %v5692_v32 = vsel %vm5687_vm3, %v5672_v19, %v5674_v36 }
 0x199   : > { %v5713_v35 = vsel %vm26359_vm4, %v5691_v56, 0.0  ;;  %v5678_v23 = vpop.permute.xlu1 %5677  ;;  %vm26366_vm4 = vmmov %vm26362_vm15 }
 0x19a   : > { %8857 = vrot.lane.b32.xlu0 %v22945_v55, %s21395_s14  ;;  %20219 = vmatprep.subr.msk.mxu1 %vm26361_vm10, %v5713_v35  ;;  %vm26365_vm10 = vnez %v26234_v15 }
 0x19b   : > { %20220 = vmatpush1.msk.msra.mxu1 %vm26362_vm15, %v5712_v59  ;;  %v5676_v8 = vpop.permute.xlu0 %5675  ;;  %v5714_v60 = vsel %vm26365_vm10, %v5692_v32, 0.0  ;;  %vm26367_vm10 = vnez %v26241_v40 }
 0x19c   : > { %v5693_v33 = vsel %vm5687_vm3, %v5674_v36, %v5676_v8  ;;  %8867 = vrot.lane.b32.xlu1 %v22993_v1, %s21395_s14  ;;  %20221 = vmatmul.mubr.msk.f32.vlgmr.msra.gmra.mrb[38].mxu1 %vm26363_vm1, %v23168_v29  ;;  %v5694_v19 = vsel %vm5687_vm3, %v5676_v8, %v5678_v23 }
 0x19d   : > { %v5715_v31 = vsel %vm26364_vm0, %v5693_v33, 0.0  ;;  %6034 = vmatprep.mubr.f32.mxu1 %v26195_v3  ;;  %v5682_v36 = vpop.permute.xlu1 %5681  ;;  %vm26369_vm0 = vmmov %vm26366_vm4 }
 0x19e   : > { %8865 = vrot.lane.b32.xlu0 %v22983_v17, %s21395_s14  ;;  %20222 = vmatprep.subr.msk.mxu0 %vm26362_vm15, %v5715_v31  ;;  %vm26368_vm15 = vnez %v26244_v52 }
 0x19f   : > { %20223 = vmatpush1.msk.msra.mxu0 %vm26366_vm4, %v5714_v60  ;;  %v5680_v56 = vpop.permute.xlu0 %5679  ;;  %v5716_v32 = vsel %vm26368_vm15, %v5694_v19, 0.0 }
 0x1a0   : > { %v5695_v35 = vsel %vm5687_vm3, %v5678_v23, %v5680_v56  ;;  %8871 = vrot.lane.b32.xlu1 %v23009_v7, %s21395_s14  ;;  %20224 = vmatmul.mubr.msk.f32.vlgmr.msra.gmra.mrb[38].mxu0 %vm26363_vm1, %v23168_v29  ;;  %v5696_v8 = vsel %vm5687_vm3, %v5680_v56, %v5682_v36 }
 0x1a1   : > { %v5717_v59 = vsel %vm26367_vm10, %v5695_v35, 0.0  ;;  %6105 = vmatprep.mubr.f32.mxu0 %v26195_v3 }
 0x1a2   : > { %8869 = vrot.lane.b32.xlu0 %v22999_v48, %s21395_s14  ;;  %20225 = vmatprep.subr.msk.mxu1 %vm26366_vm4, %v5717_v59  ;;  %v5686_v23 = vpop.permute.xlu1 %5685 }
 0x1a3   : > { %20226 = vmatpush1.msk.msra.mxu1 %vm26369_vm0, %v5716_v32  ;;  %vm6231_vm0 = vcmask 15360  }
 0x1a4   : > { %v5684_v33 = vpop.permute.xlu0 %5683  ;;  %8875 = vrot.lane.b32.xlu1 %v23026_v44, %s21395_s14  ;;  %20867 = vmatprep.subr.mxu1 %v26195_v3 }
 0x1a5   : > { %v5697_v31 = vsel %vm5687_vm3, %v5682_v36, %v5684_v33  ;;  %v5698_v60 = vsel %vm5687_vm3, %v5684_v33, %v5686_v23  ;;  %20227 = vmatmul.mubr.msk.f32.vlgmr.msra.gmra.mrb[2].mxu1 %vm26363_vm1, %v23168_v29  ;;  %v5718_v36 = vsel %vm22736_vm13, %v5696_v8, 0.0  ;;  %vm26370_vm3 = vmmov %vm26366_vm4 }
 0x1a6   : > { %v5720_v19 = vsel %vm22718_vm7, %v5698_v60, 0.0  ;;  %8873 = vrot.lane.b32.xlu0 %v23016_v63, %s21395_s14  ;;  %v5719_v56 = vsel %vm22730_vm14, %v5697_v31, 0.0  ;;  %vm26371_vm4 = vmmov %vm26370_vm3  ;;  %v6212_v35 = vpop.permute.xlu1 %6211  ;;  %20869 = vmatprep.mubr.msk.f32.mxu1 %vm26132_vm5, %v26195_v3  ;;  %v23261_v60 = vld [vmem:[%s25786_s1 + $0x28] sm:$0xf] }
 0x1a7   : > { %20228 = vmatprep.subr.msk.mxu0 %vm26370_vm3, %v5719_v56  ;;  %20868 = vmatpush3.msk.msra.mxu1 %vm26371_vm4, %v5720_v19  ;;  %vm26372_vm15 = vmmov %vm26370_vm3 }
 0x1a8   : > { %20229 = vmatpush1.msk.msra.mxu0 %vm26372_vm15, %v5718_v36  ;;  %v6210_v59 = vpop.permute.xlu0 %6209  ;;  %8879 = vrot.lane.b32.xlu1 %v23044_v62, %s21395_s14  ;;  %vm26373_vm15 = vmmov %vm26363_vm1 }
 0x1a9   : > { %v6233_v32 = vsel %vm6231_vm0, %v6210_v59, %v6212_v35  ;;  %20230 = vmatmul.mubr.msk.f32.vlgmr.msra.gmra.mrb[40].mxu0 %vm26363_vm1, %v23168_v29  ;;  %20870 = vmatmul.mubr.msk.f32.vlgmr.msra.gmra.mrb[40].mxu1 %vm26373_vm15, %v23168_v29  ;;  %v26374_v29 = vld [vmem:[#allocation18_spill] sm:$0xff]  ;;  %vm26375_vm4 = vmmov %vm26370_vm3 }
 0x1aa   : > { %8877 = vrot.lane.b32.xlu0 %v23033_v53, %s21395_s14  ;;  %v6255_v23 = vsel %vm22118_vm9, %v6233_v32, 0.0  ;;  %v6214_v8 = vpop.permute.xlu1 %6213  ;;  %6367 = vmatprep.mubr.f32.mxu0 %v26195_v3  ;;  %vm26376_vm15 = vmmov %vm26370_vm3 }
 0x1ab   : > { %20234 = vmatprep.subr.msk.mxu0 %vm26370_vm3, %v6255_v23  ;;  %6438 = vmatprep.mubr.f32.mxu1 %v26195_v3  ;;  %v6234_v36 = vsel %vm6231_vm0, %v6212_v35, %v6214_v8 }
 0x1ac   : > { %v6208_v33 = vpop.permute.xlu0 %6207  ;;  %9405 = vrot.lane.b32.xlu1 %v22958_v57, %s21396_s19  ;;  %v6256_v35 = vsel %vm26275_vm12, %v6234_v36, 0.0  ;;  %vm26380_vm12 = vmmov %vm26370_vm3 }
 0x1ad   : > { %v6232_v31 = vsel %vm6231_vm0, %v6208_v33, %v6210_v59 }
 0x1ae   : > { %v6254_v19 = vsel %vm22150_vm2, %v6232_v31, 0.0  ;;  %9403 = vrot.lane.b32.xlu0 %v22962_v30, %s21396_s19  ;;  %v6218_v56 = vpop.permute.xlu1 %6217 }
 0x1af   : > { %20235 = vmatpush1.msk.msra.mxu0 %vm26375_vm4, %v6254_v19  ;;  %vm26377_vm4 = vmmov %vm26363_vm1 }
 0x1b0   : > { %v6216_v59 = vpop.permute.xlu0 %6215  ;;  %20236 = vmatmul.mubr.msk.f32.vlgmr.msra.gmra.mrb[0].mxu0 %vm26363_vm1, %v23261_v60  ;;  %9407 = vrot.lane.b32.xlu1 %v22976_v37, %s21396_s19  ;;  %vm26378_vm1 = vnez %v26099_v39 }
 0x1b1   : > { %v6235_v32 = vsel %vm6231_vm0, %v6214_v8, %v6216_v59  ;;  %6508 = vmatprep.mubr.f32.mxu0 %v26195_v3  ;;  %v6236_v31 = vsel %vm6231_vm0, %v6216_v59, %v6218_v56 }
 0x1b2   : > { %9401 = vrot.lane.b32.xlu0 %v22945_v55, %s21396_s19  ;;  %v6257_v23 = vsel %vm22184_vm8, %v6235_v32, 0.0  ;;  %v6222_v33 = vpop.permute.xlu1 %6221 }
 0x1b3   : > { %20237 = vmatprep.subr.msk.mxu1 %vm26376_vm15, %v6257_v23  ;;  %vm26379_vm15 = vnez %v26102_v9 }
 0x1b4   : > { %20238 = vmatpush1.msk.msra.mxu1 %vm26370_vm3, %v6256_v35  ;;  %v6220_v8 = vpop.permute.xlu0 %6219  ;;  %9411 = vrot.lane.b32.xlu1 %v22993_v1, %s21396_s19  ;;  %v6258_v59 = vsel %vm26379_vm15, %v6236_v31, 0.0  ;;  %vm26381_vm15 = vnez %v26110_v11 }
 0x1b5   : > { %v6237_v19 = vsel %vm6231_vm0, %v6218_v56, %v6220_v8  ;;  %20239 = vmatmul.mubr.msk.f32.vlgmr.msra.gmra.mrb[42].mxu1 %vm26377_vm4, %v23261_v60  ;;  %v6238_v32 = vsel %vm6231_vm0, %v6220_v8, %v6222_v33 }
 0x1b6   : > { %9409 = vrot.lane.b32.xlu0 %v22983_v17, %s21396_s19  ;;  %v6259_v36 = vsel %vm26378_vm1, %v6237_v19, 0.0  ;;  %6578 = vmatprep.mubr.f32.mxu1 %v26195_v3  ;;  %v6226_v56 = vpop.permute.xlu1 %6225  ;;  %vm26383_vm1 = vmmov %vm26380_vm12 }
 0x1b7   : > { %20240 = vmatprep.subr.msk.mxu0 %vm26370_vm3, %v6259_v36  ;;  %vm26382_vm3 = vnez %v26113_v51 }
 0x1b8   : > { %20241 = vmatpush1.msk.msra.mxu0 %vm26380_vm12, %v6258_v59  ;;  %v6224_v23 = vpop.permute.xlu0 %6223  ;;  %9415 = vrot.lane.b32.xlu1 %v23009_v7, %s21396_s19  ;;  %v6260_v8 = vsel %vm26382_vm3, %v6238_v32, 0.0  ;;  %vm25931_vm3 = vcmask 7168  }
 0x1b9   : > { %v6239_v35 = vsel %vm6231_vm0, %v6222_v33, %v6224_v23  ;;  %20242 = vmatmul.mubr.msk.f32.vlgmr.msra.gmra.mrb[42].mxu0 %vm26377_vm4, %v23261_v60  ;;  %v6240_v19 = vsel %vm6231_vm0, %v6224_v23, %v6226_v56  ;;  %vm26384_vm4 = vnez %v26119_v14 }
 0x1ba   : > { %9413 = vrot.lane.b32.xlu0 %v22999_v48, %s21396_s19  ;;  %v6261_v31 = vsel %vm26381_vm15, %v6239_v35, 0.0  ;;  %6649 = vmatprep.mubr.f32.mxu0 %v26195_v3  ;;  %v6230_v33 = vpop.permute.xlu1 %6229  ;;  %vm26388_vm15 = vcmask 1043456  }
 0x1bb   : > { %20243 = vmatprep.subr.msk.mxu1 %vm26380_vm12, %v6261_v31  ;;  %vm26385_vm12 = vcmask 31744   ;;  %vm26389_vm8 = vmmov %vm26388_vm15 }
 0x1bc   : > { %20244 = vmatpush1.msk.msra.mxu1 %vm26383_vm1, %v6260_v8  ;;  %v6228_v36 = vpop.permute.xlu0 %6227  ;;  %9419 = vrot.lane.b32.xlu1 %v23026_v44, %s21396_s19  ;;  %vm26386_vm1 = vnez %v26123_v22  ;;  %vm26390_vm2 = vmmov %vm26389_vm8 }
 0x1bd   : > { %v6241_v59 = vsel %vm6231_vm0, %v6226_v56, %v6228_v36  ;;  %v6242_v9 = vsel %vm6231_vm0, %v6228_v36, %v6230_v33  ;;  %20872 = vmatprep.subr.mxu1 %v26195_v3  ;;  %20245 = vmatmul.mubr.msk.f32.vlgmr.msra.gmra.mrb[2].mxu1 %vm26385_vm12, %v23261_v60  ;;  %vm26387_vm0 = vnez %v26126_v13 }
 0x1be   : > { %v6264_v32 = vsel %vm26384_vm4, %v6242_v9, 0.0  ;;  %9417 = vrot.lane.b32.xlu0 %v23016_v63, %s21396_s19  ;;  %v6263_v23 = vsel %vm26386_vm1, %v6241_v59, 0.0  ;;  %v6262_v56 = vsel %vm26387_vm0, %v6240_v19, 0.0  ;;  %v6756_v35 = vpop.permute.xlu1 %6755  ;;  %20874 = vmatprep.mubr.msk.f32.mxu1 %vm26132_vm5, %v26195_v3  ;;  %v20251_v59 = vld [vmem:[%s25786_s1 + $0x2c] sm:$0xf]  ;;  %vm26400_vm0 = vcmask 31744  }
 0x1bf   : > { %20246 = vmatprep.subr.msk.mxu0 %vm26388_vm15, %v6263_v23  ;;  %20873 = vmatpush3.msk.msra.mxu1 %vm26389_vm8, %v6264_v32  ;;  %vm26391_vm8 = vnez %v26034_v25 }
 0x1c0   : > { %20247 = vmatpush1.msk.msra.mxu0 %vm26390_vm2, %v6262_v56  ;;  %v6754_v9 = vpop.permute.xlu0 %6753  ;;  %9423 = vrot.lane.b32.xlu1 %v23044_v62, %s21396_s19  ;;  %vm26392_vm2 = vmmov %vm26385_vm12 }
 0x1c1   : > { %v6777_v31 = vsel %vm25931_vm3, %v6754_v9, %v6756_v35  ;;  %20248 = vmatmul.mubr.msk.f32.vlgmr.msra.gmra.mrb[44].mxu0 %vm26385_vm12, %v23261_v60  ;;  %20875 = vmatmul.mubr.msk.f32.vlgmr.msra.gmra.mrb[44].mxu1 %vm26392_vm2, %v23261_v60  ;;  %vm26393_vm12 = vnez %v26037_v26  ;;  %vm26394_vm2 = vmmov %vm26388_vm15 }
 0x1c2   : > { %9421 = vrot.lane.b32.xlu0 %v23033_v53, %s21396_s19  ;;  %v6799_v8 = vsel %vm26391_vm8, %v6777_v31, 0.0  ;;  %v6758_v33 = vpop.permute.xlu1 %6757  ;;  %6911 = vmatprep.mubr.f32.mxu0 %v26195_v3  ;;  %vm26398_vm8 = vcmask 1043456  }
 0x1c3   : > { %20252 = vmatprep.subr.msk.mxu0 %vm26388_vm15, %v6799_v8  ;;  %6982 = vmatprep.mubr.f32.mxu1 %v26195_v3  ;;  %v6778_v23 = vsel %vm25931_vm3, %v6756_v35, %v6758_v33  ;;  %vm26395_vm15 = vcmask 31744  }
 0x1c4   : > { %v6752_v19 = vpop.permute.xlu0 %6751  ;;  %9951 = vrot.lane.b32.xlu1 %v22958_v57, %s21397_s22 }
 0x1c5   : > { %v6776_v36 = vsel %vm25931_vm3, %v6752_v19, %v6754_v9 }
 0x1c6   : > { %v6798_v60 = vsel %vm26393_vm12, %v6776_v36, 0.0  ;;  %9949 = vrot.lane.b32.xlu0 %v22962_v30, %s21397_s22  ;;  %v6762_v32 = vpop.permute.xlu1 %6761  ;;  %vm26396_vm12 = vnez %v26002_v54 }
 0x1c7   : > { %20253 = vmatpush1.msk.msra.mxu0 %vm26394_vm2, %v6798_v60  ;;  %vm26397_vm2 = vnez %v26005_v27 }
 0x1c8   : > { %v6760_v56 = vpop.permute.xlu0 %6759  ;;  %20254 = vmatmul.mubr.msk.f32.vlgmr.msra.gmra.mrb[0].mxu0 %vm26395_vm15, %v20251_v59  ;;  %9953 = vrot.lane.b32.xlu1 %v22976_v37, %s21397_s22  ;;  %v6800_v8 = vsel %vm26397_vm2, %v6778_v23, 0.0  ;;  %vm26399_vm15 = vmmov %vm26398_vm8  ;;  %vm26401_vm2 = vnez %v26043_v34 }
 0x1c9   : > { %v6779_v9 = vsel %vm25931_vm3, %v6758_v33, %v6760_v56  ;;  %7052 = vmatprep.mubr.f32.mxu0 %v26195_v3  ;;  %v6780_v19 = vsel %vm25931_vm3, %v6760_v56, %v6762_v32 }
 0x1ca   : > { %9947 = vrot.lane.b32.xlu0 %v22945_v55, %s21397_s22  ;;  %v6801_v31 = vsel %vm26396_vm12, %v6779_v9, 0.0  ;;  %v6766_v35 = vpop.permute.xlu1 %6765  ;;  %vm26403_vm12 = vmmov %vm26399_vm15 }
 0x1cb   : > { %20255 = vmatprep.subr.msk.mxu1 %vm26398_vm8, %v6801_v31  ;;  %vm26402_vm8 = vnez %v26047_v18 }
 0x1cc   : > { %20256 = vmatpush1.msk.msra.mxu1 %vm26399_vm15, %v6800_v8  ;;  %v6764_v33 = vpop.permute.xlu0 %6763  ;;  %9957 = vrot.lane.b32.xlu1 %v22993_v1, %s21397_s22  ;;  %v6802_v23 = vsel %vm26402_vm8, %v6780_v19, 0.0  ;;  %vm26404_vm8 = vnez %v26024_v58 }
 0x1cd   : > { %v6781_v36 = vsel %vm25931_vm3, %v6762_v32, %v6764_v33  ;;  %20257 = vmatmul.mubr.msk.f32.vlgmr.msra.gmra.mrb[46].mxu1 %vm26400_vm0, %v20251_v59  ;;  %v6782_v32 = vsel %vm25931_vm3, %v6764_v33, %v6766_v35 }
 0x1ce   : > { %9955 = vrot.lane.b32.xlu0 %v22983_v17, %s21397_s22  ;;  %v6803_v60 = vsel %vm26401_vm2, %v6781_v36, 0.0  ;;  %7122 = vmatprep.mubr.f32.mxu1 %v26195_v3  ;;  %v6770_v56 = vpop.permute.xlu1 %6769  ;;  %vm26406_vm2 = vmmov %vm26403_vm12 }
 0x1cf   : > { %20258 = vmatprep.subr.msk.mxu0 %vm26399_vm15, %v6803_v60  ;;  %vm26405_vm15 = vnez %v26018_v50 }
 0x1d0   : > { %20259 = vmatpush1.msk.msra.mxu0 %vm26403_vm12, %v6802_v23  ;;  %v6768_v9 = vpop.permute.xlu0 %6767  ;;  %9961 = vrot.lane.b32.xlu1 %v23009_v7, %s21397_s22  ;;  %v6804_v19 = vsel %vm26405_vm15, %v6782_v32, 0.0 }
 0x1d1   : > { %v6783_v31 = vsel %vm25931_vm3, %v6766_v35, %v6768_v9  ;;  %20260 = vmatmul.mubr.msk.f32.vlgmr.msra.gmra.mrb[46].mxu0 %vm26400_vm0, %v20251_v59  ;;  %v6784_v35 = vsel %vm25931_vm3, %v6768_v9, %v6770_v56 }
 0x1d2   : > { %9959 = vrot.lane.b32.xlu0 %v22999_v48, %s21397_s22  ;;  %v6805_v8 = vsel %vm26404_vm8, %v6783_v31, 0.0  ;;  %7193 = vmatprep.mubr.f32.mxu0 %v26195_v3  ;;  %v6774_v33 = vpop.permute.xlu1 %6773  ;;  %vm26407_vm8 = vnez %v26071_v12 }
 0x1d3   : > { %20261 = vmatprep.subr.msk.mxu1 %vm26403_vm12, %v6805_v8  ;;  %vm26409_vm12 = vnez %v26057_v43 }
 0x1d4   : > { %20262 = vmatpush1.msk.msra.mxu1 %vm26406_vm2, %v6804_v19  ;;  %v6772_v36 = vpop.permute.xlu0 %6771  ;;  %9965 = vrot.lane.b32.xlu1 %v23026_v44, %s21397_s22  ;;  %vm26408_vm2 = vnez %v26051_v10 }
 0x1d5   : > { %v6785_v60 = vsel %vm25931_vm3, %v6770_v56, %v6772_v36  ;;  %v6786_v23 = vsel %vm25931_vm3, %v6772_v36, %v6774_v33  ;;  %20263 = vmatmul.mubr.msk.f32.vlgmr.msra.gmra.mrb[2].mxu1 %vm26400_vm0, %v20251_v59  ;;  %20877 = vmatprep.subr.mxu1 %v26195_v3  ;;  %v6806_v56 = vsel %vm26409_vm12, %v6784_v35, 0.0  ;;  %vm26410_vm3 = vcmask 1043456   ;;  %v20269_v33 = vld [vmem:[%s25786_s1 + $0x30] sm:$0xf] }
 0x1d6   : > { %v6808_v32 = vsel %vm26407_vm8, %v6786_v23, 0.0  ;;  %9963 = vrot.lane.b32.xlu0 %v23016_v63, %s21397_s22  ;;  %v6807_v9 = vsel %vm26408_vm2, %v6785_v60, 0.0  ;;  %vm26411_vm0 = vmmov %vm26410_vm3  ;;  %v7774_v31 = vpop.permute.xlu1 %7773  ;;  %20879 = vmatprep.mubr.msk.f32.mxu1 %vm26132_vm5, %v26195_v3  ;;  %vm26413_vm8 = vcmask 31744   ;;  %v7282_v60 = vld [vmem:[#allocation2 + $0x2c] sm:$0xf]  ;;  %vm26428_vm2 = vnez %v26164_v20 }
 0x1d7   : > { %20264 = vmatprep.subr.msk.mxu0 %vm26410_vm3, %v6807_v9  ;;  %20878 = vmatpush3.msk.msra.mxu1 %vm26411_vm0, %v6808_v32  ;;  %vm26412_vm15 = vmmov %vm26411_vm0 }
 0x1d8   : > { %20265 = vmatpush1.msk.msra.mxu0 %vm26412_vm15, %v6806_v56  ;;  %v7772_v8 = vpop.permute.xlu0 %7771  ;;  %vm26414_vm1 = vmmov %vm26413_vm8  ;;  %10458 = vrot.lane.b32.xlu1 %v22962_v30, %s21398_s27 }
 0x1d9   : > { %20266 = vmatmul.mubr.msk.f32.vlgmr.msra.gmra.mrb[48].mxu0 %vm26413_vm8, %v20251_v59  ;;  %20880 = vmatmul.mubr.msk.f32.vlgmr.msra.gmra.mrb[48].mxu1 %vm26414_vm1, %v20251_v59  ;;  %vm26415_vm3 = vmmov %vm26411_vm0 }
 0x1da   : > { %9967 = vrot.lane.b32.xlu0 %v23033_v53, %s21397_s22  ;;  %20270 = vmatprep.subr.msk.mxu0 %vm26415_vm3, %v22962_v30  ;;  %vm26416_vm15 = vmmov %vm26411_vm0  ;;  %v7776_v19 = vpop.permute.xlu1 %7775 }
 0x1db   : > { %20273 = vmatprep.subr.msk.mxu1 %vm26416_vm15, %v22976_v37  ;;  %vm26417_vm1 = vmmov %vm26411_vm0  ;;  %7385 = vmatprep.mubr.f32.mxu0 %v26195_v3  ;;  %vm25938_vm15 = vcmask 1039360  }
 0x1dc   : > { %20271 = vmatpush1.msk.msra.mxu0 %vm26417_vm1, %v22945_v55  ;;  %v7770_v59 = vpop.permute.xlu0 %7769  ;;  %vm26418_vm8 = vmmov %vm26411_vm0  ;;  %7456 = vmatprep.mubr.f32.mxu1 %v26195_v3  ;;  %vm26419_vm0 = vcmask 31744   ;;  %v7796_v56 = vsel %vm25938_vm15, %v7774_v31, %v7776_v19 }
 0x1dd   : > { %20274 = vmatpush1.msk.msra.mxu1 %vm26418_vm8, %v22958_v57  ;;  %20272 = vmatmul.mubr.msk.f32.vlgmr.msra.gmra.mrb[0].mxu0 %vm26419_vm0, %v20269_v33  ;;  %vm26420_vm3 = vmmov %vm26419_vm0  ;;  %v7794_v43 = vsel %vm25938_vm15, %v7770_v59, %v7772_v8 }
 0x1de   : > { %20275 = vmatmul.mubr.msk.f32.vlgmr.msra.gmra.mrb[50].mxu1 %vm26420_vm3, %v20269_v33  ;;  %9969 = vrot.lane.b32.xlu1 %v23044_v62, %s21397_s22  ;;  %v7780_v30 = vpop.permute.xlu1 %7779  ;;  %vm26421_vm12 = vmmov %vm26417_vm1 }
 0x1df   : > { %10460 = vrot.lane.b32.xlu0 %v22958_v57, %s21398_s27  ;;  %20276 = vmatprep.subr.msk.mxu0 %vm26417_vm1, %v22993_v1  ;;  %vm26422_vm8 = vmmov %vm26417_vm1  ;;  %v7795_v57 = vsel %vm25938_vm15, %v7772_v8, %v7774_v31  ;;  %v26432_v31 = vld [vmem:[#allocation23_spill] sm:$0xff]  ;;  %v26434_v8 = vld [vmem:[#allocation21_spill] sm:$0xff] }
 0x1e0   : > { %20279 = vmatprep.subr.msk.mxu1 %vm26421_vm12, %v23009_v7  ;;  %v7778_v35 = vpop.permute.xlu0 %7777  ;;  %20277 = vmatpush1.msk.msra.mxu0 %vm26422_vm8, %v22983_v17  ;;  %vm26423_vm0 = vmmov %vm26417_vm1  ;;  %vm26425_vm1 = vcmask 31744  }
 0x1e1   : > { %7526 = vmatprep.mubr.f32.mxu0 %v26195_v3  ;;  %v7797_v36 = vsel %vm25938_vm15, %v7776_v19, %v7778_v35  ;;  %20280 = vmatpush1.msk.msra.mxu1 %vm26423_vm0, %v22999_v48  ;;  %vm26424_vm3 = vmmov %vm26423_vm0 }
 0x1e2   : > { %7596 = vmatprep.mubr.f32.mxu1 %v26195_v3  ;;  %20282 = vmatprep.subr.msk.mxu0 %vm26424_vm3, %v23026_v44  ;;  %v7784_v23 = vpop.permute.xlu1 %7783  ;;  %vm26426_vm12 = vmmov %vm26425_vm1  ;;  %v7819_v32 = vsel %vm26428_vm2, %v7797_v36, 0.0  ;;  %vm26429_vm3 = vnez %v26151_v5  ;;  %vm26436_vm2 = vcmask 31744  }
 0x1e3   : > { %20278 = vmatmul.mubr.msk.f32.vlgmr.msra.gmra.mrb[50].mxu0 %vm26425_vm1, %v20269_v33  ;;  %20281 = vmatmul.mubr.msk.f32.vlgmr.msra.gmra.mrb[2].mxu1 %vm26426_vm12, %v20269_v33  ;;  %vm26427_vm8 = vmmov %vm26423_vm0  ;;  %v7817_v10 = vsel %vm26429_vm3, %v7795_v57, 0.0  ;;  %vm26441_vm3 = vcmask 1043456  }
 0x1e4   : > { %20283 = vmatpush1.msk.msra.mxu0 %vm26427_vm8, %v23016_v63  ;;  %v7782_v9 = vpop.permute.xlu0 %7781  ;;  %20882 = vmatprep.subr.mxu1 %v26195_v3  ;;  %vm26430_vm1 = vmmov %vm26423_vm0  ;;  %vm26433_vm8 = vnez %v26432_v31 }
 0x1e5   : > { %10462 = vrot.lane.b32.xlu1 %v22976_v37, %s21398_s27  ;;  %10456 = vrot.lane.b32.xlu0 %v22945_v55, %s21398_s27  ;;  %v7799_v36 = vsel %vm25938_vm15, %v7780_v30, %v7782_v9  ;;  %vm26431_vm12 = vmmov %vm26423_vm0  ;;  %v7818_v55 = vsel %vm26433_vm8, %v7796_v56, 0.0  ;;  %vm25941_vm8 = vcmask 1031168  }
 0x1e6   : > { %20883 = vmatpush3.msk.msra.mxu1 %vm26423_vm0, %v7282_v60  ;;  %20288 = vmatprep.subr.msk.mxu0 %vm26430_vm1, %v7817_v10  ;;  %v7788_v20 = vpop.permute.xlu1 %7787  ;;  %vm26435_vm0 = vnez %v26434_v8  ;;  %vm26437_vm15 = vmmov %vm26436_vm2  ;;  %v26438_v10 = vld [vmem:[#allocation24_spill] sm:$0xff] }
 0x1e7   : > { %20291 = vmatprep.subr.msk.mxu1 %vm26431_vm12, %v7819_v32  ;;  %7667 = vmatprep.mubr.f32.mxu0 %v26195_v3  ;;  %v7816_v19 = vsel %vm26435_vm0, %v7794_v43, 0.0  ;;  %vm26439_vm1 = vnez %v26438_v10  ;;  %vm26440_vm12 = vcmask 1039360   ;;  %vm26442_vm4 = vmmov %vm26441_vm3  ;;  %v20287_v32 = vld [vmem:[%s25786_s1 + $0x34] sm:$0xf] }
 0x1e8   : > { %20884 = vmatprep.mubr.msk.f32.mxu1 %vm26132_vm5, %v26195_v3  ;;  %v7786_v37 = vpop.permute.xlu0 %7785  ;;  %20284 = vmatmul.mubr.msk.f32.vlgmr.msra.gmra.mrb[52].mxu0 %vm26436_vm2, %v20269_v33  ;;  %v7821_v59 = vsel %vm26439_vm1, %v7799_v36, 0.0  ;;  %v7798_v57 = vsel %vm26440_vm12, %v7778_v35, %v7780_v30  ;;  %vm26443_vm9 = vmmov %vm26440_vm12  ;;  %v26445_v30 = vld [vmem:[#allocation25_spill] sm:$0xff] }
 0x1e9   : > { %20885 = vmatmul.mubr.msk.f32.vlgmr.msra.gmra.mrb[52].mxu1 %vm26437_vm15, %v20269_v33  ;;  %20289 = vmatpush1.msk.msra.mxu0 %vm26441_vm3, %v7816_v19  ;;  %v7801_v60 = vsel %vm26443_vm9, %v7784_v23, %v7786_v37  ;;  %vm26444_vm2 = vmmov %vm26441_vm3  ;;  %v7800_v56 = vsel %vm26443_vm9, %v7782_v9, %v7784_v23  ;;  %vm26447_vm3 = vnez %v26343_v61 }
 0x1ea   : > { %20292 = vmatpush1.msk.msra.mxu1 %vm26442_vm4, %v7818_v55  ;;  %10466 = vrot.lane.b32.xlu1 %v22993_v1, %s21398_s27  ;;  %v7792_v43 = vpop.permute.xlu1 %7791  ;;  %vm26446_vm4 = vnez %v26445_v30  ;;  %v7823_v1 = vsel %vm26447_vm3, %v7801_v60, 0.0  ;;  %vm26448_vm12 = vmmov %vm26444_vm2 }
 0x1eb   : > { %10464 = vrot.lane.b32.xlu0 %v22983_v17, %s21398_s27  ;;  %20294 = vmatprep.subr.msk.mxu0 %vm26444_vm2, %v7821_v59  ;;  %v7820_v35 = vsel %vm26446_vm4, %v7798_v57, 0.0  ;;  %vm26449_vm1 = vmmov %vm26437_vm15 }
 0x1ec   : > { %7929 = vmatprep.mubr.f32.mxu0 %v26195_v3  ;;  %v7790_v33 = vpop.permute.xlu0 %7789  ;;  %8000 = vmatprep.mubr.f32.mxu1 %v26195_v3  ;;  %vm26450_vm2 = vmmov %vm26443_vm9 }
 0x1ed   : > { %20290 = vmatmul.mubr.msk.f32.vlgmr.msra.gmra.mrb[0].mxu0 %vm26437_vm15, %v20287_v32  ;;  %20293 = vmatmul.mubr.msk.f32.vlgmr.msra.gmra.mrb[54].mxu1 %vm26449_vm1, %v20287_v32  ;;  %v7803_v17 = vsel %vm26450_vm2, %v7788_v20, %v7790_v33  ;;  %vm26451_vm9 = vmmov %vm26450_vm2  ;;  %vm26452_vm15 = vnez %v26344_v47 }
 0x1ee   : > { %20295 = vmatpush1.msk.msra.mxu0 %vm26448_vm12, %v7820_v35  ;;  %10470 = vrot.lane.b32.xlu1 %v23009_v7, %s21398_s27  ;;  %v7804_v23 = vsel %vm26451_vm9, %v7790_v33, %v7792_v43  ;;  %v8318_v9 = vpop.permute.xlu1 %8317  ;;  %v7822_v36 = vsel %vm26452_vm15, %v7800_v56, 0.0  ;;  %vm26453_vm3 = vmmov %vm26448_vm12  ;;  %vm26458_vm9 = vnez %v26200_v2  ;;  %v23545_v43 = vld [vmem:[#allocation2 + $0x4] sm:$0xff]  ;;  %v23557_v56 = vld [vmem:[#allocation2 + $0xc] sm:$0xff] }
 0x1ef   : > { %10468 = vrot.lane.b32.xlu0 %v22999_v48, %s21398_s27  ;;  %20297 = vmatprep.subr.msk.mxu1 %vm26453_vm3, %v7823_v1  ;;  %vm26454_vm1 = vmmov %vm26450_vm2  ;;  %vm26456_vm2 = vcmask 31744   ;;  %v7825_v48 = vsel %vm26349_vm11, %v7803_v17, 0.0  ;;  %v7826_v59 = vsel %vm26347_vm6, %v7804_v23, 0.0  ;;  %vm26462_vm11 = vcmask 1031168  }
 0x1f0   : > { %8070 = vmatprep.mubr.f32.mxu0 %v26195_v3  ;;  %v8316_v55 = vpop.permute.xlu0 %8315  ;;  %v7802_v19 = vsel %vm26454_vm1, %v7786_v37, %v7788_v20  ;;  %vm26455_vm12 = vmmov %vm26453_vm3  ;;  %8140 = vmatprep.mubr.f32.mxu1 %v26195_v3  ;;  %vm26457_vm3 = vnez %v26209_v46  ;;  %vm26464_vm6 = vnez %v26217_v28  ;;  %v23561_v1 = vcombine.high %v23545_v43, %v23545_v43 }
 0x1f1   : > { %20298 = vmatpush1.msk.msra.mxu1 %vm26455_vm12, %v7822_v36  ;;  %20296 = vmatmul.mubr.msk.f32.vlgmr.msra.gmra.mrb[54].mxu0 %vm26456_vm2, %v20287_v32  ;;  %v8339_v7 = vsel %vm25941_vm8, %v8316_v55, %v8318_v9  ;;  %v7824_v57 = vsel %vm26458_vm9, %v7802_v19, 0.0  ;;  %vm26459_vm1 = vmmov %vm26456_vm2  ;;  %v23580_v36 = vcombine.high %v23557_v56, %v23557_v56 }
 0x1f2   : > { %20887 = vmatprep.subr.mxu1 %v26195_v3  ;;  %10474 = vrot.lane.b32.xlu1 %v23026_v44, %s21398_s27  ;;  %v8361_v20 = vsel %vm26457_vm3, %v8339_v7, 0.0  ;;  %v8320_v37 = vpop.permute.xlu1 %8319  ;;  %vm26460_vm2 = vmmov %vm26455_vm12 }
 0x1f3   : > { %10472 = vrot.lane.b32.xlu0 %v23016_v63, %s21398_s27  ;;  %20299 = vmatmul.mubr.msk.f32.vlgmr.msra.gmra.mrb[2].mxu1 %vm26459_vm1, %v20287_v32  ;;  %vm26461_vm8 = vmmov %vm26460_vm2 }
 0x1f4   : > { %20300 = vmatprep.subr.msk.mxu0 %vm26455_vm12, %v7825_v48  ;;  %v8314_v60 = vpop.permute.xlu0 %8313  ;;  %20888 = vmatpush3.msk.msra.mxu1 %vm26460_vm2, %v7826_v59  ;;  %vm26463_vm3 = vmmov %vm26460_vm2  ;;  %vm26471_vm12 = vnez %v26224_v38  ;;  %v23589_v48 = vld [vmem:[#allocation2 + $0x14] sm:$0xff] }
 0x1f5   : > { %20301 = vmatpush1.msk.msra.mxu0 %vm26461_vm8, %v7824_v57  ;;  %v8338_v44 = vsel %vm26462_vm11, %v8314_v60, %v8316_v55  ;;  %8211 = vmatprep.mubr.f32.mxu0 %v26195_v3  ;;  %vm26465_vm9 = vmmov %vm26459_vm1 }
 0x1f6   : > { %20306 = vmatprep.subr.msk.mxu0 %vm26463_vm3, %v8361_v20  ;;  %v8360_v63 = vsel %vm26464_vm6, %v8338_v44, 0.0  ;;  %20302 = vmatmul.mubr.msk.f32.vlgmr.msra.gmra.mrb[56].mxu0 %vm26465_vm9, %v20287_v32  ;;  %v8324_v33 = vpop.permute.xlu1 %8323  ;;  %vm26466_vm8 = vmmov %vm26462_vm11 }
 0x1f7   : > { %10478 = vrot.lane.b32.xlu1 %v23044_v62, %s21398_s27  ;;  %10476 = vrot.lane.b32.xlu0 %v23033_v53, %s21398_s27  ;;  %v8340_v35 = vsel %vm26466_vm8, %v8318_v9, %v8320_v37  ;;  %vm26467_vm11 = vmmov %vm26460_vm2  ;;  %v23574_v62 = vld [vmem:[%s25786_s1 + $0x38] sm:$0xf] }
 0x1f8   : > { %20307 = vmatpush1.msk.msra.mxu0 %vm26467_vm11, %v8360_v63  ;;  %v8322_v17 = vpop.permute.xlu0 %8321  ;;  %vm26468_vm3 = vmmov %vm26466_vm8  ;;  %20889 = vmatprep.mubr.msk.f32.mxu1 %vm26132_vm5, %v26195_v3  ;;  %v8362_v9 = vsel %vm26471_vm12, %v8340_v35, 0.0  ;;  %vm26475_vm12 = vnez %v26231_v6  ;;  %v23613_v63 = vld [vmem:[#allocation2 + $0x1c] sm:$0xff] }
 0x1f9   : > { %v8341_v23 = vsel %vm26468_vm3, %v8320_v37, %v8322_v17  ;;  %8473 = vmatprep.mubr.f32.mxu0 %v26195_v3  ;;  %vm26469_vm9 = vmmov %vm26459_vm1  ;;  %vm26470_vm1 = vnez %v26221_v0  ;;  %v23606_v37 = vcombine.high %v23589_v48, %v23589_v48 }
 0x1fa   : > { %20890 = vmatmul.mubr.msk.f32.vlgmr.msra.gmra.mrb[56].mxu1 %vm26469_vm9, %v20287_v32  ;;  %v8363_v53 = vsel %vm26470_vm1, %v8341_v23, 0.0  ;;  %v8328_v32 = vpop.permute.xlu1 %8327  ;;  %vm26472_vm8 = vmmov %vm26468_vm3  ;;  %20308 = vmatmul.mubr.msk.f32.vlgmr.msra.gmra.mrb[0].mxu0 %vm26469_vm9, %v23574_v62  ;;  %v23628_v23 = vcombine.high %v23613_v63, %v23613_v63 }
 0x1fb   : > { %11004 = vrot.lane.b32.xlu1 %v23557_v56, %s21399_s15  ;;  %20309 = vmatprep.subr.msk.mxu1 %vm26460_vm2, %v8363_v53  ;;  %v8342_v55 = vsel %vm26472_vm8, %v8322_v17, %v8324_v33  ;;  %vm26473_vm11 = vmmov %vm26460_vm2  ;;  %vm26476_vm8 = vnez %v26234_v15 }
 0x1fc   : > { %11002 = vrot.lane.b32.xlu0 %v23561_v1, %s21399_s15  ;;  %20310 = vmatpush1.msk.msra.mxu1 %vm26473_vm11, %v8362_v9  ;;  %v8326_v19 = vpop.permute.xlu0 %8325  ;;  %vm26474_vm2 = vmmov %vm26469_vm9  ;;  %v8364_v20 = vsel %vm26476_vm8, %v8342_v55, 0.0  ;;  %vm26479_vm8 = vcmask 31744  }
 0x1fd   : > { %v8343_v7 = vsel %vm26468_vm3, %v8324_v33, %v8326_v19  ;;  %8544 = vmatprep.mubr.f32.mxu1 %v26195_v3  ;;  %8614 = vmatprep.mubr.f32.mxu0 %v26195_v3  ;;  %v8344_v60 = vsel %vm26468_vm3, %v8326_v19, %v8328_v32  ;;  %vm26477_vm9 = vmmov %vm26473_vm11 }
 0x1fe   : > { %20311 = vmatmul.mubr.msk.f32.vlgmr.msra.gmra.mrb[58].mxu1 %vm26474_vm2, %v23574_v62  ;;  %v8365_v59 = vsel %vm26475_vm12, %v8343_v7, 0.0  ;;  %v8332_v57 = vpop.permute.xlu1 %8331  ;;  %vm26478_vm2 = vmmov %vm26468_vm3 }
 0x1ff   : > { %11006 = vrot.lane.b32.xlu1 %v23580_v36, %s21399_s15  ;;  %20312 = vmatprep.subr.msk.mxu0 %vm26473_vm11, %v8365_v59  ;;  %vm26480_vm11 = vnez %v26244_v52  ;;  %vm26481_vm3 = vmmov %vm26477_vm9 }
 0x200   : > { %11000 = vrot.lane.b32.xlu0 %v23545_v43, %s21399_s15  ;;  %20313 = vmatpush1.msk.msra.mxu0 %vm26477_vm9, %v8364_v20  ;;  %v8330_v44 = vpop.permute.xlu0 %8329  ;;  %v8366_v17 = vsel %vm26480_vm11, %v8344_v60, 0.0  ;;  %vm26483_vm9 = vmmov %vm26478_vm2 }
 0x201   : > { %v8345_v33 = vsel %vm26478_vm2, %v8328_v32, %v8330_v44  ;;  %20314 = vmatmul.mubr.msk.f32.vlgmr.msra.gmra.mrb[58].mxu0 %vm26479_vm8, %v23574_v62  ;;  %8684 = vmatprep.mubr.f32.mxu1 %v26195_v3  ;;  %vm26482_vm8 = vmmov %vm26481_vm3  ;;  %v23634_v32 = vld [vmem:[#allocation2 + $0x24] sm:$0xff]  ;;  %v8346_v55 = vsel %vm26483_vm9, %v8330_v44, %v8332_v57  ;;  %vm26488_vm9 = vcmask 31744  }
 0x202   : > { %v8367_v35 = vsel %vm26367_vm10, %v8345_v33, 0.0  ;;  %8755 = vmatprep.mubr.f32.mxu0 %v26195_v3  ;;  %v8336_v53 = vpop.permute.xlu1 %8335  ;;  %vm26484_vm11 = vmmov %vm26478_vm2  ;;  %vm26485_vm10 = vcmask 31744   ;;  %v8368_v44 = vsel %vm22736_vm13, %v8346_v55, 0.0 }
 0x203   : > { %11010 = vrot.lane.b32.xlu1 %v23606_v37, %s21399_s15  ;;  %20315 = vmatprep.subr.msk.mxu1 %vm26481_vm3, %v8367_v35  ;;  %vm8881_vm3 = vcmask 932864   ;;  %v23660_v35 = vld [vmem:[#allocation2 + $0x2c] sm:$0xff] }
 0x204   : > { %11008 = vrot.lane.b32.xlu0 %v23589_v48, %s21399_s15  ;;  %20316 = vmatpush1.msk.msra.mxu1 %vm26482_vm8, %v8366_v17  ;;  %v8334_v9 = vpop.permute.xlu0 %8333 }
 0x205   : > { %v8347_v19 = vsel %vm26478_vm2, %v8332_v57, %v8334_v9  ;;  %v8348_v7 = vsel %vm26484_vm11, %v8334_v9, %v8336_v53  ;;  %20317 = vmatmul.mubr.msk.f32.vlgmr.msra.gmra.mrb[2].mxu1 %vm26485_vm10, %v23574_v62  ;;  %20892 = vmatprep.subr.mxu1 %v26195_v3  ;;  %v23652_v57 = vcombine.high %v23634_v32, %v23634_v32  ;;  %vm26486_vm10 = vmmov %vm26482_vm8 }
 0x206   : > { %v8370_v59 = vsel %vm22718_vm7, %v8348_v7, 0.0  ;;  %v8369_v20 = vsel %vm22730_vm14, %v8347_v19, 0.0  ;;  %20894 = vmatprep.mubr.msk.f32.mxu1 %vm26132_vm5, %v26195_v3  ;;  %v8862_v60 = vpop.permute.xlu1 %8861  ;;  %vm26487_vm11 = vmmov %vm26482_vm8  ;;  %v23675_v9 = vcombine.high %v23660_v35, %v23660_v35  ;;  %v1186_v19 = vpop.f32.mrb[2].mxu0 }
 0x207   : > { %11014 = vrot.lane.b32.xlu1 %v23628_v23, %s21399_s15  ;;  %20318 = vmatprep.subr.msk.mxu0 %vm26486_vm10, %v8369_v20  ;;  %vm26489_vm2 = vmmov %vm26488_vm9  ;;  %vm26490_vm10 = vnez %v26066_v16  ;;  %v1188_v7 = vpop.f32.mrb[3].mxu0  ;;  %v23685_v20 = vld [vmem:[%s25786_s1 + $0x3c] sm:$0xf] }
 0x208   : > { %11012 = vrot.lane.b32.xlu0 %v23613_v63, %s21399_s15  ;;  %20893 = vmatpush3.msk.msra.mxu1 %vm26487_vm11, %v8370_v59  ;;  %v8860_v33 = vpop.permute.xlu0 %8859  ;;  %vm26491_vm11 = vmmov %vm26482_vm8 }
 0x209   : > { %20319 = vmatpush1.msk.msra.mxu0 %vm26482_vm8, %v8368_v44  ;;  %v8883_v17 = vsel %vm8881_vm3, %v8860_v33, %v8862_v60  ;;  %20895 = vmatmul.mubr.msk.f32.vlgmr.msra.gmra.mrb[60].mxu1 %vm26488_vm9, %v23574_v62  ;;  %v1327_v44 = vpop.f32.mrb[4].mxu0  ;;  %vm26492_vm8 = vnez %v26374_v29  ;;  %vm26493_vm9 = vmmov %vm26491_vm11 }
 0x20a   : > { %20320 = vmatmul.mubr.msk.f32.vlgmr.msra.gmra.mrb[60].mxu0 %vm26489_vm2, %v23574_v62  ;;  %v8905_v53 = vsel %vm26490_vm10, %v8883_v17, 0.0  ;;  %9088 = vmatprep.mubr.f32.mxu1 %v26195_v3  ;;  %v8864_v55 = vpop.permute.xlu1 %8863 }
 0x20b   : > { %11018 = vrot.lane.b32.xlu1 %v23652_v57, %s21399_s15  ;;  %20324 = vmatprep.subr.msk.mxu0 %vm26491_vm11, %v8905_v53  ;;  %v1328_v53 = vpop.f32.mrb[5].mxu0  ;;  %vm26494_vm11 = vnez %v26088_v42 }
 0x20c   : > { %11016 = vrot.lane.b32.xlu0 %v23634_v32, %s21399_s15  ;;  %v8858_v62 = vpop.permute.xlu0 %8857  ;;  %9017 = vmatprep.mubr.f32.mxu0 %v26195_v3  ;;  %v1644_v21 = vpop.f32.mrb[6].mxu0 }
 0x20d   : > { %v8882_v59 = vsel %vm8881_vm3, %v8858_v62, %v8860_v33  ;;  %v8884_v33 = vsel %vm8881_vm3, %v8862_v60, %v8864_v55  ;;  %v1645_v7 = vadd.f32 %v1644_v21, %v1186_v19  ;;  %v1646_v44 = vpop.f32.mrb[7].mxu0 }
 0x20e   : > { %v8904_v17 = vsel %vm26492_vm8, %v8882_v59, 0.0  ;;  %v8868_v16 = vpop.permute.xlu1 %8867  ;;  %v1785_v29 = vpop.f32.mrb[8].mxu0  ;;  %vm26496_vm8 = vcmask 1043456  }
 0x20f   : > { %11022 = vrot.lane.b32.xlu1 %v23675_v9, %s21399_s15  ;;  %20325 = vmatpush1.msk.msra.mxu0 %vm26493_vm9, %v8904_v17  ;;  %v1786_v49 = vpop.f32.mrb[9].mxu0  ;;  %vm26495_vm9 = vnez %v26091_v24 }
 0x210   : > { %11020 = vrot.lane.b32.xlu0 %v23660_v35, %s21399_s15  ;;  %v8866_v62 = vpop.permute.xlu0 %8865  ;;  %20326 = vmatmul.mubr.msk.f32.vlgmr.msra.gmra.mrb[0].mxu0 %vm26489_vm2, %v23685_v20  ;;  %v8906_v45 = vsel %vm26495_vm9, %v8884_v33, 0.0  ;;  %v1787_v60 = vadd.f32 %v1786_v49, %v1328_v53  ;;  %v2147_v19 = vpop.f32.mrb[10].mxu0  ;;  %vm26497_vm2 = vmmov %vm26496_vm8  ;;  %vm26498_vm9 = vcmask 31744  }
 0x211   : > { %v8885_v59 = vsel %vm8881_vm3, %v8864_v55, %v8866_v62  ;;  %9158 = vmatprep.mubr.f32.mxu0 %v26195_v3  ;;  %v8886_v29 = vsel %vm8881_vm3, %v8866_v62, %v8868_v16  ;;  %v2365_v44 = vadd.f32 %v2147_v19, %v1645_v7 }
 0x212   : > { %v8907_v17 = vsel %vm26494_vm11, %v8885_v59, 0.0  ;;  %v8872_v21 = vpop.permute.xlu1 %8871  ;;  %v2149_v59 = vpop.f32.mrb[11].mxu0 }
 0x213   : > { %11548 = vrot.lane.b32.xlu1 %v23557_v56, %s21400_s21  ;;  %20327 = vmatprep.subr.msk.mxu1 %vm26496_vm8, %v8907_v17  ;;  %v2288_v24 = vpop.f32.mrb[12].mxu0  ;;  %vm26499_vm8 = vnez %v26099_v39  ;;  %v26500_v17 = vld [vmem:[#allocation20_spill] sm:$0xff] }
 0x214   : > { %11546 = vrot.lane.b32.xlu0 %v23561_v1, %s21400_s21  ;;  %20328 = vmatpush1.msk.msra.mxu1 %vm26497_vm2, %v8906_v45  ;;  %v8870_v55 = vpop.permute.xlu0 %8869  ;;  %v2289_v53 = vpop.f32.mrb[13].mxu0  ;;  %vm26501_vm11 = vnez %v26500_v17 }
 0x215   : > { %v8887_v33 = vsel %vm8881_vm3, %v8868_v16, %v8870_v55  ;;  %20329 = vmatmul.mubr.msk.f32.vlgmr.msra.gmra.mrb[62].mxu1 %vm26498_vm9, %v23685_v20  ;;  %v8908_v62 = vsel %vm26501_vm11, %v8886_v29, 0.0  ;;  %v2368_v16 = vadd.f32 %v2289_v53, %v1787_v60  ;;  %v2713_v7 = vpop.f32.mrb[14].mxu0  ;;  %v8888_v24 = vsel %vm8881_vm3, %v8870_v55, %v8872_v21  ;;  %vm26502_vm9 = vmmov %vm26497_vm2 }
 0x216   : > { %v8909_v49 = vsel %vm26499_vm8, %v8887_v33, 0.0  ;;  %9228 = vmatprep.mubr.f32.mxu1 %v26195_v3  ;;  %v8876_v45 = vpop.permute.xlu1 %8875  ;;  %v2931_v59 = vadd.f32 %v2713_v7, %v2365_v44  ;;  %v2715_v33 = vpop.f32.mrb[15].mxu0  ;;  %vm26503_vm11 = vcmask 31744   ;;  %vm26505_vm8 = vnez %v26113_v51 }
 0x217   : > { %11550 = vrot.lane.b32.xlu1 %v23580_v36, %s21400_s21  ;;  %20330 = vmatprep.subr.msk.mxu0 %vm26497_vm2, %v8909_v49  ;;  %v2854_v17 = vpop.f32.mrb[16].mxu0  ;;  %vm26504_vm2 = vnez %v26110_v11  ;;  %v8910_v55 = vsel %vm26505_vm8, %v8888_v24, 0.0  ;;  %vm26507_vm8 = vcmask 31744  }
 0x218   : > { %11544 = vrot.lane.b32.xlu0 %v23545_v43, %s21400_s21  ;;  %20331 = vmatpush1.msk.msra.mxu0 %vm26502_vm9, %v8908_v62  ;;  %v8874_v19 = vpop.permute.xlu0 %8873  ;;  %v2855_v49 = vpop.f32.mrb[17].mxu0 }
 0x219   : > { %v8889_v29 = vsel %vm8881_vm3, %v8872_v21, %v8874_v19  ;;  %20332 = vmatmul.mubr.msk.f32.vlgmr.msra.gmra.mrb[62].mxu0 %vm26503_vm11, %v23685_v20  ;;  %v2934_v21 = vadd.f32 %v2855_v49, %v2368_v16  ;;  %v3279_v53 = vpop.f32.mrb[18].mxu0  ;;  %vm26506_vm11 = vmmov %vm26502_vm9  ;;  %v8890_v33 = vsel %vm8881_vm3, %v8874_v19, %v8876_v45 }
 0x21a   : > { %v8911_v60 = vsel %vm26504_vm2, %v8889_v29, 0.0  ;;  %9299 = vmatprep.mubr.f32.mxu0 %v26195_v3  ;;  %v8880_v44 = vpop.permute.xlu1 %8879  ;;  %v3497_v62 = vadd.f32 %v3279_v53, %v2931_v59  ;;  %v3281_v7 = vpop.f32.mrb[19].mxu0 }
 0x21b   : > { %11554 = vrot.lane.b32.xlu1 %v23606_v37, %s21400_s21  ;;  %20333 = vmatprep.subr.msk.mxu1 %vm26502_vm9, %v8911_v60  ;;  %v3420_v16 = vpop.f32.mrb[20].mxu0  ;;  %vm26508_vm9 = vnez %v26119_v14 }
 0x21c   : > { %11552 = vrot.lane.b32.xlu0 %v23589_v48, %s21400_s21  ;;  %20334 = vmatpush1.msk.msra.mxu1 %vm26506_vm11, %v8910_v55  ;;  %v8878_v17 = vpop.permute.xlu0 %8877  ;;  %vm26509_vm11 = vnez %v26123_v22  ;;  %v3421_v19 = vpop.f32.mrb[21].mxu0 }
 0x21d   : > { %v8891_v24 = vsel %vm8881_vm3, %v8876_v45, %v8878_v17  ;;  %v8892_v29 = vsel %vm8881_vm3, %v8878_v17, %v8880_v44  ;;  %20335 = vmatmul.mubr.msk.f32.vlgmr.msra.gmra.mrb[2].mxu1 %vm26507_vm8, %v23685_v20  ;;  %20897 = vmatprep.subr.mxu1 %v26195_v3  ;;  %vm26510_vm3 = vcmask 1043456   ;;  %v3500_v59 = vadd.f32 %v3421_v19, %v2934_v21  ;;  %v3823_v55 = vpop.f32.mrb[22].mxu0  ;;  %v1117_v21 = vpop.f32.mrb[1].mxu1 }
 0x21e   : > { %v8914_v60 = vsel %vm26508_vm9, %v8892_v29, 0.0  ;;  %v8913_v49 = vsel %vm26509_vm11, %v8891_v24, 0.0  ;;  %20899 = vmatprep.mubr.msk.f32.mxu1 %vm26132_vm5, %v26195_v3  ;;  %v9406_v45 = vpop.permute.xlu1 %9405  ;;  %vm26511_vm8 = vnez %v26126_v13  ;;  %vm26512_vm11 = vmmov %vm26510_vm3  ;;  %v4041_v17 = vadd.f32 %v3823_v55, %v3497_v62  ;;  %v3825_v7 = vpop.f32.mrb[23].mxu0 }
 0x21f   : > { %11558 = vrot.lane.b32.xlu1 %v23628_v23, %s21400_s21  ;;  %20336 = vmatprep.subr.msk.mxu0 %vm26510_vm3, %v8913_v49  ;;  %v8912_v44 = vsel %vm26511_vm8, %v8890_v33, 0.0  ;;  %vm26513_vm2 = vmmov %vm26510_vm3  ;;  %vm26514_vm9 = vcmask 924672   ;;  %vm26515_vm3 = vcmask 31744   ;;  %v3964_v29 = vpop.f32.mrb[24].mxu0  ;;  %vm26517_vm8 = vnez %v26034_v25  ;;  %v1397_v16 = vpop.f32.mrb[4].mxu1 }
 0x220   : > { %11556 = vrot.lane.b32.xlu0 %v23613_v63, %s21400_s21  ;;  %20898 = vmatpush3.msk.msra.mxu1 %vm26512_vm11, %v8914_v60  ;;  %v9404_v53 = vpop.permute.xlu0 %9403  ;;  %vm26516_vm10 = vmmov %vm26515_vm3  ;;  %v3965_v62 = vpop.f32.mrb[25].mxu0  ;;  %v23780_v7 = vld [vmem:[%s25786_s1 + $0x40] sm:$0xf] }
 0x221   : > { %20337 = vmatpush1.msk.msra.mxu0 %vm26513_vm2, %v8912_v44  ;;  %v9427_v24 = vsel %vm26514_vm9, %v9404_v53, %v9406_v45  ;;  %20900 = vmatmul.mubr.msk.f32.vlgmr.msra.gmra.mrb[64].mxu1 %vm26515_vm3, %v23685_v20  ;;  %v23771_v49 = vadd.f32 %v3965_v62, %v3500_v59  ;;  %v20826_v19 = vpop.f32.mrb[5].mxu1  ;;  %vm26520_vm11 = vmmov %vm26513_vm2 }
 0x222   : > { %20338 = vmatmul.mubr.msk.f32.vlgmr.msra.gmra.mrb[64].mxu0 %vm26516_vm10, %v23685_v20  ;;  %v9449_v33 = vsel %vm26517_vm8, %v9427_v24, 0.0  ;;  %9632 = vmatprep.mubr.f32.mxu1 %v26195_v3  ;;  %v9408_v60 = vpop.permute.xlu1 %9407  ;;  %v1574_v55 = vpop.f32.mrb[6].mxu1  ;;  %vm26518_vm10 = vmmov %vm26514_vm9  ;;  %vm26519_vm9 = vnez %v26037_v26  ;;  %vm26538_vm8 = vnez %v26018_v50 }
 0x223   : > { %11562 = vrot.lane.b32.xlu1 %v23652_v57, %s21400_s21  ;;  %20342 = vmatprep.subr.msk.mxu0 %vm26513_vm2, %v9449_v33  ;;  %v1575_v24 = vpop.f32.mrb[7].mxu1  ;;  %vm26521_vm3 = vmmov %vm26518_vm10  ;;  %vm26522_vm2 = vcmask 31744  }
 0x224   : > { %11560 = vrot.lane.b32.xlu0 %v23634_v32, %s21400_s21  ;;  %v9402_v20 = vpop.permute.xlu0 %9401  ;;  %9561 = vmatprep.mubr.f32.mxu0 %v26195_v3  ;;  %v1576_v29 = vadd.f32 %v1575_v24, %v1117_v21  ;;  %v1855_v33 = vpop.f32.mrb[8].mxu1 }
 0x225   : > { %v9426_v44 = vsel %vm26518_vm10, %v9402_v20, %v9404_v53  ;;  %v1856_v19 = vadd.f32 %v1855_v33, %v1397_v16  ;;  %v20831_v55 = vpop.f32.mrb[9].mxu1  ;;  %v9428_v53 = vsel %vm26521_vm3, %v9406_v45, %v9408_v60  ;;  %vm26523_vm10 = vmmov %vm26521_vm3  ;;  %vm26526_vm3 = vcmask 1043456  }
 0x226   : > { %v9448_v59 = vsel %vm26519_vm9, %v9426_v44, 0.0  ;;  %v9412_v62 = vpop.permute.xlu1 %9411  ;;  %v2077_v44 = vpop.f32.mrb[10].mxu1  ;;  %vm26525_vm9 = vnez %v26005_v27 }
 0x227   : > { %11566 = vrot.lane.b32.xlu1 %v23675_v9, %s21400_s21  ;;  %20343 = vmatpush1.msk.msra.mxu0 %vm26520_vm11, %v9448_v59  ;;  %v2078_v24 = vpop.f32.mrb[11].mxu1  ;;  %vm26524_vm11 = vnez %v26002_v54  ;;  %v9450_v55 = vsel %vm26525_vm9, %v9428_v53, 0.0  ;;  %vm26530_vm9 = vcmask 31744  }
 0x228   : > { %11564 = vrot.lane.b32.xlu0 %v23660_v35, %s21400_s21  ;;  %v9410_v20 = vpop.permute.xlu0 %9409  ;;  %20344 = vmatmul.mubr.msk.f32.vlgmr.msra.gmra.mrb[0].mxu0 %vm26522_vm2, %v23780_v7  ;;  %v2364_v16 = vadd.f32 %v2078_v24, %v1576_v29  ;;  %v2358_v33 = vpop.f32.mrb[12].mxu1  ;;  %vm26527_vm2 = vmmov %vm26523_vm10 }
 0x229   : > { %v9429_v21 = vsel %vm26523_vm10, %v9408_v60, %v9410_v20  ;;  %9702 = vmatprep.mubr.f32.mxu0 %v26195_v3  ;;  %v2369_v44 = vadd.f32 %v2358_v33, %v1856_v19  ;;  %v20836_v60 = vpop.f32.mrb[13].mxu1  ;;  %v9430_v54 = vsel %vm26527_vm2, %v9410_v20, %v9412_v62  ;;  %vm26528_vm10 = vmmov %vm26526_vm3 }
 0x22a   : > { %v9451_v59 = vsel %vm26524_vm11, %v9429_v21, 0.0  ;;  %v9416_v45 = vpop.permute.xlu1 %9415  ;;  %v4367_v21 = vpop.f32.mrb[26].mxu0  ;;  %vm26529_vm11 = vmmov %vm26527_vm2  ;;  %vm26532_vm2 = vnez %v26047_v18 }
 0x22b   : > { %12092 = vrot.lane.b32.xlu1 %v23557_v56, %s21401_s28  ;;  %20345 = vmatprep.subr.msk.mxu1 %vm26526_vm3, %v9451_v59  ;;  %v23808_v24 = vadd.f32 %v4367_v21, %v4041_v17  ;;  %v4369_v59 = vpop.f32.mrb[27].mxu0  ;;  %v2643_v27 = vpop.f32.mrb[14].mxu1  ;;  %vm26531_vm3 = vnez %v26043_v34  ;;  %v9452_v20 = vsel %vm26532_vm2, %v9430_v54, 0.0  ;;  %vm26536_vm2 = vcmask 31744  }
 0x22c   : > { %12090 = vrot.lane.b32.xlu0 %v23561_v1, %s21401_s28  ;;  %20346 = vmatpush1.msk.msra.mxu1 %vm26528_vm10, %v9450_v55  ;;  %v9414_v29 = vpop.permute.xlu0 %9413  ;;  %v2644_v33 = vpop.f32.mrb[15].mxu1 }
 0x22d   : > { %v9431_v53 = vsel %vm26529_vm11, %v9412_v62, %v9414_v29  ;;  %20347 = vmatmul.mubr.msk.f32.vlgmr.msra.gmra.mrb[66].mxu1 %vm26530_vm9, %v23780_v7  ;;  %vm26533_vm11 = vmmov %vm26528_vm10  ;;  %v2930_v55 = vadd.f32 %v2644_v33, %v2364_v16  ;;  %v2924_v17 = vpop.f32.mrb[16].mxu1  ;;  %vm26534_vm9 = vcmask 924672  }
 0x22e   : > { %v9453_v19 = vsel %vm26531_vm3, %v9431_v53, 0.0  ;;  %9772 = vmatprep.mubr.f32.mxu1 %v26195_v3  ;;  %v9420_v62 = vpop.permute.xlu1 %9419  ;;  %v9432_v27 = vsel %vm26534_vm9, %v9414_v29, %v9416_v45  ;;  %v2935_v21 = vadd.f32 %v2924_v17, %v2369_v44  ;;  %v20841_v53 = vpop.f32.mrb[17].mxu1  ;;  %vm26535_vm3 = vmmov %vm26534_vm9 }
 0x22f   : > { %12094 = vrot.lane.b32.xlu1 %v23580_v36, %s21401_s28  ;;  %20348 = vmatprep.subr.msk.mxu0 %vm26533_vm11, %v9453_v19  ;;  %v3209_v59 = vpop.f32.mrb[18].mxu1  ;;  %vm26537_vm11 = vnez %v26024_v58  ;;  %v9454_v29 = vsel %vm26538_vm8, %v9432_v27, 0.0  ;;  %vm26539_vm9 = vmmov %vm26528_vm10 }
 0x230   : > { %12088 = vrot.lane.b32.xlu0 %v23545_v43, %s21401_s28  ;;  %20349 = vmatpush1.msk.msra.mxu0 %vm26528_vm10, %v9452_v20  ;;  %v9418_v60 = vpop.permute.xlu0 %9417  ;;  %v3210_v19 = vpop.f32.mrb[19].mxu1 }
 0x231   : > { %v9433_v54 = vsel %vm26535_vm3, %v9416_v45, %v9418_v60  ;;  %20350 = vmatmul.mubr.msk.f32.vlgmr.msra.gmra.mrb[66].mxu0 %vm26536_vm2, %v23780_v7  ;;  %v3496_v45 = vadd.f32 %v3210_v19, %v2930_v55  ;;  %v3490_v33 = vpop.f32.mrb[20].mxu1  ;;  %vm26540_vm3 = vmmov %vm26539_vm9  ;;  %vm26541_vm2 = vcmask 924672  }
 0x232   : > { %v9455_v16 = vsel %vm26537_vm11, %v9433_v54, 0.0  ;;  %9843 = vmatprep.mubr.f32.mxu0 %v26195_v3  ;;  %v9424_v44 = vpop.permute.xlu1 %9423  ;;  %v4508_v17 = vpop.f32.mrb[28].mxu0  ;;  %v3501_v53 = vadd.f32 %v3490_v33, %v2935_v21  ;;  %v9434_v54 = vsel %vm26541_vm2, %v9418_v60, %v9420_v62  ;;  %vm26542_vm10 = vmmov %vm26541_vm2  ;;  %vm26544_vm11 = vcmask 31744   ;;  %v26549_v33 = vld [vmem:[#allocation16_spill] sm:$0xff] }
 0x233   : > { %12098 = vrot.lane.b32.xlu1 %v23606_v37, %s21401_s28  ;;  %20351 = vmatprep.subr.msk.mxu1 %vm26539_vm9, %v9455_v16  ;;  %vm26543_vm8 = vmmov %vm26541_vm2  ;;  %v4509_v55 = vpop.f32.mrb[29].mxu0  ;;  %v20846_v16 = vpop.f32.mrb[21].mxu1  ;;  %vm26545_vm9 = vnez %v26071_v12 }
 0x234   : > { %12096 = vrot.lane.b32.xlu0 %v23589_v48, %s21401_s28  ;;  %20352 = vmatpush1.msk.msra.mxu1 %vm26540_vm3, %v9454_v29  ;;  %v9422_v20 = vpop.permute.xlu0 %9421  ;;  %v26546_v29 = vld [vmem:[#allocation15_spill] sm:$0xff]  ;;  %v3753_v60 = vpop.f32.mrb[22].mxu1 }
 0x235   : > { %v9435_v27 = vsel %vm26542_vm10, %v9420_v62, %v9422_v20  ;;  %v9436_v59 = vsel %vm26543_vm8, %v9422_v20, %v9424_v44  ;;  %20353 = vmatmul.mubr.msk.f32.vlgmr.msra.gmra.mrb[2].mxu1 %vm26544_vm11, %v23780_v7  ;;  %20902 = vmatprep.subr.mxu1 %v26195_v3  ;;  %vm26547_vm3 = vnez %v26546_v29  ;;  %v23849_v62 = vadd.f32 %v4509_v55, %v23771_v49  ;;  %v3754_v44 = vpop.f32.mrb[23].mxu1 }
 0x236   : > { %v9458_v19 = vsel %vm26545_vm9, %v9436_v59, 0.0  ;;  %v9457_v17 = vsel %vm26547_vm3, %v9435_v27, 0.0  ;;  %20904 = vmatprep.mubr.msk.f32.mxu1 %vm26132_vm5, %v26195_v3  ;;  %vm26548_vm8 = vcmask 1043456   ;;  %v9952_v21 = vpop.permute.xlu1 %9951  ;;  %vm26550_vm11 = vnez %v26549_v33  ;;  %v4034_v49 = vpop.f32.mrb[24].mxu1 }
 0x237   : > { %12102 = vrot.lane.b32.xlu1 %v23628_v23, %s21401_s28  ;;  %20354 = vmatprep.subr.msk.mxu0 %vm26548_vm8, %v9457_v17  ;;  %v9456_v20 = vsel %vm26550_vm11, %v9434_v54, 0.0  ;;  %vm26551_vm10 = vmmov %vm26548_vm8  ;;  %v4040_v59 = vadd.f32 %v3754_v44, %v3496_v45  ;;  %vm26553_vm3 = vcmask 31744   ;;  %vm26554_vm9 = vcmask 916480   ;;  %v20851_v17 = vpop.f32.mrb[25].mxu1 }
 0x238   : > { %12100 = vrot.lane.b32.xlu0 %v23613_v63, %s21401_s28  ;;  %20903 = vmatpush3.msk.msra.mxu1 %vm26551_vm10, %v9458_v19  ;;  %v9950_v27 = vpop.permute.xlu0 %9949  ;;  %vm26552_vm2 = vmmov %vm26548_vm8  ;;  %v4045_v16 = vadd.f32 %v4034_v49, %v3501_v53  ;;  %v4297_v54 = vpop.f32.mrb[26].mxu1 }
 0x239   : > { %20355 = vmatpush1.msk.msra.mxu0 %vm26552_vm2, %v9456_v20  ;;  %20905 = vmatmul.mubr.msk.f32.vlgmr.msra.gmra.mrb[68].mxu1 %vm26553_vm3, %v23780_v7  ;;  %v9973_v55 = vsel %vm26554_vm9, %v9950_v27, %v9952_v21  ;;  %vm26555_vm8 = vmmov %vm26553_vm3  ;;  %v4298_v19 = vpop.f32.mrb[27].mxu1 }
 0x23a   : > { %20356 = vmatmul.mubr.msk.f32.vlgmr.msra.gmra.mrb[68].mxu0 %vm26555_vm8, %v23780_v7  ;;  %vm26556_vm11 = vmmov %vm26552_vm2  ;;  %v9954_v45 = vpop.permute.xlu1 %9953  ;;  %10143 = vmatprep.mubr.f32.mxu1 %v26195_v3  ;;  %v23875_v7 = vld [vmem:[%s25786_s1 + $0x44] sm:$0xf]  ;;  %v4584_v53 = vadd.f32 %v4298_v19, %v4040_v59  ;;  %v4578_v44 = vpop.f32.mrb[28].mxu1 }
 0x23b   : > { %20360 = vmatprep.subr.msk.mxu0 %vm26556_vm11, %v9973_v55  ;;  %12106 = vrot.lane.b32.xlu1 %v23652_v57, %s21401_s28  ;;  %v4589_v49 = vadd.f32 %v4578_v44, %v4045_v16  ;;  %v20856_v55 = vpop.f32.mrb[29].mxu1  ;;  %vm26557_vm3 = vmmov %vm26552_vm2 }
 0x23c   : > { %10072 = vmatprep.mubr.f32.mxu0 %v26195_v3  ;;  %12104 = vrot.lane.b32.xlu0 %v23634_v32, %s21401_s28  ;;  %v9948_v60 = vpop.permute.xlu0 %9947  ;;  %vm26558_vm2 = vmmov %vm26555_vm8 }
 0x23d   : > { %v9972_v20 = vsel %vm26554_vm9, %v9948_v60, %v9950_v27  ;;  %v4808_v54 = vpop.f32.mrb[30].mxu1  ;;  %vm26559_vm11 = vmmov %vm26554_vm9 }
 0x23e   : > { %20361 = vmatpush1.msk.msra.mxu0 %vm26557_vm3, %v9972_v20  ;;  %v9958_v17 = vpop.permute.xlu1 %9957  ;;  %v4809_v59 = vpop.f32.mrb[31].mxu1  ;;  %vm26560_vm10 = vmmov %vm26554_vm9 }
 0x23f   : > { %12110 = vrot.lane.b32.xlu1 %v23675_v9, %s21401_s28  ;;  %20362 = vmatmul.mubr.msk.f32.vlgmr.msra.gmra.mrb[0].mxu0 %vm26558_vm2, %v23875_v7  ;;  %v23887_v16 = vadd.f32 %v4809_v59, %v4584_v53  ;;  %v9974_v19 = vsel %vm26560_vm10, %v9952_v21, %v9954_v45  ;;  %vm26561_vm8 = vmmov %vm26557_vm3 }
 0x240   : > { %12108 = vrot.lane.b32.xlu0 %v23660_v35, %s21401_s28  ;;  %v9956_v33 = vpop.permute.xlu0 %9955  ;;  %10213 = vmatprep.mubr.f32.mxu0 %v26195_v3  ;;  %vm26562_vm9 = vmmov %vm26557_vm3  ;;  %s20679_s28 = sld [smem:[#allocation3 + $0x102]] }
 0x241   : > { %v9975_v27 = vsel %vm26559_vm11, %v9954_v45, %v9956_v33  ;;  %v4878_v44 = vpop.f32.mrb[30].mxu0  ;;  %vm26563_vm3 = vmmov %vm26558_vm2 }
 0x242   : > { %20363 = vmatprep.subr.msk.mxu1 %vm26561_vm8, %v9975_v27  ;;  %v9962_v60 = vpop.permute.xlu1 %9961  ;;  %v23899_v20 = vadd.f32 %v4878_v44, %v23808_v24  ;;  %v4880_v21 = vpop.f32.mrb[31].mxu0  ;;  %vm26564_vm2 = vmmov %vm26560_vm10 }
 0x243   : > { %12638 = vrot.lane.b32.xlu1 %v23557_v56, %s21402_s10  ;;  %20364 = vmatpush1.msk.msra.mxu1 %vm26562_vm9, %v9974_v19  ;;  %vm26565_vm11 = vmmov %vm26564_vm2 }
 0x244   : > { %12636 = vrot.lane.b32.xlu0 %v23561_v1, %s21402_s10  ;;  %20365 = vmatmul.mubr.msk.f32.vlgmr.msra.gmra.mrb[70].mxu1 %vm26563_vm3, %v23875_v7  ;;  %v9960_v53 = vpop.permute.xlu0 %9959  ;;  %v9976_v55 = vsel %vm26565_vm11, %v9956_v33, %v9958_v17  ;;  %vm26566_vm10 = vmmov %vm26561_vm8 }
 0x245   : > { %v9977_v45 = vsel %vm26564_vm2, %v9958_v17, %v9960_v53  ;;  %10283 = vmatprep.mubr.f32.mxu1 %v26195_v3  ;;  %vm26567_vm9 = vmmov %vm26563_vm3  ;;  %v9978_v33 = vsel %vm26564_vm2, %v9960_v53, %v9962_v60 }
 0x246   : > { %20366 = vmatprep.subr.msk.mxu0 %vm26566_vm10, %v9977_v45  ;;  %v9966_v54 = vpop.permute.xlu1 %9965  ;;  %vm26568_vm3 = vmmov %vm26564_vm2 }
 0x247   : > { %12640 = vrot.lane.b32.xlu1 %v23580_v36, %s21402_s10  ;;  %20367 = vmatpush1.msk.msra.mxu0 %vm26561_vm8, %v9976_v55  ;;  %vm26569_vm11 = vmmov %vm26561_vm8 }
 0x248   : > { %12634 = vrot.lane.b32.xlu0 %v23545_v43, %s21402_s10  ;;  %20368 = vmatmul.mubr.msk.f32.vlgmr.msra.gmra.mrb[70].mxu0 %vm26567_vm9, %v23875_v7  ;;  %v9964_v24 = vpop.permute.xlu0 %9963  ;;  %vm26570_vm10 = vmmov %vm26561_vm8 }
 0x249   : > { %v9979_v59 = vsel %vm26568_vm3, %v9962_v60, %v9964_v24  ;;  %10354 = vmatprep.mubr.f32.mxu0 %v26195_v3  ;;  %vm26571_vm8 = vmmov %vm26567_vm9 }
 0x24a   : > { %20369 = vmatprep.subr.msk.mxu1 %vm26569_vm11, %v9979_v59  ;;  %v5019_v17 = vpop.f32.mrb[32].mxu0  ;;  %v10459_v27 = vpop.permute.xlu1 %10458  ;;  %vm26572_vm9 = vmmov %vm26564_vm2 }
 0x24b   : > { %12644 = vrot.lane.b32.xlu1 %v23606_v37, %s21402_s10  ;;  %20370 = vmatpush1.msk.msra.mxu1 %vm26570_vm10, %v9978_v33  ;;  %v5020_v60 = vpop.f32.mrb[33].mxu0  ;;  %v5089_v53 = vpop.f32.mrb[32].mxu1  ;;  %vm26573_vm3 = vmmov %vm26564_vm2 }
 0x24c   : > { %12642 = vrot.lane.b32.xlu0 %v23589_v48, %s21402_s10  ;;  %v9968_v19 = vpop.permute.xlu0 %9967  ;;  %20371 = vmatmul.mubr.msk.f32.vlgmr.msra.gmra.mrb[2].mxu1 %vm26571_vm8, %v23875_v7  ;;  %v9980_v21 = vsel %vm26573_vm3, %v9964_v24, %v9966_v54  ;;  %vm26574_vm2 = vmmov %vm26570_vm10  ;;  %v23930_v45 = vadd.f32 %v5020_v60, %v23849_v62  ;;  %v23932_v55 = vadd.f32 %v5089_v53, %v4589_v49  ;;  %v20861_v59 = vpop.f32.mrb[33].mxu1  ;;  %vm25962_vm10 = vcmask 908288  }
 0x24d   : > { %v9981_v44 = vsel %vm26572_vm9, %v9966_v54, %v9968_v19  ;;  %20907 = vmatprep.subr.mxu1 %v26195_v3  ;;  %20909 = vmatprep.mubr.msk.f32.mxu1 %vm26132_vm5, %v26195_v3  ;;  %vm26575_vm11 = vmmov %vm26574_vm2 }
 0x24e   : > { %20372 = vmatprep.subr.msk.mxu0 %vm26574_vm2, %v9981_v44  ;;  %vm26576_vm9 = vmmov %vm26573_vm3 }
 0x24f   : > { %12648 = vrot.lane.b32.xlu1 %v23628_v23, %s21402_s10  ;;  %20373 = vmatpush1.msk.msra.mxu0 %vm26575_vm11, %v9980_v21  ;;  %vm26577_vm3 = vmmov %vm26574_vm2  ;;  %vm26578_vm2 = vnez %v26151_v5 }
 0x250   : > { %12646 = vrot.lane.b32.xlu0 %v23613_v63, %s21402_s10  ;;  %20374 = vmatmul.mubr.msk.f32.vlgmr.msra.gmra.mrb[72].mxu0 %vm26571_vm8, %v23875_v7  ;;  %v9970_v54 = vpop.permute.xlu1 %9969  ;;  %vm26579_vm11 = vmmov %vm26571_vm8 }
 0x251   : > { %v10461_v24 = vpop.permute.xlu0 %10460  ;;  %10616 = vmatprep.mubr.f32.mxu0 %v26195_v3  ;;  %v9982_v62 = vsel %vm26576_vm9, %v9968_v19, %v9970_v54  ;;  %vm26580_vm8 = vmmov %vm26577_vm3 }
 0x252   : > { %v10482_v49 = vsel %vm25962_vm10, %v10459_v27, %v10461_v24  ;;  %20908 = vmatpush3.msk.msra.mxu1 %vm26577_vm3, %v9982_v62  ;;  %vm26581_vm9 = vmmov %vm26577_vm3 }
 0x253   : > { %12652 = vrot.lane.b32.xlu1 %v23652_v57, %s21402_s10  ;;  %v10504_v33 = vsel %vm26578_vm2, %v10482_v49, 0.0  ;;  %20910 = vmatmul.mubr.msk.f32.vlgmr.msra.gmra.mrb[72].mxu1 %vm26579_vm11, %v23875_v7  ;;  %v23963_v7 = vld [vmem:[%s25786_s1 + $0x48] sm:$0xf]  ;;  %vm26582_vm3 = vmmov %vm26579_vm11 }
 0x254   : > { %12650 = vrot.lane.b32.xlu0 %v23634_v32, %s21402_s10  ;;  %20378 = vmatprep.subr.msk.mxu0 %vm26580_vm8, %v10504_v33  ;;  %vm26585_vm8 = vnez %v26432_v31 }
 0x255   : > { %10687 = vmatprep.mubr.f32.mxu1 %v26195_v3 }
 0x256   : > { %v5352_v44 = vpop.f32.mrb[34].mxu1 }
 0x257   : > { %13145 = vrot.lane.b32.xlu1 %v23561_v1, %s21403_s11  ;;  %v10463_v17 = vpop.permute.xlu1 %10462  ;;  %v10457_v19 = vpop.permute.xlu0 %10456  ;;  %v26583_v44 = vld [vmem:[#allocation22_spill] sm:$0xff] }
 0x258   : > { %12654 = vrot.lane.b32.xlu0 %v23660_v35, %s21402_s10  ;;  %v10481_v60 = vsel %vm25962_vm10, %v10457_v19, %v10459_v27  ;;  %v5353_v53 = vpop.f32.mrb[35].mxu1  ;;  %v10483_v54 = vsel %vm25962_vm10, %v10461_v24, %v10463_v17  ;;  %vm26584_vm11 = vnez %v26583_v44 }
 0x259   : > { %v10503_v21 = vsel %vm26435_vm0, %v10481_v60, 0.0  ;;  %v23968_v59 = vadd.f32 %v5353_v53, %v23887_v16  ;;  %v10505_v53 = vsel %vm26585_vm8, %v10483_v54, 0.0  ;;  %vm26587_vm0 = vcmask 31744  }
 0x25a   : > { %20379 = vmatpush1.msk.msra.mxu0 %vm26581_vm9, %v10503_v21  ;;  %v5422_v27 = vpop.f32.mrb[34].mxu0  ;;  %vm26588_vm8 = vnez %v26438_v10 }
 0x25b   : > { %12656 = vrot.lane.b32.xlu1 %v23675_v9, %s21402_s10  ;;  %20380 = vmatmul.mubr.msk.f32.vlgmr.msra.gmra.mrb[0].mxu0 %vm26582_vm3, %v23963_v7  ;;  %v23980_v16 = vadd.f32 %v5422_v27, %v23899_v20  ;;  %v5424_v19 = vpop.f32.mrb[35].mxu0  ;;  %vm26586_vm3 = vmmov %vm26581_vm9  ;;  %s20674_s10 = sld [smem:[#allocation5 + $0x1]] }
 0x25c   : > { %13147 = vrot.lane.b32.xlu0 %v23557_v56, %s21403_s11  ;;  %v10467_v62 = vpop.permute.xlu1 %10466  ;;  %10757 = vmatprep.mubr.f32.mxu0 %v26195_v3 }
 0x25d   : > { %v10465_v49 = vpop.permute.xlu0 %10464 }
 0x25e   : > { %v10484_v33 = vsel %vm25962_vm10, %v10463_v17, %v10465_v49  ;;  %v10485_v20 = vsel %vm25962_vm10, %v10465_v49, %v10467_v62 }
 0x25f   : > { %13149 = vrot.lane.b32.xlu1 %v23580_v36, %s21403_s11  ;;  %v10506_v60 = vsel %vm26584_vm11, %v10484_v33, 0.0  ;;  %v10507_v54 = vsel %vm26446_vm4, %v10485_v20, 0.0  ;;  %vm26592_vm4 = vnez %v26343_v61 }
 0x260   : > { %13143 = vrot.lane.b32.xlu0 %v23545_v43, %s21403_s11  ;;  %20381 = vmatprep.subr.msk.mxu1 %vm26581_vm9, %v10506_v60  ;;  %v10471_v24 = vpop.permute.xlu1 %10470  ;;  %vm26589_vm9 = vmmov %vm26586_vm3 }
 0x261   : > { %20382 = vmatpush1.msk.msra.mxu1 %vm26586_vm3, %v10505_v53  ;;  %v10469_v17 = vpop.permute.xlu0 %10468 }
 0x262   : > { %v10486_v21 = vsel %vm25962_vm10, %v10467_v62, %v10469_v17  ;;  %20383 = vmatmul.mubr.msk.f32.vlgmr.msra.gmra.mrb[74].mxu1 %vm26587_vm0, %v23963_v7  ;;  %v10487_v49 = vsel %vm25962_vm10, %v10469_v17, %v10471_v24  ;;  %vm26590_vm0 = vmmov %vm26586_vm3  ;;  %vm26591_vm3 = vcmask 31744  }
 0x263   : > { %13153 = vrot.lane.b32.xlu1 %v23606_v37, %s21403_s11  ;;  %v10508_v27 = vsel %vm26588_vm8, %v10486_v21, 0.0  ;;  %10827 = vmatprep.mubr.f32.mxu1 %v26195_v3  ;;  %v5563_v62 = vpop.f32.mrb[36].mxu0 }
 0x264   : > { %13151 = vrot.lane.b32.xlu0 %v23589_v48, %s21403_s11  ;;  %20384 = vmatprep.subr.msk.mxu0 %vm26589_vm9, %v10508_v27  ;;  %v10475_v33 = vpop.permute.xlu1 %10474  ;;  %v5564_v53 = vpop.f32.mrb[37].mxu0  ;;  %vm26593_vm9 = vmmov %vm26590_vm0 }
 0x265   : > { %20385 = vmatpush1.msk.msra.mxu0 %vm26590_vm0, %v10507_v54  ;;  %v10473_v19 = vpop.permute.xlu0 %10472  ;;  %v5633_v21 = vpop.f32.mrb[36].mxu1  ;;  %v24018_v17 = vadd.f32 %v5564_v53, %v23930_v45  ;;  %v10509_v54 = vsel %vm26452_vm15, %v10487_v49, 0.0  ;;  %vm26596_vm15 = vnez %v26200_v2 }
 0x266   : > { %v10488_v60 = vsel %vm25962_vm10, %v10471_v24, %v10473_v19  ;;  %20386 = vmatmul.mubr.msk.f32.vlgmr.msra.gmra.mrb[74].mxu0 %vm26591_vm3, %v23963_v7  ;;  %v24021_v27 = vadd.f32 %v5633_v21, %v23932_v55  ;;  %v20866_v24 = vpop.f32.mrb[37].mxu1 }
 0x267   : > { %13157 = vrot.lane.b32.xlu1 %v23628_v23, %s21403_s11  ;;  %v10510_v20 = vsel %vm26592_vm4, %v10488_v60, 0.0  ;;  %10898 = vmatprep.mubr.f32.mxu0 %v26195_v3  ;;  %v10489_v60 = vsel %vm25962_vm10, %v10473_v19, %v10475_v33 }
 0x268   : > { %13155 = vrot.lane.b32.xlu0 %v23613_v63, %s21403_s11  ;;  %20387 = vmatprep.subr.msk.mxu1 %vm26593_vm9, %v10510_v20  ;;  %vm26594_vm9 = vnez %v26193_v41 }
 0x269   : > { %v10479_v62 = vpop.permute.xlu1 %10478  ;;  %20388 = vmatpush1.msk.msra.mxu1 %vm26590_vm0, %v10509_v54  ;;  %v10477_v61 = vpop.permute.xlu0 %10476  ;;  %vm26595_vm0 = vnez %v26198_v4 }
 0x26a   : > { %20389 = vmatmul.mubr.msk.f32.vlgmr.msra.gmra.mrb[2].mxu1 %vm26591_vm3, %v23963_v7  ;;  %20912 = vmatprep.subr.mxu1 %v26195_v3  ;;  %v10490_v45 = vsel %vm25962_vm10, %v10475_v33, %v10477_v61  ;;  %v10491_v55 = vsel %vm25962_vm10, %v10477_v61, %v10479_v62  ;;  %vm25964_vm3 = vcmask 900096   ;;  %v10511_v33 = vsel %vm26596_vm15, %v10489_v60, 0.0 }
 0x26b   : > { %13161 = vrot.lane.b32.xlu1 %v23652_v57, %s21403_s11  ;;  %20914 = vmatprep.mubr.msk.f32.mxu1 %vm26132_vm5, %v26195_v3  ;;  %v10513_v49 = vsel %vm26594_vm9, %v10491_v55, 0.0  ;;  %v10512_v19 = vsel %vm26595_vm0, %v10490_v45, 0.0  ;;  %vm26597_vm10 = vcmask 1043456   ;;  %vm26600_vm9 = vcmask 31744   ;;  %v24073_v55 = vld [vmem:[%s25786_s1 + $0x4c] sm:$0xf] }
 0x26c   : > { %13159 = vrot.lane.b32.xlu0 %v23634_v32, %s21403_s11  ;;  %20390 = vmatprep.subr.msk.mxu0 %vm26597_vm10, %v10512_v19  ;;  %vm26598_vm4 = vmmov %vm26597_vm10 }
 0x26d   : > { %20913 = vmatpush3.msk.msra.mxu1 %vm26598_vm4, %v10513_v49  ;;  %v11005_v61 = vpop.permute.xlu1 %11004  ;;  %vm26599_vm8 = vmmov %vm26598_vm4  ;;  %vm26602_vm4 = vnez %v26209_v46  ;;  %v20485_v46 = vld [vmem:[%s25786_s1 + $0x60] sm:$0xf] }
 0x26e   : > { %20391 = vmatpush1.msk.msra.mxu0 %vm26599_vm8, %v10511_v33  ;;  %v11003_v53 = vpop.permute.xlu0 %11002  ;;  %20915 = vmatmul.mubr.msk.f32.vlgmr.msra.gmra.mrb[76].mxu1 %vm26600_vm9, %v23963_v7  ;;  %vm26601_vm11 = vmmov %vm26600_vm9 }
 0x26f   : > { %v11026_v21 = vsel %vm25964_vm3, %v11003_v53, %v11005_v61  ;;  %20392 = vmatmul.mubr.msk.f32.vlgmr.msra.gmra.mrb[76].mxu0 %vm26601_vm11, %v23963_v7  ;;  %13165 = vrot.lane.b32.xlu1 %v23675_v9, %s21403_s11  ;;  %v5896_v24 = vpop.f32.mrb[38].mxu1  ;;  %vm26603_vm10 = vmmov %vm26599_vm8 }
 0x270   : > { %13163 = vrot.lane.b32.xlu0 %v23660_v35, %s21403_s11  ;;  %v11048_v20 = vsel %vm26602_vm4, %v11026_v21, 0.0  ;;  %11160 = vmatprep.mubr.f32.mxu0 %v26195_v3  ;;  %v5897_v62 = vpop.f32.mrb[39].mxu1  ;;  %vm26604_vm11 = vmmov %vm26599_vm8  ;;  %s20681_s11 = sld [smem:[#allocation5 + $0x2]] }
 0x271   : > { %20396 = vmatprep.subr.msk.mxu0 %vm26603_vm10, %v11048_v20  ;;  %v11007_v54 = vpop.permute.xlu1 %11006  ;;  %11231 = vmatprep.mubr.f32.mxu1 %v26195_v3  ;;  %v24065_v7 = vadd.f32 %v5897_v62, %v23968_v59  ;;  %vm26605_vm8 = vmmov %vm26600_vm9  ;;  %vm26606_vm9 = vnez %v26224_v38 }
 0x272   : > { %v11001_v60 = vpop.permute.xlu0 %11000 }
 0x273   : > { %v11025_v45 = vsel %vm25964_vm3, %v11001_v60, %v11003_v53  ;;  %13691 = vrot.lane.b32.xlu1 %v23557_v56, %s21404_s18  ;;  %v5966_v19 = vpop.f32.mrb[38].mxu0  ;;  %v11027_v56 = vsel %vm25964_vm3, %v11005_v61, %v11007_v54 }
 0x274   : > { %v11047_v49 = vsel %vm26464_vm6, %v11025_v45, 0.0  ;;  %13689 = vrot.lane.b32.xlu0 %v23561_v1, %s21404_s18  ;;  %v24081_v33 = vadd.f32 %v5966_v19, %v23980_v16  ;;  %v5968_v53 = vpop.f32.mrb[39].mxu0  ;;  %v11049_v16 = vsel %vm26606_vm9, %v11027_v56, 0.0  ;;  %vm26618_vm6 = vcmask 31744  }
 0x275   : > { %20397 = vmatpush1.msk.msra.mxu0 %vm26604_vm11, %v11047_v49  ;;  %v11011_v59 = vpop.permute.xlu1 %11010  ;;  %vm26607_vm11 = vmmov %vm26603_vm10 }
 0x276   : > { %v11009_v21 = vpop.permute.xlu0 %11008  ;;  %20398 = vmatmul.mubr.msk.f32.vlgmr.msra.gmra.mrb[0].mxu0 %vm26605_vm8, %v24073_v55 }
 0x277   : > { %v11028_v20 = vsel %vm25964_vm3, %v11007_v54, %v11009_v21  ;;  %13693 = vrot.lane.b32.xlu1 %v23580_v36, %s21404_s18  ;;  %11301 = vmatprep.mubr.f32.mxu0 %v26195_v3  ;;  %v11029_v24 = vsel %vm25964_vm3, %v11009_v21, %v11011_v59 }
 0x278   : > { %13687 = vrot.lane.b32.xlu0 %v23545_v43, %s21404_s18  ;;  %v11050_v1 = vsel %vm26470_vm1, %v11028_v20, 0.0 }
 0x279   : > { %20399 = vmatprep.subr.msk.mxu1 %vm26603_vm10, %v11050_v1  ;;  %v11015_v61 = vpop.permute.xlu1 %11014  ;;  %vm26608_vm10 = vnez %v26234_v15 }
 0x27a   : > { %20400 = vmatpush1.msk.msra.mxu1 %vm26607_vm11, %v11049_v16  ;;  %v11013_v54 = vpop.permute.xlu0 %11012  ;;  %v11051_v60 = vsel %vm26608_vm10, %v11029_v24, 0.0 }
 0x27b   : > { %v11030_v36 = vsel %vm25964_vm3, %v11011_v59, %v11013_v54  ;;  %20401 = vmatmul.mubr.msk.f32.vlgmr.msra.gmra.mrb[78].mxu1 %vm26605_vm8, %v24073_v55  ;;  %13697 = vrot.lane.b32.xlu1 %v23606_v37, %s21404_s18  ;;  %v11031_v19 = vsel %vm25964_vm3, %v11013_v54, %v11015_v61  ;;  %vm26609_vm8 = vmmov %vm26607_vm11  ;;  %v26620_v54 = vld [vmem:[#allocation30_spill] sm:$0xff] }
 0x27c   : > { %13695 = vrot.lane.b32.xlu0 %v23589_v48, %s21404_s18  ;;  %v11052_v43 = vsel %vm26475_vm12, %v11030_v36, 0.0  ;;  %11371 = vmatprep.mubr.f32.mxu1 %v26195_v3  ;;  %v6107_v62 = vpop.f32.mrb[40].mxu0  ;;  %v6177_v59 = vpop.f32.mrb[40].mxu1  ;;  %vm26610_vm12 = vcmask 31744  }
 0x27d   : > { %20402 = vmatprep.subr.msk.mxu0 %vm26607_vm11, %v11052_v43  ;;  %v11019_v45 = vpop.permute.xlu1 %11018  ;;  %v6108_v49 = vpop.f32.mrb[41].mxu0  ;;  %v24123_v56 = vadd.f32 %v6177_v59, %v24021_v27  ;;  %vm26611_vm11 = vnez %v26241_v40 }
 0x27e   : > { %20403 = vmatpush1.msk.msra.mxu0 %vm26609_vm8, %v11051_v60  ;;  %v11017_v37 = vpop.permute.xlu0 %11016  ;;  %v24115_v48 = vadd.f32 %v6108_v49, %v24018_v17  ;;  %v20871_v21 = vpop.f32.mrb[41].mxu1  ;;  %vm26612_vm8 = vnez %v26244_v52 }
 0x27f   : > { %v11032_v53 = vsel %vm25964_vm3, %v11015_v61, %v11017_v37  ;;  %20404 = vmatmul.mubr.msk.f32.vlgmr.msra.gmra.mrb[78].mxu0 %vm26610_vm12, %v24073_v55  ;;  %13701 = vrot.lane.b32.xlu1 %v23628_v23, %s21404_s18  ;;  %v11053_v20 = vsel %vm26612_vm8, %v11031_v19, 0.0  ;;  %vm26613_vm3 = vcmask 1043456   ;;  %vm26614_vm12 = vcmask 900096   ;;  %v26619_v61 = vld [vmem:[#allocation29_spill] sm:$0xff]  ;;  %v26629_v21 = vld [vmem:[#allocation18_spill] sm:$0xff] }
 0x280   : > { %13699 = vrot.lane.b32.xlu0 %v23613_v63, %s21404_s18  ;;  %v11054_v17 = vsel %vm26611_vm11, %v11032_v53, 0.0  ;;  %11442 = vmatprep.mubr.f32.mxu0 %v26195_v3  ;;  %v11033_v23 = vsel %vm26614_vm12, %v11017_v37, %v11019_v45  ;;  %vm26615_vm10 = vmmov %vm26613_vm3 }
 0x281   : > { %20405 = vmatprep.subr.msk.mxu1 %vm26613_vm3, %v11054_v17  ;;  %v11023_v1 = vpop.permute.xlu1 %11022  ;;  %vm26616_vm9 = vmmov %vm26614_vm12  ;;  %vm11568_vm3 = vcmask 801792   ;;  %v11055_v62 = vsel %vm22736_vm13, %v11033_v23, 0.0 }
 0x282   : > { %20406 = vmatpush1.msk.msra.mxu1 %vm26615_vm10, %v11053_v20  ;;  %v11021_v27 = vpop.permute.xlu0 %11020  ;;  %vm26617_vm1 = vmmov %vm26616_vm9 }
 0x283   : > { %v11034_v16 = vsel %vm26616_vm9, %v11019_v45, %v11021_v27  ;;  %v11035_v63 = vsel %vm26617_vm1, %v11021_v27, %v11023_v1  ;;  %20407 = vmatmul.mubr.msk.f32.vlgmr.msra.gmra.mrb[2].mxu1 %vm26618_vm6, %v24073_v55  ;;  %20917 = vmatprep.subr.mxu1 %v26195_v3  ;;  %vm26622_vm1 = vmmov %vm26615_vm10  ;;  %vm26625_vm10 = vcmask 31744   ;;  %v26627_v45 = vld [vmem:[#allocation17_spill] sm:$0xff] }
 0x284   : > { %v11057_v24 = vsel %vm22718_vm7, %v11035_v63, 0.0  ;;  %13703 = vrot.lane.b32.xlu0 %v23634_v32, %s21404_s18  ;;  %13705 = vrot.lane.b32.xlu1 %v23652_v57, %s21404_s18  ;;  %v11056_v36 = vsel %vm22730_vm14, %v11034_v16, 0.0  ;;  %vm26623_vm6 = vmmov %vm26622_vm1  ;;  %vm26637_vm14 = vnez %v26099_v39  ;;  %vm26655_vm7 = vnez %v26034_v25 }
 0x285   : > { %20408 = vmatprep.subr.msk.mxu0 %vm26622_vm1, %v11056_v36  ;;  %20918 = vmatpush3.msk.msra.mxu1 %vm26623_vm6, %v11057_v24  ;;  %v11549_v60 = vpop.permute.xlu1 %11548  ;;  %vm26624_vm9 = vmmov %vm26622_vm1  ;;  %vm26628_vm1 = vnez %v26627_v45  ;;  %v26633_v36 = vld [vmem:[#allocation19_spill] sm:$0xff] }
 0x286   : > { %20409 = vmatpush1.msk.msra.mxu0 %vm26624_vm9, %v11055_v62  ;;  %20919 = vmatprep.mubr.msk.f32.mxu1 %vm26132_vm5, %v26195_v3  ;;  %v11547_v32 = vpop.permute.xlu0 %11546  ;;  %vm26626_vm12 = vmmov %vm26625_vm10  ;;  %vm26630_vm9 = vnez %v26629_v21 }
 0x287   : > { %v11570_v57 = vsel %vm11568_vm3, %v11547_v32, %v11549_v60  ;;  %20410 = vmatmul.mubr.msk.f32.vlgmr.msra.gmra.mrb[80].mxu0 %vm26625_vm10, %v24073_v55  ;;  %20920 = vmatmul.mubr.msk.f32.vlgmr.msra.gmra.mrb[80].mxu1 %vm26626_vm12, %v24073_v55  ;;  %vm26631_vm10 = vmmov %vm26623_vm6 }
 0x288   : > { %13707 = vrot.lane.b32.xlu0 %v23660_v35, %s21404_s18  ;;  %13709 = vrot.lane.b32.xlu1 %v23675_v9, %s21404_s18  ;;  %v11592_v49 = vsel %vm26628_vm1, %v11570_v57, 0.0  ;;  %v6440_v19 = vpop.f32.mrb[42].mxu1  ;;  %v20413_v9 = vld [vmem:[%s25786_s1 + $0x50] sm:$0xf]  ;;  %vm26632_vm1 = vnez %v26088_v42  ;;  %s25685_s18 = scalar_lea.vmem %s25792_s7, %s20752_s17 }
 0x289   : > { %20414 = vmatprep.subr.msk.mxu0 %vm26623_vm6, %v11592_v49  ;;  %v11551_v37 = vpop.permute.xlu1 %11550  ;;  %11704 = vmatprep.mubr.f32.mxu0 %v26195_v3  ;;  %v6441_v59 = vpop.f32.mrb[43].mxu1  ;;  %vm26634_vm6 = vnez %v26633_v36  ;;  %v26638_v49 = vld [vmem:[#allocation20_spill] sm:$0xff] }
 0x28a   : > { %v11545_v53 = vpop.permute.xlu0 %11544  ;;  %11775 = vmatprep.mubr.f32.mxu1 %v26195_v3  ;;  %v24170_v55 = vadd.f32 %v6441_v59, %v24065_v7  ;;  %v11571_v7 = vsel %vm11568_vm3, %v11549_v60, %v11551_v37 }
 0x28b   : > { %v11569_v35 = vsel %vm11568_vm3, %v11545_v53, %v11547_v32  ;;  %v11593_v62 = vsel %vm26634_vm6, %v11571_v7, 0.0 }
 0x28c   : > { %v11591_v17 = vsel %vm26630_vm9, %v11569_v35, 0.0  ;;  %v6510_v20 = vpop.f32.mrb[42].mxu0  ;;  %vm26635_vm9 = vmmov %vm26631_vm10 }
 0x28d   : > { %20415 = vmatpush1.msk.msra.mxu0 %vm26631_vm10, %v11591_v17  ;;  %v11555_v1 = vpop.permute.xlu1 %11554  ;;  %v24180_v23 = vadd.f32 %v6510_v20, %v24081_v33  ;;  %v6512_v27 = vpop.f32.mrb[43].mxu0  ;;  %vm26636_vm10 = vmmov %vm26635_vm9 }
 0x28e   : > { %v11553_v16 = vpop.permute.xlu0 %11552  ;;  %20416 = vmatmul.mubr.msk.f32.vlgmr.msra.gmra.mrb[0].mxu0 %vm26626_vm12, %v20413_v9  ;;  %vm26640_vm6 = vmmov %vm26635_vm9 }
 0x28f   : > { %v11572_v63 = vsel %vm11568_vm3, %v11551_v37, %v11553_v16  ;;  %11845 = vmatprep.mubr.f32.mxu0 %v26195_v3  ;;  %v11573_v32 = vsel %vm11568_vm3, %v11553_v16, %v11555_v1 }
 0x290   : > { %v11594_v24 = vsel %vm26632_vm1, %v11572_v63, 0.0  ;;  %vm26639_vm1 = vnez %v26638_v49 }
 0x291   : > { %20417 = vmatprep.subr.msk.mxu1 %vm26635_vm9, %v11594_v24  ;;  %v11559_v33 = vpop.permute.xlu1 %11558  ;;  %v11595_v19 = vsel %vm26639_vm1, %v11573_v32, 0.0  ;;  %vm26641_vm9 = vmmov %vm26640_vm6 }
 0x292   : > { %20418 = vmatpush1.msk.msra.mxu1 %vm26636_vm10, %v11593_v62  ;;  %v11557_v60 = vpop.permute.xlu0 %11556  ;;  %vm26643_vm10 = vnez %v26110_v11  ;;  %vm26645_vm1 = vmmov %vm26640_vm6 }
 0x293   : > { %v11574_v57 = vsel %vm11568_vm3, %v11555_v1, %v11557_v60  ;;  %20419 = vmatmul.mubr.msk.f32.vlgmr.msra.gmra.mrb[82].mxu1 %vm26626_vm12, %v20413_v9  ;;  %v11575_v53 = vsel %vm11568_vm3, %v11557_v60, %v11559_v33 }
 0x294   : > { %v11596_v45 = vsel %vm26637_vm14, %v11574_v57, 0.0  ;;  %11915 = vmatprep.mubr.f32.mxu1 %v26195_v3  ;;  %v6651_v42 = vpop.f32.mrb[44].mxu0  ;;  %v6721_v39 = vpop.f32.mrb[44].mxu1  ;;  %vm26642_vm14 = vmmov %vm26626_vm12  ;;  %vm26644_vm12 = vnez %v26113_v51 }
 0x295   : > { %20420 = vmatprep.subr.msk.mxu0 %vm26640_vm6, %v11596_v45  ;;  %v11563_v37 = vpop.permute.xlu1 %11562  ;;  %v6652_v59 = vpop.f32.mrb[45].mxu0  ;;  %v24209_v20 = vadd.f32 %v6721_v39, %v24123_v56  ;;  %v11597_v7 = vsel %vm26644_vm12, %v11575_v53, 0.0  ;;  %vm26646_vm6 = vmmov %vm26645_vm1  ;;  %vm12112_vm12 = vcmask 793600  }
 0x296   : > { %20421 = vmatpush1.msk.msra.mxu0 %vm26641_vm9, %v11595_v19  ;;  %v11561_v35 = vpop.permute.xlu0 %11560  ;;  %v24204_v21 = vadd.f32 %v6652_v59, %v24115_v48  ;;  %v20876_v1 = vpop.f32.mrb[45].mxu1  ;;  %vm26647_vm9 = vmmov %vm26642_vm14 }
 0x297   : > { %v11576_v17 = vsel %vm11568_vm3, %v11559_v33, %v11561_v35  ;;  %20422 = vmatmul.mubr.msk.f32.vlgmr.msra.gmra.mrb[82].mxu0 %vm26642_vm14, %v20413_v9  ;;  %v11577_v16 = vsel %vm11568_vm3, %v11561_v35, %v11563_v37  ;;  %vm26648_vm14 = vnez %v26119_v14 }
 0x298   : > { %v11598_v27 = vsel %vm26643_vm10, %v11576_v17, 0.0  ;;  %11986 = vmatprep.mubr.f32.mxu0 %v26195_v3  ;;  %vm26649_vm10 = vnez %v26123_v22  ;;  %v26660_v17 = vld [vmem:[#allocation13_spill] sm:$0xff] }
 0x299   : > { %20423 = vmatprep.subr.msk.mxu1 %vm26645_vm1, %v11598_v27  ;;  %v11567_v48 = vpop.permute.xlu1 %11566  ;;  %vm26650_vm1 = vnez %v26126_v13  ;;  %v26662_v27 = vld [vmem:[#allocation14_spill] sm:$0xff] }
 0x29a   : > { %20424 = vmatpush1.msk.msra.mxu1 %vm26646_vm6, %v11597_v7  ;;  %v11565_v63 = vpop.permute.xlu0 %11564  ;;  %v11599_v36 = vsel %vm26650_vm1, %v11577_v16, 0.0 }
 0x29b   : > { %v11578_v56 = vsel %vm11568_vm3, %v11563_v37, %v11565_v63  ;;  %v11579_v24 = vsel %vm11568_vm3, %v11565_v63, %v11567_v48  ;;  %20425 = vmatmul.mubr.msk.f32.vlgmr.msra.gmra.mrb[2].mxu1 %vm26647_vm9, %v20413_v9  ;;  %20922 = vmatprep.subr.mxu1 %v26195_v3  ;;  %vm26651_vm3 = vmmov %vm26646_vm6 }
 0x29c   : > { %v11601_v11 = vsel %vm26648_vm14, %v11579_v24, 0.0  ;;  %v11600_v51 = vsel %vm26649_vm10, %v11578_v56, 0.0  ;;  %20924 = vmatprep.mubr.msk.f32.mxu1 %vm26132_vm5, %v26195_v3  ;;  %vm26652_vm9 = vmmov %vm26651_vm3  ;;  %vm26653_vm14 = vcmask 31744  }
 0x29d   : > { %20426 = vmatprep.subr.msk.mxu0 %vm26646_vm6, %v11600_v51  ;;  %20923 = vmatpush3.msk.msra.mxu1 %vm26651_vm3, %v11601_v11  ;;  %v12093_v62 = vpop.permute.xlu1 %12092  ;;  %vm26654_vm10 = vmmov %vm26653_vm14  ;;  %vm26657_vm6 = vnez %v26037_v26 }
 0x29e   : > { %20427 = vmatpush1.msk.msra.mxu0 %vm26652_vm9, %v11599_v36  ;;  %v12091_v33 = vpop.permute.xlu0 %12090  ;;  %vm26656_vm1 = vmmov %vm26651_vm3 }
 0x29f   : > { %v12114_v14 = vsel %vm12112_vm12, %v12091_v33, %v12093_v62  ;;  %20428 = vmatmul.mubr.msk.f32.vlgmr.msra.gmra.mrb[84].mxu0 %vm26653_vm14, %v20413_v9  ;;  %20925 = vmatmul.mubr.msk.f32.vlgmr.msra.gmra.mrb[84].mxu1 %vm26654_vm10, %v20413_v9  ;;  %v24247_v9 = vld [vmem:[%s25786_s1 + $0x54] sm:$0xf]  ;;  %vm26658_vm3 = vmmov %vm26656_vm1  ;;  %vm26661_vm14 = vnez %v26660_v17 }
 0x2a0   : > { %v12136_v22 = vsel %vm26655_vm7, %v12114_v14, 0.0  ;;  %12248 = vmatprep.mubr.f32.mxu0 %v26195_v3  ;;  %12319 = vmatprep.mubr.f32.mxu1 %v26195_v3  ;;  %v6984_v13 = vpop.f32.mrb[46].mxu1  ;;  %vm26659_vm9 = vmmov %vm26654_vm10  ;;  %vm26663_vm10 = vnez %v26662_v27 }
 0x2a1   : > { %20432 = vmatprep.subr.msk.mxu0 %vm26656_vm1, %v12136_v22  ;;  %v12095_v32 = vpop.permute.xlu1 %12094  ;;  %v6985_v60 = vpop.f32.mrb[47].mxu1 }
 0x2a2   : > { %v12089_v57 = vpop.permute.xlu0 %12088  ;;  %v7271_v45 = vadd.f32 %v6985_v60, %v24170_v55  ;;  %v12115_v35 = vsel %vm12112_vm12, %v12093_v62, %v12095_v32 }
 0x2a3   : > { %v12113_v42 = vsel %vm12112_vm12, %v12089_v57, %v12091_v33  ;;  %v12137_v7 = vsel %vm26663_vm10, %v12115_v35, 0.0 }
 0x2a4   : > { %v12135_v49 = vsel %vm26657_vm6, %v12113_v42, 0.0  ;;  %v7054_v19 = vpop.f32.mrb[46].mxu0  ;;  %vm26665_vm6 = vnez %v26043_v34 }
 0x2a5   : > { %20433 = vmatpush1.msk.msra.mxu0 %vm26658_vm3, %v12135_v49  ;;  %v12099_v37 = vpop.permute.xlu1 %12098  ;;  %v7272_v59 = vadd.f32 %v7054_v19, %v24180_v23  ;;  %v7056_v53 = vpop.f32.mrb[47].mxu0  ;;  %vm26664_vm3 = vmmov %vm26656_vm1 }
 0x2a6   : > { %v12097_v55 = vpop.permute.xlu0 %12096  ;;  %20434 = vmatmul.mubr.msk.f32.vlgmr.msra.gmra.mrb[0].mxu0 %vm26659_vm9, %v24247_v9  ;;  %vm26667_vm10 = vmmov %vm26664_vm3 }
 0x2a7   : > { %v12116_v39 = vsel %vm12112_vm12, %v12095_v32, %v12097_v55  ;;  %12389 = vmatprep.mubr.f32.mxu0 %v26195_v3  ;;  %v12117_v48 = vsel %vm12112_vm12, %v12097_v55, %v12099_v37 }
 0x2a8   : > { %v12138_v1 = vsel %vm26661_vm14, %v12116_v39, 0.0  ;;  %vm26668_vm14 = vnez %v26024_v58 }
 0x2a9   : > { %20435 = vmatprep.subr.msk.mxu1 %vm26656_vm1, %v12138_v1  ;;  %v12103_v23 = vpop.permute.xlu1 %12102  ;;  %vm26666_vm1 = vnez %v26047_v18 }
 0x2aa   : > { %20436 = vmatpush1.msk.msra.mxu1 %vm26664_vm3, %v12137_v7  ;;  %v12101_v16 = vpop.permute.xlu0 %12100  ;;  %v12139_v51 = vsel %vm26666_vm1, %v12117_v48, 0.0  ;;  %vm26670_vm1 = vmmov %vm26664_vm3  ;;  %v26674_v7 = vld [vmem:[#allocation16_spill] sm:$0xff] }
 0x2ab   : > { %v12118_v63 = vsel %vm12112_vm12, %v12099_v37, %v12101_v16  ;;  %20437 = vmatmul.mubr.msk.f32.vlgmr.msra.gmra.mrb[86].mxu1 %vm26659_vm9, %v24247_v9  ;;  %v12119_v14 = vsel %vm12112_vm12, %v12101_v16, %v12103_v23 }
 0x2ac   : > { %v12140_v56 = vsel %vm26665_vm6, %v12118_v63, 0.0  ;;  %12459 = vmatprep.mubr.f32.mxu1 %v26195_v3  ;;  %v7195_v24 = vpop.f32.mrb[48].mxu0  ;;  %v7265_v11 = vpop.f32.mrb[48].mxu1 }
 0x2ad   : > { %20438 = vmatprep.subr.msk.mxu0 %vm26667_vm10, %v12140_v56  ;;  %v12107_v36 = vpop.permute.xlu1 %12106  ;;  %v7196_v62 = vpop.f32.mrb[49].mxu0  ;;  %v7276_v33 = vadd.f32 %v7265_v11, %v24209_v20  ;;  %vm26669_vm10 = vnez %v26018_v50 }
 0x2ae   : > { %20439 = vmatpush1.msk.msra.mxu0 %vm26664_vm3, %v12139_v51  ;;  %v12105_v22 = vpop.permute.xlu0 %12104  ;;  %v7275_v13 = vadd.f32 %v7196_v62, %v24204_v21  ;;  %v20881_v32 = vpop.f32.mrb[49].mxu1  ;;  %v12141_v20 = vsel %vm26669_vm10, %v12119_v14, 0.0  ;;  %vm26671_vm3 = vmmov %vm26670_vm1  ;;  %vm26673_vm10 = vnez %v26546_v29  ;;  %v21405_v62 = vmov 0  }
 0x2af   : > { %v12120_v60 = vsel %vm12112_vm12, %v12103_v23, %v12105_v22  ;;  %20440 = vmatmul.mubr.msk.f32.vlgmr.msra.gmra.mrb[86].mxu0 %vm26659_vm9, %v24247_v9  ;;  %v12121_v21 = vsel %vm12112_vm12, %v12105_v22, %v12107_v36  ;;  %21198 = vset.pattern.permute.xlu0 %v21405_v62 }
 0x2b0   : > { %v12142_v57 = vsel %vm26668_vm14, %v12120_v60, 0.0  ;;  %12530 = vmatprep.mubr.f32.mxu0 %v26195_v3  ;;  %vm26675_vm14 = vnez %v26674_v7 }
 0x2b1   : > { %20441 = vmatprep.subr.msk.mxu1 %vm26670_vm1, %v12142_v57  ;;  %v12111_v42 = vpop.permute.xlu1 %12110  ;;  %v7458_v49 = vpop.f32.mrb[50].mxu1  ;;  %vm26672_vm1 = vnez %v26071_v12  ;;  %v12143_v23 = vsel %vm26675_vm14, %v12121_v21, 0.0 }
 0x2b2   : > { %20442 = vmatpush1.msk.msra.mxu1 %vm26671_vm3, %v12141_v20  ;;  %v12109_v19 = vpop.permute.xlu0 %12108  ;;  %v7459_v37 = vpop.f32.mrb[51].mxu1  ;;  %vm12658_vm3 = vcmask 785408  }
 0x2b3   : > { %v12122_v53 = vsel %vm12112_vm12, %v12107_v36, %v12109_v19  ;;  %v12123_v35 = vsel %vm12112_vm12, %v12109_v19, %v12111_v42  ;;  %20443 = vmatmul.mubr.msk.f32.vlgmr.msra.gmra.mrb[2].mxu1 %vm26659_vm9, %v24247_v9  ;;  %20927 = vmatprep.subr.mxu1 %v26195_v3  ;;  %v7745_v55 = vadd.f32 %v7459_v37, %v7271_v45  ;;  %vm26676_vm12 = vcmask 1043456   ;;  %v24316_v36 = vld [vmem:[%s25786_s1 + $0x58] sm:$0xf] }
 0x2b4   : > { %v12145_v39 = vsel %vm26672_vm1, %v12123_v35, 0.0  ;;  %v12144_v1 = vsel %vm26673_vm10, %v12122_v53, 0.0  ;;  %20929 = vmatprep.mubr.msk.f32.mxu1 %vm26132_vm5, %v26195_v3  ;;  %vm26677_vm6 = vmmov %vm26676_vm12  ;;  %vm26679_vm1 = vcmask 31744  }
 0x2b5   : > { %20444 = vmatprep.subr.msk.mxu0 %vm26676_vm12, %v12144_v1  ;;  %20928 = vmatpush3.msk.msra.mxu1 %vm26677_vm6, %v12145_v39  ;;  %v12639_v48 = vpop.permute.xlu1 %12638  ;;  %vm26678_vm9 = vmmov %vm26677_vm6 }
 0x2b6   : > { %20445 = vmatpush1.msk.msra.mxu0 %vm26678_vm9, %v12143_v23  ;;  %v12637_v45 = vpop.permute.xlu0 %12636  ;;  %v7528_v16 = vpop.f32.mrb[50].mxu0  ;;  %vm26680_vm10 = vmmov %vm26679_vm1 }
 0x2b7   : > { %20446 = vmatmul.mubr.msk.f32.vlgmr.msra.gmra.mrb[88].mxu0 %vm26679_vm1, %v24247_v9  ;;  %20930 = vmatmul.mubr.msk.f32.vlgmr.msra.gmra.mrb[88].mxu1 %vm26680_vm10, %v24247_v9  ;;  %v12660_v63 = vsel %vm12658_vm3, %v12637_v45, %v12639_v48  ;;  %v7746_v56 = vadd.f32 %v7528_v16, %v7272_v59  ;;  %v7530_v24 = vpop.f32.mrb[51].mxu0  ;;  %vm26681_vm14 = vmmov %vm26677_vm6  ;;  %v14213_v9 = vld [vmem:[%s25787_s2] sm:$0xf] }
 0x2b8   : > { %20450 = vmatprep.subr.msk.mxu0 %vm26681_vm14, %v12660_v63  ;;  %12759 = vmatprep.mubr.f32.mxu0 %v26195_v3  ;;  %vm26682_vm14 = vmmov %vm26679_vm1 }
 0x2b9   : > { %v12641_v11 = vpop.permute.xlu1 %12640  ;;  %12830 = vmatprep.mubr.f32.mxu1 %v26195_v3  ;;  %14216 = vperm.xlu0 %21198, %v14213_v9   ;;  %vm26683_vm10 = vmmov %vm26677_vm6 }
 0x2ba   : > { %v12635_v51 = vpop.permute.xlu0 %12634  ;;  %v12661_v19 = vsel %vm12658_vm3, %v12639_v48, %v12641_v11  ;;  %vm26684_vm1 = vmmov %vm26677_vm6 }
 0x2bb   : > { %v12659_v59 = vsel %vm12658_vm3, %v12635_v51, %v12637_v45  ;;  %v7669_v14 = vpop.f32.mrb[52].mxu0  ;;  %vm26685_vm12 = vmmov %vm26682_vm14 }
 0x2bc   : > { %20451 = vmatpush1.msk.msra.mxu0 %vm26677_vm6, %v12659_v59  ;;  %v7739_v22 = vpop.f32.mrb[52].mxu1  ;;  %v7670_v60 = vpop.f32.mrb[53].mxu0  ;;  %vm26686_vm9 = vmmov %vm26684_vm1 }
 0x2bd   : > { %v12645_v32 = vpop.permute.xlu1 %12644  ;;  %20452 = vmatmul.mubr.msk.f32.vlgmr.msra.gmra.mrb[0].mxu0 %vm26682_vm14, %v24316_v36  ;;  %v7750_v57 = vadd.f32 %v7739_v22, %v7276_v33  ;;  %v7749_v42 = vadd.f32 %v7670_v60, %v7275_v13  ;;  %v20886_v49 = vpop.f32.mrb[53].mxu1  ;;  %vm26687_vm6 = vmmov %vm26684_vm1 }
 0x2be   : > { %v12643_v20 = vpop.permute.xlu0 %12642  ;;  %12900 = vmatprep.mubr.f32.mxu0 %v26195_v3  ;;  %vm26688_vm14 = vmmov %vm26685_vm12 }
 0x2bf   : > { %v12662_v21 = vsel %vm12658_vm3, %v12641_v11, %v12643_v20  ;;  %v12663_v1 = vsel %vm12658_vm3, %v12643_v20, %v12645_v32 }
 0x2c0   : > { %20453 = vmatprep.subr.msk.mxu1 %vm26683_vm10, %v12662_v21  ;;  %v8002_v53 = vpop.f32.mrb[54].mxu1  ;;  %vm26689_vm10 = vmmov %vm26684_vm1 }
 0x2c1   : > { %20454 = vmatpush1.msk.msra.mxu1 %vm26684_vm1, %v12661_v19  ;;  %v12649_v37 = vpop.permute.xlu1 %12648  ;;  %v8003_v33 = vpop.f32.mrb[55].mxu1 }
 0x2c2   : > { %20455 = vmatmul.mubr.msk.f32.vlgmr.msra.gmra.mrb[90].mxu1 %vm26685_vm12, %v24316_v36  ;;  %v12647_v35 = vpop.permute.xlu0 %12646  ;;  %v8289_v39 = vadd.f32 %v8003_v33, %v7745_v55 }
 0x2c3   : > { %v12664_v13 = vsel %vm12658_vm3, %v12645_v32, %v12647_v35  ;;  %12970 = vmatprep.mubr.f32.mxu1 %v26195_v3  ;;  %v12665_v55 = vsel %vm12658_vm3, %v12647_v35, %v12649_v37 }
 0x2c4   : > { %20456 = vmatprep.subr.msk.mxu0 %vm26686_vm9, %v12664_v13  ;;  %v8072_v23 = vpop.f32.mrb[54].mxu0  ;;  %vm26690_vm9 = vmmov %vm26684_vm1 }
 0x2c5   : > { %20457 = vmatpush1.msk.msra.mxu0 %vm26687_vm6, %v12663_v1  ;;  %v12653_v48 = vpop.permute.xlu1 %12652  ;;  %v8290_v45 = vadd.f32 %v8072_v23, %v7746_v56  ;;  %v8074_v16 = vpop.f32.mrb[55].mxu0  ;;  %vm13167_vm6 = vcmask 777216   ;;  %v20467_v1 = vld [vmem:[%s25786_s1 + $0x5c] sm:$0xf] }
 0x2c6   : > { %20458 = vmatmul.mubr.msk.f32.vlgmr.msra.gmra.mrb[90].mxu0 %vm26688_vm14, %v24316_v36  ;;  %v12651_v63 = vpop.permute.xlu0 %12650  ;;  %vm26691_vm14 = vmmov %vm26684_vm1 }
 0x2c7   : > { %v12666_v24 = vsel %vm12658_vm3, %v12649_v37, %v12651_v63  ;;  %13041 = vmatprep.mubr.f32.mxu0 %v26195_v3  ;;  %v12667_v62 = vsel %vm12658_vm3, %v12651_v63, %v12653_v48 }
 0x2c8   : > { %20459 = vmatprep.subr.msk.mxu1 %vm26689_vm10, %v12666_v24  ;;  %vm26692_vm10 = vmmov %vm26685_vm12 }
 0x2c9   : > { %20460 = vmatpush1.msk.msra.mxu1 %vm26684_vm1, %v12665_v55  ;;  %v13146_v11 = vpop.permute.xlu1 %13145  ;;  %v8213_v51 = vpop.f32.mrb[56].mxu0 }
 0x2ca   : > { %v12655_v9 = vpop.permute.xlu0 %12654  ;;  %20461 = vmatmul.mubr.msk.f32.vlgmr.msra.gmra.mrb[2].mxu1 %vm26685_vm12, %v24316_v36  ;;  %20932 = vmatprep.subr.mxu1 %v26195_v3  ;;  %v8214_v56 = vpop.f32.mrb[57].mxu0  ;;  %vm26693_vm12 = vmmov %vm26692_vm10 }
 0x2cb   : > { %v12668_v59 = vsel %vm12658_vm3, %v12653_v48, %v12655_v9  ;;  %20934 = vmatprep.mubr.msk.f32.mxu1 %vm26132_vm5, %v26195_v3  ;;  %v8293_v14 = vadd.f32 %v8214_v56, %v7749_v42 }
 0x2cc   : > { %20462 = vmatprep.subr.msk.mxu0 %vm26690_vm9, %v12668_v59  ;;  %vm26694_vm9 = vmmov %vm26684_vm1 }
 0x2cd   : > { %20463 = vmatpush1.msk.msra.mxu0 %vm26691_vm14, %v12667_v62  ;;  %v12657_v22 = vpop.permute.xlu1 %12656  ;;  %v8283_v32 = vpop.f32.mrb[56].mxu1  ;;  %vm26696_vm14 = vmmov %vm26684_vm1 }
 0x2ce   : > { %v12669_v60 = vsel %vm12658_vm3, %v12655_v9, %v12657_v22  ;;  %20464 = vmatmul.mubr.msk.f32.vlgmr.msra.gmra.mrb[92].mxu0 %vm26692_vm10, %v24316_v36  ;;  %v13148_v20 = vpop.permute.xlu0 %13147  ;;  %v8294_v49 = vadd.f32 %v8283_v32, %v7750_v57  ;;  %v20891_v21 = vpop.f32.mrb[57].mxu1  ;;  %vm26695_vm3 = vnez %v26434_v8 }
 0x2cf   : > { %v13169_v19 = vsel %vm13167_vm6, %v13146_v11, %v13148_v20  ;;  %20933 = vmatpush3.msk.msra.mxu1 %vm26684_vm1, %v12669_v60  ;;  %13303 = vmatprep.mubr.f32.mxu0 %v26195_v3  ;;  %vm26697_vm1 = vnez %v26583_v44 }
 0x2d0   : > { %20935 = vmatmul.mubr.msk.f32.vlgmr.msra.gmra.mrb[92].mxu1 %vm26693_vm12, %v24316_v36  ;;  %v13191_v42 = vsel %vm26578_vm2, %v13169_v19, 0.0  ;;  %vm26698_vm12 = vnez %v26432_v31 }
 0x2d1   : > { %20468 = vmatprep.subr.msk.mxu0 %vm26694_vm9, %v13191_v42  ;;  %v13150_v37 = vpop.permute.xlu1 %13149  ;;  %v8546_v53 = vpop.f32.mrb[58].mxu1  ;;  %13374 = vmatprep.mubr.f32.mxu1 %v26195_v3 }
 0x2d2   : > { %v13144_v57 = vpop.permute.xlu0 %13143  ;;  %v8547_v35 = vpop.f32.mrb[59].mxu1  ;;  %v13170_v24 = vsel %vm13167_vm6, %v13148_v20, %v13150_v37 }
 0x2d3   : > { %v13168_v33 = vsel %vm13167_vm6, %v13144_v57, %v13146_v11  ;;  %v24366_v13 = vadd.f32 %v8547_v35, %v8289_v39  ;;  %v13192_v51 = vsel %vm26698_vm12, %v13170_v24, 0.0  ;;  %vm26701_vm12 = vnez %v26445_v30 }
 0x2d4   : > { %v13190_v36 = vsel %vm26695_vm3, %v13168_v33, 0.0  ;;  %v8616_v23 = vpop.f32.mrb[58].mxu0  ;;  %vm26700_vm3 = vnez %v26438_v10  ;;  %v26703_v33 = vld [vmem:[#allocation26_spill] sm:$0xff] }
 0x2d5   : > { %20469 = vmatpush1.msk.msra.mxu0 %vm26696_vm14, %v13190_v36  ;;  %v13154_v48 = vpop.permute.xlu1 %13153  ;;  %v24374_v16 = vadd.f32 %v8616_v23, %v8290_v45  ;;  %v8618_v63 = vpop.f32.mrb[59].mxu0  ;;  %vm26699_vm14 = vmmov %vm26694_vm9 }
 0x2d6   : > { %v13152_v55 = vpop.permute.xlu0 %13151  ;;  %20470 = vmatmul.mubr.msk.f32.vlgmr.msra.gmra.mrb[0].mxu0 %vm26692_vm10, %v20467_v1 }
 0x2d7   : > { %v13171_v39 = vsel %vm13167_vm6, %v13150_v37, %v13152_v55  ;;  %13444 = vmatprep.mubr.f32.mxu0 %v26195_v3  ;;  %v13172_v9 = vsel %vm13167_vm6, %v13152_v55, %v13154_v48 }
 0x2d8   : > { %v13193_v11 = vsel %vm26697_vm1, %v13171_v39, 0.0  ;;  %v13194_v32 = vsel %vm26701_vm12, %v13172_v9, 0.0  ;;  %vm26704_vm1 = vnez %v26703_v33 }
 0x2d9   : > { %20471 = vmatprep.subr.msk.mxu1 %vm26694_vm9, %v13193_v11  ;;  %v13158_v45 = vpop.permute.xlu1 %13157 }
 0x2da   : > { %20472 = vmatpush1.msk.msra.mxu1 %vm26699_vm14, %v13192_v51  ;;  %v13156_v56 = vpop.permute.xlu0 %13155  ;;  %vm26702_vm14 = vmmov %vm26694_vm9 }
 0x2db   : > { %v13173_v59 = vsel %vm13167_vm6, %v13154_v48, %v13156_v56  ;;  %20473 = vmatmul.mubr.msk.f32.vlgmr.msra.gmra.mrb[94].mxu1 %vm26692_vm10, %v20467_v1  ;;  %v13174_v19 = vsel %vm13167_vm6, %v13156_v56, %v13158_v45  ;;  %vm26706_vm12 = vmmov %vm26702_vm14 }
 0x2dc   : > { %v13195_v62 = vsel %vm26700_vm3, %v13173_v59, 0.0  ;;  %v8827_v22 = vpop.f32.mrb[60].mxu1  ;;  %13514 = vmatprep.mubr.f32.mxu1 %v26195_v3 }
 0x2dd   : > { %20474 = vmatprep.subr.msk.mxu0 %vm26694_vm9, %v13195_v62  ;;  %v13162_v60 = vpop.permute.xlu1 %13161  ;;  %v8757_v20 = vpop.f32.mrb[60].mxu0  ;;  %v24395_v21 = vadd.f32 %v8827_v22, %v8294_v49  ;;  %vm26705_vm9 = vnez %v26344_v47 }
 0x2de   : > { %20475 = vmatpush1.msk.msra.mxu0 %vm26702_vm14, %v13194_v32  ;;  %v13160_v42 = vpop.permute.xlu0 %13159  ;;  %v8758_v37 = vpop.f32.mrb[61].mxu0  ;;  %v13196_v49 = vsel %vm26705_vm9, %v13174_v19, 0.0  ;;  %vm26707_vm14 = vmmov %vm26706_vm12 }
 0x2df   : > { %v13175_v53 = vsel %vm13167_vm6, %v13158_v45, %v13160_v42  ;;  %20476 = vmatmul.mubr.msk.f32.vlgmr.msra.gmra.mrb[94].mxu0 %vm26692_vm10, %v20467_v1  ;;  %v24401_v57 = vadd.f32 %v8758_v37, %v8293_v14  ;;  %v20896_v35 = vpop.f32.mrb[61].mxu1  ;;  %v13176_v48 = vsel %vm13167_vm6, %v13160_v42, %v13162_v60 }
 0x2e0   : > { %v13197_v36 = vsel %vm26704_vm1, %v13175_v53, 0.0  ;;  %13585 = vmatprep.mubr.f32.mxu0 %v26195_v3  ;;  %vm26708_vm1 = vnez %v26193_v41  ;;  %v13198_v11 = vsel %vm26596_vm15, %v13176_v48, 0.0 }
 0x2e1   : > { %20477 = vmatprep.subr.msk.mxu1 %vm26706_vm12, %v13197_v36  ;;  %v13166_v23 = vpop.permute.xlu1 %13165  ;;  %vm13711_vm12 = vcmask 769024  }
 0x2e2   : > { %20478 = vmatpush1.msk.msra.mxu1 %vm26707_vm14, %v13196_v49  ;;  %v13164_v63 = vpop.permute.xlu0 %13163 }
 0x2e3   : > { %v13177_v14 = vsel %vm13167_vm6, %v13162_v60, %v13164_v63  ;;  %v13178_v24 = vsel %vm13167_vm6, %v13164_v63, %v13166_v23  ;;  %20479 = vmatmul.mubr.msk.f32.vlgmr.msra.gmra.mrb[2].mxu1 %vm26692_vm10, %v20467_v1  ;;  %20937 = vmatprep.subr.mxu1 %v26195_v3  ;;  %vm26709_vm6 = vmmov %vm26707_vm14 }
 0x2e4   : > { %v13200_v55 = vsel %vm26708_vm1, %v13178_v24, 0.0  ;;  %v13199_v39 = vsel %vm26595_vm0, %v13177_v14, 0.0  ;;  %20939 = vmatprep.mubr.msk.f32.mxu1 %vm26132_vm5, %v26195_v3  ;;  %vm26710_vm10 = vmmov %vm26709_vm6  ;;  %vm26711_vm1 = vcmask 31744  }
 0x2e5   : > { %20480 = vmatprep.subr.msk.mxu0 %vm26707_vm14, %v13199_v39  ;;  %20938 = vmatpush3.msk.msra.mxu1 %vm26709_vm6, %v13200_v55  ;;  %v13692_v51 = vpop.permute.xlu1 %13691  ;;  %vm26712_vm9 = vmmov %vm26711_vm1 }
 0x2e6   : > { %20481 = vmatpush1.msk.msra.mxu0 %vm26710_vm10, %v13198_v11  ;;  %v13690_v45 = vpop.permute.xlu0 %13689  ;;  %vm26713_vm14 = vmmov %vm26709_vm6  ;;  %vm26717_vm10 = vnez %v26224_v38 }
 0x2e7   : > { %v13713_v9 = vsel %vm13711_vm12, %v13690_v45, %v13692_v51  ;;  %20482 = vmatmul.mubr.msk.f32.vlgmr.msra.gmra.mrb[96].mxu0 %vm26711_vm1, %v20467_v1  ;;  %20940 = vmatmul.mubr.msk.f32.vlgmr.msra.gmra.mrb[96].mxu1 %vm26712_vm9, %v20467_v1  ;;  %vm26715_vm1 = vmmov %vm26709_vm6  ;;  %vm26716_vm6 = vnez %v26221_v0 }
 0x2e8   : > { %v13735_v56 = vsel %vm26602_vm4, %v13713_v9, 0.0  ;;  %13847 = vmatprep.mubr.f32.mxu0 %v26195_v3  ;;  %v9090_v59 = vpop.f32.mrb[62].mxu1  ;;  %13918 = vmatprep.mubr.f32.mxu1 %v26195_v3  ;;  %vm26714_vm4 = vnez %v26217_v28 }
 0x2e9   : > { %20486 = vmatprep.subr.msk.mxu0 %vm26713_vm14, %v13735_v56  ;;  %v13694_v62 = vpop.permute.xlu1 %13693  ;;  %v9091_v22 = vpop.f32.mrb[63].mxu1  ;;  %vm26718_vm14 = vmmov %vm26715_vm1 }
 0x2ea   : > { %v13688_v32 = vpop.permute.xlu0 %13687  ;;  %v24435_v60 = vadd.f32 %v9091_v22, %v24366_v13  ;;  %v13714_v35 = vsel %vm13711_vm12, %v13692_v51, %v13694_v62 }
 0x2eb   : > { %v13712_v20 = vsel %vm13711_vm12, %v13688_v32, %v13690_v45  ;;  %v13736_v23 = vsel %vm26717_vm10, %v13714_v35, 0.0 }
 0x2ec   : > { %v13734_v1 = vsel %vm26714_vm4, %v13712_v20, 0.0  ;;  %v9160_v19 = vpop.f32.mrb[62].mxu0  ;;  %vm26719_vm4 = vmmov %vm26715_vm1 }
 0x2ed   : > { %20487 = vmatpush1.msk.msra.mxu0 %vm26715_vm1, %v13734_v1  ;;  %v13698_v42 = vpop.permute.xlu1 %13697  ;;  %v9378_v37 = vadd.f32 %v9160_v19, %v24374_v16  ;;  %v9162_v53 = vpop.f32.mrb[63].mxu0  ;;  %vm26720_vm1 = vnez %v26234_v15  ;;  %vm26722_vm10 = vmmov %vm26719_vm4 }
 0x2ee   : > { %20488 = vmatmul.mubr.msk.f32.vlgmr.msra.gmra.mrb[0].mxu0 %vm26712_vm9, %v20485_v46  ;;  %v13696_v13 = vpop.permute.xlu0 %13695 }
 0x2ef   : > { %v13715_v36 = vsel %vm13711_vm12, %v13694_v62, %v13696_v13  ;;  %13988 = vmatprep.mubr.f32.mxu0 %v26195_v3  ;;  %v13716_v49 = vsel %vm13711_vm12, %v13696_v13, %v13698_v42 }
 0x2f0   : > { %v13737_v28 = vsel %vm26716_vm6, %v13715_v36, 0.0  ;;  %v13738_v63 = vsel %vm26720_vm1, %v13716_v49, 0.0  ;;  %vm26721_vm6 = vnez %v26231_v6  ;;  %vm26725_vm1 = vmmov %vm26722_vm10 }
 0x2f1   : > { %20489 = vmatprep.subr.msk.mxu1 %vm26718_vm14, %v13737_v28  ;;  %v13702_v16 = vpop.permute.xlu1 %13701  ;;  %vm26723_vm14 = vmmov %vm26719_vm4 }
 0x2f2   : > { %20490 = vmatpush1.msk.msra.mxu1 %vm26719_vm4, %v13736_v23  ;;  %v13700_v48 = vpop.permute.xlu0 %13699  ;;  %vm26724_vm4 = vmmov %vm26712_vm9 }
 0x2f3   : > { %v13717_v14 = vsel %vm13711_vm12, %v13698_v42, %v13700_v48  ;;  %20491 = vmatmul.mubr.msk.f32.vlgmr.msra.gmra.mrb[98].mxu1 %vm26712_vm9, %v20485_v46  ;;  %v13718_v24 = vsel %vm13711_vm12, %v13700_v48, %v13702_v16  ;;  %vm26726_vm9 = vmmov %vm26725_vm1 }
 0x2f4   : > { %v13739_v0 = vsel %vm26721_vm6, %v13717_v14, 0.0  ;;  %v9371_v38 = vpop.f32.mrb[64].mxu1  ;;  %14058 = vmatprep.mubr.f32.mxu1 %v26195_v3  ;;  %v13740_v45 = vsel %vm26612_vm8, %v13718_v24, 0.0  ;;  %vm26727_vm8 = vmmov %vm26724_vm4  ;;  %vm26729_vm6 = vnez %v26620_v54 }
 0x2f5   : > { %20492 = vmatprep.subr.msk.mxu0 %vm26722_vm10, %v13739_v0  ;;  %v9301_v55 = vpop.f32.mrb[64].mxu0  ;;  %v9382_v39 = vadd.f32 %v9371_v38, %v24395_v21  ;;  %v20901_v11 = vpop.f32.mrb[65].mxu1  ;;  %vm26730_vm10 = vmmov %vm26725_vm1 }
 0x2f6   : > { %20493 = vmatpush1.msk.msra.mxu0 %vm26723_vm14, %v13738_v63  ;;  %v13704_v15 = vpop.permute.xlu0 %13703  ;;  %v13706_v51 = vpop.permute.xlu1 %13705  ;;  %vm26732_vm14 = vmmov %vm26725_vm1 }
 0x2f7   : > { %v13719_v9 = vsel %vm13711_vm12, %v13702_v16, %v13704_v15  ;;  %20494 = vmatmul.mubr.msk.f32.vlgmr.msra.gmra.mrb[98].mxu0 %vm26724_vm4, %v20485_v46  ;;  %v9302_v6 = vpop.f32.mrb[65].mxu0  ;;  %v13720_v56 = vsel %vm13711_vm12, %v13704_v15, %v13706_v51 }
 0x2f8   : > { %v13741_v59 = vsel %vm26611_vm11, %v13719_v9, 0.0  ;;  %v9381_v21 = vadd.f32 %v9302_v6, %v24401_v57  ;;  %14129 = vmatprep.mubr.f32.mxu0 %v26195_v3  ;;  %v13742_v22 = vsel %vm22736_vm13, %v13720_v56, 0.0  ;;  %vm26728_vm11 = vnez %v26619_v61  ;;  %vm26731_vm13 = vmmov %vm26725_vm1 }
 0x2f9   : > { %20495 = vmatprep.subr.msk.mxu1 %vm26725_vm1, %v13741_v59  ;;  %vm26737_vm1 = vcmask 130048  }
 0x2fa   : > { %20496 = vmatpush1.msk.msra.mxu1 %vm26726_vm9, %v13740_v45  ;;  %v13708_v52 = vpop.permute.xlu0 %13707  ;;  %v13710_v62 = vpop.permute.xlu1 %13709  ;;  %vm26738_vm9 = vmmov %vm26737_vm1 }
 0x2fb   : > { %v13721_v32 = vsel %vm13711_vm12, %v13706_v51, %v13708_v52  ;;  %v13722_v20 = vsel %vm13711_vm12, %v13708_v52, %v13710_v62  ;;  %20497 = vmatmul.mubr.msk.f32.vlgmr.msra.gmra.mrb[2].mxu1 %vm26727_vm8, %v20485_v46  ;;  %20942 = vmatprep.subr.mxu1 %v26195_v3  ;;  %vm26733_vm12 = vmmov %vm26724_vm4 }
 0x2fc   : > { %v13744_v40 = vsel %vm26728_vm11, %v13722_v20, 0.0  ;;  %v13743_v57 = vsel %vm26729_vm6, %v13721_v32, 0.0  ;;  %20944 = vmatprep.mubr.msk.f32.mxu1 %vm26132_vm5, %v26195_v3  ;;  %vm26739_vm8 = vmmov %vm26730_vm10 }
 0x2fd   : > { %20498 = vmatprep.subr.msk.mxu0 %vm26730_vm10, %v13743_v57  ;;  %20943 = vmatpush3.msk.msra.mxu1 %vm26731_vm13, %v13744_v40  ;;  %vm26740_vm11 = vmmov %vm26739_vm8  ;;  %vm26742_vm10 = vcmask 7168  }
 0x2fe   : > { %20499 = vmatpush1.msk.msra.mxu0 %vm26732_vm14, %v13742_v22  ;;  %vm26741_vm6 = vmmov %vm26724_vm4  ;;  %vm26744_vm14 = vcmask 121856  }
 0x2ff   : > { %20500 = vmatmul.mubr.msk.f32.vlgmr.msra.gmra.mrb[100].mxu0 %vm26733_vm12, %v20485_v46  ;;  %20945 = vmatmul.mubr.msk.f32.vlgmr.msra.gmra.mrb[100].mxu1 %vm26724_vm4, %v20485_v46  ;;  %vm26743_vm13 = vmmov %vm26742_vm10 }
 0x300   : > { %v9634_v43 = vpop.f32.mrb[66].mxu1  ;;  %14528 = vmatprep.mubr.f32.mxu1 %v26195_v3  ;;  %14457 = vmatprep.mubr.f32.mxu0 %v26195_v3  ;;  %vm26746_vm12 = vmmov %vm26742_vm10 }
 0x301   : > { %v9635_v61 = vpop.f32.mrb[67].mxu1  ;;  %vm26748_vm4 = vmmov %vm26737_vm1 }
 0x302   : > { %v9921_v54 = vadd.f32 %v9635_v61, %v24435_v60 }
 0x304   : > { %v9704_v1 = vpop.f32.mrb[66].mxu0 }
 0x305   : > { %v9922_v19 = vadd.f32 %v9704_v1, %v9378_v37  ;;  %v9706_v42 = vpop.f32.mrb[67].mxu0 }
 0x30c   : > { %v9915_v53 = vpop.f32.mrb[68].mxu1 }
 0x30d   : > { %v9845_v35 = vpop.f32.mrb[68].mxu0  ;;  %v9926_v13 = vadd.f32 %v9915_v53, %v9382_v39  ;;  %v20906_v36 = vpop.f32.mrb[69].mxu1 }
 0x30e   : > { %v9846_v49 = vpop.f32.mrb[69].mxu0 }
 0x30f   : > { %v9925_v28 = vadd.f32 %v9846_v49, %v9381_v21 }
 0x317   : > { %v10145_v23 = vpop.f32.mrb[70].mxu1 }
 0x318   : > { %v10146_v16 = vpop.f32.mrb[71].mxu1 }
 0x319   : > { %v10432_v46 = vadd.f32 %v10146_v16, %v9921_v54 }
 0x31b   : > { %v10215_v48 = vpop.f32.mrb[70].mxu0 }
 0x31c   : > { %v10433_v63 = vadd.f32 %v10215_v48, %v9922_v19  ;;  %v10217_v14 = vpop.f32.mrb[71].mxu0 }
 0x323   : > { %v10356_v24 = vpop.f32.mrb[72].mxu0 }
 0x324   : > { %v10357_v0 = vpop.f32.mrb[73].mxu0 }
 0x325   : > { %v10436_v38 = vadd.f32 %v10357_v0, %v9925_v28 }
 0x326   : > { %v10426_v55 = vpop.f32.mrb[72].mxu1 }
 0x327   : > { %v10437_v60 = vadd.f32 %v10426_v55, %v9926_v13  ;;  %v20911_v11 = vpop.f32.mrb[73].mxu1 }
 0x335   : > { %v10689_v37 = vpop.f32.mrb[74].mxu1 }
 0x336   : > { %v10690_v15 = vpop.f32.mrb[75].mxu1 }
 0x337   : > { %v10976_v51 = vadd.f32 %v10690_v15, %v10432_v46 }
 0x339   : > { %v10759_v45 = vpop.f32.mrb[74].mxu0 }
 0x33a   : > { %v10977_v39 = vadd.f32 %v10759_v45, %v10433_v63  ;;  %v10761_v9 = vpop.f32.mrb[75].mxu0 }
 0x341   : > { %v10970_v6 = vpop.f32.mrb[76].mxu1 }
 0x342   : > { %v10900_v56 = vpop.f32.mrb[76].mxu0  ;;  %v10981_v59 = vadd.f32 %v10970_v6, %v10437_v60  ;;  %v20916_v21 = vpop.f32.mrb[77].mxu1 }
 0x343   : > { %v10901_v52 = vpop.f32.mrb[77].mxu0 }
 0x344   : > { %v10980_v62 = vadd.f32 %v10901_v52, %v10436_v38 }
 0x34e   : > { %v11233_v22 = vpop.f32.mrb[78].mxu1 }
 0x34f   : > { %v11234_v32 = vpop.f32.mrb[79].mxu1 }
 0x350   : > { %v11520_v20 = vadd.f32 %v11234_v32, %v10976_v51 }
 0x352   : > { %v11303_v40 = vpop.f32.mrb[78].mxu0 }
 0x353   : > { %v11521_v57 = vadd.f32 %v11303_v40, %v10977_v39  ;;  %v11305_v43 = vpop.f32.mrb[79].mxu0 }
 0x35a   : > { %v11444_v61 = vpop.f32.mrb[80].mxu0  ;;  %v11514_v54 = vpop.f32.mrb[80].mxu1 }
 0x35b   : > { %v11525_v1 = vadd.f32 %v11514_v54, %v10981_v59  ;;  %v11445_v19 = vpop.f32.mrb[81].mxu0  ;;  %v20921_v42 = vpop.f32.mrb[81].mxu1 }
 0x35c   : > { %v11524_v53 = vadd.f32 %v11445_v19, %v10980_v62 }
 0x366   : > { %v11777_v35 = vpop.f32.mrb[82].mxu1 }
 0x367   : > { %v11778_v13 = vpop.f32.mrb[83].mxu1 }
 0x368   : > { %v12064_v36 = vadd.f32 %v11778_v13, %v11520_v20 }
 0x36a   : > { %v11847_v49 = vpop.f32.mrb[82].mxu0 }
 0x36b   : > { %v12065_v28 = vadd.f32 %v11847_v49, %v11521_v57  ;;  %v11849_v23 = vpop.f32.mrb[83].mxu0 }
 0x372   : > { %v11988_v16 = vpop.f32.mrb[84].mxu0  ;;  %v12058_v46 = vpop.f32.mrb[84].mxu1 }
 0x373   : > { %v12069_v48 = vadd.f32 %v12058_v46, %v11525_v1  ;;  %v11989_v63 = vpop.f32.mrb[85].mxu0  ;;  %v20926_v14 = vpop.f32.mrb[85].mxu1 }
 0x374   : > { %v12068_v24 = vadd.f32 %v11989_v63, %v11524_v53  ;;  %v14217_v46 = vpop.permute.xlu0 %14216 }
 0x37e   : > { %v12321_v0 = vpop.f32.mrb[86].mxu1 }
 0x37f   : > { %v12322_v38 = vpop.f32.mrb[87].mxu1 }
 0x380   : > { %v12608_v55 = vadd.f32 %v12322_v38, %v12064_v36 }
 0x382   : > { %v12391_v60 = vpop.f32.mrb[86].mxu0 }
 0x383   : > { %v12609_v11 = vadd.f32 %v12391_v60, %v12065_v28  ;;  %v12393_v37 = vpop.f32.mrb[87].mxu0 }
 0x38a   : > { %v12532_v15 = vpop.f32.mrb[88].mxu0  ;;  %v12602_v51 = vpop.f32.mrb[88].mxu1 }
 0x38b   : > { %v12613_v45 = vadd.f32 %v12602_v51, %v12069_v48  ;;  %v12533_v39 = vpop.f32.mrb[89].mxu0  ;;  %v20931_v9 = vpop.f32.mrb[89].mxu1 }
 0x38c   : > { %v12612_v6 = vadd.f32 %v12533_v39, %v12068_v24 }
 0x395   : > { %v12832_v56 = vpop.f32.mrb[90].mxu1 }
 0x396   : > { %v12833_v59 = vpop.f32.mrb[91].mxu1 }
 0x397   : > { %v13119_v21 = vadd.f32 %v12833_v59, %v12608_v55 }
 0x399   : > { %v12902_v52 = vpop.f32.mrb[90].mxu0 }
 0x39a   : > { %v13120_v62 = vadd.f32 %v12902_v52, %v12609_v11  ;;  %v12904_v22 = vpop.f32.mrb[91].mxu0 }
 0x3a1   : > { %v13043_v32 = vpop.f32.mrb[92].mxu0 }
 0x3a2   : > { %v13044_v20 = vpop.f32.mrb[93].mxu0 }
 0x3a3   : > { %v13123_v40 = vadd.f32 %v13044_v20, %v12612_v6  ;;  %v13113_v57 = vpop.f32.mrb[92].mxu1 }
 0x3a4   : > { %v13124_v43 = vadd.f32 %v13113_v57, %v12613_v45  ;;  %v20936_v61 = vpop.f32.mrb[93].mxu1 }
 0x3ae   : > { %v13376_v54 = vpop.f32.mrb[94].mxu1 }
 0x3af   : > { %v13377_v1 = vpop.f32.mrb[95].mxu1 }
 0x3b0   : > { %v13663_v19 = vadd.f32 %v13377_v1, %v13119_v21 }
 0x3b2   : > { %v13446_v42 = vpop.f32.mrb[94].mxu0 }
 0x3b3   : > { %v13664_v53 = vadd.f32 %v13446_v42, %v13120_v62  ;;  %v13448_v35 = vpop.f32.mrb[95].mxu0 }
 0x3ba   : > { %v13587_v13 = vpop.f32.mrb[96].mxu0  ;;  %v13657_v36 = vpop.f32.mrb[96].mxu1 }
 0x3bb   : > { %v13668_v49 = vadd.f32 %v13657_v36, %v13124_v43  ;;  %v13588_v28 = vpop.f32.mrb[97].mxu0  ;;  %v20941_v23 = vpop.f32.mrb[97].mxu1 }
 0x3bc   : > { %v13667_v16 = vadd.f32 %v13588_v28, %v13123_v40 }
 0x3c1   : > { %v13849_v48 = vpop.f32.mrb[0].mxu0 }
 0x3c2   : > { %v13851_v63 = vpop.f32.mrb[1].mxu0  ;;  %v14219_v14 = vadd.f32 %v14217_v46, %v13849_v48 }
 0x3c3   : > { %v14220_v24 = vadd.f32 %v14217_v46, %v13851_v63 }
 0x3c4   : > { %v14227_v0 = vmax.f32 %v14219_v14, 0.0 }
 0x3c5   : > { %v24498_v38 = vmax.f32 %v14220_v24, 0.0 }
 0x3c6   : > { %v13920_v55 = vpop.f32.mrb[98].mxu1 }
 0x3c7   : > { %v24501_v60 = vcombine.low %v14227_v0, %v24498_v38  ;;  %v13921_v11 = vpop.f32.mrb[99].mxu1  ;;  %v24558_v55 = vcombine.low %v24498_v38, %v24498_v38 }
 0x3c8   : > { %v14207_v37 = vadd.f32 %v13921_v11, %v13663_v19 }
 0x3c9   : > { %14239 = vst [vmem:[#allocation2 + $0x4] sm:$0xff] %v24501_v60  ;;  %26735 = vst [vmem:[#allocation21_spill] sm:$0xff] %v24558_v55 }
 0x3ca   : > { %v13990_v15 = vpop.f32.mrb[98].mxu0  ;;  %v14221_v51 = vadd.f32 %v14217_v46, %v14207_v37 }
 0x3cb   : > { %v14208_v45 = vadd.f32 %v13990_v15, %v13664_v53  ;;  %v13992_v39 = vpop.f32.mrb[99].mxu0 }
 0x3cc   : > { %v14229_v56 = vmax.f32 %v14221_v51, 0.0 }
 0x3cd   : > { %v14222_v9 = vadd.f32 %v14217_v46, %v14208_v45 }
 0x3ce   : > { %v14060_v6 = vpop.f32.mrb[2].mxu1 }
 0x3cf   : > { %v14230_v59 = vmax.f32 %v14222_v9, 0.0  ;;  %v14223_v21 = vadd.f32 %v14217_v46, %v14060_v6  ;;  %v14062_v52 = vpop.f32.mrb[3].mxu1 }
 0x3d0   : > { %v14224_v62 = vadd.f32 %v14217_v46, %v14062_v52  ;;  %v14256_v22 = vld [vmem:[#allocation2 + $0x8] sm:$0xff]  ;;  %v14255_v32 = vld [vmem:[#allocation2] sm:$0xff] }
 0x3d1   : > { %v14242_v20 = vcombine.low %v14229_v56, %v14230_v59  ;;  %v14231_v40 = vmax.f32 %v14223_v21, 0.0  ;;  %14337 = vrot.lane.b32.xlu1 %v14256_v22, %s21388_s12  ;;  %14333 = vrot.lane.b32.xlu0 %v14255_v32, %s21388_s12  ;;  %v14267_v23 = vcombine.high %v14255_v32, %v14255_v32  ;;  %v21327_v24 = vcombine.low %v14230_v59, %v14230_v59 }
 0x3d2   : > { %v24506_v57 = vmax.f32 %v14224_v62, 0.0  ;;  %v14131_v43 = vpop.f32.mrb[100].mxu0  ;;  %v14201_v61 = vpop.f32.mrb[100].mxu1 }
 0x3d3   : > { %14244 = vst [vmem:[#allocation2 + $0x10] sm:$0xff] %v14242_v20  ;;  %v14212_v54 = vadd.f32 %v14201_v61, %v13668_v49  ;;  %v14132_v1 = vpop.f32.mrb[101].mxu0  ;;  %v20946_v19 = vpop.f32.mrb[101].mxu1 }
 0x3d4   : > { %v24509_v42 = vcombine.low %v14231_v40, %v24506_v57  ;;  %v14211_v53 = vadd.f32 %v14132_v1, %v13667_v16  ;;  %v14268_v16 = vcombine.high %v14256_v22, %v14256_v22  ;;  %v24594_v45 = vcombine.low %v24506_v57, %v24506_v57  ;;  %v24652_v19 = vld [vmem:[%s25788_s3 + $0x4] sm:$0xf] }
 0x3d5   : > { %v14226_v35 = vadd.f32 %v14217_v46, %v14212_v54  ;;  %14277 = vrot.lane.b32.xlu1 %v14256_v22, %s21387_s30  ;;  %14273 = vrot.lane.b32.xlu0 %v14255_v32, %s21387_s30 }
 0x3d6   : > { %26734 = vst [vmem:[#allocation23_spill] sm:$0xff] %v24509_v42  ;;  %14249 = vst [vmem:[#allocation2 + $0x1c] sm:$0xff] %v24509_v42  ;;  %v14225_v13 = vadd.f32 %v14217_v46, %v14211_v53 }
 0x3d7   : > { %v14234_v36 = vmax.f32 %v14226_v35, 0.0 }
 0x3d8   : > { %v14233_v28 = vmax.f32 %v14225_v13, 0.0 }
 0x3d9   : > { %15295 = vrot.lane.b32.xlu1 %v14256_v22, %s21389_s13  ;;  %15291 = vrot.lane.b32.xlu0 %v14255_v32, %s21389_s13  ;;  %v21328_v0 = vcombine.low %v14234_v36, %v14234_v36 }
 0x3da   : > { %v14252_v49 = vcombine.low %v14233_v28, %v14234_v36  ;;  %v24566_v11 = vld [vmem:[#allocation2 + $0x14] sm:$0xff]  ;;  %v24568_v37 = vld [vmem:[#allocation2 + $0xc] sm:$0xff] }
 0x3db   : > { %26736 = vst [vmem:[#allocation24_spill] sm:$0xff] %v24568_v37  ;;  %v24576_v38 = vcombine.high %v24568_v37, %v24568_v37  ;;  %v24584_v15 = vcombine.high %v24566_v11, %v24566_v11 }
 0x3dc   : > { %14254 = vst [vmem:[#allocation2 + $0x28] sm:$0xff] %v14252_v49 }
 0x3dd   : > { %15838 = vrot.lane.b32.xlu1 %v14256_v22, %s21392_s25  ;;  %15834 = vrot.lane.b32.xlu0 %v14255_v32, %s21392_s25  ;;  %v14258_v46 = vld [vmem:[#allocation2 + $0x18] sm:$0xff]  ;;  %v14259_v48 = vld [vmem:[#allocation2 + $0x20] sm:$0xff] }
 0x3de   : > { %v14270_v63 = vcombine.high %v14258_v46, %v14258_v46  ;;  %v14271_v14 = vcombine.high %v14259_v48, %v14259_v48 }
 0x3e1   : > { %14275 = vrot.lane.b32.xlu0 %v14267_v23, %s21387_s30  ;;  %14335 = vrot.lane.b32.xlu1 %v14267_v23, %s21388_s12 }
 0x3e3   : > { %v24586_v51 = vld [vmem:[#allocation2 + $0x24] sm:$0xff]  ;;  %v24596_v39 = vld [vmem:[#allocation2 + $0x2c] sm:$0xff] }
 0x3e4   : > { %v24604_v9 = vcombine.high %v24586_v51, %v24586_v51  ;;  %v24614_v59 = vcombine.high %v24596_v39, %v24596_v39 }
 0x3e5   : > { %15293 = vrot.lane.b32.xlu0 %v14267_v23, %s21389_s13  ;;  %14339 = vrot.lane.b32.xlu1 %v14268_v16, %s21388_s12 }
 0x3e9   : > { %15836 = vrot.lane.b32.xlu0 %v14267_v23, %s21392_s25  ;;  %14279 = vrot.lane.b32.xlu1 %v14268_v16, %s21387_s30 }
 0x3ed   : > { %14345 = vrot.lane.b32.xlu0 %v14258_v46, %s21388_s12  ;;  %15297 = vrot.lane.b32.xlu1 %v14268_v16, %s21389_s13 }
 0x3f1   : > { %14349 = vrot.lane.b32.xlu0 %v14259_v48, %s21388_s12  ;;  %15840 = vrot.lane.b32.xlu1 %v14268_v16, %s21392_s25 }
 0x3f5   : > { %14285 = vrot.lane.b32.xlu0 %v14258_v46, %s21387_s30  ;;  %14347 = vrot.lane.b32.xlu1 %v14270_v63, %s21388_s12 }
 0x3f9   : > { %14289 = vrot.lane.b32.xlu0 %v14259_v48, %s21387_s30  ;;  %14351 = vrot.lane.b32.xlu1 %v14271_v14, %s21388_s12 }
 0x3fd   : > { %15303 = vrot.lane.b32.xlu0 %v14258_v46, %s21389_s13  ;;  %14287 = vrot.lane.b32.xlu1 %v14270_v63, %s21387_s30 }
 0x401   : > { %15307 = vrot.lane.b32.xlu0 %v14259_v48, %s21389_s13  ;;  %14291 = vrot.lane.b32.xlu1 %v14271_v14, %s21387_s30 }
 0x405   : > { %14341 = vrot.lane.b32.xlu0 %v14242_v20, %s21388_s12  ;;  %15305 = vrot.lane.b32.xlu1 %v14270_v63, %s21389_s13 }
 0x409   : > { %14281 = vrot.lane.b32.xlu0 %v14242_v20, %s21387_s30  ;;  %15309 = vrot.lane.b32.xlu1 %v14271_v14, %s21389_s13 }
 0x40d   : > { %15299 = vrot.lane.b32.xlu0 %v14242_v20, %s21389_s13  ;;  %14343 = vrot.lane.b32.xlu1 %v21327_v24, %s21388_s12 }
 0x411   : > { %15842 = vrot.lane.b32.xlu0 %v14242_v20, %s21392_s25  ;;  %14283 = vrot.lane.b32.xlu1 %v21327_v24, %s21387_s30 }
 0x415   : > { %14353 = vrot.lane.b32.xlu0 %v14252_v49, %s21388_s12  ;;  %15301 = vrot.lane.b32.xlu1 %v21327_v24, %s21389_s13 }
 0x419   : > { %14293 = vrot.lane.b32.xlu0 %v14252_v49, %s21387_s30  ;;  %15844 = vrot.lane.b32.xlu1 %v21327_v24, %s21392_s25 }
 0x41d   : > { %15311 = vrot.lane.b32.xlu0 %v14252_v49, %s21389_s13  ;;  %15848 = vrot.lane.b32.xlu1 %v14270_v63, %s21392_s25 }
 0x421   : > { %15846 = vrot.lane.b32.xlu0 %v14258_v46, %s21392_s25  ;;  %14355 = vrot.lane.b32.xlu1 %v21328_v0, %s21388_s12  ;;  %s25395_s12 = sld [smem:[#allocation3 + $0x80]] }
 0x425   : > { %15850 = vrot.lane.b32.xlu0 %v14259_v48, %s21392_s25  ;;  %14295 = vrot.lane.b32.xlu1 %v21328_v0, %s21387_s30  ;;  %s25393_s30 = sld [smem:[#allocation3]] }
 0x429   : > { %15854 = vrot.lane.b32.xlu0 %v14252_v49, %s21392_s25  ;;  %15313 = vrot.lane.b32.xlu1 %v21328_v0, %s21389_s13  ;;  %s25397_s13 = sld [smem:[#allocation3 + $0x100]] }
 0x42d   : > { %16853 = vrot.lane.b32.xlu0 %v24558_v55, %s21393_s8  ;;  %15852 = vrot.lane.b32.xlu1 %v14271_v14, %s21392_s25 }
 0x431   : > { %16851 = vrot.lane.b32.xlu0 %v24501_v60, %s21393_s8  ;;  %15856 = vrot.lane.b32.xlu1 %v21328_v0, %s21392_s25  ;;  %s25400_s25 = sld [smem:[#allocation3 + $0x180]] }
 0x435   : > { %16859 = vrot.lane.b32.xlu0 %v24566_v11, %s21393_s8  ;;  %16855 = vrot.lane.b32.xlu1 %v24568_v37, %s21393_s8 }
 0x439   : > { %16863 = vrot.lane.b32.xlu0 %v24509_v42, %s21393_s8  ;;  %16857 = vrot.lane.b32.xlu1 %v24576_v38, %s21393_s8 }
 0x43d   : > { %16867 = vrot.lane.b32.xlu0 %v24586_v51, %s21393_s8  ;;  %16861 = vrot.lane.b32.xlu1 %v24584_v15, %s21393_s8 }
 0x441   : > { %16871 = vrot.lane.b32.xlu0 %v24596_v39, %s21393_s8  ;;  %16865 = vrot.lane.b32.xlu1 %v24594_v45, %s21393_s8 }
 0x443   : > { %v24606_v6 = vpop.permute.xlu1 %14337  ;;  %v14334_v56 = vpop.permute.xlu0 %14333 }
 0x445   : > { %17396 = vrot.lane.b32.xlu0 %v24558_v55, %s21396_s19  ;;  %16869 = vrot.lane.b32.xlu1 %v24604_v9, %s21393_s8 }
 0x447   : > { %v24616_v21 = vpop.permute.xlu1 %14277  ;;  %v24618_v52 = vpop.permute.xlu0 %14273 }
 0x449   : > { %17394 = vrot.lane.b32.xlu0 %v24501_v60, %s21396_s19  ;;  %16873 = vrot.lane.b32.xlu1 %v24614_v59, %s21393_s8  ;;  %s25402_s8 = sld [smem:[#allocation3 + $0x1]] }
 0x44b   : > { %v24624_v62 = vpop.permute.xlu1 %15295  ;;  %v24626_v22 = vpop.permute.xlu0 %15291 }
 0x44d   : > { %17402 = vrot.lane.b32.xlu0 %v24566_v11, %s21396_s19  ;;  %17398 = vrot.lane.b32.xlu1 %v24568_v37, %s21396_s19 }
 0x44f   : > { %v15839_v32 = vpop.permute.xlu1 %15838  ;;  %v15835_v20 = vpop.permute.xlu0 %15834 }
 0x451   : > { %17406 = vrot.lane.b32.xlu0 %v24509_v42, %s21396_s19  ;;  %17400 = vrot.lane.b32.xlu1 %v24576_v38, %s21396_s19 }
 0x453   : > { %v24636_v40 = vpop.permute.xlu0 %14275  ;;  %v14336_v57 = vpop.permute.xlu1 %14335 }
 0x454   : > { %v14357_v43 = vsel %vm26737_vm1, %v14334_v56, %v14336_v57  ;;  %v14358_v61 = vsel %vm26738_vm9, %v14336_v57, %v24606_v6  ;;  %vm26749_vm9 = vmmov %vm26739_vm8 }
 0x455   : > { %17410 = vrot.lane.b32.xlu0 %v24586_v51, %s21396_s19  ;;  %17404 = vrot.lane.b32.xlu1 %v24584_v15, %s21396_s19 }
 0x456   : > { %20504 = vmatprep.subr.msk.mxu0 %vm26739_vm8, %v14358_v61  ;;  %vm26750_vm8 = vmmov %vm26737_vm1 }
 0x457   : > { %20505 = vmatpush1.msk.msra.mxu0 %vm26740_vm11, %v14357_v43  ;;  %v24647_v54 = vpop.permute.xlu0 %15293  ;;  %v14340_v1 = vpop.permute.xlu1 %14339  ;;  %vm26751_vm11 = vmmov %vm26749_vm9 }
 0x458   : > { %20506 = vmatmul.mubr.msk.f32.vlgmr.msra.gmra.mrb[102].mxu0 %vm26741_vm6, %v24652_v19  ;;  %vm26752_vm6 = vmmov %vm26737_vm1 }
 0x459   : > { %17414 = vrot.lane.b32.xlu0 %v24596_v39, %s21396_s19  ;;  %17408 = vrot.lane.b32.xlu1 %v24594_v45, %s21396_s19 }
 0x45a   : > { %14598 = vmatprep.mubr.f32.mxu0 %v26195_v3 }
 0x45b   : > { %v15837_v53 = vpop.permute.xlu0 %15836  ;;  %v24661_v35 = vpop.permute.xlu1 %14279 }
 0x45c   : > { %v24664_v13 = vsel %vm26742_vm10, %v15835_v20, %v15837_v53  ;;  %v24667_v36 = vsel %vm26743_vm13, %v15837_v53, %v15839_v32  ;;  %vm26753_vm10 = vmmov %vm26749_vm9  ;;  %vm26754_vm13 = vcmask 31744  }
 0x45d   : > { %17941 = vrot.lane.b32.xlu0 %v24558_v55, %s21397_s22  ;;  %17412 = vrot.lane.b32.xlu1 %v24604_v9, %s21396_s19 }
 0x45f   : > { %v14346_v28 = vpop.permute.xlu0 %14345  ;;  %v24673_v49 = vpop.permute.xlu1 %15297 }
 0x460   : > { %v24678_v23 = vsel %vm26744_vm14, %v24624_v62, %v24673_v49  ;;  %vm26755_vm14 = vmmov %vm26749_vm9 }
 0x461   : > { %17939 = vrot.lane.b32.xlu0 %v24501_v60, %s21397_s22  ;;  %17416 = vrot.lane.b32.xlu1 %v24614_v59, %s21396_s19  ;;  %s25407_s19 = sld [smem:[#allocation3 + $0x81]] }
 0x463   : > { %v14350_v16 = vpop.permute.xlu0 %14349  ;;  %v24684_v46 = vpop.permute.xlu1 %15840 }
 0x464   : > { %26745 = vst [vmem:[#allocation25_spill] sm:$0xff] %v24684_v46  ;;  %v24688_v48 = vsel %vm26746_vm12, %v15839_v32, %v24684_v46  ;;  %vm26756_vm12 = vmmov %vm26737_vm1 }
 0x465   : > { %26747 = vst [vmem:[#allocation15_spill] sm:$0xff] %v24688_v48  ;;  %17947 = vrot.lane.b32.xlu0 %v24566_v11, %s21397_s22  ;;  %17943 = vrot.lane.b32.xlu1 %v24568_v37, %s21397_s22  ;;  %v14359_v48 = vsel %vm26737_vm1, %v24606_v6, %v14340_v1 }
 0x467   : > { %v24694_v63 = vpop.permute.xlu0 %14285  ;;  %v14348_v14 = vpop.permute.xlu1 %14347 }
 0x468   : > { %v14363_v47 = vsel %vm26752_vm6, %v14346_v28, %v14348_v14  ;;  %vm26761_vm6 = vcmask 138240  }
 0x469   : > { %17951 = vrot.lane.b32.xlu0 %v24509_v42, %s21397_s22  ;;  %17945 = vrot.lane.b32.xlu1 %v24576_v38, %s21397_s22 }
 0x46b   : > { %v24700_v24 = vpop.permute.xlu0 %14289  ;;  %v14352_v0 = vpop.permute.xlu1 %14351 }
 0x46d   : > { %17955 = vrot.lane.b32.xlu0 %v24586_v51, %s21397_s22  ;;  %17949 = vrot.lane.b32.xlu1 %v24584_v15, %s21397_s22 }
 0x46f   : > { %v24706_v56 = vpop.permute.xlu0 %15303  ;;  %v24708_v32 = vpop.permute.xlu1 %14287 }
 0x471   : > { %17959 = vrot.lane.b32.xlu0 %v24596_v39, %s21397_s22  ;;  %17953 = vrot.lane.b32.xlu1 %v24594_v45, %s21397_s22 }
 0x473   : > { %v24714_v20 = vpop.permute.xlu0 %15307  ;;  %v24716_v57 = vpop.permute.xlu1 %14291 }
 0x475   : > { %18449 = vrot.lane.b32.xlu0 %v24558_v55, %s21398_s27  ;;  %17957 = vrot.lane.b32.xlu1 %v24604_v9, %s21397_s22  ;;  %v14364_v55 = vsel %vm26750_vm8, %v14348_v14, %v14350_v16  ;;  %vm26759_vm8 = vmmov %vm26749_vm9 }
 0x477   : > { %v14342_v43 = vpop.permute.xlu0 %14341  ;;  %v24722_v61 = vpop.permute.xlu1 %15305 }
 0x478   : > { %v14360_v53 = vsel %vm26748_vm4, %v14340_v1, %v14342_v43  ;;  %vm26757_vm4 = vmmov %vm26737_vm1 }
 0x479   : > { %18447 = vrot.lane.b32.xlu0 %v24501_v60, %s21398_s27  ;;  %17961 = vrot.lane.b32.xlu1 %v24614_v59, %s21397_s22  ;;  %vm26758_vm1 = vmmov %vm26754_vm13  ;;  %s25409_s22 = sld [smem:[#allocation3 + $0x101]] }
 0x47a   : > { %20507 = vmatprep.subr.msk.mxu1 %vm26749_vm9, %v14360_v53 }
 0x47b   : > { %20508 = vmatpush1.msk.msra.mxu1 %vm26751_vm11, %v14359_v48  ;;  %v24734_v41 = vpop.permute.xlu0 %14281  ;;  %v24736_v46 = vpop.permute.xlu1 %15309  ;;  %vm26760_vm11 = vmmov %vm26758_vm1 }
 0x47c   : > { %20513 = vmatprep.subr.msk.mxu1 %vm26753_vm10, %v14364_v55  ;;  %20509 = vmatmul.mubr.msk.f32.vlgmr.msra.gmra.mrb[102].mxu1 %vm26754_vm13, %v24652_v19  ;;  %vm26762_vm10 = vmmov %vm26761_vm6 }
 0x47d   : > { %20514 = vmatpush1.msk.msra.mxu1 %vm26755_vm14, %v14363_v47  ;;  %18455 = vrot.lane.b32.xlu0 %v24566_v11, %s21398_s27  ;;  %vm26763_vm13 = vmmov %vm26757_vm4 }
 0x47e   : > { %18451 = vrot.lane.b32.xlu1 %v24568_v37, %s21398_s27  ;;  %14668 = vmatprep.mubr.f32.mxu1 %v26195_v3  ;;  %vm26764_vm14 = vmmov %vm26757_vm4 }
 0x47f   : > { %v24748_v6 = vpop.permute.xlu0 %15299  ;;  %v14344_v1 = vpop.permute.xlu1 %14343  ;;  %20947 = vmatprep.subr.mxu1 %v26195_v3 }
 0x480   : > { %v14361_v55 = vsel %vm26756_vm12, %v14342_v43, %v14344_v1  ;;  %v14362_v48 = vsel %vm26757_vm4, %v14344_v1, %v14346_v28  ;;  %20515 = vmatmul.mubr.msk.f32.vlgmr.msra.gmra.mrb[104].mxu1 %vm26758_vm1, %v24652_v19  ;;  %v14298_v28 = vsel %vm26761_vm6, %v24636_v40, %v24616_v21  ;;  %v14297_v1 = vsel %vm26762_vm10, %v24618_v52, %v24636_v40  ;;  %vm26765_vm12 = vmmov %vm26761_vm6  ;;  %v18972_v52 = vld [vmem:[%s25789_s4] sm:$0xf] }
 0x481   : > { %18459 = vrot.lane.b32.xlu0 %v24509_v42, %s21398_s27  ;;  %20510 = vmatprep.subr.msk.mxu0 %vm26749_vm9, %v14362_v48  ;;  %v14365_v48 = vsel %vm26764_vm14, %v14350_v16, %v14352_v0  ;;  %vm26766_vm4 = vmmov %vm26759_vm8  ;;  %v14320_v37 = vsel %vm26655_vm7, %v14298_v28, 0.0  ;;  %vm26768_vm9 = vnez %v26037_v26  ;;  %vm26771_vm10 = vnez %v26043_v34  ;;  %v25213_v26 = vld [vmem:[%s25788_s3 + $0x18] sm:$0xf] }
 0x482   : > { %18453 = vrot.lane.b32.xlu1 %v24576_v38, %s21398_s27  ;;  %20511 = vmatpush1.msk.msra.mxu0 %vm26759_vm8, %v14361_v55  ;;  %vm26767_vm1 = vmmov %vm26766_vm4  ;;  %v14319_v40 = vsel %vm26768_vm9, %v14297_v1, 0.0  ;;  %v24813_v1 = vld [vmem:[%s25788_s3] sm:$0xf] }
 0x483   : > { %v24761_v47 = vpop.permute.xlu0 %15842  ;;  %v14284_v14 = vpop.permute.xlu1 %14283  ;;  %20512 = vmatmul.mubr.msk.f32.vlgmr.msra.gmra.mrb[104].mxu0 %vm26760_vm11, %v24652_v19  ;;  %20949 = vmatprep.mubr.msk.f32.mxu1 %vm26132_vm5, %v26195_v3  ;;  %vm26769_vm8 = vmmov %vm26760_vm11 }
 0x484   : > { %14739 = vmatprep.mubr.f32.mxu0 %v26195_v3  ;;  %v14302_v42 = vsel %vm26765_vm12, %v14284_v14, %v24694_v63  ;;  %vm26770_vm11 = vmmov %vm26767_vm1 }
 0x485   : > { %18463 = vrot.lane.b32.xlu0 %v24586_v51, %s21398_s27  ;;  %v14324_v28 = vsel %vm26771_vm10, %v14302_v42, 0.0  ;;  %vm26773_vm14 = vmmov %vm26761_vm6 }
 0x486   : > { %18457 = vrot.lane.b32.xlu1 %v24584_v15, %s21398_s27  ;;  %vm26774_vm12 = vmmov %vm26767_vm1 }
 0x487   : > { %v14354_v43 = vpop.permute.xlu0 %14353  ;;  %v24775_v53 = vpop.permute.xlu1 %15301 }
 0x488   : > { %v14366_v55 = vsel %vm26763_vm13, %v14352_v0, %v14354_v43  ;;  %v14301_v0 = vsel %vm26761_vm6, %v24734_v41, %v14284_v14  ;;  %vm26772_vm13 = vmmov %vm26767_vm1 }
 0x489   : > { %18467 = vrot.lane.b32.xlu0 %v24596_v39, %s21398_s27  ;;  %20516 = vmatprep.subr.msk.mxu0 %vm26766_vm4, %v14366_v55  ;;  %vm26775_vm4 = vnez %v26047_v18 }
 0x48a   : > { %18461 = vrot.lane.b32.xlu1 %v24594_v45, %s21398_s27  ;;  %20517 = vmatpush1.msk.msra.mxu0 %vm26767_vm1, %v14365_v48  ;;  %v14323_v42 = vsel %vm26775_vm4, %v14301_v0, 0.0  ;;  %vm26776_vm1 = vmmov %vm26769_vm8 }
 0x48b   : > { %v24797_v16 = vpop.permute.xlu0 %14293  ;;  %20518 = vmatmul.mubr.msk.f32.vlgmr.msra.gmra.mrb[106].mxu0 %vm26769_vm8, %v24652_v19  ;;  %20521 = vmatprep.subr.msk.mxu0 %vm26770_vm11, %v14320_v37  ;;  %v24802_v39 = vpop.permute.xlu1 %15844  ;;  %vm26777_vm8 = vmmov %vm26761_vm6  ;;  %vm26778_vm11 = vnez %v26546_v29 }
 0x48c   : > { %20522 = vmatpush1.msk.msra.mxu0 %vm26772_vm13, %v14319_v40  ;;  %14915 = vmatprep.mubr.f32.mxu0 %v26195_v3  ;;  %v14306_v37 = vsel %vm26773_vm14, %v24716_v57, %v24797_v16  ;;  %v14305_v48 = vsel %vm26777_vm8, %v24700_v24, %v24716_v57  ;;  %vm26779_vm6 = vmmov %vm26774_vm12  ;;  %vm26780_vm13 = vcmask 121856  }
 0x48d   : > { %18975 = vperm.xlu0 %21198, %v18972_v52   ;;  %20527 = vmatprep.subr.msk.mxu0 %vm26774_vm12, %v14324_v28  ;;  %v14328_v52 = vsel %vm26778_vm11, %v14306_v37, 0.0  ;;  %v15316_v40 = vsel %vm26780_vm13, %v24647_v54, %v24624_v62  ;;  %vm26781_vm14 = vmmov %vm26779_vm6  ;;  %vm26793_vm11 = vnez %v26662_v27 }
 0x48e   : > { %18465 = vrot.lane.b32.xlu1 %v24604_v9, %s21398_s27  ;;  %vm26782_vm12 = vmmov %vm26777_vm8 }
 0x48f   : > { %v24823_v14 = vpop.permute.xlu0 %15311  ;;  %20523 = vmatmul.mubr.msk.f32.vlgmr.msra.gmra.mrb[102].mxu0 %vm26776_vm1, %v24813_v1  ;;  %v24827_v55 = vpop.permute.xlu1 %15848  ;;  %v14300_v0 = vsel %vm26782_vm12, %v24661_v35, %v24734_v41  ;;  %vm26783_vm1 = vmmov %vm26777_vm8  ;;  %vm26784_vm8 = vnez %v26674_v7  ;;  %v15315_v41 = vsel %vm26780_vm13, %v24626_v22, %v24647_v54  ;;  %vm26787_vm12 = vcmask 1043456  }
 0x490   : > { %20528 = vmatpush1.msk.msra.mxu0 %vm26779_vm6, %v14323_v42  ;;  %15056 = vmatprep.mubr.f32.mxu0 %v26195_v3  ;;  %v14299_v57 = vsel %vm26783_vm1, %v24616_v21, %v24661_v35  ;;  %v14327_v28 = vsel %vm26784_vm8, %v14305_v48, 0.0  ;;  %vm26785_vm6 = vcmask 31744   ;;  %vm26790_vm8 = vmmov %vm26780_vm13 }
 0x491   : > { %20533 = vmatprep.subr.msk.mxu0 %vm26781_vm14, %v14328_v52  ;;  %vm26786_vm14 = vmmov %vm26783_vm1  ;;  %vm26788_vm1 = vcmask 130048   ;;  %v15320_v22 = vsel %vm26790_vm8, %v24775_v53, %v24706_v56  ;;  %v14321_v54 = vsel %vm26793_vm11, %v14299_v57, 0.0  ;;  %vm26798_vm8 = vnez %v26024_v58 }
 0x492   : > { %18469 = vrot.lane.b32.xlu1 %v24614_v59, %s21398_s27  ;;  %v15338_v59 = vsel %vm26578_vm2, %v15316_v40, 0.0  ;;  %v14304_v21 = vsel %vm26786_vm14, %v24708_v32, %v24700_v24  ;;  %vm26791_vm13 = vmmov %vm26787_vm12  ;;  %vm26794_vm14 = vcmask 31744   ;;  %s25411_s27 = sld [smem:[#allocation3 + $0x181]] }
 0x493   : > { %v24850_v37 = vpop.permute.xlu0 %15846  ;;  %20529 = vmatmul.mubr.msk.f32.vlgmr.msra.gmra.mrb[108].mxu0 %vm26785_vm6, %v24813_v1  ;;  %v14356_v62 = vpop.permute.xlu1 %14355  ;;  %vm26789_vm6 = vnez %v26660_v17  ;;  %vm26792_vm2 = vmmov %vm26787_vm12  ;;  %v14326_v48 = vsel %vm26798_vm8, %v14304_v21, 0.0 }
 0x494   : > { %20534 = vmatpush1.msk.msra.mxu0 %vm26787_vm12, %v14327_v28  ;;  %v14367_v35 = vsel %vm26788_vm1, %v14354_v43, %v14356_v62  ;;  %15197 = vmatprep.mubr.f32.mxu0 %v26195_v3  ;;  %v14322_v42 = vsel %vm26789_vm6, %v14300_v0, 0.0  ;;  %vm26795_vm12 = vmmov %vm26792_vm2  ;;  %vm26796_vm1 = vnez %v26434_v8  ;;  %vm26797_vm6 = vcmask 138240  }
 0x495   : > { %20539 = vmatprep.subr.msk.mxu0 %vm26791_vm13, %v15338_v59  ;;  %20948 = vmatpush3.msk.msra.mxu1 %vm26792_vm2, %v14367_v35  ;;  %v15337_v24 = vsel %vm26796_vm1, %v15315_v41, 0.0  ;;  %v14303_v43 = vsel %vm26797_vm6, %v24694_v63, %v24708_v32  ;;  %vm26799_vm13 = vmmov %vm26794_vm14  ;;  %v15342_v0 = vsel %vm26700_vm3, %v15320_v22, 0.0  ;;  %v24899_v63 = vld [vmem:[%s25788_s3 + $0x8] sm:$0xf]  ;;  %vm26808_vm3 = vcmask 138240  }
 0x496   : > { %20950 = vmatmul.mubr.msk.f32.vlgmr.msra.gmra.mrb[106].mxu1 %vm26794_vm14, %v24652_v19  ;;  %20524 = vmatprep.subr.msk.mxu1 %vm26795_vm12, %v14322_v42  ;;  %vm26800_vm14 = vcmask 121856   ;;  %vm26801_vm12 = vmmov %vm26792_vm2  ;;  %v15881_v22 = vsel %vm26655_vm7, %v24667_v36, 0.0  ;;  %vm26825_vm7 = vcmask 31744  }
 0x497   : > { %v24884_v52 = vpop.permute.xlu0 %15850  ;;  %20525 = vmatpush1.msk.msra.mxu1 %vm26792_vm2, %v14321_v54  ;;  %20535 = vmatmul.mubr.msk.f32.vlgmr.msra.gmra.mrb[110].mxu0 %vm26799_vm13, %v24813_v1  ;;  %v14296_v19 = vpop.permute.xlu1 %14295  ;;  %v15319_v40 = vsel %vm26800_vm14, %v24748_v6, %v24775_v53  ;;  %vm26802_vm6 = vmmov %vm26792_vm2 }
 0x498   : > { %20540 = vmatpush1.msk.msra.mxu0 %vm26801_vm12, %v15337_v24  ;;  %20530 = vmatprep.subr.msk.mxu1 %vm26802_vm6, %v14326_v48  ;;  %vm26803_vm2 = vmmov %vm26800_vm14  ;;  %vm26805_vm14 = vnez %v26018_v50  ;;  %vm26806_vm12 = vcmask 31744   ;;  %v14307_v28 = vsel %vm26808_vm3, %v24797_v16, %v14296_v19  ;;  %v20628_v50 = vld [vmem:[%s25788_s3 + $0x1c] sm:$0xf] }
 0x499   : > { %v15324_v32 = vsel %vm26803_vm2, %v24736_v46, %v24823_v14  ;;  %vm26804_vm13 = vmmov %vm26802_vm6  ;;  %14986 = vmatprep.mubr.f32.mxu1 %v26195_v3  ;;  %v14325_v53 = vsel %vm26805_vm14, %v14303_v43, 0.0  ;;  %15450 = vmatprep.mubr.f32.mxu0 %v26195_v3  ;;  %vm26807_vm6 = vnez %v26445_v30 }
 0x49a   : > { %20545 = vmatprep.subr.msk.mxu0 %vm26804_vm13, %v15342_v0  ;;  %20526 = vmatmul.mubr.msk.f32.vlgmr.msra.gmra.mrb[108].mxu1 %vm26806_vm12, %v24813_v1  ;;  %v15341_v57 = vsel %vm26807_vm6, %v15319_v40, 0.0  ;;  %vm26809_vm1 = vmmov %vm26804_vm13  ;;  %vm26811_vm13 = vcmask 121856   ;;  %v15346_v35 = vsel %vm26595_vm0, %v15324_v32, 0.0 }
 0x49b   : > { %20531 = vmatpush1.msk.msra.mxu1 %vm26809_vm1, %v14325_v53  ;;  %v24916_v62 = vpop.permute.xlu0 %15854  ;;  %vm26810_vm2 = vmmov %vm26806_vm12  ;;  %v15314_v41 = vpop.permute.xlu1 %15313  ;;  %v15323_v59 = vsel %vm26811_vm13, %v24714_v20, %v24736_v46  ;;  %15126 = vmatprep.mubr.f32.mxu1 %v26195_v3 }
 0x49c   : > { %20541 = vmatmul.mubr.msk.f32.vlgmr.msra.gmra.mrb[102].mxu0 %vm26810_vm2, %v24899_v63  ;;  %vm26812_vm12 = vmmov %vm26811_vm13  ;;  %20952 = vmatprep.subr.mxu1 %v26195_v3  ;;  %vm26814_vm2 = vnez %v26071_v12  ;;  %vm26815_vm13 = vcmask 31744  }
 0x49d   : > { %v15318_v21 = vsel %vm26812_vm12, %v24673_v49, %v24748_v6  ;;  %vm26813_vm3 = vmmov %vm26809_vm1  ;;  %v14329_v16 = vsel %vm26814_vm2, %v14307_v28, 0.0  ;;  %15591 = vmatprep.mubr.f32.mxu0 %v26195_v3  ;;  %v15345_v49 = vsel %vm26596_vm15, %v15323_v59, 0.0  ;;  %vm26816_vm12 = vnez %v26583_v44  ;;  %v26840_v28 = vld [vmem:[#allocation25_spill] sm:$0xff] }
 0x49e   : > { %20546 = vmatpush1.msk.msra.mxu0 %vm26813_vm3, %v15341_v57  ;;  %20532 = vmatmul.mubr.msk.f32.vlgmr.msra.gmra.mrb[104].mxu1 %vm26815_vm13, %v24813_v1  ;;  %v15340_v46 = vsel %vm26816_vm12, %v15318_v21, 0.0  ;;  %vm26817_vm3 = vmmov %vm26809_vm1 }
 0x49f   : > { %20551 = vmatprep.subr.msk.mxu0 %vm26809_vm1, %v15346_v35  ;;  %20953 = vmatpush3.msk.msra.mxu1 %vm26817_vm3, %v14329_v16  ;;  %v24942_v6 = vpop.permute.xlu0 %16853  ;;  %vm26818_vm1 = vmmov %vm26815_vm13  ;;  %v15853_v42 = vpop.permute.xlu1 %15852  ;;  %vm26819_vm13 = vcmask 121856  }
 0x4a0   : > { %20547 = vmatmul.mubr.msk.f32.vlgmr.msra.gmra.mrb[112].mxu0 %vm26818_vm1, %v24899_v63  ;;  %v15322_v54 = vsel %vm26819_vm13, %v24722_v61, %v24714_v20  ;;  %vm26820_vm15 = vmmov %vm26817_vm3  ;;  %20954 = vmatprep.mubr.msk.f32.mxu1 %vm26132_vm5, %v26195_v3  ;;  %vm26824_vm1 = vnez %v26432_v31  ;;  %v15880_v20 = vsel %vm26768_vm9, %v24664_v13, 0.0 }
 0x4a1   : > { %20542 = vmatprep.subr.msk.mxu1 %vm26820_vm15, %v15340_v46  ;;  %vm26821_vm0 = vmmov %vm26817_vm3  ;;  %vm26822_vm3 = vcmask 7168   ;;  %v15339_v36 = vsel %vm26824_vm1, %v24678_v23, 0.0  ;;  %15732 = vmatprep.mubr.f32.mxu0 %v26195_v3 }
 0x4a2   : > { %20552 = vmatpush1.msk.msra.mxu0 %vm26821_vm0, %v15345_v49  ;;  %v15863_v24 = vsel %vm26822_vm3, %v24802_v39, %v24850_v37  ;;  %vm26823_vm12 = vmmov %vm26821_vm0  ;;  %20955 = vmatmul.mubr.msk.f32.vlgmr.msra.gmra.mrb[110].mxu1 %vm26825_vm7, %v24813_v1  ;;  %vm26827_vm0 = vnez %v26703_v33 }
 0x4a3   : > { %20557 = vmatprep.subr.msk.mxu0 %vm26823_vm12, %v15881_v22  ;;  %vm26826_vm15 = vmmov %vm26819_vm13  ;;  %v15344_v48 = vsel %vm26827_vm0, %v15322_v54, 0.0  ;;  %20543 = vmatpush1.msk.msra.mxu1 %vm26823_vm12, %v15339_v36  ;;  %v24975_v19 = vpop.permute.xlu0 %16851  ;;  %v15857_v23 = vpop.permute.xlu1 %15856  ;;  %v15885_v13 = vsel %vm26771_vm10, %v15863_v24, 0.0  ;;  %vm26836_vm10 = vcmask 31744   ;;  %v26855_v22 = vld [vmem:[#allocation21_spill] sm:$0xff]  ;;  %v26857_v54 = vld [vmem:[#allocation15_spill] sm:$0xff] }
 0x4a4   : > { %v15321_v43 = vsel %vm26826_vm15, %v24706_v56, %v24722_v61  ;;  %vm26828_vm13 = vmmov %vm26825_vm7  ;;  %v24989_v56 = vld [vmem:[%s25788_s3 + $0xc] sm:$0xf]  ;;  %15521 = vmatprep.mubr.f32.mxu1 %v26195_v3  ;;  %v15882_v24 = vsel %vm26793_vm11, %v26857_v54, 0.0 }
 0x4a5   : > { %20553 = vmatmul.mubr.msk.f32.vlgmr.msra.gmra.mrb[114].mxu0 %vm26828_vm13, %v24899_v63  ;;  %vm26829_vm7 = vmmov %vm26822_vm3 }
 0x4a6   : > { %v15862_v1 = vsel %vm26829_vm7, %v24761_v47, %v24802_v39  ;;  %vm26830_vm3 = vmmov %vm26823_vm12  ;;  %v26834_v39 = vld [vmem:[#allocation27_spill] sm:$0xff]  ;;  %20544 = vmatmul.mubr.msk.f32.vlgmr.msra.gmra.mrb[112].mxu1 %vm26836_vm10, %v24899_v63  ;;  %15993 = vmatprep.mubr.f32.mxu0 %v26195_v3 }
 0x4a7   : > { %20548 = vmatprep.subr.msk.mxu1 %vm26830_vm3, %v15344_v48  ;;  %vm26831_vm15 = vmmov %vm26830_vm3  ;;  %v15884_v0 = vsel %vm26775_vm4, %v15862_v1, 0.0  ;;  %v25005_v53 = vpop.permute.xlu0 %16859  ;;  %v25009_v57 = vpop.permute.xlu1 %16855  ;;  %15661 = vmatprep.mubr.f32.mxu1 %v26195_v3  ;;  %vm26848_vm4 = vcmask 31744  }
 0x4a8   : > { %20558 = vmatpush1.msk.msra.mxu0 %vm26831_vm15, %v15880_v20  ;;  %vm26832_vm12 = vmmov %vm26829_vm7  ;;  %vm26835_vm7 = vnez %v26834_v39 }
 0x4a9   : > { %v15867_v61 = vsel %vm26832_vm12, %v15853_v42, %v24916_v62  ;;  %vm26833_vm13 = vmmov %vm26830_vm3  ;;  %v15343_v40 = vsel %vm26835_vm7, %v15321_v43, 0.0  ;;  %vm26837_vm3 = vcmask 121856   ;;  %vm26843_vm7 = vnez %v26546_v29 }
 0x4aa   : > { %20563 = vmatprep.subr.msk.mxu0 %vm26833_vm13, %v15885_v13  ;;  %v15325_v32 = vsel %vm26837_vm3, %v24823_v14, %v15314_v41  ;;  %vm26838_vm15 = vmmov %vm26833_vm13  ;;  %v15889_v35 = vsel %vm26843_vm7, %v15867_v61, 0.0  ;;  %v26846_v14 = vld [vmem:[#allocation28_spill] sm:$0xff] }
 0x4ab   : > { %20549 = vmatpush1.msk.msra.mxu1 %vm26838_vm15, %v15343_v40  ;;  %vm26839_vm12 = vmmov %vm26836_vm10  ;;  %vm26841_vm10 = vcmask 7168   ;;  %v25032_v49 = vpop.permute.xlu0 %16863  ;;  %v25036_v46 = vpop.permute.xlu1 %16857  ;;  %v25140_v40 = vld [vmem:[%s25788_s3 + $0x14] sm:$0xf] }
 0x4ac   : > { %20559 = vmatmul.mubr.msk.f32.vlgmr.msra.gmra.mrb[102].mxu0 %vm26839_vm12, %v24989_v56  ;;  %v15861_v59 = vsel %vm26841_vm10, %v26840_v28, %v24761_v47  ;;  %vm26842_vm13 = vmmov %vm26841_vm10  ;;  %20957 = vmatprep.subr.mxu1 %v26195_v3  ;;  %vm26847_vm12 = vnez %v26846_v14  ;;  %vm26849_vm10 = vnez %v26660_v17 }
 0x4ad   : > { %v15866_v21 = vsel %vm26842_vm13, %v24884_v52, %v15853_v42  ;;  %vm26844_vm3 = vmmov %vm26838_vm15  ;;  %v15347_v41 = vsel %vm26847_vm12, %v15325_v32, 0.0  ;;  %20550 = vmatmul.mubr.msk.f32.vlgmr.msra.gmra.mrb[104].mxu1 %vm26848_vm4, %v24899_v63  ;;  %16134 = vmatprep.mubr.f32.mxu0 %v26195_v3  ;;  %v15883_v47 = vsel %vm26849_vm10, %v15861_v59, 0.0  ;;  %vm26850_vm13 = vnez %v26674_v7  ;;  %v26891_v32 = vld [vmem:[#allocation23_spill] sm:$0xff] }
 0x4ae   : > { %20564 = vmatpush1.msk.msra.mxu0 %vm26844_vm3, %v15884_v0  ;;  %vm26845_vm15 = vmmov %vm26844_vm3  ;;  %v15888_v16 = vsel %vm26850_vm13, %v15866_v21, 0.0  ;;  %20958 = vmatpush3.msk.msra.mxu1 %vm26844_vm3, %v15347_v41 }
 0x4af   : > { %20569 = vmatprep.subr.msk.mxu0 %vm26845_vm15, %v15889_v35  ;;  %vm26851_vm15 = vmmov %vm26848_vm4  ;;  %vm26852_vm4 = vcmask 7168   ;;  %20959 = vmatprep.mubr.msk.f32.mxu1 %vm26132_vm5, %v26195_v3  ;;  %v25059_v20 = vpop.permute.xlu0 %16867  ;;  %v16862_v43 = vpop.permute.xlu1 %16861 }
 0x4b0   : > { %20565 = vmatmul.mubr.msk.f32.vlgmr.msra.gmra.mrb[116].mxu0 %vm26851_vm15, %v24989_v56  ;;  %v15865_v42 = vsel %vm26852_vm4, %v24827_v55, %v24884_v52  ;;  %vm26853_vm7 = vmmov %vm26844_vm3 }
 0x4b1   : > { %20560 = vmatprep.subr.msk.mxu1 %vm26853_vm7, %v15883_v47  ;;  %vm26854_vm12 = vmmov %vm26844_vm3  ;;  %16275 = vmatprep.mubr.f32.mxu0 %v26195_v3  ;;  %v15887_v36 = vsel %vm26798_vm8, %v15865_v42, 0.0 }
 0x4b2   : > { %20570 = vmatpush1.msk.msra.mxu0 %vm26854_vm12, %v15888_v16  ;;  %vm26856_vm10 = vmmov %vm26844_vm3 }
 0x4b3   : > { %20575 = vmatprep.subr.msk.mxu0 %vm26856_vm10, %v26855_v22  ;;  %vm26858_vm3 = vmmov %vm26851_vm15 }
 0x4b4   : > { %20960 = vmatmul.mubr.msk.f32.vlgmr.msra.gmra.mrb[114].mxu1 %vm26858_vm3, %v24899_v63  ;;  %vm26859_vm7 = vmmov %vm26852_vm4  ;;  %v25082_v63 = vpop.permute.xlu0 %16871 }
 0x4b5   : > { %v15864_v52 = vsel %vm26859_vm7, %v24850_v37, %v24827_v55  ;;  %vm26860_vm12 = vmmov %vm26856_vm10  ;;  %v25069_v55 = vld [vmem:[%s25788_s3 + $0x10] sm:$0xf]  ;;  %16064 = vmatprep.mubr.f32.mxu1 %v26195_v3 }
 0x4b6   : > { %20561 = vmatpush1.msk.msra.mxu1 %vm26860_vm12, %v15882_v24  ;;  %vm26861_vm10 = vmmov %vm26858_vm3  ;;  %v15886_v37 = vsel %vm26805_vm14, %v15864_v52, 0.0 }
 0x4b7   : > { %20571 = vmatmul.mubr.msk.f32.vlgmr.msra.gmra.mrb[118].mxu0 %vm26861_vm10, %v24989_v56  ;;  %vm26862_vm15 = vmmov %vm26860_vm12 }
 0x4b8   : > { %20566 = vmatprep.subr.msk.mxu1 %vm26862_vm15, %v15887_v36  ;;  %vm26863_vm4 = vmmov %vm26860_vm12  ;;  %16467 = vmatprep.mubr.f32.mxu0 %v26195_v3  ;;  %vm26866_vm12 = vcmask 7168  }
 0x4b9   : > { %20576 = vmatpush1.msk.msra.mxu0 %vm26863_vm4, %v24501_v60  ;;  %vm26864_vm3 = vmmov %vm26863_vm4  ;;  %v15868_v60 = vsel %vm26866_vm12, %v24916_v62, %v15857_v23 }
 0x4ba   : > { %20581 = vmatprep.subr.msk.mxu0 %vm26864_vm3, %v24584_v15  ;;  %vm26865_vm7 = vmmov %vm26861_vm10  ;;  %v25086_v15 = vpop.permute.xlu1 %16865  ;;  %v15890_v62 = vsel %vm26814_vm2, %v15868_v60, 0.0 }
 0x4bb   : > { %20562 = vmatmul.mubr.msk.f32.vlgmr.msra.gmra.mrb[116].mxu1 %vm26865_vm7, %v24989_v56  ;;  %vm26867_vm10 = vmmov %vm26864_vm3 }
 0x4bc   : > { %20567 = vmatpush1.msk.msra.mxu1 %vm26867_vm10, %v15886_v37  ;;  %vm26868_vm15 = vmmov %vm26865_vm7  ;;  %16204 = vmatprep.mubr.f32.mxu1 %v26195_v3 }
 0x4bd   : > { %20577 = vmatmul.mubr.msk.f32.vlgmr.msra.gmra.mrb[102].mxu0 %vm26868_vm15, %v25069_v55  ;;  %vm26869_vm4 = vmmov %vm26864_vm3  ;;  %vm26870_vm3 = vcmask 1039360   ;;  %20962 = vmatprep.subr.mxu1 %v26195_v3 }
 0x4be   : > { %20582 = vmatpush1.msk.msra.mxu0 %vm26869_vm4, %v24566_v11  ;;  %v16876_v48 = vsel %vm26870_vm3, %v24942_v6, %v25009_v57  ;;  %vm26871_vm7 = vmmov %vm26869_vm4  ;;  %16608 = vmatprep.mubr.f32.mxu0 %v26195_v3  ;;  %v17397_v11 = vpop.permute.xlu0 %17396  ;;  %v16870_v23 = vpop.permute.xlu1 %16869 }
 0x4bf   : > { %20587 = vmatprep.subr.msk.mxu0 %vm26871_vm7, %v24604_v9  ;;  %vm26872_vm12 = vmmov %vm26868_vm15 }
 0x4c0   : > { %20568 = vmatmul.mubr.msk.f32.vlgmr.msra.gmra.mrb[104].mxu1 %vm26872_vm12, %v24989_v56  ;;  %vm26873_vm10 = vmmov %vm26869_vm4 }
 0x4c1   : > { %20963 = vmatpush3.msk.msra.mxu1 %vm26873_vm10, %v15890_v62  ;;  %vm26874_vm15 = vmmov %vm26872_vm12  ;;  %20964 = vmatprep.mubr.msk.f32.mxu1 %vm26132_vm5, %v26195_v3 }
 0x4c2   : > { %20583 = vmatmul.mubr.msk.f32.vlgmr.msra.gmra.mrb[120].mxu0 %vm26874_vm15, %v25069_v55  ;;  %vm26875_vm4 = vmmov %vm26870_vm3  ;;  %vm26876_vm3 = vnez %v26151_v5  ;;  %20578 = vmatprep.subr.msk.mxu1 %vm26871_vm7, %v24576_v38  ;;  %v26881_v38 = vld [vmem:[#allocation24_spill] sm:$0xff] }
 0x4c3   : > { %v16875_v9 = vsel %vm26875_vm4, %v24975_v19, %v24942_v6  ;;  %v16898_v1 = vsel %vm26876_vm3, %v16876_v48, 0.0  ;;  %vm26877_vm12 = vmmov %vm26871_vm7  ;;  %16749 = vmatprep.mubr.f32.mxu0 %v26195_v3  ;;  %v25128_v19 = vpop.permute.xlu1 %16873 }
 0x4c4   : > { %20588 = vmatpush1.msk.msra.mxu0 %vm26877_vm12, %v24586_v51  ;;  %vm26878_vm10 = vmmov %vm26875_vm4  ;;  %20965 = vmatmul.mubr.msk.f32.vlgmr.msra.gmra.mrb[118].mxu1 %vm26874_vm15, %v24989_v56  ;;  %vm26880_vm4 = vnez %v26434_v8  ;;  %v17395_v51 = vpop.permute.xlu0 %17394 }
 0x4c5   : > { %v16880_v13 = vsel %vm26878_vm10, %v16862_v43, %v25032_v49  ;;  %vm26879_vm2 = vmmov %vm26871_vm7  ;;  %v16897_v6 = vsel %vm26880_vm4, %v16875_v9, 0.0  ;;  %16538 = vmatprep.mubr.f32.mxu1 %v26195_v3 }
 0x4c6   : > { %20593 = vmatprep.subr.msk.mxu0 %vm26879_vm2, %v16898_v1  ;;  %vm26882_vm7 = vmmov %vm26879_vm2 }
 0x4c7   : > { %20579 = vmatpush1.msk.msra.mxu1 %vm26882_vm7, %v26881_v38  ;;  %vm26883_vm12 = vmmov %vm26874_vm15  ;;  %v17399_v59 = vpop.permute.xlu1 %17398 }
 0x4c8   : > { %20589 = vmatmul.mubr.msk.f32.vlgmr.msra.gmra.mrb[122].mxu0 %vm26883_vm12, %v25069_v55  ;;  %vm26884_vm2 = vmmov %vm26878_vm10  ;;  %vm26885_vm10 = vnez %v26438_v10  ;;  %v17403_v28 = vpop.permute.xlu0 %17402 }
 0x4c9   : > { %v16879_v61 = vsel %vm26884_vm2, %v25005_v53, %v16862_v43  ;;  %v16902_v56 = vsel %vm26885_vm10, %v16880_v13, 0.0  ;;  %vm26886_vm15 = vmmov %vm26882_vm7  ;;  %17010 = vmatprep.mubr.f32.mxu0 %v26195_v3 }
 0x4ca   : > { %20584 = vmatprep.subr.msk.mxu1 %vm26886_vm15, %v24594_v45  ;;  %vm26887_vm3 = vmmov %vm26882_vm7  ;;  %v16901_v45 = vsel %vm26807_vm6, %v16879_v61, 0.0 }
 0x4cb   : > { %20594 = vmatpush1.msk.msra.mxu0 %vm26887_vm3, %v16897_v6  ;;  %vm26888_vm7 = vmmov %vm26884_vm2  ;;  %vm26890_vm2 = vcmask 31744   ;;  %v17401_v24 = vpop.permute.xlu1 %17400 }
 0x4cc   : > { %v16884_v0 = vsel %vm26888_vm7, %v16870_v23, %v25082_v63  ;;  %vm26889_vm12 = vmmov %vm26887_vm3  ;;  %20580 = vmatmul.mubr.msk.f32.vlgmr.msra.gmra.mrb[120].mxu1 %vm26890_vm2, %v25069_v55  ;;  %v16878_v21 = vsel %vm26888_vm7, %v25036_v46, %v25005_v53  ;;  %v16364_v53 = vld [vmem:[#allocation2 + $0x2c] sm:$0xf]  ;;  %v16877_v16 = vsel %vm26888_vm7, %v25009_v57, %v25036_v46  ;;  %v17407_v54 = vpop.permute.xlu0 %17406 }
 0x4cd   : > { %20599 = vmatprep.subr.msk.mxu0 %vm26889_vm12, %v16902_v56  ;;  %20585 = vmatpush1.msk.msra.mxu1 %vm26887_vm3, %v26891_v32  ;;  %vm26892_vm15 = vmmov %vm26890_vm2  ;;  %vm26894_vm2 = vnez %v26198_v4  ;;  %v16899_v46 = vsel %vm26824_vm1, %v16877_v16, 0.0 }
 0x4ce   : > { %20595 = vmatmul.mubr.msk.f32.vlgmr.msra.gmra.mrb[102].mxu0 %vm26892_vm15, %v25140_v40  ;;  %vm26893_vm12 = vmmov %vm26888_vm7  ;;  %v16906_v41 = vsel %vm26894_vm2, %v16884_v0, 0.0  ;;  %16678 = vmatprep.mubr.f32.mxu1 %v26195_v3  ;;  %vm26903_vm2 = vcmask 924672  }
 0x4cf   : > { %v16883_v35 = vsel %vm26893_vm12, %v25059_v20, %v16870_v23  ;;  %vm26895_vm10 = vmmov %vm26887_vm3  ;;  %vm26896_vm3 = vcmask 924672   ;;  %20967 = vmatprep.subr.mxu1 %v26195_v3  ;;  %17151 = vmatprep.mubr.f32.mxu0 %v26195_v3  ;;  %vm26899_vm12 = vnez %v26200_v2  ;;  %v17418_v36 = vsel %vm26903_vm2, %v17395_v51, %v17397_v11  ;;  %v17405_v60 = vpop.permute.xlu1 %17404 }
 0x4d0   : > { %20600 = vmatpush1.msk.msra.mxu0 %vm26895_vm10, %v16901_v45  ;;  %v17419_v47 = vsel %vm26896_vm3, %v17397_v11, %v17399_v59  ;;  %vm26897_vm6 = vmmov %vm26895_vm10  ;;  %20586 = vmatmul.mubr.msk.f32.vlgmr.msra.gmra.mrb[104].mxu1 %vm26892_vm15, %v25069_v55  ;;  %vm26898_vm10 = vnez %v26583_v44  ;;  %v16905_v22 = vsel %vm26899_vm12, %v16883_v35, 0.0  ;;  %v17440_v43 = vsel %vm26768_vm9, %v17418_v36, 0.0  ;;  %v17411_v37 = vpop.permute.xlu0 %17410 }
 0x4d1   : > { %20605 = vmatprep.subr.msk.mxu0 %vm26897_vm6, %v16906_v41  ;;  %v16900_v42 = vsel %vm26898_vm10, %v16878_v21, 0.0  ;;  %vm26900_vm3 = vmmov %vm26897_vm6  ;;  %20969 = vmatprep.mubr.msk.f32.mxu1 %vm26132_vm5, %v26195_v3  ;;  %vm26915_vm9 = vnez %v26047_v18 }
 0x4d2   : > { %20968 = vmatpush3.msk.msra.mxu1 %vm26900_vm3, %v16364_v53  ;;  %vm26901_vm6 = vmmov %vm26892_vm15 }
 0x4d3   : > { %20601 = vmatmul.mubr.msk.f32.vlgmr.msra.gmra.mrb[124].mxu0 %vm26901_vm6, %v25140_v40  ;;  %vm26902_vm15 = vmmov %vm26888_vm7  ;;  %vm26904_vm7 = vnez %v26034_v25  ;;  %v17409_v11 = vpop.permute.xlu1 %17408 }
 0x4d4   : > { %v16882_v52 = vsel %vm26902_vm15, %v25086_v15, %v25059_v20  ;;  %v17441_v57 = vsel %vm26904_vm7, %v17419_v47, 0.0  ;;  %vm26905_vm10 = vmmov %vm26900_vm3  ;;  %17292 = vmatprep.mubr.f32.mxu0 %v26195_v3 }
 0x4d5   : > { %20596 = vmatprep.subr.msk.mxu1 %vm26905_vm10, %v16900_v42  ;;  %vm26906_vm4 = vmmov %vm26900_vm3  ;;  %v16904_v20 = vsel %vm26827_vm0, %v16882_v52, 0.0 }
 0x4d6   : > { %20606 = vmatpush1.msk.msra.mxu0 %vm26906_vm4, %v16905_v22  ;;  %vm26907_vm12 = vmmov %vm26900_vm3 }
 0x4d7   : > { %20611 = vmatprep.subr.msk.mxu0 %vm26907_vm12, %v17441_v57  ;;  %vm26908_vm3 = vmmov %vm26901_vm6  ;;  %v17413_v6 = vpop.permute.xlu1 %17412 }
 0x4d8   : > { %20970 = vmatmul.mubr.msk.f32.vlgmr.msra.gmra.mrb[122].mxu1 %vm26908_vm3, %v25069_v55  ;;  %vm26909_vm2 = vmmov %vm26902_vm15  ;;  %vm26913_vm15 = vcmask 924672  }
 0x4d9   : > { %v16881_v25 = vsel %vm26909_vm2, %v25032_v49, %v25086_v15  ;;  %20597 = vmatpush1.msk.msra.mxu1 %vm26906_vm4, %v16899_v46  ;;  %vm26910_vm10 = vmmov %vm26908_vm3  ;;  %v17422_v55 = vsel %vm26913_vm15, %v17403_v28, %v17405_v60  ;;  %vm26916_vm3 = vnez %v26043_v34  ;;  %17081 = vmatprep.mubr.f32.mxu1 %v26195_v3  ;;  %vm26917_vm2 = vnez %v26834_v39  ;;  %v17415_v34 = vpop.permute.xlu0 %17414 }
 0x4da   : > { %20607 = vmatmul.mubr.msk.f32.vlgmr.msra.gmra.mrb[126].mxu0 %vm26910_vm10, %v25140_v40  ;;  %vm26911_vm12 = vmmov %vm26906_vm4  ;;  %v17444_v15 = vsel %vm26915_vm9, %v17422_v55, 0.0  ;;  %v16903_v62 = vsel %vm26917_vm2, %v16881_v25, 0.0 }
 0x4db   : > { %20602 = vmatprep.subr.msk.mxu1 %vm26911_vm12, %v16904_v20  ;;  %vm26912_vm6 = vmmov %vm26906_vm4  ;;  %17553 = vmatprep.mubr.f32.mxu0 %v26195_v3  ;;  %vm26920_vm12 = vcmask 1039360  }
 0x4dc   : > { %20612 = vmatpush1.msk.msra.mxu0 %vm26912_vm6, %v17440_v43  ;;  %vm26914_vm7 = vmmov %vm26913_vm15  ;;  %v16885_v18 = vsel %vm26920_vm12, %v25082_v63, %v25128_v19  ;;  %vm26925_vm12 = vnez %v26660_v17 }
 0x4dd   : > { %v17423_v49 = vsel %vm26914_vm7, %v17405_v60, %v17407_v54  ;;  %vm26918_vm4 = vmmov %vm26910_vm10  ;;  %v17421_v23 = vsel %vm26914_vm7, %v17401_v24, %v17403_v28  ;;  %v17942_v13 = vpop.permute.xlu0 %17941  ;;  %v17425_v38 = vsel %vm26914_vm7, %v17409_v11, %v17411_v37 }
 0x4de   : > { %v17445_v48 = vsel %vm26916_vm3, %v17423_v49, 0.0  ;;  %20598 = vmatmul.mubr.msk.f32.vlgmr.msra.gmra.mrb[124].mxu1 %vm26918_vm4, %v25140_v40  ;;  %vm26919_vm10 = vmmov %vm26912_vm6  ;;  %vm26923_vm3 = vnez %v26846_v14  ;;  %v17443_v1 = vsel %vm26925_vm12, %v17421_v23, 0.0  ;;  %v17447_v45 = vsel %vm26798_vm8, %v17425_v38, 0.0 }
 0x4df   : > { %20617 = vmatprep.subr.msk.mxu0 %vm26919_vm10, %v17445_v48  ;;  %20603 = vmatpush1.msk.msra.mxu1 %vm26912_vm6, %v16903_v62  ;;  %vm26921_vm15 = vmmov %vm26918_vm4  ;;  %v16907_v63 = vsel %vm26923_vm3, %v16885_v18, 0.0  ;;  %v20646_v62 = vld [vmem:[%s25788_s3 + $0x20] sm:$0xf] }
 0x4e0   : > { %20613 = vmatmul.mubr.msk.f32.vlgmr.msra.gmra.mrb[102].mxu0 %vm26921_vm15, %v25213_v26  ;;  %vm26922_vm9 = vmmov %vm26912_vm6  ;;  %17221 = vmatprep.mubr.f32.mxu1 %v26195_v3 }
 0x4e1   : > { %20618 = vmatpush1.msk.msra.mxu0 %vm26922_vm9, %v17444_v15  ;;  %20972 = vmatprep.subr.mxu1 %v26195_v3  ;;  %vm26924_vm10 = vmmov %vm26914_vm7  ;;  %v17940_v7 = vpop.permute.xlu0 %17939 }
 0x4e2   : > { %17694 = vmatprep.mubr.f32.mxu0 %v26195_v3  ;;  %20604 = vmatmul.mubr.msk.f32.vlgmr.msra.gmra.mrb[104].mxu1 %vm26918_vm4, %v25140_v40  ;;  %v17420_v9 = vsel %vm26924_vm10, %v17399_v59, %v17401_v24  ;;  %vm26926_vm15 = vmmov %vm26918_vm4  ;;  %vm26930_vm4 = vnez %v26546_v29  ;;  %v17417_v29 = vpop.permute.xlu1 %17416 }
 0x4e3   : > { %20973 = vmatpush3.msk.msra.mxu1 %vm26912_vm6, %v16907_v63  ;;  %vm26927_vm9 = vmmov %vm26912_vm6  ;;  %20974 = vmatprep.mubr.msk.f32.mxu1 %vm26132_vm5, %v26195_v3  ;;  %v17442_v56 = vsel %vm26793_vm11, %v17420_v9, 0.0 }
 0x4e4   : > { %20619 = vmatmul.mubr.msk.f32.vlgmr.msra.gmra.mrb[128].mxu0 %vm26926_vm15, %v25213_v26  ;;  %20614 = vmatprep.subr.msk.mxu1 %vm26927_vm9, %v17443_v1  ;;  %vm26928_vm3 = vmmov %vm26914_vm7  ;;  %vm26940_vm9 = vcmask 916480  }
 0x4e5   : > { %v17426_v51 = vsel %vm26928_vm3, %v17411_v37, %v17413_v6  ;;  %vm26929_vm0 = vmmov %vm26928_vm3  ;;  %17835 = vmatprep.mubr.f32.mxu0 %v26195_v3 }
 0x4e6   : > { %v17427_v19 = vsel %vm26929_vm0, %v17413_v6, %v17415_v34  ;;  %v17448_v17 = vsel %vm26850_vm13, %v17426_v51, 0.0  ;;  %vm26931_vm10 = vmmov %vm26926_vm15  ;;  %v17424_v0 = vsel %vm26929_vm0, %v17407_v54, %v17409_v11  ;;  %v17944_v32 = vpop.permute.xlu1 %17943 }
 0x4e7   : > { %v17449_v61 = vsel %vm26930_vm4, %v17427_v19, 0.0  ;;  %20975 = vmatmul.mubr.msk.f32.vlgmr.msra.gmra.mrb[126].mxu1 %vm26931_vm10, %v25140_v40  ;;  %vm26932_vm3 = vmmov %vm26912_vm6  ;;  %v17446_v27 = vsel %vm26805_vm14, %v17424_v0, 0.0  ;;  %v17948_v40 = vpop.permute.xlu0 %17947  ;;  %v17964_v28 = vsel %vm26940_vm9, %v17942_v13, %v17944_v32  ;;  %vm26943_vm14 = vnez %v26071_v12 }
 0x4e8   : > { %20623 = vmatprep.subr.msk.mxu0 %vm26932_vm3, %v17449_v61  ;;  %vm26933_vm12 = vmmov %vm26932_vm3  ;;  %17624 = vmatprep.mubr.f32.mxu1 %v26195_v3 }
 0x4e9   : > { %20615 = vmatpush1.msk.msra.mxu1 %vm26933_vm12, %v17442_v56  ;;  %vm26934_vm13 = vmmov %vm26932_vm3 }
 0x4ea   : > { %20624 = vmatpush1.msk.msra.mxu0 %vm26934_vm13, %v17448_v17  ;;  %vm26935_vm6 = vmmov %vm26932_vm3  ;;  %v17946_v41 = vpop.permute.xlu1 %17945 }
 0x4eb   : > { %20620 = vmatprep.subr.msk.mxu1 %vm26935_vm6, %v17447_v45  ;;  %vm26936_vm11 = vmmov %vm26931_vm10  ;;  %v17952_v35 = vpop.permute.xlu0 %17951 }
 0x4ec   : > { %20625 = vmatmul.mubr.msk.f32.vlgmr.msra.gmra.mrb[130].mxu0 %vm26936_vm11, %v25213_v26  ;;  %vm26937_vm8 = vmmov %vm26931_vm10 }
 0x4ed   : > { %18063 = vmatprep.mubr.f32.mxu0 %v26195_v3  ;;  %20616 = vmatmul.mubr.msk.f32.vlgmr.msra.gmra.mrb[128].mxu1 %vm26937_vm8, %v25213_v26  ;;  %vm26938_vm15 = vmmov %vm26929_vm0 }
 0x4ee   : > { %v17428_v58 = vsel %vm26938_vm15, %v17415_v34, %v17417_v29  ;;  %vm26939_vm7 = vmmov %vm26932_vm3  ;;  %17764 = vmatprep.mubr.f32.mxu1 %v26195_v3  ;;  %v17950_v16 = vpop.permute.xlu1 %17949 }
 0x4ef   : > { %20621 = vmatpush1.msk.msra.mxu1 %vm26939_vm7, %v17446_v27  ;;  %vm26941_vm4 = vmmov %vm26940_vm9  ;;  %v17450_v21 = vsel %vm26943_vm14, %v17428_v58, 0.0  ;;  %v17956_v12 = vpop.permute.xlu0 %17955 }
 0x4f0   : > { %20977 = vmatprep.subr.mxu1 %v26195_v3  ;;  %v17963_v59 = vsel %vm26941_vm4, %v17940_v7, %v17942_v13  ;;  %vm26942_vm10 = vmmov %vm26932_vm3  ;;  %v17968_v22 = vsel %vm26941_vm4, %v17950_v16, %v17952_v35 }
 0x4f1   : > { %20629 = vmatprep.subr.msk.mxu0 %vm26942_vm10, %v17964_v28  ;;  %vm26944_vm3 = vmmov %vm26937_vm8 }
 0x4f2   : > { %20622 = vmatmul.mubr.msk.f32.vlgmr.msra.gmra.mrb[104].mxu1 %vm26944_vm3, %v25213_v26  ;;  %vm26945_vm0 = vmmov %vm26935_vm6  ;;  %v17954_v24 = vpop.permute.xlu1 %17953 }
 0x4f3   : > { %20630 = vmatpush1.msk.msra.mxu0 %vm26945_vm0, %v17963_v59  ;;  %vm26946_vm12 = vmmov %vm26945_vm0  ;;  %20979 = vmatprep.mubr.msk.f32.mxu1 %vm26132_vm5, %v26195_v3  ;;  %v17960_v54 = vpop.permute.xlu0 %17959 }
 0x4f4   : > { %20978 = vmatpush3.msk.msra.mxu1 %vm26946_vm12, %v17450_v21  ;;  %vm26947_vm13 = vmmov %vm26941_vm4 }
 0x4f5   : > { %v17965_v47 = vsel %vm26947_vm13, %v17944_v32, %v17946_v41  ;;  %vm26948_vm6 = vmmov %vm26941_vm4 }
 0x4f6   : > { %v17966_v53 = vsel %vm26948_vm6, %v17946_v41, %v17948_v40  ;;  %vm26949_vm11 = vmmov %vm26944_vm3  ;;  %v17958_v46 = vpop.permute.xlu1 %17957 }
 0x4f7   : > { %20631 = vmatmul.mubr.msk.f32.vlgmr.msra.gmra.mrb[102].mxu0 %vm26949_vm11, %v20628_v50  ;;  %vm26950_vm8 = vmmov %vm26945_vm0  ;;  %v18450_v57 = vpop.permute.xlu0 %18449 }
 0x4f8   : > { %20632 = vmatprep.subr.msk.mxu1 %vm26950_vm8, %v17966_v53  ;;  %18204 = vmatprep.mubr.f32.mxu0 %v26195_v3  ;;  %vm26951_vm15 = vmmov %vm26944_vm3 }
 0x4f9   : > { %20980 = vmatmul.mubr.msk.f32.vlgmr.msra.gmra.mrb[130].mxu1 %vm26951_vm15, %v25213_v26  ;;  %vm26952_vm7 = vmmov %vm26945_vm0 }
 0x4fa   : > { %20633 = vmatpush1.msk.msra.mxu1 %vm26952_vm7, %v17965_v47  ;;  %18134 = vmatprep.mubr.f32.mxu1 %v26195_v3  ;;  %vm26953_vm9 = vmmov %vm26941_vm4  ;;  %v17962_v37 = vpop.permute.xlu1 %17961 }
 0x4fb   : > { %v17967_v42 = vsel %vm26953_vm9, %v17948_v40, %v17950_v16  ;;  %vm26954_vm10 = vmmov %vm26945_vm0  ;;  %v18448_v43 = vpop.permute.xlu0 %18447 }
 0x4fc   : > { %20635 = vmatprep.subr.msk.mxu0 %vm26954_vm10, %v17968_v22  ;;  %vm26955_vm14 = vmmov %vm26944_vm3 }
 0x4fd   : > { %20634 = vmatmul.mubr.msk.f32.vlgmr.msra.gmra.mrb[132].mxu1 %vm26955_vm14, %v20628_v50  ;;  %vm26956_vm3 = vmmov %vm26945_vm0 }
 0x4fe   : > { %20636 = vmatpush1.msk.msra.mxu0 %vm26956_vm3, %v17967_v42  ;;  %vm26957_vm0 = vmmov %vm26949_vm11  ;;  %18274 = vmatprep.mubr.f32.mxu1 %v26195_v3  ;;  %v18452_v26 = vpop.permute.xlu1 %18451 }
 0x4ff   : > { %20637 = vmatmul.mubr.msk.f32.vlgmr.msra.gmra.mrb[132].mxu0 %vm26957_vm0, %v20628_v50  ;;  %vm26958_vm12 = vmmov %vm26941_vm4  ;;  %v18456_v55 = vpop.permute.xlu0 %18455 }
 0x500   : > { %v17969_v52 = vsel %vm26958_vm12, %v17952_v35, %v17954_v24  ;;  %vm26959_vm13 = vmmov %vm26941_vm4  ;;  %18345 = vmatprep.mubr.f32.mxu0 %v26195_v3  ;;  %vm26969_vm12 = vcmask 908288  }
 0x501   : > { %v17970_v36 = vsel %vm26959_vm13, %v17954_v24, %v17956_v12  ;;  %vm26960_vm6 = vmmov %vm26956_vm3  ;;  %v18471_v49 = vsel %vm26969_vm12, %v18448_v43, %v18450_v57 }
 0x502   : > { %20638 = vmatprep.subr.msk.mxu1 %vm26960_vm6, %v17970_v36  ;;  %vm26961_vm11 = vmmov %vm26956_vm3  ;;  %vm26971_vm6 = vnez %v26151_v5  ;;  %v18454_v11 = vpop.permute.xlu1 %18453 }
 0x503   : > { %20639 = vmatpush1.msk.msra.mxu1 %vm26961_vm11, %v17969_v52  ;;  %vm26962_vm8 = vmmov %vm26957_vm0  ;;  %vm26972_vm11 = vnez %v26434_v8  ;;  %v18460_v34 = vpop.permute.xlu0 %18459 }
 0x504   : > { %20640 = vmatmul.mubr.msk.f32.vlgmr.msra.gmra.mrb[104].mxu1 %vm26962_vm8, %v20628_v50  ;;  %20982 = vmatprep.subr.mxu1 %v26195_v3  ;;  %vm26963_vm15 = vmmov %vm26941_vm4  ;;  %v18493_v18 = vsel %vm26972_vm11, %v18471_v49, 0.0 }
 0x505   : > { %v17971_v25 = vsel %vm26963_vm15, %v17956_v12, %v17958_v46  ;;  %vm26964_vm7 = vmmov %vm26941_vm4  ;;  %20984 = vmatprep.mubr.msk.f32.mxu1 %vm26132_vm5, %v26195_v3 }
 0x506   : > { %v17972_v20 = vsel %vm26964_vm7, %v17958_v46, %v17960_v54  ;;  %vm26965_vm9 = vmmov %vm26956_vm3  ;;  %v18458_v8 = vpop.permute.xlu1 %18457 }
 0x507   : > { %20641 = vmatprep.subr.msk.mxu0 %vm26965_vm9, %v17972_v20  ;;  %vm26966_vm4 = vmmov %vm26956_vm3  ;;  %v18464_v6 = vpop.permute.xlu0 %18463 }
 0x508   : > { %20642 = vmatpush1.msk.msra.mxu0 %vm26966_vm4, %v17971_v25  ;;  %vm26967_vm10 = vmmov %vm26957_vm0 }
 0x509   : > { %20643 = vmatmul.mubr.msk.f32.vlgmr.msra.gmra.mrb[134].mxu0 %vm26967_vm10, %v20628_v50  ;;  %vm26968_vm14 = vmmov %vm26964_vm7  ;;  %vm26978_vm10 = vnez %v26583_v44 }
 0x50a   : > { %v17973_v60 = vsel %vm26968_vm14, %v17960_v54, %v17962_v37  ;;  %18606 = vmatprep.mubr.f32.mxu0 %v26195_v3  ;;  %vm26970_vm13 = vmmov %vm26969_vm12  ;;  %v18462_v38 = vpop.permute.xlu1 %18461 }
 0x50b   : > { %20983 = vmatpush3.msk.msra.mxu1 %vm26956_vm3, %v17973_v60  ;;  %v18472_v15 = vsel %vm26970_vm13, %v18450_v57, %v18452_v26  ;;  %vm26973_vm8 = vmmov %vm26956_vm3  ;;  %v18468_v17 = vpop.permute.xlu0 %18467 }
 0x50c   : > { %20985 = vmatmul.mubr.msk.f32.vlgmr.msra.gmra.mrb[134].mxu1 %vm26957_vm0, %v20628_v50  ;;  %v18494_v48 = vsel %vm26971_vm6, %v18472_v15, 0.0  ;;  %vm26974_vm15 = vmmov %vm26956_vm3  ;;  %vm26983_vm6 = vnez %v26445_v30 }
 0x50d   : > { %18677 = vmatprep.mubr.f32.mxu1 %v26195_v3  ;;  %20647 = vmatprep.subr.msk.mxu0 %vm26973_vm8, %v18494_v48  ;;  %vm26975_vm7 = vmmov %vm26969_vm12 }
 0x50e   : > { %20648 = vmatpush1.msk.msra.mxu0 %vm26974_vm15, %v18493_v18  ;;  %v18473_v23 = vsel %vm26975_vm7, %v18452_v26, %v18454_v11  ;;  %vm26976_vm9 = vmmov %vm26975_vm7  ;;  %v18466_v61 = vpop.permute.xlu1 %18465 }
 0x50f   : > { %v18474_v63 = vsel %vm26976_vm9, %v18454_v11, %v18456_v55  ;;  %vm26977_vm4 = vmmov %vm26957_vm0  ;;  %v18495_v5 = vsel %vm26824_vm1, %v18473_v23, 0.0  ;;  %vm26984_vm1 = vnez %v26438_v10 }
 0x510   : > { %20649 = vmatmul.mubr.msk.f32.vlgmr.msra.gmra.mrb[102].mxu0 %vm26977_vm4, %v20646_v62  ;;  %v18496_v9 = vsel %vm26978_vm10, %v18474_v63, 0.0  ;;  %vm26979_vm14 = vmmov %vm26956_vm3 }
 0x511   : > { %18747 = vmatprep.mubr.f32.mxu0 %v26195_v3  ;;  %20650 = vmatprep.subr.msk.mxu1 %vm26979_vm14, %v18496_v9  ;;  %vm26980_vm0 = vmmov %vm26975_vm7 }
 0x512   : > { %20651 = vmatpush1.msk.msra.mxu1 %vm26956_vm3, %v18495_v5  ;;  %v18475_v1 = vsel %vm26980_vm0, %v18456_v55, %v18458_v8  ;;  %vm26981_vm12 = vmmov %vm26980_vm0  ;;  %v18480_v0 = vsel %vm26980_vm0, %v18466_v61, %v18468_v17  ;;  %v18470_v45 = vpop.permute.xlu1 %18469 }
 0x513   : > { %v18476_v13 = vsel %vm26981_vm12, %v18458_v8, %v18460_v34  ;;  %vm26982_vm13 = vmmov %vm26977_vm4  ;;  %v18497_v31 = vsel %vm26983_vm6, %v18475_v1, 0.0 }
 0x514   : > { %20652 = vmatmul.mubr.msk.f32.vlgmr.msra.gmra.mrb[136].mxu1 %vm26982_vm13, %v20646_v62  ;;  %v18498_v44 = vsel %vm26984_vm1, %v18476_v13, 0.0  ;;  %vm26985_vm11 = vmmov %vm26956_vm3  ;;  %vm26996_vm13 = vnez %v26198_v4 }
 0x515   : > { %18817 = vmatprep.mubr.f32.mxu1 %v26195_v3  ;;  %20653 = vmatprep.subr.msk.mxu0 %vm26985_vm11, %v18498_v44  ;;  %vm26986_vm8 = vmmov %vm26956_vm3  ;;  %v18502_v39 = vsel %vm26996_vm13, %v18480_v0, 0.0 }
 0x516   : > { %20654 = vmatpush1.msk.msra.mxu0 %vm26986_vm8, %v18497_v31  ;;  %vm26987_vm15 = vmmov %vm26980_vm0 }
 0x517   : > { %v18477_v51 = vsel %vm26987_vm15, %v18460_v34, %v18462_v38  ;;  %vm26988_vm7 = vmmov %vm26980_vm0  ;;  %vm27001_vm15 = vnez %v26846_v14 }
 0x518   : > { %v18478_v19 = vsel %vm26988_vm7, %v18462_v38, %v18464_v6  ;;  %vm26989_vm9 = vmmov %vm26977_vm4  ;;  %v18499_v30 = vsel %vm26917_vm2, %v18477_v51, 0.0  ;;  %vm26990_vm4 = vnez %v26703_v33  ;;  %vm26995_vm2 = vnez %v26200_v2 }
 0x519   : > { %20655 = vmatmul.mubr.msk.f32.vlgmr.msra.gmra.mrb[136].mxu0 %vm26989_vm9, %v20646_v62  ;;  %v18500_v10 = vsel %vm26990_vm4, %v18478_v19, 0.0  ;;  %vm26991_vm10 = vmmov %vm26956_vm3 }
 0x51a   : > { %18888 = vmatprep.mubr.f32.mxu0 %v26195_v3  ;;  %20656 = vmatprep.subr.msk.mxu1 %vm26991_vm10, %v18500_v10  ;;  %vm26992_vm14 = vmmov %vm26956_vm3 }
 0x51b   : > { %20657 = vmatpush1.msk.msra.mxu1 %vm26992_vm14, %v18499_v30  ;;  %vm26993_vm3 = vmmov %vm26980_vm0 }
 0x51c   : > { %v18479_v56 = vsel %vm26993_vm3, %v18464_v6, %v18466_v61  ;;  %vm26994_vm12 = vmmov %vm26989_vm9  ;;  %20987 = vmatprep.subr.mxu1 %v26195_v3 }
 0x51d   : > { %20658 = vmatmul.mubr.msk.f32.vlgmr.msra.gmra.mrb[104].mxu1 %vm26994_vm12, %v20646_v62  ;;  %v18501_v33 = vsel %vm26995_vm2, %v18479_v56, 0.0  ;;  %vm26997_vm6 = vmmov %vm26986_vm8 }
 0x51e   : > { %20989 = vmatprep.mubr.msk.f32.mxu1 %vm26132_vm5, %v26195_v3  ;;  %20659 = vmatprep.subr.msk.mxu0 %vm26997_vm6, %v18502_v39  ;;  %vm26998_vm1 = vmmov %vm26997_vm6 }
 0x51f   : > { %20660 = vmatpush1.msk.msra.mxu0 %vm26998_vm1, %v18501_v33  ;;  %vm26999_vm11 = vmmov %vm26980_vm0 }
 0x520   : > { %v18481_v7 = vsel %vm26999_vm11, %v18468_v17, %v18470_v45  ;;  %vm27000_vm8 = vmmov %vm26989_vm9 }
 0x521   : > { %20661 = vmatmul.mubr.msk.f32.vlgmr.msra.gmra.mrb[138].mxu0 %vm27000_vm8, %v20646_v62  ;;  %v18503_v29 = vsel %vm27001_vm15, %v18481_v7, 0.0  ;;  %vm27002_vm7 = vmmov %vm26998_vm1 }
 0x522   : > { %20988 = vmatpush3.msk.msra.mxu1 %vm27002_vm7, %v18503_v29  ;;  %vm27003_vm9 = vmmov %vm27000_vm8 }
 0x523   : > { %20990 = vmatmul.mubr.msk.f32.vlgmr.msra.gmra.mrb[138].mxu1 %vm27003_vm9, %v20646_v62 }
 0x54f   : > { %v14530_v2 = vpop.f32.mrb[102].mxu1 }
 0x550   : > { %v14531_v4 = vpop.f32.mrb[103].mxu1 }
 0x556   : > { %v14600_v27 = vpop.f32.mrb[104].mxu0 }
 0x557   : > { %v14602_v3 = vpop.f32.mrb[105].mxu0 }
 0x55e   : > { %v14741_v58 = vpop.f32.mrb[106].mxu0 }
 0x55f   : > { %v14742_v40 = vpop.f32.mrb[107].mxu0 }
 0x566   : > { %v15058_v32 = vpop.f32.mrb[108].mxu0 }
 0x567   : > { %v15059_v28 = vadd.f32 %v15058_v32, %v14600_v27  ;;  %v15060_v59 = vpop.f32.mrb[109].mxu0 }
 0x569   : > { %v14811_v50 = vpop.f32.mrb[106].mxu1 }
 0x56a   : > { %v20951_v21 = vpop.f32.mrb[107].mxu1  ;;  %v15199_v35 = vpop.f32.mrb[110].mxu0 }
 0x56b   : > { %v15200_v41 = vpop.f32.mrb[111].mxu0 }
 0x56c   : > { %v15201_v47 = vadd.f32 %v15200_v41, %v14742_v40 }
 0x56d   : > { %v14988_v14 = vpop.f32.mrb[108].mxu1 }
 0x56e   : > { %v14989_v53 = vpop.f32.mrb[109].mxu1 }
 0x56f   : > { %v14990_v12 = vadd.f32 %v14989_v53, %v14531_v4 }
 0x573   : > { %v15593_v16 = vpop.f32.mrb[112].mxu0 }
 0x574   : > { %v15811_v42 = vadd.f32 %v15593_v16, %v15059_v28  ;;  %v15595_v22 = vpop.f32.mrb[113].mxu0 }
 0x575   : > { %v15269_v54 = vpop.f32.mrb[110].mxu1 }
 0x576   : > { %v15270_v24 = vadd.f32 %v15269_v54, %v14811_v50  ;;  %v20956_v52 = vpop.f32.mrb[111].mxu1 }
 0x578   : > { %v15734_v36 = vpop.f32.mrb[114].mxu0 }
 0x579   : > { %v15735_v57 = vpop.f32.mrb[115].mxu0  ;;  %v15523_v25 = vpop.f32.mrb[112].mxu1  ;;  %v27004_v36 = vld [vmem:[#allocation9_spill] sm:$0xff] }
 0x57a   : > { %v15814_v46 = vadd.f32 %v15735_v57, %v15201_v47  ;;  %v15524_v20 = vpop.f32.mrb[113].mxu1  ;;  %v20664_v57 = vadd.f32 -1.0, %v27004_v36  ;;  %v27005_v25 = vld [vmem:[#allocation10_spill] sm:$0xff] }
 0x57b   : > { %v15810_v43 = vadd.f32 %v15524_v20, %v14990_v12  ;;  %v20685_v20 = vadd.f32 -1.0, %v27005_v25 }
 0x583   : > { %v16136_v37 = vpop.f32.mrb[116].mxu0 }
 0x584   : > { %v16354_v60 = vadd.f32 %v16136_v37, %v15811_v42  ;;  %v16138_v55 = vpop.f32.mrb[117].mxu0 }
 0x587   : > { %v15804_v49 = vpop.f32.mrb[114].mxu1 }
 0x588   : > { %v15815_v26 = vadd.f32 %v15804_v49, %v15270_v24  ;;  %v20961_v48 = vpop.f32.mrb[115].mxu1 }
 0x58a   : > { %v16277_v15 = vpop.f32.mrb[118].mxu0 }
 0x58b   : > { %v16278_v62 = vpop.f32.mrb[119].mxu0  ;;  %v27006_v15 = vld [vmem:[#allocation11_spill] sm:$0xff] }
 0x58c   : > { %v16357_v18 = vadd.f32 %v16278_v62, %v15814_v46  ;;  %v25419_v48 = vadd.f32 -1.0, %v27006_v15  ;;  %v19232_v62 = vmax.f32 %v27005_v25, 0.0 }
 0x58e   : > { %v16066_v34 = vpop.f32.mrb[116].mxu1 }
 0x58f   : > { %v16067_v11 = vpop.f32.mrb[117].mxu1 }
 0x590   : > { %v16353_v23 = vadd.f32 %v16067_v11, %v15810_v43  ;;  %v19470_v11 = vmax.f32 %v27006_v15, 0.0 }
 0x595   : > { %v16610_v63 = vpop.f32.mrb[120].mxu0 }
 0x596   : > { %v16828_v5 = vadd.f32 %v16610_v63, %v16354_v60  ;;  %v16612_v9 = vpop.f32.mrb[121].mxu0  ;;  %v18995_v60 = vmax.f32 %v27004_v36, 0.0 }
 0x597   : > { %v16347_v8 = vpop.f32.mrb[118].mxu1 }
 0x598   : > { %v16358_v1 = vadd.f32 %v16347_v8, %v15815_v26  ;;  %v20966_v6 = vpop.f32.mrb[119].mxu1  ;;  %v18997_v26 = vmax.f32 %v20664_v57, 0.0  ;;  %v25431_v8 = vstv %s25393_s30 }
 0x59a   : > { %v25422_v34 = vsub.f32 %v18995_v60, %v18997_v26 }
 0x59b   : > { %v16751_v13 = vpop.f32.mrb[122].mxu0 }
 0x59c   : > { %v16752_v31 = vpop.f32.mrb[123].mxu0  ;;  %v25437_v13 = vstv %s25397_s13 }
 0x59d   : > { %v16831_v44 = vadd.f32 %v16752_v31, %v16357_v18  ;;  %v19234_v18 = vmax.f32 %v20685_v20, 0.0  ;;  %v25441_v31 = vstv %s25400_s25 }
 0x59f   : > { %v16540_v38 = vpop.f32.mrb[120].mxu1  ;;  %v25426_v63 = vsub.f32 %v19232_v62, %v19234_v18 }
 0x5a0   : > { %v16541_v51 = vpop.f32.mrb[121].mxu1  ;;  %v25447_v38 = vstv %s25407_s19 }
 0x5a1   : > { %v16827_v19 = vadd.f32 %v16541_v51, %v16353_v23  ;;  %v19472_v23 = vmax.f32 %v25419_v48, 0.0 }
 0x5a6   : > { %v17153_v30 = vpop.f32.mrb[124].mxu0 }
 0x5a7   : > { %v17371_v10 = vadd.f32 %v17153_v30, %v16828_v5  ;;  %v17155_v17 = vpop.f32.mrb[125].mxu0  ;;  %v25428_v5 = vpop.permute.xlu0 %18975  ;;  %v25453_v30 = vstv %s25411_s27 }
 0x5ab   : > { %v16821_v61 = vpop.f32.mrb[122].mxu1 }
 0x5ac   : > { %v16832_v56 = vadd.f32 %v16821_v61, %v16358_v1  ;;  %v20971_v33 = vpop.f32.mrb[123].mxu1  ;;  %v25434_v1 = vstv %s25395_s12 }
 0x5ad   : > { %v17294_v0 = vpop.f32.mrb[126].mxu0  ;;  %v25463_v33 = vstv %s20680_s9 }
 0x5ae   : > { %v17295_v39 = vpop.f32.mrb[127].mxu0  ;;  %v25461_v0 = vstv %s20679_s28 }
 0x5af   : > { %v17374_v45 = vadd.f32 %v17295_v39, %v16831_v44  ;;  %v25444_v44 = vstv %s25402_s8  ;;  %v25465_v39 = vstv %s19039_s29 }
 0x5b1   : > { %v17083_v7 = vpop.f32.mrb[124].mxu1 }
 0x5b2   : > { %v17084_v29 = vpop.f32.mrb[125].mxu1  ;;  %v25469_v7 = vstv %s20681_s11 }
 0x5b3   : > { %v17370_v2 = vadd.f32 %v17084_v29, %v16827_v19  ;;  %v25450_v19 = vstv %s25409_s22 }
 0x5b7   : > { %v17696_v4 = vpop.f32.mrb[128].mxu0 }
 0x5b8   : > { %v17914_v27 = vadd.f32 %v17696_v4, %v17371_v10  ;;  %v17698_v3 = vpop.f32.mrb[129].mxu0  ;;  %v25456_v10 = vstv %s25413_s23 }
 0x5ba   : > { %v17364_v58 = vpop.f32.mrb[126].mxu1 }
 0x5bb   : > { %v17375_v40 = vadd.f32 %v17364_v58, %v16832_v56  ;;  %v20976_v32 = vpop.f32.mrb[127].mxu1  ;;  %v25459_v56 = vstv %s20678_s26 }
 0x5bf   : > { %v17837_v28 = vpop.f32.mrb[130].mxu0 }
 0x5c0   : > { %v17838_v59 = vpop.f32.mrb[131].mxu0  ;;  %v17626_v21 = vpop.f32.mrb[128].mxu1 }
 0x5c1   : > { %v17917_v50 = vadd.f32 %v17838_v59, %v17374_v45  ;;  %v17627_v35 = vpop.f32.mrb[129].mxu1  ;;  %v25467_v45 = vstv %s20674_s10 }
 0x5c2   : > { %v17913_v41 = vadd.f32 %v17627_v35, %v17370_v2 }
 0x5cc   : > { %v17907_v47 = vpop.f32.mrb[130].mxu1 }
 0x5cd   : > { %v17918_v14 = vadd.f32 %v17907_v47, %v17375_v40  ;;  %v20981_v53 = vpop.f32.mrb[131].mxu1 }
 0x5d0   : > { %v18136_v12 = vpop.f32.mrb[132].mxu1 }
 0x5d1   : > { %v18137_v16 = vpop.f32.mrb[133].mxu1 }
 0x5d2   : > { %v18206_v42 = vpop.f32.mrb[132].mxu0  ;;  %v25389_v22 = vadd.f32 %v18137_v16, %v17913_v41 }
 0x5d3   : > { %v25391_v54 = vadd.f32 %v18206_v42, %v17914_v27  ;;  %v18208_v24 = vpop.f32.mrb[133].mxu0 }
 0x5dc   : > { %v18347_v52 = vpop.f32.mrb[134].mxu0 }
 0x5dd   : > { %v18348_v46 = vpop.f32.mrb[135].mxu0 }
 0x5de   : > { %v25405_v43 = vadd.f32 %v18348_v46, %v17917_v50 }
 0x5df   : > { %v18417_v37 = vpop.f32.mrb[134].mxu1 }
 0x5e0   : > { %v25416_v55 = vadd.f32 %v18417_v37, %v17918_v14  ;;  %v20986_v49 = vpop.f32.mrb[135].mxu1 }
 0x5e3   : > { %v18608_v9 = vpop.f32.mrb[102].mxu0 }
 0x5e4   : > { %v18978_v6 = vadd.f32 %v25428_v5, %v18608_v9  ;;  %v18610_v51 = vpop.f32.mrb[103].mxu0 }
 0x5e5   : > { %v18979_v17 = vadd.f32 %v25428_v5, %v18610_v51 }
 0x5e6   : > { %v18986_v61 = vmax.f32 %v18978_v6, 0.0 }
 0x5e7   : > { %v25471_v29 = vmax.f32 %v18979_v17, 0.0  ;;  %v18679_v2 = vpop.f32.mrb[136].mxu1 }
 0x5e8   : > { %v19001_v4 = vmul.f32 %v25431_v8, %v18986_v61  ;;  %v19005_v27 = vmul.f32 %v25434_v1, %v18986_v61  ;;  %v19017_v3 = vmul.f32 %v25437_v13, %v18986_v61  ;;  %v19029_v58 = vmul.f32 %v25441_v31, %v18986_v61  ;;  %v25477_v40 = vpop.f32.mrb[137].mxu1 }
 0x5e9   : > { %v19078_v32 = vmul.f32 %v25444_v44, %v18986_v61  ;;  %v19082_v28 = vmul.f32 %v25447_v38, %v18986_v61  ;;  %v19094_v59 = vmul.f32 %v25450_v19, %v18986_v61  ;;  %v19106_v50 = vmul.f32 %v25453_v30, %v18986_v61 }
 0x5ea   : > { %v19009_v21 = vrot.slane %v19005_v27, 1  ;;  %v19021_v35 = vrot.slane %v19017_v3, 2  ;;  %v19033_v41 = vrot.slane %v19029_v58, 3  ;;  %v19155_v47 = vmul.f32 %v25456_v10, %v18986_v61 }
 0x5eb   : > { %v19086_v14 = vrot.slane %v19082_v28, 1  ;;  %v19098_v53 = vrot.slane %v19094_v59, 2  ;;  %v19110_v12 = vrot.slane %v19106_v50, 3  ;;  %v19159_v16 = vmul.f32 %v25459_v56, %v18986_v61 }
 0x5ec   : > { %v25485_v42 = vpop.f32.mrb[136].mxu0  ;;  %v19013_v24 = vadd.f32 %v19009_v21, %v19001_v4  ;;  %v19171_v52 = vmul.f32 %v25461_v0, %v18986_v61  ;;  %v19183_v36 = vmul.f32 %v25463_v33, %v18986_v61  ;;  %v19002_v57 = vmul.f32 %v25431_v8, %v25471_v29 }
 0x5ed   : > { %v18751_v46 = vpop.f32.mrb[137].mxu0  ;;  %v19090_v25 = vadd.f32 %v19086_v14, %v19078_v32  ;;  %v19163_v20 = vrot.slane %v19159_v16, 1  ;;  %v19006_v37 = vmul.f32 %v25434_v1, %v25471_v29  ;;  %v19018_v60 = vmul.f32 %v25437_v13, %v25471_v29 }
 0x5ee   : > { %v19025_v49 = vadd.f32 %v19021_v35, %v19013_v24  ;;  %v19175_v26 = vrot.slane %v19171_v52, 2  ;;  %v19187_v62 = vrot.slane %v19183_v36, 3  ;;  %v19030_v18 = vmul.f32 %v25441_v31, %v25471_v29 }
 0x5ef   : > { %v19102_v9 = vadd.f32 %v19098_v53, %v19090_v25  ;;  %v19167_v6 = vadd.f32 %v19163_v20, %v19155_v47  ;;  %v19010_v51 = vrot.slane %v19006_v37, 1  ;;  %v19022_v17 = vrot.slane %v19018_v60, 2 }
 0x5f0   : > { %v18819_v61 = vpop.f32.mrb[104].mxu1  ;;  %v19037_v2 = vadd.f32 %v19033_v41, %v19025_v49  ;;  %v19034_v4 = vrot.slane %v19030_v18, 3  ;;  %v19079_v27 = vmul.f32 %v25444_v44, %v25471_v29  ;;  %v19083_v3 = vmul.f32 %v25447_v38, %v25471_v29 }
 0x5f1   : > { %v18821_v58 = vpop.f32.mrb[105].mxu1  ;;  %v19114_v32 = vadd.f32 %v19110_v12, %v19102_v9  ;;  %v19179_v28 = vadd.f32 %v19175_v26, %v19167_v6  ;;  %v19014_v59 = vadd.f32 %v19010_v51, %v19002_v57  ;;  %v19095_v50 = vmul.f32 %v25450_v19, %v25471_v29 }
 0x5f2   : > { %v19041_v21 = vadd.f32 %v25465_v39, %v19037_v2  ;;  %v19087_v35 = vrot.slane %v19083_v3, 1  ;;  %v19107_v41 = vmul.f32 %v25453_v30, %v25471_v29  ;;  %v19156_v47 = vmul.f32 %v25456_v10, %v25471_v29 }
 0x5f3   : > { %v19118_v14 = vadd.f32 %v25467_v45, %v19114_v32  ;;  %v19191_v53 = vadd.f32 %v19187_v62, %v19179_v28  ;;  %v19026_v16 = vadd.f32 %v19022_v17, %v19014_v59  ;;  %v19099_v24 = vrot.slane %v19095_v50, 2 }
 0x5f4   : > { %v18890_v12 = vpop.f32.mrb[138].mxu0  ;;  %v20668_v52 = vmul.f32 -1.442695, %v19041_v21  ;;  %v19091_v36 = vadd.f32 %v19087_v35, %v19079_v27  ;;  %v19111_v57 = vrot.slane %v19107_v41, 3  ;;  %v19160_v46 = vmul.f32 %v25459_v56, %v25471_v29 }
 0x5f5   : > { %v18891_v25 = vpop.f32.mrb[139].mxu0  ;;  %v20675_v20 = vmul.f32 -1.442695, %v19118_v14  ;;  %v19195_v37 = vadd.f32 %v25469_v7, %v19191_v53  ;;  %v19038_v60 = vadd.f32 %v19034_v4, %v19026_v16  ;;  %v19172_v49 = vmul.f32 %v25461_v0, %v25471_v29 }
 0x5f6   : > { %21231 = vpow2.f32 %v20668_v52  ;;  %v19103_v26 = vadd.f32 %v19099_v24, %v19091_v36  ;;  %v19164_v62 = vrot.slane %v19160_v46, 1  ;;  %v19184_v18 = vmul.f32 %v25463_v33, %v25471_v29  ;;  %v25516_v9 = vpop.f32.mrb[138].mxu1 }
 0x5f7   : > { %v27007_v6 = vlaneseq  ;;  %21233 = vpow2.f32 %v20675_v20  ;;  %v20682_v17 = vmul.f32 -1.442695, %v19195_v37  ;;  %v19042_v2 = vadd.f32 %v25465_v39, %v19038_v60  ;;  %v20991_v27 = vpop.f32.mrb[139].mxu1 }
 0x5f8   : > { %v19115_v3 = vadd.f32 %v19111_v57, %v19103_v26  ;;  %v19168_v4 = vadd.f32 %v19164_v62, %v19156_v47  ;;  %v19176_v32 = vrot.slane %v19172_v49, 2  ;;  %v18966_v28 = vadd.f32 %v25477_v40, %v25389_v22 }
 0x5f9   : > { %v19057_v51 = vshrl.u32 %v27007_v6, 7  ;;  %v25523_v59 = vsub.f32 1.0, %v25422_v34  ;;  %21235 = vpow2.f32 %v20682_v17  ;;  %v20669_v29 = vmul.f32 -1.442695, %v19042_v2 }
 0x5fa   : > { %v18967_v50 = vadd.f32 %v25485_v42, %v25391_v54  ;;  %v19119_v21 = vadd.f32 %v25467_v45, %v19115_v3  ;;  %v19180_v35 = vadd.f32 %v19176_v32, %v19168_v4  ;;  %v19188_v41 = vrot.slane %v19184_v18, 3 }
 0x5fb   : > { %v18980_v14 = vadd.f32 %v25428_v5, %v18966_v28  ;;  %v25533_v47 = vsub.f32 %v19470_v11, %v19472_v23  ;;  %21237 = vpow2.f32 %v20669_v29  ;;  %v25536_v22 = vadd.f32 %v18891_v25, %v25405_v43 }
 0x5fc   : > { %v25539_v40 = vsub.f32 1.0, %v25426_v63  ;;  %v20676_v54 = vmul.f32 -1.442695, %v19119_v21  ;;  %v19192_v42 = vadd.f32 %v19188_v41, %v19180_v35  ;;  %v19065_v16 = vcombine.high %v25523_v59, %v25523_v59 }
 0x5fd   : > { %v18988_v53 = vmax.f32 %v18980_v14, 0.0  ;;  %v25543_v24 = vsub.s32 0, %v19057_v51  ;;  %v18982_v48 = vadd.f32 %v25428_v5, %v18819_v61  ;;  %v25547_v15 = vadd.f32 %v25428_v5, %v18821_v58 }
 0x5fe   : > { %21239 = vpow2.f32 %v20676_v54  ;;  %v19196_v43 = vadd.f32 %v25469_v7, %v19192_v42  ;;  %v18981_v23 = vadd.f32 %v25428_v5, %v18967_v50 }
 0x5ff   : > { %v19242_v11 = vmul.f32 %v25434_v1, %v18988_v53  ;;  %v19238_v12 = vmul.f32 %v25431_v8, %v18988_v53  ;;  %v19254_v52 = vmul.f32 %v25437_v13, %v18988_v53  ;;  %v19266_v36 = vmul.f32 %v25441_v31, %v18988_v53 }
 0x600   : > { %v19319_v57 = vmul.f32 %v25447_v38, %v18988_v53  ;;  %v21232_v46 = vpop.eup %21231  ;;  %v20683_v61 = vmul.f32 -1.442695, %v19196_v43  ;;  %v19331_v58 = vmul.f32 %v25450_v19, %v18988_v53  ;;  %v19343_v20 = vmul.f32 %v25453_v30, %v18988_v53 }
 0x601   : > { %v19246_v25 = vrot.slane %v19242_v11, 1  ;;  %v21234_v37 = vpop.eup %21233  ;;  %v19049_v60 = vadd.f32 1.0, %v21232_v46  ;;  %v19315_v49 = vmul.f32 %v25444_v44, %v18988_v53  ;;  %v25559_v62 = vmax.f32 %v18982_v48, 0.0 }
 0x602   : > { %v19323_v26 = vrot.slane %v19319_v57, 1  ;;  %v19126_v18 = vadd.f32 1.0, %v21234_v37  ;;  %21241 = vpow2.f32 %v20683_v61  ;;  %v19258_v51 = vrot.slane %v19254_v52, 2 }
 0x603   : > { %v19250_v6 = vadd.f32 %v19246_v25, %v19238_v12  ;;  %v21236_v17 = vpop.eup %21235  ;;  %21243 = vrcp.f32 %v19049_v60  ;;  %v19335_v27 = vrot.slane %v19331_v58, 2  ;;  %v25561_v3 = vmax.f32 %v18981_v23, 0.0 }
 0x604   : > { %v19327_v2 = vadd.f32 %v19323_v26, %v19315_v49  ;;  %v19270_v32 = vrot.slane %v19266_v36, 3  ;;  %v19347_v28 = vrot.slane %v19343_v20, 3  ;;  %v19396_v29 = vmul.f32 %v25459_v56, %v18988_v53 }
 0x605   : > { %v19262_v4 = vadd.f32 %v19258_v51, %v19250_v6  ;;  %v21238_v50 = vpop.eup %21237  ;;  %21245 = vrcp.f32 %v19126_v18  ;;  %v19392_v35 = vmul.f32 %v25456_v10, %v18988_v53  ;;  %v19408_v41 = vmul.f32 %v25461_v0, %v18988_v53 }
 0x606   : > { %v19339_v21 = vadd.f32 %v19335_v27, %v19327_v2  ;;  %v19203_v14 = vadd.f32 1.0, %v21236_v17  ;;  %v19050_v54 = vadd.f32 1.0, %v21238_v50  ;;  %v19400_v48 = vrot.slane %v19396_v29, 1 }
 0x607   : > { %v19274_v42 = vadd.f32 %v19270_v32, %v19262_v4  ;;  %v19412_v11 = vrot.slane %v19408_v41, 2  ;;  %v19420_v23 = vmul.f32 %v25463_v33, %v18988_v53  ;;  %v19243_v12 = vmul.f32 %v25434_v1, %v25561_v3 }
 0x608   : > { %v19351_v43 = vadd.f32 %v19347_v28, %v19339_v21  ;;  %v21240_v52 = vpop.eup %21239  ;;  %21247 = vrcp.f32 %v19050_v54  ;;  %v19404_v57 = vadd.f32 %v19400_v48, %v19392_v35  ;;  %v19255_v46 = vmul.f32 %v25437_v13, %v25561_v3 }
 0x609   : > { %v19278_v36 = vadd.f32 %v19274_v42, %v25465_v39  ;;  %v19239_v25 = vmul.f32 %v25431_v8, %v25561_v3  ;;  %v19247_v58 = vrot.slane %v19243_v12, 1  ;;  %v19267_v53 = vmul.f32 %v25441_v31, %v25561_v3 }
 0x60a   : > { %v19355_v61 = vadd.f32 %v19351_v43, %v25467_v45  ;;  %21249 = vrcp.f32 %v19203_v14  ;;  %v19416_v37 = vadd.f32 %v19412_v11, %v19404_v57  ;;  %v19476_v60 = vmul.f32 %v25431_v8, %v25559_v62 }
 0x60b   : > { %v20689_v20 = vmul.f32 -1.442695, %v19278_v36  ;;  %v19127_v49 = vadd.f32 1.0, %v21240_v52  ;;  %v19424_v26 = vrot.slane %v19420_v23, 3  ;;  %v19251_v18 = vadd.f32 %v19247_v58, %v19239_v25 }
 0x60c   : > { %v19259_v6 = vrot.slane %v19255_v46, 2  ;;  %v21242_v51 = vpop.eup %21241  ;;  %v20696_v17 = vmul.f32 -1.442695, %v19355_v61  ;;  %v19320_v2 = vmul.f32 %v25447_v38, %v25561_v3  ;;  %v19332_v27 = vmul.f32 %v25450_v19, %v25561_v3 }
 0x60d   : > { %21251 = vpow2.f32 %v20689_v20  ;;  %v21244_v4 = vpop.eup %21243  ;;  %v19428_v32 = vadd.f32 %v19424_v26, %v19416_v37  ;;  %v19271_v29 = vrot.slane %v19267_v53, 3  ;;  %v19316_v50 = vmul.f32 %v25444_v44, %v25561_v3 }
 0x60e   : > { %v19263_v28 = vadd.f32 %v19259_v6, %v19251_v18  ;;  %v19059_v21 = vrot.slane %v21244_v4, %v25543_v24  ;;  %v19204_v35 = vadd.f32 1.0, %v21242_v51  ;;  %v19324_v41 = vrot.slane %v19320_v2, 1 }
 0x60f   : > { %v19344_v14 = vmul.f32 %v25453_v30, %v25561_v3  ;;  %v25588_v54 = vpop.eup %21245  ;;  %21253 = vrcp.f32 %v19127_v49  ;;  %v19480_v48 = vmul.f32 %v25434_v1, %v25559_v62  ;;  %v19492_v43 = vmul.f32 %v25437_v13, %v25559_v62 }
 0x610   : > { %v19275_v42 = vadd.f32 %v19271_v29, %v19263_v28  ;;  %v19067_v11 = vmul.f32 %v19059_v21, %v25523_v59  ;;  %21255 = vpow2.f32 %v20696_v17  ;;  %v19328_v23 = vadd.f32 %v19324_v41, %v19316_v50 }
 0x611   : > { %v19336_v12 = vrot.slane %v19332_v27, 2  ;;  %v19432_v52 = vadd.f32 %v19428_v32, %v25469_v7  ;;  %v19397_v57 = vmul.f32 %v25459_v56, %v25561_v3  ;;  %v19409_v46 = vmul.f32 %v25461_v0, %v25561_v3 }
 0x612   : > { %v19279_v36 = vadd.f32 %v19275_v42, %v25465_v39  ;;  %v21248_v61 = vpop.eup %21247  ;;  %21257 = vrcp.f32 %v19204_v35  ;;  %v19348_v58 = vrot.slane %v19344_v14, 3  ;;  %v19393_v53 = vmul.f32 %v25456_v10, %v25561_v3 }
 0x613   : > { %v19340_v25 = vadd.f32 %v19336_v12, %v19328_v23  ;;  %v19063_v20 = vrot.slane %v21248_v61, %v25543_v24  ;;  %v19401_v49 = vrot.slane %v19397_v57, 1  ;;  %v19421_v26 = vmul.f32 %v25463_v33, %v25561_v3 }
 0x614   : > { %v20690_v37 = vmul.f32 -1.442695, %v19279_v36  ;;  %v25606_v18 = vpop.eup %21249  ;;  %v19069_v6 = vadd.f32 1.0, %v19067_v11  ;;  %v19413_v17 = vrot.slane %v19409_v46, 2  ;;  %v19484_v2 = vrot.slane %v19480_v48, 1 }
 0x615   : > { %v19352_v51 = vadd.f32 %v19348_v58, %v19340_v25  ;;  %v19068_v27 = vmul.f32 %v19065_v16, %v19063_v20  ;;  %v19405_v4 = vadd.f32 %v19401_v49, %v19393_v53  ;;  %v19504_v32 = vmul.f32 %v25441_v31, %v25559_v62 }
 0x616   : > { %21259 = vpow2.f32 %v20690_v37  ;;  %v20703_v29 = vmul.f32 -1.442695, %v19432_v52  ;;  %v19488_v3 = vadd.f32 %v19484_v2, %v19476_v60  ;;  %v19496_v21 = vrot.slane %v19492_v43, 2 }
 0x617   : > { %v21252_v28 = vpop.eup %21251  ;;  %v19356_v50 = vadd.f32 %v19352_v51, %v25467_v45  ;;  %v19070_v35 = vadd.f32 1.0, %v19068_v27  ;;  %v19417_v14 = vadd.f32 %v19413_v17, %v19405_v4  ;;  %v19425_v42 = vrot.slane %v19421_v26, 3 }
 0x618   : > { %v19286_v41 = vadd.f32 1.0, %v21252_v28  ;;  %v19500_v11 = vadd.f32 %v19496_v21, %v19488_v3  ;;  %v19508_v23 = vrot.slane %v19504_v32, 3  ;;  %v19557_v59 = vmul.f32 %v25447_v38, %v25559_v62 }
 0x619   : > { %v20697_v48 = vmul.f32 -1.442695, %v19356_v50  ;;  %v21254_v16 = vpop.eup %21253  ;;  %v19073_v12 = vcombine.low %v19069_v6, %v19070_v35  ;;  %v19429_v36 = vadd.f32 %v19425_v42, %v19417_v14  ;;  %v19569_v52 = vmul.f32 %v25450_v19, %v25559_v62 }
 0x61a   : > { %21261 = vrcp.f32 %v19286_v41  ;;  %v21256_v57 = vpop.eup %21255  ;;  %v19512_v60 = vadd.f32 %v19508_v23, %v19500_v11  ;;  %v19553_v43 = vmul.f32 %v25444_v44, %v25559_v62  ;;  %v19561_v46 = vrot.slane %v19557_v59, 1 }
 0x61b   : > { %21263 = vpow2.f32 %v20703_v29  ;;  %v19075_v61 = vmul.f32 %v19073_v12, %v25422_v34  ;;  %v19433_v25 = vadd.f32 %v19429_v36, %v25469_v7  ;;  %v25623_v58 = vmax.f32 %v25547_v15, 0.0 }
 0x61c   : > { %21265 = vpow2.f32 %v20697_v48  ;;  %v25625_v53 = vpop.eup %21257  ;;  %v19516_v20 = vadd.f32 %v19512_v60, %v25465_v39  ;;  %v19565_v37 = vadd.f32 %v19561_v46, %v19553_v43  ;;  %v19573_v49 = vrot.slane %v19569_v52, 2 }
 0x61d   : > { %v19581_v26 = vmul.f32 %v25453_v30, %v25559_v62  ;;  %v19136_v6 = vrot.slane %v25588_v54, %v25543_v24  ;;  %v19132_v51 = vsub.f32 1.0, %v19075_v61  ;;  %v19140_v34 = vrot.slane %v21254_v16, %v25543_v24 }
 0x61e   : > { %v19634_v17 = vmul.f32 %v25459_v56, %v25559_v62  ;;  %v20711_v15 = vmul.f32 -1.442695, %v19516_v20  ;;  %v19577_v2 = vadd.f32 %v19573_v49, %v19565_v37  ;;  %v19646_v4 = vmul.f32 %v25461_v0, %v25559_v62 }
 0x61f   : > { %v19585_v27 = vrot.slane %v19581_v26, 3  ;;  %v19142_v28 = vcombine.high %v19132_v51, %v19132_v51  ;;  %v19144_v29 = vmul.f32 %v19136_v6, %v19132_v51  ;;  %v19630_v50 = vmul.f32 %v25456_v10, %v25559_v62 }
 0x620   : > { %v21260_v32 = vpop.eup %21259  ;;  %v19638_v3 = vrot.slane %v19634_v17, 1  ;;  %v19302_v54 = vcombine.high %v25539_v40, %v25539_v40  ;;  %v20704_v35 = vmul.f32 -1.442695, %v19433_v25  ;;  %v19363_v42 = vadd.f32 1.0, %v21256_v57 }
 0x621   : > { %v19287_v21 = vadd.f32 1.0, %v21260_v32  ;;  %v19589_v41 = vadd.f32 %v19585_v27, %v19577_v2  ;;  %v19145_v14 = vmul.f32 %v19142_v28, %v19140_v34  ;;  %21267 = vpow2.f32 %v20711_v15 }
 0x622   : > { %v19642_v48 = vadd.f32 %v19638_v3, %v19630_v50  ;;  %v19650_v23 = vrot.slane %v19646_v4, 2  ;;  %v19658_v59 = vmul.f32 %v25463_v33, %v25559_v62  ;;  %v19146_v12 = vadd.f32 1.0, %v19144_v29 }
 0x623   : > { %21269 = vrcp.f32 %v19287_v21  ;;  %v19593_v11 = vadd.f32 %v19589_v41, %v25467_v45  ;;  %v19147_v36 = vadd.f32 1.0, %v19145_v14  ;;  %v19481_v52 = vmul.f32 %v25434_v1, %v25623_v58 }
 0x624   : > { %v21262_v16 = vpop.eup %21261  ;;  %v19493_v60 = vmul.f32 %v25437_v13, %v25623_v58  ;;  %v19213_v57 = vrot.slane %v25606_v18, %v25543_v24  ;;  %21271 = vpow2.f32 %v20704_v35  ;;  %v19654_v25 = vadd.f32 %v19650_v23, %v19642_v48 }
 0x625   : > { %v21264_v43 = vpop.eup %21263  ;;  %v19296_v46 = vrot.slane %v21262_v16, %v25543_v24  ;;  %v19150_v37 = vcombine.low %v19146_v12, %v19147_v36  ;;  %v19477_v62 = vmul.f32 %v25431_v8, %v25623_v58  ;;  %v19485_v49 = vrot.slane %v19481_v52, 1 }
 0x626   : > { %v21266_v20 = vpop.eup %21265  ;;  %v19505_v26 = vmul.f32 %v25441_v31, %v25623_v58  ;;  %v19217_v6 = vrot.slane %v25625_v53, %v25543_v24  ;;  %21273 = vrcp.f32 %v19363_v42  ;;  %v20718_v51 = vmul.f32 -1.442695, %v19593_v11 }
 0x627   : > { %v19662_v34 = vrot.slane %v19658_v59, 3  ;;  %v19152_v18 = vmul.f32 %v19150_v37, %v19075_v61  ;;  %v19364_v17 = vadd.f32 1.0, %v21266_v20  ;;  %v19489_v15 = vadd.f32 %v19485_v49, %v19477_v62 }
 0x628   : > { %v19497_v2 = vrot.slane %v19493_v60, 2  ;;  %v19304_v27 = vmul.f32 %v19296_v46, %v25539_v40  ;;  %v19440_v4 = vadd.f32 1.0, %v21264_v43  ;;  %v19558_v28 = vmul.f32 %v25447_v38, %v25623_v58 }
 0x629   : > { %v19666_v32 = vadd.f32 %v19662_v34, %v19654_v25  ;;  %v19209_v29 = vsub.f32 1.0, %v19152_v18  ;;  %v19509_v3 = vrot.slane %v19505_v26, 3  ;;  %v19570_v53 = vmul.f32 %v25450_v19, %v25623_v58 }
 0x62a   : > { %v19501_v50 = vadd.f32 %v19497_v2, %v19489_v15  ;;  %21275 = vpow2.f32 %v20718_v51  ;;  %v19554_v61 = vmul.f32 %v25444_v44, %v25623_v58  ;;  %v19562_v21 = vrot.slane %v19558_v28, 1 }
 0x62b   : > { %v19582_v35 = vmul.f32 %v25453_v30, %v25623_v58  ;;  %v21268_v41 = vpop.eup %21267  ;;  %v19219_v14 = vcombine.high %v19209_v29, %v19209_v29  ;;  %v19221_v42 = vmul.f32 %v19213_v57, %v19209_v29  ;;  %21277 = vrcp.f32 %v19364_v17 }
 0x62c   : > { %v19513_v48 = vadd.f32 %v19509_v3, %v19501_v50  ;;  %v19524_v23 = vadd.f32 1.0, %v21268_v41  ;;  %v19670_v59 = vadd.f32 %v19666_v32, %v25469_v7  ;;  %v19566_v16 = vadd.f32 %v19562_v21, %v19554_v61 }
 0x62d   : > { %v21270_v11 = vpop.eup %21269  ;;  %v19574_v12 = vrot.slane %v19570_v53, 2  ;;  %v19222_v36 = vmul.f32 %v19219_v14, %v19217_v6  ;;  %v19223_v52 = vadd.f32 1.0, %v19221_v42  ;;  %v19306_v60 = vadd.f32 1.0, %v19304_v27 }
 0x62e   : > { %v19300_v43 = vrot.slane %v21270_v11, %v25543_v24  ;;  %v21272_v46 = vpop.eup %21271  ;;  %21279 = vrcp.f32 %v19524_v23  ;;  %v19517_v25 = vadd.f32 %v19513_v48, %v25465_v39  ;;  %v19586_v57 = vrot.slane %v19582_v35, 3 }
 0x62f   : > { %v19578_v20 = vadd.f32 %v19574_v12, %v19566_v16  ;;  %v19224_v37 = vadd.f32 1.0, %v19222_v36  ;;  %v19635_v49 = vmul.f32 %v25459_v56, %v25623_v58  ;;  %v19647_v26 = vmul.f32 %v25461_v0, %v25623_v58 }
 0x630   : > { %v19305_v62 = vmul.f32 %v19302_v54, %v19300_v43  ;;  %v21274_v6 = vpop.eup %21273  ;;  %v20725_v51 = vmul.f32 -1.442695, %v19670_v59  ;;  %v20712_v34 = vmul.f32 -1.442695, %v19517_v25  ;;  %v18984_v15 = vadd.f32 %v25428_v5, %v25536_v22 }
 0x631   : > { %v19590_v17 = vadd.f32 %v19586_v57, %v19578_v20  ;;  %v19227_v2 = vcombine.low %v19223_v52, %v19224_v37  ;;  %v19631_v32 = vmul.f32 %v25456_v10, %v25623_v58  ;;  %v19639_v40 = vrot.slane %v19635_v49, 1 }
 0x632   : > { %v19307_v27 = vadd.f32 1.0, %v19305_v62  ;;  %v19441_v54 = vadd.f32 1.0, %v21272_v46  ;;  %21281 = vpow2.f32 %v20712_v34  ;;  %v19659_v22 = vmul.f32 %v25463_v33, %v25623_v58 }
 0x633   : > { %v19594_v28 = vadd.f32 %v19590_v17, %v25467_v45  ;;  %v19229_v29 = vmul.f32 %v19227_v2, %v19152_v18  ;;  %21283 = vrcp.f32 %v19440_v4  ;;  %v19651_v3 = vrot.slane %v19647_v26, 2 }
 0x634   : > { %v19310_v50 = vcombine.low %v19306_v60, %v19307_v27  ;;  %v21276_v53 = vpop.eup %21275  ;;  %v19643_v21 = vadd.f32 %v19639_v40, %v19631_v32  ;;  %v25690_v35 = vmax.f32 %v18984_v15, 0.0  ;;  %v18971_v41 = vadd.f32 %v25516_v9, %v25416_v55 }
 0x635   : > { %v20719_v61 = vmul.f32 -1.442695, %v19594_v28  ;;  %v21278_v14 = vpop.eup %21277  ;;  %v25695_v42 = vsub.f32 1.0, %v25533_v47  ;;  %19230 = vst [vmem:[%s25685_s18] sm:$0xff] %v19229_v29  ;;  %21285 = vpow2.f32 %v20725_v51  ;;  %v19663_v18 = vrot.slane %v19659_v22, 3 }
 0x636   : > { %v19312_v48 = vmul.f32 %v19310_v50, %v25426_v63  ;;  %21287 = vrcp.f32 %v19441_v54  ;;  %v19655_v58 = vadd.f32 %v19651_v3, %v19643_v21  ;;  %v19718_v4 = vmul.f32 %v25434_v1, %v25690_v35 }
 0x637   : > { %v19373_v11 = vrot.slane %v21274_v6, %v25543_v24  ;;  %21289 = vpow2.f32 %v20719_v61  ;;  %v19730_v55 = vmul.f32 %v25437_v13, %v25690_v35  ;;  %v19714_v16 = vmul.f32 %v25431_v8, %v25690_v35 }
 0x638   : > { %v19369_v23 = vsub.f32 1.0, %v19312_v48  ;;  %v21280_v9 = vpop.eup %21279  ;;  %v19667_v59 = vadd.f32 %v19663_v18, %v19655_v58  ;;  %v19722_v63 = vrot.slane %v19718_v4, 1  ;;  %v19742_v12 = vmul.f32 %v25441_v31, %v25690_v35 }
 0x639   : > { %v19377_v36 = vrot.slane %v21278_v14, %v25543_v24  ;;  %v19534_v43 = vrot.slane %v21280_v9, %v25543_v24  ;;  %v19734_v25 = vrot.slane %v19730_v55, 2  ;;  %v19795_v62 = vmul.f32 %v25447_v38, %v25690_v35 }
 0x63a   : > { %v19379_v52 = vcombine.high %v19369_v23, %v19369_v23  ;;  %v19381_v60 = vmul.f32 %v19373_v11, %v19369_v23  ;;  %v19726_v46 = vadd.f32 %v19722_v63, %v19714_v16  ;;  %v19671_v37 = vadd.f32 %v19667_v59, %v25469_v7 }
 0x63b   : > { %v19542_v57 = vmul.f32 %v19534_v43, %v25695_v42  ;;  %v19746_v6 = vrot.slane %v19742_v12, 3  ;;  %v19601_v2 = vadd.f32 1.0, %v21276_v53  ;;  %v19799_v28 = vrot.slane %v19795_v62, 1 }
 0x63c   : > { %v19382_v20 = vmul.f32 %v19379_v52, %v19377_v36  ;;  %v21282_v49 = vpop.eup %21281  ;;  %v19738_v26 = vadd.f32 %v19734_v25, %v19726_v46  ;;  %v19383_v34 = vadd.f32 1.0, %v19381_v60  ;;  %v20726_v54 = vmul.f32 -1.442695, %v19671_v37 }
 0x63d   : > { %v21284_v51 = vpop.eup %21283  ;;  %v19525_v15 = vadd.f32 1.0, %v21282_v49  ;;  %v19807_v29 = vmul.f32 %v25450_v19, %v25690_v35  ;;  %v19791_v21 = vmul.f32 %v25444_v44, %v25690_v35  ;;  %v19540_v53 = vcombine.high %v25695_v42, %v25695_v42 }
 0x63e   : > { %v19384_v17 = vadd.f32 1.0, %v19382_v20  ;;  %v19750_v27 = vadd.f32 %v19746_v6, %v19738_v26  ;;  %v19450_v14 = vrot.slane %v21284_v51, %v25543_v24  ;;  %v18985_v58 = vadd.f32 %v25428_v5, %v18971_v41 }
 0x63f   : > { %v21286_v32 = vpop.eup %21285  ;;  %21291 = vrcp.f32 %v19525_v15  ;;  %v19803_v4 = vadd.f32 %v19799_v28, %v19791_v21  ;;  %v19819_v11 = vmul.f32 %v25453_v30, %v25690_v35  ;;  %v19811_v55 = vrot.slane %v19807_v29, 2 }
 0x640   : > { %v19387_v40 = vcombine.low %v19383_v34, %v19384_v17  ;;  %v21288_v22 = vpop.eup %21287  ;;  %v19754_v61 = vadd.f32 %v19750_v27, %v25465_v39  ;;  %21293 = vrcp.f32 %v19601_v2  ;;  %v25726_v9 = vmax.f32 %v18985_v58, 0.0 }
 0x641   : > { %v21290_v50 = vpop.eup %21289  ;;  %21295 = vpow2.f32 %v20726_v54  ;;  %v19872_v63 = vmul.f32 %v25459_v56, %v25690_v35  ;;  %v19544_v12 = vadd.f32 1.0, %v19542_v57  ;;  %v19678_v5 = vadd.f32 1.0, %v21286_v32 }
 0x642   : > { %v19389_v3 = vmul.f32 %v19387_v40, %v19312_v48  ;;  %v19454_v48 = vrot.slane %v21288_v22, %v25543_v24  ;;  %v19602_v23 = vadd.f32 1.0, %v21290_v50  ;;  %v20733_v42 = vmul.f32 -1.442695, %v19754_v61 }
 0x643   : > { %v19719_v41 = vmul.f32 %v25434_v1, %v25726_v9  ;;  %v19731_v36 = vmul.f32 %v25437_v13, %v25726_v9  ;;  %v19815_v60 = vadd.f32 %v19811_v55, %v19803_v4  ;;  %v19823_v43 = vrot.slane %v19819_v11, 3 }
 0x644   : > { %v19446_v18 = vsub.f32 1.0, %v19389_v3  ;;  %v19884_v46 = vmul.f32 %v25461_v0, %v25690_v35  ;;  %21297 = vrcp.f32 %v19602_v23  ;;  %v19715_v25 = vmul.f32 %v25431_v8, %v25726_v9 }
 0x645   : > { %v19723_v20 = vrot.slane %v19719_v41, 1  ;;  %v19743_v57 = vmul.f32 %v25441_v31, %v25726_v9  ;;  %21299 = vpow2.f32 %v20733_v42  ;;  %v19876_v49 = vrot.slane %v19872_v63, 1 }
 0x646   : > { %v19456_v59 = vcombine.high %v19446_v18, %v19446_v18  ;;  %v19458_v16 = vmul.f32 %v19450_v14, %v19446_v18  ;;  %v19735_v6 = vrot.slane %v19731_v36, 2  ;;  %v19796_v51 = vmul.f32 %v25447_v38, %v25726_v9 }
 0x647   : > { %v19727_v26 = vadd.f32 %v19723_v20, %v19715_v25  ;;  %v19827_v17 = vadd.f32 %v19823_v43, %v19815_v60  ;;  %v19868_v8 = vmul.f32 %v25456_v10, %v25690_v35  ;;  %v19808_v31 = vmul.f32 %v25450_v19, %v25726_v9 }
 0x648   : > { %v19459_v52 = vmul.f32 %v19456_v59, %v19454_v48  ;;  %v19460_v62 = vadd.f32 1.0, %v19458_v16  ;;  %v19747_v32 = vrot.slane %v19743_v57, 3  ;;  %v19800_v40 = vrot.slane %v19796_v51, 1 }
 0x649   : > { %v21292_v37 = vpop.eup %21291  ;;  %v19739_v27 = vadd.f32 %v19735_v6, %v19727_v26  ;;  %v19896_v22 = vmul.f32 %v25463_v33, %v25690_v35  ;;  %v19792_v38 = vmul.f32 %v25444_v44, %v25726_v9  ;;  %v19820_v29 = vmul.f32 %v25453_v30, %v25726_v9 }
 0x64a   : > { %v19461_v1 = vadd.f32 1.0, %v19459_v52  ;;  %v19538_v13 = vrot.slane %v21292_v37, %v25543_v24  ;;  %v21294_v15 = vpop.eup %21293  ;;  %v19880_v61 = vadd.f32 %v19876_v49, %v19868_v8  ;;  %v19888_v21 = vrot.slane %v19884_v46, 2 }
 0x64b   : > { %v21296_v54 = vpop.eup %21295  ;;  %v19751_v19 = vadd.f32 %v19747_v32, %v19739_v27  ;;  %v19804_v14 = vadd.f32 %v19800_v40, %v19792_v38  ;;  %v19812_v58 = vrot.slane %v19808_v31, 2  ;;  %v19885_v44 = vmul.f32 %v25461_v0, %v25726_v9 }
 0x64c   : > { %v19464_v34 = vcombine.low %v19460_v62, %v19461_v1  ;;  %v19543_v2 = vmul.f32 %v19540_v53, %v19538_v13  ;;  %v19831_v53 = vadd.f32 %v19827_v17, %v25467_v45  ;;  %v19679_v35 = vadd.f32 1.0, %v21296_v54  ;;  %v27008_v1 = vld [vmem:[#allocation12_spill] sm:$0xff] }
 0x64d   : > { %v19755_v4 = vadd.f32 %v19751_v19, %v25465_v39  ;;  %v19816_v30 = vadd.f32 %v19812_v58, %v19804_v14  ;;  %v19824_v11 = vrot.slane %v19820_v29, 3  ;;  %v19869_v48 = vmul.f32 %v25456_v10, %v25726_v9 }
 0x64e   : > { %v19466_v28 = vmul.f32 %v19464_v34, %v19389_v3  ;;  %v19545_v50 = vadd.f32 1.0, %v19543_v2  ;;  %v19873_v3 = vmul.f32 %v25459_v56, %v25726_v9  ;;  %v21298_v55 = vpop.eup %21297  ;;  %v19611_v59 = vrot.slane %v21294_v15, %v25543_v24 }
 0x64f   : > { %21301 = vrcp.f32 %v19678_v5  ;;  %v20734_v56 = vmul.f32 -1.442695, %v19755_v4  ;;  %v21300_v42 = vpop.eup %21299  ;;  %v20740_v63 = vmul.f32 -1.442695, %v19831_v53  ;;  %v19828_v39 = vadd.f32 %v19824_v11, %v19816_v30 }
 0x650   : > { %20705 = vst [vmem:[%s25685_s18 + $0x8] sm:$0xff] %v19466_v28  ;;  %v19548_v18 = vcombine.low %v19544_v12, %v19545_v50  ;;  %v19877_v23 = vrot.slane %v19873_v3, 1  ;;  %v19892_v12 = vadd.f32 %v19888_v21, %v19880_v61  ;;  %v19889_v0 = vrot.slane %v19885_v44, 2 }
 0x651   : > { %21303 = vpow2.f32 %v20734_v56  ;;  %v19897_v52 = vmul.f32 %v25463_v33, %v25726_v9  ;;  %v19900_v10 = vrot.slane %v19896_v22, 3  ;;  %v19832_v60 = vadd.f32 %v19828_v39, %v25467_v45 }
 0x652   : > { %v19550_v16 = vmul.f32 %v19548_v18, %v25533_v47  ;;  %v19881_v41 = vadd.f32 %v19877_v23, %v19869_v48  ;;  %21305 = vrcp.f32 %v19679_v35  ;;  %v19615_v5 = vrot.slane %v21298_v55, %v25543_v24 }
 0x653   : > { %v19762_v25 = vadd.f32 1.0, %v21300_v42  ;;  %v20741_v20 = vmul.f32 -1.442695, %v19832_v60  ;;  %21307 = vpow2.f32 %v20740_v63  ;;  %v19904_v37 = vadd.f32 %v19900_v10, %v19892_v12 }
 0x654   : > { %v19607_v36 = vsub.f32 1.0, %v19550_v16  ;;  %v19893_v46 = vadd.f32 %v19889_v0, %v19881_v41  ;;  %v19901_v62 = vrot.slane %v19897_v52, 3  ;;  %v20729_v49 = vadd.f32 -1.0, %v27008_v1 }
 0x655   : > { %21309 = vpow2.f32 %v20741_v20  ;;  %v19908_v6 = vadd.f32 %v19904_v37, %v25469_v7  ;;  %v19708_v51 = vmax.f32 %v27008_v1, 0.0 }
 0x656   : > { %v19617_v43 = vcombine.high %v19607_v36, %v19607_v36  ;;  %v19619_v47 = vmul.f32 %v19611_v59, %v19607_v36  ;;  %v19905_v33 = vadd.f32 %v19901_v62, %v19893_v46  ;;  %21311 = vrcp.f32 %v19762_v25 }
 0x657   : > { %v19710_v34 = vmax.f32 %v20729_v49, 0.0  ;;  %v20747_v40 = vmul.f32 -1.442695, %v19908_v6 }
 0x658   : > { %v19620_v57 = vmul.f32 %v19617_v43, %v19615_v5  ;;  %v19621_v13 = vadd.f32 1.0, %v19619_v47  ;;  %v19909_v31 = vadd.f32 %v19905_v33, %v25469_v7 }
 0x659   : > { %v21302_v9 = vpop.eup %21301  ;;  %v19711_v54 = vsub.f32 %v19708_v51, %v19710_v34 }
 0x65a   : > { %v19622_v26 = vadd.f32 1.0, %v19620_v57  ;;  %v19688_v27 = vrot.slane %v21302_v9, %v25543_v24  ;;  %v20748_v50 = vmul.f32 -1.442695, %v19909_v31 }
 0x65b   : > { %v21304_v17 = vpop.eup %21303  ;;  %v19768_v53 = vsub.f32 1.0, %v19711_v54 }
 0x65c   : > { %v19625_v45 = vcombine.low %v19621_v13, %v19622_v26  ;;  %v21306_v15 = vpop.eup %21305  ;;  %v19763_v2 = vadd.f32 1.0, %v21304_v17 }
 0x65d   : > { %v21308_v28 = vpop.eup %21307  ;;  %v19692_v22 = vrot.slane %v21306_v15, %v25543_v24  ;;  %v19778_v4 = vcombine.high %v19768_v53, %v19768_v53 }
 0x65e   : > { %v19627_v8 = vmul.f32 %v19625_v45, %v19550_v16  ;;  %21313 = vrcp.f32 %v19763_v2  ;;  %v19839_v7 = vadd.f32 1.0, %v21308_v28 }
 0x65f   : > { %v21310_v61 = vpop.eup %21309  ;;  %21315 = vpow2.f32 %v20747_v40 }
 0x660   : > { %v19684_v32 = vsub.f32 1.0, %v19627_v8  ;;  %v21312_v19 = vpop.eup %21311  ;;  %21317 = vpow2.f32 %v20748_v50  ;;  %v19840_v3 = vadd.f32 1.0, %v21310_v61 }
 0x661   : > { %v19772_v35 = vrot.slane %v21312_v19, %v25543_v24  ;;  %21319 = vrcp.f32 %v19839_v7 }
 0x662   : > { %v19694_v38 = vcombine.high %v19684_v32, %v19684_v32  ;;  %v19696_v29 = vmul.f32 %v19688_v27, %v19684_v32  ;;  %21321 = vrcp.f32 %v19840_v3 }
 0x663   : > { %v19780_v11 = vmul.f32 %v19772_v35, %v19768_v53 }
 0x664   : > { %v19697_v21 = vmul.f32 %v19694_v38, %v19692_v22  ;;  %v19698_v14 = vadd.f32 1.0, %v19696_v29 }
 0x665   : > { %v19782_v16 = vadd.f32 1.0, %v19780_v11 }
 0x666   : > { %v19699_v58 = vadd.f32 1.0, %v19697_v21 }
 0x668   : > { %v19702_v18 = vcombine.low %v19698_v14, %v19699_v58  ;;  %v21314_v30 = vpop.eup %21313 }
 0x669   : > { %v19776_v48 = vrot.slane %v21314_v30, %v25543_v24  ;;  %v21316_v23 = vpop.eup %21315 }
 0x66a   : > { %v19704_v44 = vmul.f32 %v19702_v18, %v19627_v8  ;;  %v21318_v59 = vpop.eup %21317  ;;  %v19916_v42 = vadd.f32 1.0, %v21316_v23 }
 0x66b   : > { %v19781_v55 = vmul.f32 %v19778_v4, %v19776_v48  ;;  %v21320_v12 = vpop.eup %21319  ;;  %v19917_v39 = vadd.f32 1.0, %v21318_v59 }
 0x66c   : > { %20727 = vst [vmem:[%s25685_s18 + $0x10] sm:$0xff] %v19704_v44  ;;  %v21322_v36 = vpop.eup %21321  ;;  %21323 = vrcp.f32 %v19916_v42  ;;  %v19849_v0 = vrot.slane %v21320_v12, %v25543_v24 }
 0x66d   : > { %v19783_v56 = vadd.f32 1.0, %v19781_v55  ;;  %21325 = vrcp.f32 %v19917_v39  ;;  %v19853_v10 = vrot.slane %v21322_v36, %v25543_v24 }
 0x66f   : > { %v19786_v63 = vcombine.low %v19782_v16, %v19783_v56 }
 0x671   : > { %v19788_v41 = vmul.f32 %v19786_v63, %v19711_v54 }
 0x673   : > { %v19845_v52 = vsub.f32 1.0, %v19788_v41 }
 0x675   : > { %v19855_v60 = vcombine.high %v19845_v52, %v19845_v52  ;;  %v19857_v5 = vmul.f32 %v19849_v0, %v19845_v52 }
 0x676   : > { %v21324_v20 = vpop.eup %21323 }
 0x677   : > { %v19858_v43 = vmul.f32 %v19855_v60, %v19853_v10  ;;  %v19859_v47 = vadd.f32 1.0, %v19857_v5  ;;  %v21326_v37 = vpop.eup %21325  ;;  %v19926_v62 = vrot.slane %v21324_v20, %v25543_v24 }
 0x678   : > { %v19930_v49 = vrot.slane %v21326_v37, %v25543_v24 }
 0x679   : > { %v19860_v46 = vadd.f32 1.0, %v19858_v43 }
 0x67b   : > { %v19863_v25 = vcombine.low %v19859_v47, %v19860_v46 }
 0x67d   : > { %v19865_v57 = vmul.f32 %v19863_v25, %v19788_v41 }
 0x67f   : > { %v19922_v1 = vsub.f32 1.0, %v19865_v57 }
 0x681   : > { %v19932_v13 = vcombine.high %v19922_v1, %v19922_v1  ;;  %v19934_v26 = vmul.f32 %v19926_v62, %v19922_v1 }
 0x683   : > { %v19935_v33 = vmul.f32 %v19932_v13, %v19930_v49  ;;  %v19936_v9 = vadd.f32 1.0, %v19934_v26 }
 0x685   : > { %v19937_v45 = vadd.f32 1.0, %v19935_v33 }
 0x687   : > { %v19940_v6 = vcombine.low %v19936_v9, %v19937_v45 }
 0x689   : > { %v19942_v51 = vmul.f32 %v19940_v6, %v19865_v57 }
 0x68b   : > { %20749 = vst [vmem:[%s25685_s18 + $0x18] sm:$0xff] %v19942_v51 }
 0x68c PF: > { %s19_s24 = sadd.s32 1, %s21375_s24  }
 0x68d   : > { %p16_p3 = scmp.ge.s32.totalorder %s19_s24, 4  }
 0x68f   :  { %18 = sbr.rel (!%p16_p3) target bundleno = 2 (0x2), region = 125 }
 0x696   :  { %19969 = vsyncpa [#allocation4], 1 }
 0x697   :  { %19971 = vsyncpa [#allocation4 + $0x1], 1 }
 0x698   :  { %19972 = vsyncpa [#allocation6], 1 }

</bundles_post_ra>
